<compile_context>
chip_gen: v6e
topology: v6e:2x2x1
jax: 0.10.0
libtpu: 0.0.40
codegen_flags: <defaults>
</compile_context>

<pallas_src>
import functools

import jax
import jax.numpy as jnp
from jax.experimental import pallas as pl
from jax.experimental.pallas import tpu as pltpu

_SQRT2 = 1.4142135623730951
_TILE_M = 1024                    # rows per grid step for the M-tiled FNO-layer kernel
_VMEM_LIMIT = 32 * 1024 * 1024    # explicit scoped-VMEM limit (safe on v5e/v6e/v7x)


def _rup(n, m=128):
    """Round n up to a multiple of m."""
    return -(-n // m) * m


def _block_rows(m, tile=_TILE_M):
    """Pick (block_rows, grid_steps) for an M-tiled kernel.

    Prefers an even number of grid steps so both v7x TensorCores stay busy under
    dimension_semantics=('parallel',). v5e/v6e (1 TC) are unaffected.
    """
    if m <= tile:
        if m >= 64:
            bm = _rup(pl.cdiv(m, 2), 8)
            return bm, pl.cdiv(m, bm)
        return m, 1
    steps = pl.cdiv(m, tile)
    if steps % 2:
        steps += 1
    bm = _rup(pl.cdiv(m, steps), 8)
    while pl.cdiv(m, bm) % 2 and bm > 8:   # keep step count even after 8-row rounding
        bm -= 8
    return bm, pl.cdiv(m, bm)


# ----------------------------- activations (in-kernel) -----------------------------
def _apply_act(y, act):
    if act == "idt":
        return y
    if act == "tanh":
        return jnp.tanh(y)
    if act == "relu":
        return jnp.maximum(y, 0.0)
    if act == "elu":
        return jnp.where(y > 0, y, jnp.expm1(y))
    if act == "softplus":
        return jnp.logaddexp(y, 0.0)
    if act == "sigmoid":
        return jax.nn.sigmoid(y)
    if act == "gelu":
        # exact (erf-based) GELU to match torch.nn.GELU(); kernels are mem-bound so the
        # VPU erf polynomial is free filler (tanh-approx not needed).
        return 0.5 * y * (1.0 + jax.lax.erf(y / _SQRT2))
    raise KeyError(f"act name not in act_dict: {act}")


# ----------------------------- Pallas kernels -----------------------------
def _lift_pad_kernel(x_ref, w_ref, b_ref, ow_ref, on_ref, *, xs, ys, width):
    # fc0 (in_features=1) lift fused with the spatial F.pad([0,p,0,p]):
    # writes the (1, Hp, Wp, wp) zero-padded block directly, plus a narrow
    # (true-width) copy feeding the first spectral conv.
    lifted = x_ref[0] * w_ref[...] + b_ref[...]            # (xs, ys, wp), pure VPU fma
    ow_ref[...] = jnp.zeros_like(ow_ref)
    on_ref[...] = jnp.zeros_like(on_ref)
    ow_ref[0, :xs, :ys, :] = lifted.astype(ow_ref.dtype)
    on_ref[0, :xs, :ys, :] = lifted[:, :, :width].astype(on_ref.dtype)


def _fno_layer_kernel(x_ref, s_ref, w_ref, e_ref, b_ref, *o_refs, act, width):
    # y = act( spectral + Conv2d_1x1(x) ) in channels-last layout.
    # The spectral branch arrives at native width; a tiny identity-embed matmul places it
    # into the first `width` lanes (exact, no in-kernel pad/concat, no padded HBM copy).
    y = jnp.dot(x_ref[...], w_ref[...], preferred_element_type=jnp.float32)
    y = y + jnp.dot(s_ref[...], e_ref[...], preferred_element_type=jnp.float32)
    y = _apply_act(y + b_ref[...], act)
    o_refs[0][...] = y.astype(o_refs[0].dtype)
    if len(o_refs) > 1:            # narrow copy for the next layer's spectral conv
        o_refs[1][...] = y[:, :width].astype(o_refs[1].dtype)


def _head_bt_kernel(x_ref, w1_ref, b1_ref, w2_ref, b2_ref, x2_ref, o_ref, *, act):
    # Fused FNO projection head (fc1 -> act -> fc2) + DeepONet branch/trunk contraction
    # for one batch element:  o[n, c] = sum_hw x2[n, hw] * fc2(act(fc1(h[hw, :])))[c]
    h = jnp.dot(x_ref[0], w1_ref[...], preferred_element_type=jnp.float32) + b1_ref[...]
    h = _apply_act(h, act)
    y = jnp.dot(h, w2_ref[...], preferred_element_type=jnp.float32) + b2_ref[...]
    o_ref[0] = jnp.dot(x2_ref[...], y, preferred_element_type=jnp.float32).astype(o_ref.dtype)


def _fnn_kernel(loc_ref, *refs, act, eps):
    # Whole FNN in one kernel: [Linear -> act -> BatchNorm1d]*(L-1) -> Linear.
    # Un-tiled so BatchNorm statistics cover the full batch (training-mode stats,
    # default nn.Module state: gamma=1, beta=0, eps=1e-5). Padded columns stay 0.
    o_ref = refs[-1]
    wb = refs[:-1]
    n_layers = len(wb) // 2
    h = loc_ref[...]
    for i in range(n_layers - 1):
        w, b = wb[2 * i][...], wb[2 * i + 1][...]
        h = jnp.dot(h, w, preferred_element_type=jnp.float32) + b
        h = _apply_act(h, act)
        mean = jnp.mean(h, axis=0, keepdims=True)
        var = jnp.mean((h - mean) ** 2, axis=0, keepdims=True)  # biased var, like torch BN
        h = (h - mean) * jax.lax.rsqrt(var + eps)
    w, b = wb[-2][...], wb[-1][...]
    y = jnp.dot(h, w, preferred_element_type=jnp.float32) + b
    o_ref[...] = y.astype(o_ref.dtype)


# ----------------------------- Pallas wrappers -----------------------------
def pallas_lift_pad(x, w, b, width, padding):
    # x: (B, X, Y, 1); w, b: (1, wp)  ->  (B, Hp, Wp, wp) padded  +  (B, Hp, Wp, width)
    bsz, xs, ys, _ = x.shape
    wp = w.shape[1]
    hp, wps = xs + padding, ys + padding
    return pl.pallas_call(
        functools.partial(_lift_pad_kernel, xs=xs, ys=ys, width=width),
        out_shape=(jax.ShapeDtypeStruct((bsz, hp, wps, wp), jnp.float32),
                   jax.ShapeDtypeStruct((bsz, hp, wps, width), jnp.float32)),
        grid=(bsz,),
        in_specs=[
            pl.BlockSpec((1, xs, ys, 1), lambda i: (i, 0, 0, 0)),
            pl.BlockSpec((1, wp), lambda i: (0, 0)),
            pl.BlockSpec((1, wp), lambda i: (0, 0)),
        ],
        out_specs=(pl.BlockSpec((1, hp, wps, wp), lambda i: (i, 0, 0, 0)),
                   pl.BlockSpec((1, hp, wps, width), lambda i: (i, 0, 0, 0))),
        compiler_params=pltpu.CompilerParams(
            dimension_semantics=("parallel",), vmem_limit_bytes=_VMEM_LIMIT),
    )(x, w, b)


def pallas_fno_layer(x_flat, s_flat, w, embed, b, act, want_narrow):
    # x_flat: (m, wp); s_flat: (m, width); w: (wp, wp); embed: (width, wp); b: (1, wp)
    m, wp = x_flat.shape
    width = s_flat.shape[1]
    bm, steps = _block_rows(m)
    out_shape = [jax.ShapeDtypeStruct((m, wp), jnp.float32)]
    out_specs = [pl.BlockSpec((bm, wp), lambda i: (i, 0))]
    if want_narrow:
        out_shape.append(jax.ShapeDtypeStruct((m, width), jnp.float32))
        out_specs.append(pl.BlockSpec((bm, width), lambda i: (i, 0)))
    flops = 2 * m * wp * wp + 2 * m * width * wp
    bytes_accessed = 4 * (m * (2 * wp + width + (width if want_narrow else 0))
                          + wp * wp + width * wp + wp)
    outs = pl.pallas_call(
        functools.partial(_fno_layer_kernel, act=act, width=width),
        out_shape=tuple(out_shape),
        grid=(steps,),
        in_specs=[
            pl.BlockSpec((bm, wp), lambda i: (i, 0)),
            pl.BlockSpec((bm, width), lambda i: (i, 0)),
            pl.BlockSpec((wp, wp), lambda i: (0, 0)),
            pl.BlockSpec((width, wp), lambda i: (0, 0)),
            pl.BlockSpec((1, wp), lambda i: (0, 0)),
        ],
        out_specs=tuple(out_specs),
        compiler_params=pltpu.CompilerParams(
            dimension_semantics=("parallel",), vmem_limit_bytes=_VMEM_LIMIT),
        cost_estimate=pl.CostEstimate(flops=flops, transcendentals=m * wp,
                                      bytes_accessed=bytes_accessed),
    )(x_flat, s_flat, w, embed, b)
    if want_narrow:
        return outs[0], outs[1]
    return outs[0], None


def pallas_head_branch_trunk(h_flat, w1, b1, w2, b2, x2, act):
    # h_flat: (B, HW, wp); x2: (nlp, HW)  ->  (B, nlp, npad)
    bsz, hw, wp = h_flat.shape
    lp = w1.shape[1]
    npad = w2.shape[1]
    nlp = x2.shape[0]
    flops = 2 * bsz * hw * (wp * lp + lp * npad) + 2 * bsz * nlp * hw * npad
    bytes_accessed = 4 * (bsz * hw * wp + wp * lp + lp + lp * npad + npad
                          + nlp * hw + bsz * nlp * npad)
    return pl.pallas_call(
        functools.partial(_head_bt_kernel, act=act),
        out_shape=jax.ShapeDtypeStruct((bsz, nlp, npad), jnp.float32),
        grid=(bsz,),
        in_specs=[
            pl.BlockSpec((1, hw, wp), lambda i: (i, 0, 0)),
            pl.BlockSpec((wp, lp), lambda i: (0, 0)),
            pl.BlockSpec((1, lp), lambda i: (0, 0)),
            pl.BlockSpec((lp, npad), lambda i: (0, 0)),
            pl.BlockSpec((1, npad), lambda i: (0, 0)),
            pl.BlockSpec((nlp, hw), lambda i: (0, 0)),
        ],
        out_specs=pl.BlockSpec((1, nlp, npad), lambda i: (i, 0, 0)),
        compiler_params=pltpu.CompilerParams(
            dimension_semantics=("parallel",), vmem_limit_bytes=_VMEM_LIMIT),
        cost_estimate=pl.CostEstimate(flops=flops, transcendentals=bsz * hw * lp,
                                      bytes_accessed=bytes_accessed),
    )(h_flat, w1, b1, w2, b2, x2)


def fnn_forward(loc, params, act, eps=1e-5):
    # Whole FNN in one Pallas kernel (tiny m => single block, BN stays full-batch correct).
    w_list, b_list = params["w"], params["b"]
    k0 = w_list[0].shape[0]
    if loc.shape[1] != k0:
        loc = jnp.pad(loc, ((0, 0), (0, k0 - loc.shape[1])))  # tiny (n_loc, 2) -> (n_loc, 128)
    args = [loc]
    for w, b in zip(w_list, b_list):
        args += [w, b]
    n_last = w_list[-1].shape[1]
    return pl.pallas_call(
        functools.partial(_fnn_kernel, act=act, eps=eps),
        out_shape=jax.ShapeDtypeStruct((loc.shape[0], n_last), jnp.float32),
        compiler_params=pltpu.CompilerParams(vmem_limit_bytes=_VMEM_LIMIT),
    )(*args)


# ----------------------------- SpectralConv2d (FFT glue in JAX) -----------------------------
def spectral_conv2d(x, w1, w2, modes1, modes2):
    # x: (B, H, W, Cin) real; w1, w2: (Cin, Cout, m1, m2) complex64
    bsz, h, w, _ = x.shape
    cout = w1.shape[1]
    x_ft = jnp.fft.rfft2(x, axes=(1, 2))  # (B, H, W//2+1, Cin) complex64
    wf = w // 2 + 1
    out_ft = jnp.zeros((bsz, h, wf, cout), dtype=jnp.complex64)
    top = jnp.einsum("bxyi,ioxy->bxyo", x_ft[:, :modes1, :modes2, :], w1)
    bot = jnp.einsum("bxyi,ioxy->bxyo", x_ft[:, h - modes1 :, :modes2, :], w2)
    out_ft = out_ft.at[:, :modes1, :modes2, :].set(top)
    out_ft = out_ft.at[:, h - modes1 :, :modes2, :].set(bot)
    return jnp.fft.irfft2(out_ft, s=(h, w), axes=(1, 2))  # (B, H, W, Cout) real


# ----------------------------- DeepONet forward -----------------------------
def deeponet_forward(loc, x, fnn_params, fno_params, *, modes1, modes2, layer_num,
                     width, n_out, fnn_act="tanh", fno_act="gelu", padding=9):
    bsz, xs, ys, _ = x.shape
    hw = xs * ys
    n_loc = loc.shape[0]

    # ---- FNO branch: lift + spatial pad fused into one kernel ----
    h_wide, h_nar = pallas_lift_pad(x, fno_params["fc0_w"], fno_params["fc0_b"],
                                    width=width, padding=padding)
    _, hp, wps, wp = h_wide.shape
    m = bsz * hp * wps
    for i in range(layer_num):
        s = spectral_conv2d(h_nar, fno_params["sc_w1"][i], fno_params["sc_w2"][i],
                            modes1, modes2)                       # (B, Hp, Wp, width)
        wide_flat, nar_flat = pallas_fno_layer(
            h_wide.reshape(m, wp), s.reshape(m, width),
            fno_params["conv_w"][i], fno_params["embed"], fno_params["conv_b"][i],
            act=fno_act, want_narrow=(i + 1 < layer_num))
        h_wide = wide_flat.reshape(bsz, hp, wps, wp)
        if nar_flat is not None:
            h_nar = nar_flat.reshape(bsz, hp, wps, width)

    # spatial un-pad (x[..., :-p, :-p]) and flatten HW for the fused head
    h_flat = h_wide[:, :xs, :ys, :].reshape(bsz, hw, wp)

    # ---- FNN trunk ----
    x2 = fnn_forward(loc, fnn_params, act=fnn_act)                # (n_loc, HW_pad)
    x2 = x2[:, :hw]
    nlp = _rup(max(n_loc, 8), 8)
    if nlp != n_loc:
        x2 = jnp.pad(x2, ((0, nlp - n_loc), (0, 0)))              # tiny

    # ---- fused projection head + branch/trunk contraction ----
    out = pallas_head_branch_trunk(h_flat, fno_params["fc1_w"], fno_params["fc1_b"],
                                   fno_params["fc2_w"], fno_params["fc2_b"], x2,
                                   act=fno_act)                   # (B, nlp, npad)
    out = out[:, :n_loc, :n_out]                                  # tiny slice
    # torch: cat([einsum('bi,ni->bn', x1_i, x2) for i in range(n_out)], dim=-1)
    return jnp.transpose(out, (0, 2, 1)).reshape(bsz, n_out * n_loc)


# ----------------------------- deterministic parameter init -----------------------------
def init_params(key, layer_sizes, modes1, modes2, width, n_out, layer_num, last_size):
    keys = iter(jax.random.split(key, 8 + 4 * layer_num + 2 * len(layer_sizes)))

    # FNN: xavier_normal weights, zero bias
    fnn = {"w": [], "b": []}
    for i in range(1, len(layer_sizes)):
        fan_in, fan_out = layer_sizes[i - 1], layer_sizes[i]
        std = (2.0 / (fan_in + fan_out)) ** 0.5
        fnn["w"].append(std * jax.random.normal(next(keys), (fan_in, fan_out), jnp.float32))
        fnn["b"].append(jnp.zeros((fan_out,), jnp.float32))

    # FNO2d
    scale = 1.0 / (width * width)
    fno = {
        "fc0_w": 0.1 * jax.random.normal(next(keys), (1, width), jnp.float32),
        "fc0_b": jnp.zeros((width,), jnp.float32),
        "sc_w1": [], "sc_w2": [], "conv_w": [], "conv_b": [],
        "fc1_w": 0.1 * jax.random.normal(next(keys), (width, last_size), jnp.float32),
        "fc1_b": jnp.zeros((last_size,), jnp.float32),
        "fc2_w": 0.1 * jax.random.normal(next(keys), (last_size, n_out), jnp.float32),
        "fc2_b": jnp.zeros((n_out,), jnp.float32),
    }
    for _ in range(layer_num):
        wr = jax.random.uniform(next(keys), (width, width, modes1, modes2), jnp.float32)
        wi = jax.random.uniform(next(keys), (width, width, modes1, modes2), jnp.float32)
        fno["sc_w1"].append((scale * (wr + 1j * wi)).astype(jnp.complex64))
        wr = jax.random.uniform(next(keys), (width, width, modes1, modes2), jnp.float32)
        wi = jax.random.uniform(next(keys), (width, width, modes1, modes2), jnp.float32)
        fno["sc_w2"].append((scale * (wr + 1j * wi)).astype(jnp.complex64))
        fno["conv_w"].append(0.1 * jax.random.normal(next(keys), (width, width), jnp.float32))
        fno["conv_b"].append(jnp.zeros((width,), jnp.float32))
    return fnn, fno


def prepare_params(fnn_raw, fno_raw, width, last_size, n_out):
    """Zero-pad every weight/bias ONCE to lane-dense (multiples of 128) kernel shapes.
    Zero padding is exact: padded input columns stay 0, padded weight rows/cols contribute 0.
    NOTE: when importing real PyTorch Conv2d 1x1 weights (Cout, Cin, 1, 1), transpose to
    (Cin, Cout) before padding."""
    wp, lp, npad = _rup(width), _rup(last_size), _rup(n_out)

    # FNN
    sizes = [fnn_raw["w"][0].shape[0]] + [w.shape[1] for w in fnn_raw["w"]]
    psizes = [_rup(s) for s in sizes]
    fnn = {"w": [], "b": []}
    for i, (w, b) in enumerate(zip(fnn_raw["w"], fnn_raw["b"])):
        fnn["w"].append(jnp.pad(w, ((0, psizes[i] - w.shape[0]),
                                    (0, psizes[i + 1] - w.shape[1]))))
        fnn["b"].append(jnp.pad(b, (0, psizes[i + 1] - b.shape[0])).reshape(1, -1))

    # FNO2d
    fno = {
        "fc0_w": jnp.pad(fno_raw["fc0_w"], ((0, 0), (0, wp - width))),
        "fc0_b": jnp.pad(fno_raw["fc0_b"], (0, wp - width)).reshape(1, -1),
        "sc_w1": fno_raw["sc_w1"], "sc_w2": fno_raw["sc_w2"],
        "conv_w": [jnp.pad(w, ((0, wp - width), (0, wp - width))) for w in fno_raw["conv_w"]],
        "conv_b": [jnp.pad(b, (0, wp - width)).reshape(1, -1) for b in fno_raw["conv_b"]],
        "fc1_w": jnp.pad(fno_raw["fc1_w"], ((0, wp - width), (0, lp - last_size))),
        "fc1_b": jnp.pad(fno_raw["fc1_b"], (0, lp - last_size)).reshape(1, -1),
        "fc2_w": jnp.pad(fno_raw["fc2_w"], ((0, lp - last_size), (0, npad - n_out))),
        "fc2_b": jnp.pad(fno_raw["fc2_b"], (0, npad - n_out)).reshape(1, -1),
        # identity embed: places the native-width spectral branch into lanes [0, width)
        "embed": jnp.eye(width, wp, dtype=jnp.float32),
    }
    return fnn, fno


# ----------------------------- main -----------------------------
if __name__ == "__main__":
    B, X, Y = 2, 16, 16          # FNO grid input (batch, x, y, 1)
    n_loc = 8                    # number of query locations for the trunk net
    width = 8                    # FNO lifted width
    modes1 = modes2 = 4
    n_out = 4
    layer_num = 2
    last_size = 32
    layer_sizes = [2, 32, X * Y]  # FNN: last layer size must equal X*Y
    # NOTE: the PyTorch default act_fno='GELU' would KeyError; we use 'gelu'.

    key = jax.random.PRNGKey(0)
    k_param, k_loc, k_x = jax.random.split(key, 3)
    fnn_raw, fno_raw = init_params(
        k_param, layer_sizes, modes1, modes2, width, n_out, layer_num, last_size
    )
    fnn_params, fno_params = prepare_params(fnn_raw, fno_raw, width, last_size, n_out)

    loc = jax.random.normal(k_loc, (n_loc, 2), jnp.float32)
    x = jax.random.normal(k_x, (B, X, Y, 1), jnp.float32)

    fwd = jax.jit(functools.partial(
        deeponet_forward, modes1=modes1, modes2=modes2, layer_num=layer_num,
        width=width, n_out=n_out, fnn_act="tanh", fno_act="gelu"))
    out = jax.block_until_ready(fwd(loc, x, fnn_params, fno_params))
    assert out.shape == (B, n_out * n_loc), out.shape
    assert bool(jnp.all(jnp.isfinite(out)))
    print("KERNEL_OK")
</pallas_src>

<mosaic_0001>
module attributes {stable_mosaic.version = 11 : i64} {
  func.func @_lift_pad_kernel(%arg0: i32, %arg1: memref<1x16x16x1xf32, #tpu.memory_space<vmem>>, %arg2: memref<1x128xf32, #tpu.memory_space<vmem>>, %arg3: memref<1x128xf32, #tpu.memory_space<vmem>>, %arg4: memref<1x25x25x128xf32, #tpu.memory_space<vmem>>, %arg5: memref<1x25x25x8xf32, #tpu.memory_space<vmem>>) attributes {dimension_semantics = [#tpu.dimension_semantics<parallel>], iteration_bounds = array<i64: 2>, scalar_prefetch = 0 : i64, scratch_operands = 0 : i64, tpu.core_type = #tpu.core_type<tc>, window_params = [{transform_indices = @transform_0, window_bounds = array<i64: 1, 16, 16, 1>}, {pipeline_mode = #tpu.pipeline_mode<synchronous>, transform_indices = @transform_1, window_bounds = array<i64: 1, 128>}, {pipeline_mode = #tpu.pipeline_mode<synchronous>, transform_indices = @transform_2, window_bounds = array<i64: 1, 128>}, {transform_indices = @transform_3, window_bounds = array<i64: 1, 25, 25, 128>}, {transform_indices = @transform_4, window_bounds = array<i64: 1, 25, 25, 8>}]} {
    %c0 = arith.constant 0 : index
    %c0_0 = arith.constant 0 : index
    %c0_1 = arith.constant 0 : index
    %c0_2 = arith.constant 0 : index
    %0 = vector.load %arg1[%c0, %c0_0, %c0_1, %c0_2] : memref<1x16x16x1xf32, #tpu.memory_space<vmem>>, vector<1x16x16x1xf32>
    %1 = vector.shape_cast %0 : vector<1x16x16x1xf32> to vector<16x16x1xf32>
    %c0_3 = arith.constant 0 : index
    %c0_4 = arith.constant 0 : index
    %2 = vector.load %arg2[%c0_3, %c0_4] : memref<1x128xf32, #tpu.memory_space<vmem>>, vector<1x128xf32>
    %3 = vector.shape_cast %2 : vector<1x128xf32> to vector<1x1x128xf32>
    %4 = vector.broadcast %1 : vector<16x16x1xf32> to vector<16x16x128xf32>
    %5 = vector.broadcast %3 : vector<1x1x128xf32> to vector<16x16x128xf32>
    %6 = arith.mulf %4, %5 : vector<16x16x128xf32>
    %c0_5 = arith.constant 0 : index
    %c0_6 = arith.constant 0 : index
    %7 = vector.load %arg3[%c0_5, %c0_6] : memref<1x128xf32, #tpu.memory_space<vmem>>, vector<1x128xf32>
    %8 = vector.shape_cast %7 : vector<1x128xf32> to vector<1x1x128xf32>
    %9 = vector.broadcast %8 : vector<1x1x128xf32> to vector<16x16x128xf32>
    %10 = arith.addf %6, %9 : vector<16x16x128xf32>
    %cst = arith.constant 0.000000e+00 : f32
    %11 = vector.broadcast %cst : f32 to vector<1x25x25x128xf32>
    %c0_7 = arith.constant 0 : index
    %c0_8 = arith.constant 0 : index
    %c0_9 = arith.constant 0 : index
    %c0_10 = arith.constant 0 : index
    %12 = vector.load %arg4[%c0_7, %c0_8, %c0_9, %c0_10] : memref<1x25x25x128xf32, #tpu.memory_space<vmem>>, vector<1x25x25x128xf32>
    tpu.vector_store %arg4[%c0_7, %c0_8, %c0_9, %c0_10], %11 {strides = array<i32>} : memref<1x25x25x128xf32, #tpu.memory_space<vmem>>, vector<1x25x25x128xf32>,
    %cst_11 = arith.constant 0.000000e+00 : f32
    %13 = vector.broadcast %cst_11 : f32 to vector<1x25x25x8xf32>
    %c0_12 = arith.constant 0 : index
    %c0_13 = arith.constant 0 : index
    %c0_14 = arith.constant 0 : index
    %c0_15 = arith.constant 0 : index
    %14 = vector.load %arg5[%c0_12, %c0_13, %c0_14, %c0_15] : memref<1x25x25x8xf32, #tpu.memory_space<vmem>>, vector<1x25x25x8xf32>
    tpu.vector_store %arg5[%c0_12, %c0_13, %c0_14, %c0_15], %13 {strides = array<i32>} : memref<1x25x25x8xf32, #tpu.memory_space<vmem>>, vector<1x25x25x8xf32>,
    %c0_16 = arith.constant 0 : index
    %c0_17 = arith.constant 0 : index
    %c0_18 = arith.constant 0 : index
    %c0_19 = arith.constant 0 : index
    %15 = vector.load %arg4[%c0_16, %c0_17, %c0_18, %c0_19] : memref<1x25x25x128xf32, #tpu.memory_space<vmem>>, vector<1x16x16x128xf32>
    %16 = vector.shape_cast %15 : vector<1x16x16x128xf32> to vector<16x16x128xf32>
    %17 = vector.shape_cast %10 : vector<16x16x128xf32> to vector<1x16x16x128xf32>
    tpu.vector_store %arg4[%c0_16, %c0_17, %c0_18, %c0_19], %17 {strides = array<i32>} : memref<1x25x25x128xf32, #tpu.memory_space<vmem>>, vector<1x16x16x128xf32>,
    %18 = vector.extract_strided_slice %10 {offsets = [0, 0, 0], sizes = [16, 16, 8], strides = [1, 1, 1]} : vector<16x16x128xf32> to vector<16x16x8xf32>
    %c0_20 = arith.constant 0 : index
    %c0_21 = arith.constant 0 : index
    %c0_22 = arith.constant 0 : index
    %c0_23 = arith.constant 0 : index
    %19 = vector.load %arg5[%c0_20, %c0_21, %c0_22, %c0_23] : memref<1x25x25x8xf32, #tpu.memory_space<vmem>>, vector<1x16x16x8xf32>
    %20 = vector.shape_cast %19 : vector<1x16x16x8xf32> to vector<16x16x8xf32>
    %21 = vector.shape_cast %18 : vector<16x16x8xf32> to vector<1x16x16x8xf32>
    tpu.vector_store %arg5[%c0_20, %c0_21, %c0_22, %c0_23], %21 {strides = array<i32>} : memref<1x25x25x8xf32, #tpu.memory_space<vmem>>, vector<1x16x16x8xf32>,
    return
  }
  func.func @transform_0(%arg0: i32) -> (i32, i32, i32, i32) {
    %c0_i32 = arith.constant 0 : i32
    %c0_i32_0 = arith.constant 0 : i32
    %c0_i32_1 = arith.constant 0 : i32
    %c0_i32_2 = arith.constant 0 : i32
    return %arg0, %c0_i32, %c0_i32_0, %c0_i32_1 : i32, i32, i32, i32
  }
  func.func @transform_1(%arg0: i32) -> (i32, i32) {
    %c0_i32 = arith.constant 0 : i32
    %c0_i32_0 = arith.constant 0 : i32
    %c0_i32_1 = arith.constant 0 : i32
    return %c0_i32, %c0_i32_0 : i32, i32
  }
  func.func @transform_2(%arg0: i32) -> (i32, i32) {
    %c0_i32 = arith.constant 0 : i32
    %c0_i32_0 = arith.constant 0 : i32
    %c0_i32_1 = arith.constant 0 : i32
    return %c0_i32, %c0_i32_0 : i32, i32
  }
  func.func @transform_3(%arg0: i32) -> (i32, i32, i32, i32) {
    %c0_i32 = arith.constant 0 : i32
    %c0_i32_0 = arith.constant 0 : i32
    %c0_i32_1 = arith.constant 0 : i32
    %c0_i32_2 = arith.constant 0 : i32
    return %arg0, %c0_i32, %c0_i32_0, %c0_i32_1 : i32, i32, i32, i32
  }
  func.func @transform_4(%arg0: i32) -> (i32, i32, i32, i32) {
    %c0_i32 = arith.constant 0 : i32
    %c0_i32_0 = arith.constant 0 : i32
    %c0_i32_1 = arith.constant 0 : i32
    %c0_i32_2 = arith.constant 0 : i32
    return %arg0, %c0_i32, %c0_i32_0, %c0_i32_1 : i32, i32, i32, i32
  }
}

module attributes {stable_mosaic.version = 11 : i64} {
  func.func @_fno_layer_kernel(%arg0: i32, %arg1: memref<632x128xf32, #tpu.memory_space<vmem>>, %arg2: memref<632x8xf32, #tpu.memory_space<vmem>>, %arg3: memref<128x128xf32, #tpu.memory_space<vmem>>, %arg4: memref<8x128xf32, #tpu.memory_space<vmem>>, %arg5: memref<1x128xf32, #tpu.memory_space<vmem>>, %arg6: memref<632x128xf32, #tpu.memory_space<vmem>>, %arg7: memref<632x8xf32, #tpu.memory_space<vmem>>) attributes {dimension_semantics = [#tpu.dimension_semantics<parallel>], iteration_bounds = array<i64: 2>, scalar_prefetch = 0 : i64, scratch_operands = 0 : i64, tpu.core_type = #tpu.core_type<tc>, window_params = [{transform_indices = @transform_0, window_bounds = array<i64: 632, 128>}, {transform_indices = @transform_1, window_bounds = array<i64: 632, 8>}, {pipeline_mode = #tpu.pipeline_mode<synchronous>, transform_indices = @transform_2, window_bounds = array<i64: 128, 128>}, {pipeline_mode = #tpu.pipeline_mode<synchronous>, transform_indices = @transform_3, window_bounds = array<i64: 8, 128>}, {pipeline_mode = #tpu.pipeline_mode<synchronous>, transform_indices = @transform_4, window_bounds = array<i64: 1, 128>}, {transform_indices = @transform_5, window_bounds = array<i64: 632, 128>}, {transform_indices = @transform_6, window_bounds = array<i64: 632, 8>}]} {
    %c0 = arith.constant 0 : index
    %c0_0 = arith.constant 0 : index
    %0 = vector.load %arg1[%c0, %c0_0] : memref<632x128xf32, #tpu.memory_space<vmem>>, vector<632x128xf32>
    %c0_1 = arith.constant 0 : index
    %c0_2 = arith.constant 0 : index
    %1 = vector.load %arg3[%c0_1, %c0_2] : memref<128x128xf32, #tpu.memory_space<vmem>>, vector<128x128xf32>
    %cst = arith.constant dense<0.000000e+00> : vector<632x128xf32>
    %2 = tpu.matmul %0, %1, %cst {dimension_numbers = #tpu.dot_dimension_numbers<[1], [0], [0], [1], [0, 0, 1, 1], [], []>} : vector<632x128xf32>, vector<128x128xf32>, vector<632x128xf32> -> vector<632x128xf32>
    %c0_3 = arith.constant 0 : index
    %c0_4 = arith.constant 0 : index
    %3 = vector.load %arg2[%c0_3, %c0_4] : memref<632x8xf32, #tpu.memory_space<vmem>>, vector<632x8xf32>
    %c0_5 = arith.constant 0 : index
    %c0_6 = arith.constant 0 : index
    %4 = vector.load %arg4[%c0_5, %c0_6] : memref<8x128xf32, #tpu.memory_space<vmem>>, vector<8x128xf32>
    %cst_7 = arith.constant dense<0.000000e+00> : vector<632x128xf32>
    %5 = tpu.matmul %3, %4, %cst_7 {dimension_numbers = #tpu.dot_dimension_numbers<[1], [0], [0], [1], [0, 0, 1, 1], [], []>} : vector<632x8xf32>, vector<8x128xf32>, vector<632x128xf32> -> vector<632x128xf32>
    %6 = arith.addf %2, %5 : vector<632x128xf32>
    %c0_8 = arith.constant 0 : index
    %c0_9 = arith.constant 0 : index
    %7 = vector.load %arg5[%c0_8, %c0_9] : memref<1x128xf32, #tpu.memory_space<vmem>>, vector<1x128xf32>
    %8 = vector.broadcast %7 : vector<1x128xf32> to vector<632x128xf32>
    %9 = arith.addf %6, %8 : vector<632x128xf32>
    %cst_10 = arith.constant 5.000000e-01 : f32
    %10 = vector.broadcast %cst_10 : f32 to vector<632x128xf32>
    %11 = arith.mulf %10, %9 : vector<632x128xf32>
    %cst_11 = arith.constant 1.41421354 : f32
    %12 = vector.broadcast %cst_11 : f32 to vector<632x128xf32>
    %13 = arith.divf %9, %12 : vector<632x128xf32>
    %14 = math.erf %13 : vector<632x128xf32>
    %cst_12 = arith.constant 1.000000e+00 : f32
    %15 = vector.broadcast %cst_12 : f32 to vector<632x128xf32>
    %16 = arith.addf %15, %14 : vector<632x128xf32>
    %17 = arith.mulf %11, %16 : vector<632x128xf32>
    %c0_13 = arith.constant 0 : index
    %c0_14 = arith.constant 0 : index
    %18 = vector.load %arg6[%c0_13, %c0_14] : memref<632x128xf32, #tpu.memory_space<vmem>>, vector<632x128xf32>
    tpu.vector_store %arg6[%c0_13, %c0_14], %17 {strides = array<i32>} : memref<632x128xf32, #tpu.memory_space<vmem>>, vector<632x128xf32>,
    %19 = vector.extract_strided_slice %17 {offsets = [0, 0], sizes = [632, 8], strides = [1, 1]} : vector<632x128xf32> to vector<632x8xf32>
    %c0_15 = arith.constant 0 : index
    %c0_16 = arith.constant 0 : index
    %20 = vector.load %arg7[%c0_15, %c0_16] : memref<632x8xf32, #tpu.memory_space<vmem>>, vector<632x8xf32>
    tpu.vector_store %arg7[%c0_15, %c0_16], %19 {strides = array<i32>} : memref<632x8xf32, #tpu.memory_space<vmem>>, vector<632x8xf32>,
    return
  }
  func.func @transform_0(%arg0: i32) -> (i32, i32) {
    %c0_i32 = arith.constant 0 : i32
    %c0_i32_0 = arith.constant 0 : i32
    return %arg0, %c0_i32 : i32, i32
  }
  func.func @transform_1(%arg0: i32) -> (i32, i32) {
    %c0_i32 = arith.constant 0 : i32
    %c0_i32_0 = arith.constant 0 : i32
    return %arg0, %c0_i32 : i32, i32
  }
  func.func @transform_2(%arg0: i32) -> (i32, i32) {
    %c0_i32 = arith.constant 0 : i32
    %c0_i32_0 = arith.constant 0 : i32
    %c0_i32_1 = arith.constant 0 : i32
    return %c0_i32, %c0_i32_0 : i32, i32
  }
  func.func @transform_3(%arg0: i32) -> (i32, i32) {
    %c0_i32 = arith.constant 0 : i32
    %c0_i32_0 = arith.constant 0 : i32
    %c0_i32_1 = arith.constant 0 : i32
    return %c0_i32, %c0_i32_0 : i32, i32
  }
  func.func @transform_4(%arg0: i32) -> (i32, i32) {
    %c0_i32 = arith.constant 0 : i32
    %c0_i32_0 = arith.constant 0 : i32
    %c0_i32_1 = arith.constant 0 : i32
    return %c0_i32, %c0_i32_0 : i32, i32
  }
  func.func @transform_5(%arg0: i32) -> (i32, i32) {
    %c0_i32 = arith.constant 0 : i32
    %c0_i32_0 = arith.constant 0 : i32
    return %arg0, %c0_i32 : i32, i32
  }
  func.func @transform_6(%arg0: i32) -> (i32, i32) {
    %c0_i32 = arith.constant 0 : i32
    %c0_i32_0 = arith.constant 0 : i32
    return %arg0, %c0_i32 : i32, i32
  }
}

module attributes {stable_mosaic.version = 11 : i64} {
  func.func @_fno_layer_kernel(%arg0: i32, %arg1: memref<632x128xf32, #tpu.memory_space<vmem>>, %arg2: memref<632x8xf32, #tpu.memory_space<vmem>>, %arg3: memref<128x128xf32, #tpu.memory_space<vmem>>, %arg4: memref<8x128xf32, #tpu.memory_space<vmem>>, %arg5: memref<1x128xf32, #tpu.memory_space<vmem>>, %arg6: memref<632x128xf32, #tpu.memory_space<vmem>>) attributes {dimension_semantics = [#tpu.dimension_semantics<parallel>], iteration_bounds = array<i64: 2>, scalar_prefetch = 0 : i64, scratch_operands = 0 : i64, tpu.core_type = #tpu.core_type<tc>, window_params = [{transform_indices = @transform_0, window_bounds = array<i64: 632, 128>}, {transform_indices = @transform_1, window_bounds = array<i64: 632, 8>}, {pipeline_mode = #tpu.pipeline_mode<synchronous>, transform_indices = @transform_2, window_bounds = array<i64: 128, 128>}, {pipeline_mode = #tpu.pipeline_mode<synchronous>, transform_indices = @transform_3, window_bounds = array<i64: 8, 128>}, {pipeline_mode = #tpu.pipeline_mode<synchronous>, transform_indices = @transform_4, window_bounds = array<i64: 1, 128>}, {transform_indices = @transform_5, window_bounds = array<i64: 632, 128>}]} {
    %c0 = arith.constant 0 : index
    %c0_0 = arith.constant 0 : index
    %0 = vector.load %arg1[%c0, %c0_0] : memref<632x128xf32, #tpu.memory_space<vmem>>, vector<632x128xf32>
    %c0_1 = arith.constant 0 : index
    %c0_2 = arith.constant 0 : index
    %1 = vector.load %arg3[%c0_1, %c0_2] : memref<128x128xf32, #tpu.memory_space<vmem>>, vector<128x128xf32>
    %cst = arith.constant dense<0.000000e+00> : vector<632x128xf32>
    %2 = tpu.matmul %0, %1, %cst {dimension_numbers = #tpu.dot_dimension_numbers<[1], [0], [0], [1], [0, 0, 1, 1], [], []>} : vector<632x128xf32>, vector<128x128xf32>, vector<632x128xf32> -> vector<632x128xf32>
    %c0_3 = arith.constant 0 : index
    %c0_4 = arith.constant 0 : index
    %3 = vector.load %arg2[%c0_3, %c0_4] : memref<632x8xf32, #tpu.memory_space<vmem>>, vector<632x8xf32>
    %c0_5 = arith.constant 0 : index
    %c0_6 = arith.constant 0 : index
    %4 = vector.load %arg4[%c0_5, %c0_6] : memref<8x128xf32, #tpu.memory_space<vmem>>, vector<8x128xf32>
    %cst_7 = arith.constant dense<0.000000e+00> : vector<632x128xf32>
    %5 = tpu.matmul %3, %4, %cst_7 {dimension_numbers = #tpu.dot_dimension_numbers<[1], [0], [0], [1], [0, 0, 1, 1], [], []>} : vector<632x8xf32>, vector<8x128xf32>, vector<632x128xf32> -> vector<632x128xf32>
    %6 = arith.addf %2, %5 : vector<632x128xf32>
    %c0_8 = arith.constant 0 : index
    %c0_9 = arith.constant 0 : index
    %7 = vector.load %arg5[%c0_8, %c0_9] : memref<1x128xf32, #tpu.memory_space<vmem>>, vector<1x128xf32>
    %8 = vector.broadcast %7 : vector<1x128xf32> to vector<632x128xf32>
    %9 = arith.addf %6, %8 : vector<632x128xf32>
    %cst_10 = arith.constant 5.000000e-01 : f32
    %10 = vector.broadcast %cst_10 : f32 to vector<632x128xf32>
    %11 = arith.mulf %10, %9 : vector<632x128xf32>
    %cst_11 = arith.constant 1.41421354 : f32
    %12 = vector.broadcast %cst_11 : f32 to vector<632x128xf32>
    %13 = arith.divf %9, %12 : vector<632x128xf32>
    %14 = math.erf %13 : vector<632x128xf32>
    %cst_12 = arith.constant 1.000000e+00 : f32
    %15 = vector.broadcast %cst_12 : f32 to vector<632x128xf32>
    %16 = arith.addf %15, %14 : vector<632x128xf32>
    %17 = arith.mulf %11, %16 : vector<632x128xf32>
    %c0_13 = arith.constant 0 : index
    %c0_14 = arith.constant 0 : index
    %18 = vector.load %arg6[%c0_13, %c0_14] : memref<632x128xf32, #tpu.memory_space<vmem>>, vector<632x128xf32>
    tpu.vector_store %arg6[%c0_13, %c0_14], %17 {strides = array<i32>} : memref<632x128xf32, #tpu.memory_space<vmem>>, vector<632x128xf32>,
    return
  }
  func.func @transform_0(%arg0: i32) -> (i32, i32) {
    %c0_i32 = arith.constant 0 : i32
    %c0_i32_0 = arith.constant 0 : i32
    return %arg0, %c0_i32 : i32, i32
  }
  func.func @transform_1(%arg0: i32) -> (i32, i32) {
    %c0_i32 = arith.constant 0 : i32
    %c0_i32_0 = arith.constant 0 : i32
    return %arg0, %c0_i32 : i32, i32
  }
  func.func @transform_2(%arg0: i32) -> (i32, i32) {
    %c0_i32 = arith.constant 0 : i32
    %c0_i32_0 = arith.constant 0 : i32
    %c0_i32_1 = arith.constant 0 : i32
    return %c0_i32, %c0_i32_0 : i32, i32
  }
  func.func @transform_3(%arg0: i32) -> (i32, i32) {
    %c0_i32 = arith.constant 0 : i32
    %c0_i32_0 = arith.constant 0 : i32
    %c0_i32_1 = arith.constant 0 : i32
    return %c0_i32, %c0_i32_0 : i32, i32
  }
  func.func @transform_4(%arg0: i32) -> (i32, i32) {
    %c0_i32 = arith.constant 0 : i32
    %c0_i32_0 = arith.constant 0 : i32
    %c0_i32_1 = arith.constant 0 : i32
    return %c0_i32, %c0_i32_0 : i32, i32
  }
  func.func @transform_5(%arg0: i32) -> (i32, i32) {
    %c0_i32 = arith.constant 0 : i32
    %c0_i32_0 = arith.constant 0 : i32
    return %arg0, %c0_i32 : i32, i32
  }
}

module attributes {stable_mosaic.version = 11 : i64} {
  func.func @_fnn_kernel(%arg0: memref<8x128xf32, #tpu.memory_space<vmem>>, %arg1: memref<128x128xf32, #tpu.memory_space<vmem>>, %arg2: memref<1x128xf32, #tpu.memory_space<vmem>>, %arg3: memref<128x256xf32, #tpu.memory_space<vmem>>, %arg4: memref<1x256xf32, #tpu.memory_space<vmem>>, %arg5: memref<8x256xf32, #tpu.memory_space<vmem>>) attributes {dimension_semantics = [], scalar_prefetch = 0 : i64, scratch_operands = 0 : i64, tpu.core_type = #tpu.core_type<tc>} {
    %c0 = arith.constant 0 : index
    %c0_0 = arith.constant 0 : index
    %0 = vector.load %arg0[%c0, %c0_0] : memref<8x128xf32, #tpu.memory_space<vmem>>, vector<8x128xf32>
    %c0_1 = arith.constant 0 : index
    %c0_2 = arith.constant 0 : index
    %1 = vector.load %arg1[%c0_1, %c0_2] : memref<128x128xf32, #tpu.memory_space<vmem>>, vector<128x128xf32>
    %c0_3 = arith.constant 0 : index
    %c0_4 = arith.constant 0 : index
    %2 = vector.load %arg2[%c0_3, %c0_4] : memref<1x128xf32, #tpu.memory_space<vmem>>, vector<1x128xf32>
    %cst = arith.constant dense<0.000000e+00> : vector<8x128xf32>
    %3 = tpu.matmul %0, %1, %cst {dimension_numbers = #tpu.dot_dimension_numbers<[1], [0], [0], [1], [0, 0, 1, 1], [], []>} : vector<8x128xf32>, vector<128x128xf32>, vector<8x128xf32> -> vector<8x128xf32>
    %4 = vector.broadcast %2 : vector<1x128xf32> to vector<8x128xf32>
    %5 = arith.addf %3, %4 : vector<8x128xf32>
    %6 = math.tanh %5 : vector<8x128xf32>
    %cst_5 = arith.constant dense<0.000000e+00> : vector<128xf32>
    %7 = vector.multi_reduction <add>, %6, %cst_5 [0] : vector<8x128xf32> to vector<128xf32>
    %8 = vector.shape_cast %7 : vector<128xf32> to vector<1x128xf32>
    %cst_6 = arith.constant 8.000000e+00 : f32
    %9 = vector.broadcast %cst_6 : f32 to vector<1x128xf32>
    %10 = arith.divf %8, %9 : vector<1x128xf32>
    %11 = vector.broadcast %10 : vector<1x128xf32> to vector<8x128xf32>
    %12 = arith.subf %6, %11 : vector<8x128xf32>
    %13 = arith.mulf %12, %12 : vector<8x128xf32>
    %cst_7 = arith.constant dense<0.000000e+00> : vector<128xf32>
    %14 = vector.multi_reduction <add>, %13, %cst_7 [0] : vector<8x128xf32> to vector<128xf32>
    %15 = vector.shape_cast %14 : vector<128xf32> to vector<1x128xf32>
    %cst_8 = arith.constant 8.000000e+00 : f32
    %16 = vector.broadcast %cst_8 : f32 to vector<1x128xf32>
    %17 = arith.divf %15, %16 : vector<1x128xf32>
    %18 = vector.broadcast %10 : vector<1x128xf32> to vector<8x128xf32>
    %19 = arith.subf %6, %18 : vector<8x128xf32>
    %cst_9 = arith.constant 9.99999974E-6 : f32
    %20 = vector.broadcast %cst_9 : f32 to vector<1x128xf32>
    %21 = arith.addf %17, %20 : vector<1x128xf32>
    %22 = math.rsqrt %21 : vector<1x128xf32>
    %23 = vector.broadcast %22 : vector<1x128xf32> to vector<8x128xf32>
    %24 = arith.mulf %19, %23 : vector<8x128xf32>
    %c0_10 = arith.constant 0 : index
    %c0_11 = arith.constant 0 : index
    %25 = vector.load %arg3[%c0_10, %c0_11] : memref<128x256xf32, #tpu.memory_space<vmem>>, vector<128x256xf32>
    %c0_12 = arith.constant 0 : index
    %c0_13 = arith.constant 0 : index
    %26 = vector.load %arg4[%c0_12, %c0_13] : memref<1x256xf32, #tpu.memory_space<vmem>>, vector<1x256xf32>
    %cst_14 = arith.constant dense<0.000000e+00> : vector<8x256xf32>
    %27 = tpu.matmul %24, %25, %cst_14 {dimension_numbers = #tpu.dot_dimension_numbers<[1], [0], [0], [1], [0, 0, 1, 1], [], []>} : vector<8x128xf32>, vector<128x256xf32>, vector<8x256xf32> -> vector<8x256xf32>
    %28 = vector.broadcast %26 : vector<1x256xf32> to vector<8x256xf32>
    %29 = arith.addf %27, %28 : vector<8x256xf32>
    %c0_15 = arith.constant 0 : index
    %c0_16 = arith.constant 0 : index
    %30 = vector.load %arg5[%c0_15, %c0_16] : memref<8x256xf32, #tpu.memory_space<vmem>>, vector<8x256xf32>
    tpu.vector_store %arg5[%c0_15, %c0_16], %29 {strides = array<i32>} : memref<8x256xf32, #tpu.memory_space<vmem>>, vector<8x256xf32>,
    return
  }
}

module attributes {stable_mosaic.version = 11 : i64} {
  func.func @_head_bt_kernel(%arg0: i32, %arg1: memref<1x256x128xf32, #tpu.memory_space<vmem>>, %arg2: memref<128x128xf32, #tpu.memory_space<vmem>>, %arg3: memref<1x128xf32, #tpu.memory_space<vmem>>, %arg4: memref<128x128xf32, #tpu.memory_space<vmem>>, %arg5: memref<1x128xf32, #tpu.memory_space<vmem>>, %arg6: memref<8x256xf32, #tpu.memory_space<vmem>>, %arg7: memref<1x8x128xf32, #tpu.memory_space<vmem>>) attributes {dimension_semantics = [#tpu.dimension_semantics<parallel>], iteration_bounds = array<i64: 2>, scalar_prefetch = 0 : i64, scratch_operands = 0 : i64, tpu.core_type = #tpu.core_type<tc>, window_params = [{transform_indices = @transform_0, window_bounds = array<i64: 1, 256, 128>}, {pipeline_mode = #tpu.pipeline_mode<synchronous>, transform_indices = @transform_1, window_bounds = array<i64: 128, 128>}, {pipeline_mode = #tpu.pipeline_mode<synchronous>, transform_indices = @transform_2, window_bounds = array<i64: 1, 128>}, {pipeline_mode = #tpu.pipeline_mode<synchronous>, transform_indices = @transform_3, window_bounds = array<i64: 128, 128>}, {pipeline_mode = #tpu.pipeline_mode<synchronous>, transform_indices = @transform_4, window_bounds = array<i64: 1, 128>}, {pipeline_mode = #tpu.pipeline_mode<synchronous>, transform_indices = @transform_5, window_bounds = array<i64: 8, 256>}, {transform_indices = @transform_6, window_bounds = array<i64: 1, 8, 128>}]} {
    %c0 = arith.constant 0 : index
    %c0_0 = arith.constant 0 : index
    %c0_1 = arith.constant 0 : index
    %0 = vector.load %arg1[%c0, %c0_0, %c0_1] : memref<1x256x128xf32, #tpu.memory_space<vmem>>, vector<1x256x128xf32>
    %1 = vector.shape_cast %0 : vector<1x256x128xf32> to vector<256x128xf32>
    %c0_2 = arith.constant 0 : index
    %c0_3 = arith.constant 0 : index
    %2 = vector.load %arg2[%c0_2, %c0_3] : memref<128x128xf32, #tpu.memory_space<vmem>>, vector<128x128xf32>
    %cst = arith.constant dense<0.000000e+00> : vector<256x128xf32>
    %3 = tpu.matmul %1, %2, %cst {dimension_numbers = #tpu.dot_dimension_numbers<[1], [0], [0], [1], [0, 0, 1, 1], [], []>} : vector<256x128xf32>, vector<128x128xf32>, vector<256x128xf32> -> vector<256x128xf32>
    %c0_4 = arith.constant 0 : index
    %c0_5 = arith.constant 0 : index
    %4 = vector.load %arg3[%c0_4, %c0_5] : memref<1x128xf32, #tpu.memory_space<vmem>>, vector<1x128xf32>
    %5 = vector.broadcast %4 : vector<1x128xf32> to vector<256x128xf32>
    %6 = arith.addf %3, %5 : vector<256x128xf32>
    %cst_6 = arith.constant 5.000000e-01 : f32
    %7 = vector.broadcast %cst_6 : f32 to vector<256x128xf32>
    %8 = arith.mulf %7, %6 : vector<256x128xf32>
    %cst_7 = arith.constant 1.41421354 : f32
    %9 = vector.broadcast %cst_7 : f32 to vector<256x128xf32>
    %10 = arith.divf %6, %9 : vector<256x128xf32>
    %11 = math.erf %10 : vector<256x128xf32>
    %cst_8 = arith.constant 1.000000e+00 : f32
    %12 = vector.broadcast %cst_8 : f32 to vector<256x128xf32>
    %13 = arith.addf %12, %11 : vector<256x128xf32>
    %14 = arith.mulf %8, %13 : vector<256x128xf32>
    %c0_9 = arith.constant 0 : index
    %c0_10 = arith.constant 0 : index
    %15 = vector.load %arg4[%c0_9, %c0_10] : memref<128x128xf32, #tpu.memory_space<vmem>>, vector<128x128xf32>
    %cst_11 = arith.constant dense<0.000000e+00> : vector<256x128xf32>
    %16 = tpu.matmul %14, %15, %cst_11 {dimension_numbers = #tpu.dot_dimension_numbers<[1], [0], [0], [1], [0, 0, 1, 1], [], []>} : vector<256x128xf32>, vector<128x128xf32>, vector<256x128xf32> -> vector<256x128xf32>
    %c0_12 = arith.constant 0 : index
    %c0_13 = arith.constant 0 : index
    %17 = vector.load %arg5[%c0_12, %c0_13] : memref<1x128xf32, #tpu.memory_space<vmem>>, vector<1x128xf32>
    %18 = vector.broadcast %17 : vector<1x128xf32> to vector<256x128xf32>
    %19 = arith.addf %16, %18 : vector<256x128xf32>
    %c0_14 = arith.constant 0 : index
    %c0_15 = arith.constant 0 : index
    %20 = vector.load %arg6[%c0_14, %c0_15] : memref<8x256xf32, #tpu.memory_space<vmem>>, vector<8x256xf32>
    %cst_16 = arith.constant dense<0.000000e+00> : vector<8x128xf32>
    %21 = tpu.matmul %20, %19, %cst_16 {dimension_numbers = #tpu.dot_dimension_numbers<[1], [0], [0], [1], [0, 0, 1, 1], [], []>} : vector<8x256xf32>, vector<256x128xf32>, vector<8x128xf32> -> vector<8x128xf32>
    %c0_17 = arith.constant 0 : index
    %c0_18 = arith.constant 0 : index
    %c0_19 = arith.constant 0 : index
    %22 = vector.load %arg7[%c0_17, %c0_18, %c0_19] : memref<1x8x128xf32, #tpu.memory_space<vmem>>, vector<1x8x128xf32>
    %23 = vector.shape_cast %22 : vector<1x8x128xf32> to vector<8x128xf32>
    %24 = vector.shape_cast %21 : vector<8x128xf32> to vector<1x8x128xf32>
    tpu.vector_store %arg7[%c0_17, %c0_18, %c0_19], %24 {strides = array<i32>} : memref<1x8x128xf32, #tpu.memory_space<vmem>>, vector<1x8x128xf32>,
    return
  }
  func.func @transform_0(%arg0: i32) -> (i32, i32, i32) {
    %c0_i32 = arith.constant 0 : i32
    %c0_i32_0 = arith.constant 0 : i32
    %c0_i32_1 = arith.constant 0 : i32
    return %arg0, %c0_i32, %c0_i32_0 : i32, i32, i32
  }
  func.func @transform_1(%arg0: i32) -> (i32, i32) {
    %c0_i32 = arith.constant 0 : i32
    %c0_i32_0 = arith.constant 0 : i32
    %c0_i32_1 = arith.constant 0 : i32
    return %c0_i32, %c0_i32_0 : i32, i32
  }
  func.func @transform_2(%arg0: i32) -> (i32, i32) {
    %c0_i32 = arith.constant 0 : i32
    %c0_i32_0 = arith.constant 0 : i32
    %c0_i32_1 = arith.constant 0 : i32
    return %c0_i32, %c0_i32_0 : i32, i32
  }
  func.func @transform_3(%arg0: i32) -> (i32, i32) {
    %c0_i32 = arith.constant 0 : i32
    %c0_i32_0 = arith.constant 0 : i32
    %c0_i32_1 = arith.constant 0 : i32
    return %c0_i32, %c0_i32_0 : i32, i32
  }
  func.func @transform_4(%arg0: i32) -> (i32, i32) {
    %c0_i32 = arith.constant 0 : i32
    %c0_i32_0 = arith.constant 0 : i32
    %c0_i32_1 = arith.constant 0 : i32
    return %c0_i32, %c0_i32_0 : i32, i32
  }
  func.func @transform_5(%arg0: i32) -> (i32, i32) {
    %c0_i32 = arith.constant 0 : i32
    %c0_i32_0 = arith.constant 0 : i32
    %c0_i32_1 = arith.constant 0 : i32
    return %c0_i32, %c0_i32_0 : i32, i32
  }
  func.func @transform_6(%arg0: i32) -> (i32, i32, i32) {
    %c0_i32 = arith.constant 0 : i32
    %c0_i32_0 = arith.constant 0 : i32
    %c0_i32_1 = arith.constant 0 : i32
    return %arg0, %c0_i32, %c0_i32_0 : i32, i32, i32
  }
}

</mosaic_0001>

<bundles_post_ra>
// kernel: deeponet_forward.5
= control target key start
LH: loop header
LB: loop body
LE: loop exit
PB: predicated region body
PF: predicated region fallthrough
CT: control target
= control target key end

     0   :  { %s897_s15 = smov 0   ;;  %s1561_s0 = inlined_call_operand.vmem [shape: f32[2,16,16,1], index: 0, kind: input, shape index: {}]   ;;  %s1562_s1 = inlined_call_operand.vmem [shape: f32[1,128], index: 1, kind: input, shape index: {}]   ;;  %s1563_s2 = inlined_call_operand.vmem [shape: f32[1,128], index: 2, kind: input, shape index: {}]   ;;  %s1564_s3 = inlined_call_operand.vmem [shape: f32[2,25,25,128], index: 3, kind: output, shape index: {0}]   ;;  %s1565_s4 = inlined_call_operand.vmem [shape: f32[2,25,25,8], index: 4, kind: output, shape index: {1}]  }
   0x1 LB: > { %s835_s16 = sadd.s32 4294967295, %s868_s15   ;;  %p839_p0 = scmp.ge.s32.totalorder %s868_s15, 1  ;;  %s868_s15 = sphi %s897_s15, %s15_s15  }
   0x2   : > { %p165_p1 = scmp.lt.s32.totalorder %s868_s15, 3 }
   0x4   : > { %p166_p2 = pnand %p839_p0, %p165_p1 }
   0x5   : > { %p196_p3 = scmp.lt.s32.totalorder (!%p166_p2), %s835_s16, 1 }
   0x6   : > { %169 = sbr.rel (%p166_p2) target bundleno = 205 (0xcd), region = 32 }
   0xb   : > { %v870_v0 = vmov 0   ;;  %s1567_s16 = smov (!%p196_p3, %s835_s16), 1  ;;  %vm581_vm0 = vcmask 64512   ;;  %v871_v3 = vmov 0.0   ;;  %vm585_vm1 = vcmask 57344  }
   0xc   : > { %861 = vset.pattern.permute.xlu1 %v870_v0  ;;  %860 = vset.pattern.permute.xlu0 %v870_v0  ;;  %s848_s17 = sshll.u32 %s1567_s16, 8  ;;  %s849_s18 = smul.u32 800, %s1567_s16  ;;  %v1391_v34 = vld [vmem:[%s1562_s1] ss:$0 sm:$0xff] }
   0xd   : > { %s908_s21 = scalar_lea.vmem %s1561_s0, %s848_s17  ;;  %v1396_v35 = vld [vmem:[%s1563_s2] ss:$0 sm:$0xff] }
   0xe   : > { %s913_s24 = scalar_lea.vmem %s1564_s3, %s849_s18  ;;  %s918_s27 = scalar_lea.vmem %s1565_s4, %s849_s18  ;;  %v213_v1 = vld [vmem:[%s908_s21 + $0x10] sm:$0xff]  ;;  %v211_v2 = vld [vmem:[%s908_s21] sm:$0xff]  ;;  %v214_v4 = vld [vmem:[%s908_s21 + $0x18] sm:$0xff] }
   0xf   : > { %256 = vperm.xlu1 %861, %v213_v1   ;;  %246 = vperm.xlu0 %860, %v211_v2   ;;  %587 = vst.msk [vmem:[%s918_s27 + $0x20] sm:$0xff] %vm581_vm0, %v871_v3  ;;  %483 = vst [vmem:[%s913_s24 + $0x10] sm:$0xff] %v871_v3  ;;  %v212_v5 = vld [vmem:[%s908_s21 + $0x8] sm:$0xff]  ;;  %v215_v7 = vld [vmem:[%s908_s21 + $0x20] sm:$0xff] }
  0x10   : > { %484 = vst [vmem:[%s913_s24 + $0x18] sm:$0x1] %v871_v3  ;;  %487 = vst [vmem:[%s913_s24 + $0x30] sm:$0xff] %v871_v3  ;;  %v216_v6 = vld [vmem:[%s908_s21 + $0x28] sm:$0xff]  ;;  %v218_v8 = vld [vmem:[%s908_s21 + $0x38] sm:$0xff] }
  0x11   : > { %488 = vst [vmem:[%s913_s24 + $0x38] sm:$0x1] %v871_v3  ;;  %491 = vst [vmem:[%s913_s24 + $0x50] sm:$0xff] %v871_v3  ;;  %v217_v9 = vld [vmem:[%s908_s21 + $0x30] sm:$0xff]  ;;  %v220_v10 = vld [vmem:[%s908_s21 + $0x48] sm:$0xff] }
  0x12   : > { %492 = vst [vmem:[%s913_s24 + $0x58] sm:$0x1] %v871_v3  ;;  %495 = vst [vmem:[%s913_s24 + $0x70] sm:$0xff] %v871_v3  ;;  %v219_v11 = vld [vmem:[%s908_s21 + $0x40] sm:$0xff]  ;;  %v222_v12 = vld [vmem:[%s908_s21 + $0x58] sm:$0xff] }
  0x13   : > { %496 = vst [vmem:[%s913_s24 + $0x78] sm:$0x1] %v871_v3  ;;  %499 = vst [vmem:[%s913_s24 + $0x90] sm:$0xff] %v871_v3  ;;  %261 = vperm.xlu1 %861, %v214_v4   ;;  %251 = vperm.xlu0 %860, %v212_v5   ;;  %v221_v13 = vld [vmem:[%s908_s21 + $0x50] sm:$0xff]  ;;  %v224_v14 = vld [vmem:[%s908_s21 + $0x68] sm:$0xff] }
  0x14   : > { %500 = vst [vmem:[%s913_s24 + $0x98] sm:$0x1] %v871_v3  ;;  %503 = vst [vmem:[%s913_s24 + $0xb0] sm:$0xff] %v871_v3  ;;  %v223_v15 = vld [vmem:[%s908_s21 + $0x60] sm:$0xff]  ;;  %v226_v16 = vld [vmem:[%s908_s21 + $0x78] sm:$0xff] }
  0x15   : > { %504 = vst [vmem:[%s913_s24 + $0xb8] sm:$0x1] %v871_v3  ;;  %507 = vst [vmem:[%s913_s24 + $0xd0] sm:$0xff] %v871_v3  ;;  %v225_v17 = vld [vmem:[%s908_s21 + $0x70] sm:$0xff]  ;;  %v228_v18 = vld [vmem:[%s908_s21 + $0x88] sm:$0xff] }
  0x16   : > { %508 = vst [vmem:[%s913_s24 + $0xd8] sm:$0x1] %v871_v3  ;;  %511 = vst [vmem:[%s913_s24 + $0xf0] sm:$0xff] %v871_v3  ;;  %v227_v19 = vld [vmem:[%s908_s21 + $0x80] sm:$0xff]  ;;  %v230_v20 = vld [vmem:[%s908_s21 + $0x98] sm:$0xff] }
  0x17   : > { %512 = vst [vmem:[%s913_s24 + $0xf8] sm:$0x1] %v871_v3  ;;  %515 = vst [vmem:[%s913_s24 + $0x110] sm:$0xff] %v871_v3  ;;  %271 = vperm.xlu1 %861, %v216_v6   ;;  %266 = vperm.xlu0 %860, %v215_v7   ;;  %v229_v21 = vld [vmem:[%s908_s21 + $0x90] sm:$0xff]  ;;  %v232_v22 = vld [vmem:[%s908_s21 + $0xa8] sm:$0xff] }
  0x18   : > { %516 = vst [vmem:[%s913_s24 + $0x118] sm:$0x1] %v871_v3  ;;  %519 = vst [vmem:[%s913_s24 + $0x130] sm:$0xff] %v871_v3  ;;  %v231_v23 = vld [vmem:[%s908_s21 + $0xa0] sm:$0xff]  ;;  %v234_v24 = vld [vmem:[%s908_s21 + $0xb8] sm:$0xff] }
  0x19   : > { %520 = vst [vmem:[%s913_s24 + $0x138] sm:$0x1] %v871_v3  ;;  %523 = vst [vmem:[%s913_s24 + $0x150] sm:$0xff] %v871_v3  ;;  %v233_v25 = vld [vmem:[%s908_s21 + $0xb0] sm:$0xff]  ;;  %v236_v26 = vld [vmem:[%s908_s21 + $0xc8] sm:$0xff] }
  0x1a   : > { %524 = vst [vmem:[%s913_s24 + $0x158] sm:$0x1] %v871_v3  ;;  %527 = vst [vmem:[%s913_s24 + $0x170] sm:$0xff] %v871_v3  ;;  %v235_v27 = vld [vmem:[%s908_s21 + $0xc0] sm:$0xff]  ;;  %v238_v28 = vld [vmem:[%s908_s21 + $0xd8] sm:$0xff] }
  0x1b   : > { %528 = vst [vmem:[%s913_s24 + $0x178] sm:$0x1] %v871_v3  ;;  %531 = vst [vmem:[%s913_s24 + $0x190] sm:$0xff] %v871_v3  ;;  %281 = vperm.xlu1 %861, %v218_v8   ;;  %276 = vperm.xlu0 %860, %v217_v9   ;;  %v237_v29 = vld [vmem:[%s908_s21 + $0xd0] sm:$0xff]  ;;  %v240_v30 = vld [vmem:[%s908_s21 + $0xe8] sm:$0xff] }
  0x1c   : > { %532 = vst [vmem:[%s913_s24 + $0x198] sm:$0x1] %v871_v3  ;;  %535 = vst [vmem:[%s913_s24 + $0x1b0] sm:$0xff] %v871_v3  ;;  %v239_v31 = vld [vmem:[%s908_s21 + $0xe0] sm:$0xff]  ;;  %v242_v32 = vld [vmem:[%s908_s21 + $0xf8] sm:$0xff] }
  0x1d   : > { %536 = vst [vmem:[%s913_s24 + $0x1b8] sm:$0x1] %v871_v3  ;;  %539 = vst [vmem:[%s913_s24 + $0x1d0] sm:$0xff] %v871_v3  ;;  %v241_v33 = vld [vmem:[%s908_s21 + $0xf0] sm:$0xff] }
  0x1e   : > { %540 = vst [vmem:[%s913_s24 + $0x1d8] sm:$0x1] %v871_v3  ;;  %543 = vst [vmem:[%s913_s24 + $0x1f0] sm:$0xff] %v871_v3 }
  0x1f   : > { %544 = vst [vmem:[%s913_s24 + $0x1f8] sm:$0x1] %v871_v3  ;;  %545 = vst [vmem:[%s913_s24 + $0x200] sm:$0xff] %v871_v3  ;;  %291 = vperm.xlu1 %861, %v220_v10   ;;  %286 = vperm.xlu0 %860, %v219_v11  }
  0x20   : > { %546 = vst [vmem:[%s913_s24 + $0x208] sm:$0xff] %v871_v3  ;;  %547 = vst [vmem:[%s913_s24 + $0x210] sm:$0xff] %v871_v3 }
  0x21   : > { %548 = vst [vmem:[%s913_s24 + $0x218] sm:$0x1] %v871_v3  ;;  %549 = vst [vmem:[%s913_s24 + $0x220] sm:$0xff] %v871_v3 }
  0x22   : > { %550 = vst [vmem:[%s913_s24 + $0x228] sm:$0xff] %v871_v3  ;;  %551 = vst [vmem:[%s913_s24 + $0x230] sm:$0xff] %v871_v3 }
  0x23   : > { %552 = vst [vmem:[%s913_s24 + $0x238] sm:$0x1] %v871_v3  ;;  %553 = vst [vmem:[%s913_s24 + $0x240] sm:$0xff] %v871_v3  ;;  %301 = vperm.xlu1 %861, %v222_v12   ;;  %296 = vperm.xlu0 %860, %v221_v13  }
  0x24   : > { %554 = vst [vmem:[%s913_s24 + $0x248] sm:$0xff] %v871_v3  ;;  %555 = vst [vmem:[%s913_s24 + $0x250] sm:$0xff] %v871_v3 }
  0x25   : > { %556 = vst [vmem:[%s913_s24 + $0x258] sm:$0x1] %v871_v3  ;;  %557 = vst [vmem:[%s913_s24 + $0x260] sm:$0xff] %v871_v3 }
  0x26   : > { %558 = vst [vmem:[%s913_s24 + $0x268] sm:$0xff] %v871_v3  ;;  %559 = vst [vmem:[%s913_s24 + $0x270] sm:$0xff] %v871_v3 }
  0x27   : > { %560 = vst [vmem:[%s913_s24 + $0x278] sm:$0x1] %v871_v3  ;;  %561 = vst [vmem:[%s913_s24 + $0x280] sm:$0xff] %v871_v3  ;;  %311 = vperm.xlu1 %861, %v224_v14   ;;  %306 = vperm.xlu0 %860, %v223_v15  }
  0x28   : > { %562 = vst [vmem:[%s913_s24 + $0x288] sm:$0xff] %v871_v3  ;;  %563 = vst [vmem:[%s913_s24 + $0x290] sm:$0xff] %v871_v3 }
  0x29   : > { %564 = vst [vmem:[%s913_s24 + $0x298] sm:$0x1] %v871_v3  ;;  %565 = vst [vmem:[%s913_s24 + $0x2a0] sm:$0xff] %v871_v3 }
  0x2a   : > { %566 = vst [vmem:[%s913_s24 + $0x2a8] sm:$0xff] %v871_v3  ;;  %567 = vst [vmem:[%s913_s24 + $0x2b0] sm:$0xff] %v871_v3 }
  0x2b   : > { %568 = vst [vmem:[%s913_s24 + $0x2b8] sm:$0x1] %v871_v3  ;;  %569 = vst [vmem:[%s913_s24 + $0x2c0] sm:$0xff] %v871_v3  ;;  %321 = vperm.xlu1 %861, %v226_v16   ;;  %316 = vperm.xlu0 %860, %v225_v17  }
  0x2c   : > { %570 = vst [vmem:[%s913_s24 + $0x2c8] sm:$0xff] %v871_v3  ;;  %571 = vst [vmem:[%s913_s24 + $0x2d0] sm:$0xff] %v871_v3 }
  0x2d   : > { %572 = vst [vmem:[%s913_s24 + $0x2d8] sm:$0x1] %v871_v3  ;;  %573 = vst [vmem:[%s913_s24 + $0x2e0] sm:$0xff] %v871_v3 }
  0x2e   : > { %574 = vst [vmem:[%s913_s24 + $0x2e8] sm:$0xff] %v871_v3  ;;  %575 = vst [vmem:[%s913_s24 + $0x2f0] sm:$0xff] %v871_v3 }
  0x2f   : > { %576 = vst [vmem:[%s913_s24 + $0x2f8] sm:$0x1] %v871_v3  ;;  %577 = vst [vmem:[%s913_s24 + $0x300] sm:$0xff] %v871_v3  ;;  %331 = vperm.xlu1 %861, %v228_v18   ;;  %326 = vperm.xlu0 %860, %v227_v19  }
  0x30   : > { %578 = vst [vmem:[%s913_s24 + $0x308] sm:$0xff] %v871_v3  ;;  %579 = vst [vmem:[%s913_s24 + $0x310] sm:$0xff] %v871_v3 }
  0x31   : > { %580 = vst [vmem:[%s913_s24 + $0x318] sm:$0x1] %v871_v3  ;;  %582 = vst.msk [vmem:[%s918_s27] sm:$0xff] %vm581_vm0, %v871_v3 }
  0x32   : > { %583 = vst.msk [vmem:[%s918_s27 + $0x8] sm:$0xff] %vm581_vm0, %v871_v3  ;;  %584 = vst.msk [vmem:[%s918_s27 + $0x10] sm:$0xff] %vm581_vm0, %v871_v3 }
  0x33   : > { %588 = vst.msk [vmem:[%s918_s27 + $0x28] sm:$0xff] %vm581_vm0, %v871_v3  ;;  %589 = vst.msk [vmem:[%s918_s27 + $0x30] sm:$0xff] %vm581_vm0, %v871_v3  ;;  %341 = vperm.xlu1 %861, %v230_v20   ;;  %336 = vperm.xlu0 %860, %v229_v21  }
  0x34   : > { %591 = vst.msk [vmem:[%s918_s27 + $0x40] sm:$0xff] %vm581_vm0, %v871_v3  ;;  %592 = vst.msk [vmem:[%s918_s27 + $0x48] sm:$0xff] %vm581_vm0, %v871_v3 }
  0x35   : > { %593 = vst.msk [vmem:[%s918_s27 + $0x50] sm:$0xff] %vm581_vm0, %v871_v3  ;;  %595 = vst.msk [vmem:[%s918_s27 + $0x60] sm:$0xff] %vm581_vm0, %v871_v3 }
  0x36   : > { %596 = vst.msk [vmem:[%s918_s27 + $0x68] sm:$0xff] %vm581_vm0, %v871_v3  ;;  %597 = vst.msk [vmem:[%s918_s27 + $0x70] sm:$0xff] %vm581_vm0, %v871_v3 }
  0x37   : > { %599 = vst.msk [vmem:[%s918_s27 + $0x80] sm:$0xff] %vm581_vm0, %v871_v3  ;;  %600 = vst.msk [vmem:[%s918_s27 + $0x88] sm:$0xff] %vm581_vm0, %v871_v3  ;;  %351 = vperm.xlu1 %861, %v232_v22   ;;  %346 = vperm.xlu0 %860, %v231_v23  }
  0x38   : > { %601 = vst.msk [vmem:[%s918_s27 + $0x90] sm:$0xff] %vm581_vm0, %v871_v3  ;;  %603 = vst.msk [vmem:[%s918_s27 + $0xa0] sm:$0xff] %vm581_vm0, %v871_v3 }
  0x39   : > { %604 = vst.msk [vmem:[%s918_s27 + $0xa8] sm:$0xff] %vm581_vm0, %v871_v3  ;;  %605 = vst.msk [vmem:[%s918_s27 + $0xb0] sm:$0xff] %vm581_vm0, %v871_v3 }
  0x3a   : > { %607 = vst.msk [vmem:[%s918_s27 + $0xc0] sm:$0xff] %vm581_vm0, %v871_v3  ;;  %608 = vst.msk [vmem:[%s918_s27 + $0xc8] sm:$0xff] %vm581_vm0, %v871_v3 }
  0x3b   : > { %609 = vst.msk [vmem:[%s918_s27 + $0xd0] sm:$0xff] %vm581_vm0, %v871_v3  ;;  %611 = vst.msk [vmem:[%s918_s27 + $0xe0] sm:$0xff] %vm581_vm0, %v871_v3  ;;  %361 = vperm.xlu1 %861, %v234_v24   ;;  %356 = vperm.xlu0 %860, %v233_v25  }
  0x3c   : > { %612 = vst.msk [vmem:[%s918_s27 + $0xe8] sm:$0xff] %vm581_vm0, %v871_v3  ;;  %613 = vst.msk [vmem:[%s918_s27 + $0xf0] sm:$0xff] %vm581_vm0, %v871_v3 }
  0x3d   : > { %615 = vst.msk [vmem:[%s918_s27 + $0x100] sm:$0xff] %vm581_vm0, %v871_v3  ;;  %616 = vst.msk [vmem:[%s918_s27 + $0x108] sm:$0xff] %vm581_vm0, %v871_v3 }
  0x3e   : > { %617 = vst.msk [vmem:[%s918_s27 + $0x110] sm:$0xff] %vm581_vm0, %v871_v3  ;;  %619 = vst.msk [vmem:[%s918_s27 + $0x120] sm:$0xff] %vm581_vm0, %v871_v3 }
  0x3f   : > { %620 = vst.msk [vmem:[%s918_s27 + $0x128] sm:$0xff] %vm581_vm0, %v871_v3  ;;  %621 = vst.msk [vmem:[%s918_s27 + $0x130] sm:$0xff] %vm581_vm0, %v871_v3  ;;  %371 = vperm.xlu1 %861, %v236_v26   ;;  %366 = vperm.xlu0 %860, %v235_v27  }
  0x40   : > { %623 = vst.msk [vmem:[%s918_s27 + $0x140] sm:$0xff] %vm581_vm0, %v871_v3  ;;  %624 = vst.msk [vmem:[%s918_s27 + $0x148] sm:$0xff] %vm581_vm0, %v871_v3 }
  0x41   : > { %625 = vst.msk [vmem:[%s918_s27 + $0x150] sm:$0xff] %vm581_vm0, %v871_v3  ;;  %627 = vst.msk [vmem:[%s918_s27 + $0x160] sm:$0xff] %vm581_vm0, %v871_v3 }
  0x42   : > { %628 = vst.msk [vmem:[%s918_s27 + $0x168] sm:$0xff] %vm581_vm0, %v871_v3  ;;  %629 = vst.msk [vmem:[%s918_s27 + $0x170] sm:$0xff] %vm581_vm0, %v871_v3 }
  0x43   : > { %631 = vst.msk [vmem:[%s918_s27 + $0x180] sm:$0xff] %vm581_vm0, %v871_v3  ;;  %632 = vst.msk [vmem:[%s918_s27 + $0x188] sm:$0xff] %vm581_vm0, %v871_v3  ;;  %381 = vperm.xlu1 %861, %v238_v28   ;;  %376 = vperm.xlu0 %860, %v237_v29  }
  0x44   : > { %633 = vst.msk [vmem:[%s918_s27 + $0x190] sm:$0xff] %vm581_vm0, %v871_v3  ;;  %635 = vst.msk [vmem:[%s918_s27 + $0x1a0] sm:$0xff] %vm581_vm0, %v871_v3 }
  0x45   : > { %636 = vst.msk [vmem:[%s918_s27 + $0x1a8] sm:$0xff] %vm581_vm0, %v871_v3  ;;  %637 = vst.msk [vmem:[%s918_s27 + $0x1b0] sm:$0xff] %vm581_vm0, %v871_v3 }
  0x46   : > { %639 = vst.msk [vmem:[%s918_s27 + $0x1c0] sm:$0xff] %vm581_vm0, %v871_v3  ;;  %640 = vst.msk [vmem:[%s918_s27 + $0x1c8] sm:$0xff] %vm581_vm0, %v871_v3 }
  0x47   : > { %641 = vst.msk [vmem:[%s918_s27 + $0x1d0] sm:$0xff] %vm581_vm0, %v871_v3  ;;  %643 = vst.msk [vmem:[%s918_s27 + $0x1e0] sm:$0xff] %vm581_vm0, %v871_v3  ;;  %391 = vperm.xlu1 %861, %v240_v30   ;;  %386 = vperm.xlu0 %860, %v239_v31  }
  0x48   : > { %644 = vst.msk [vmem:[%s918_s27 + $0x1e8] sm:$0xff] %vm581_vm0, %v871_v3  ;;  %645 = vst.msk [vmem:[%s918_s27 + $0x1f0] sm:$0xff] %vm581_vm0, %v871_v3 }
  0x49   : > { %647 = vst.msk [vmem:[%s918_s27 + $0x200] sm:$0xff] %vm581_vm0, %v871_v3  ;;  %648 = vst.msk [vmem:[%s918_s27 + $0x208] sm:$0xff] %vm581_vm0, %v871_v3 }
  0x4a   : > { %649 = vst.msk [vmem:[%s918_s27 + $0x210] sm:$0xff] %vm581_vm0, %v871_v3  ;;  %651 = vst.msk [vmem:[%s918_s27 + $0x220] sm:$0xff] %vm581_vm0, %v871_v3 }
  0x4b   : > { %652 = vst.msk [vmem:[%s918_s27 + $0x228] sm:$0xff] %vm581_vm0, %v871_v3  ;;  %653 = vst.msk [vmem:[%s918_s27 + $0x230] sm:$0xff] %vm581_vm0, %v871_v3  ;;  %401 = vperm.xlu1 %861, %v242_v32   ;;  %396 = vperm.xlu0 %860, %v241_v33  }
  0x4c   : > { %655 = vst.msk [vmem:[%s918_s27 + $0x240] sm:$0xff] %vm581_vm0, %v871_v3  ;;  %656 = vst.msk [vmem:[%s918_s27 + $0x248] sm:$0xff] %vm581_vm0, %v871_v3 }
  0x4d   : > { %657 = vst.msk [vmem:[%s918_s27 + $0x250] sm:$0xff] %vm581_vm0, %v871_v3  ;;  %659 = vst.msk [vmem:[%s918_s27 + $0x260] sm:$0xff] %vm581_vm0, %v871_v3 }
  0x4e   : > { %660 = vst.msk [vmem:[%s918_s27 + $0x268] sm:$0xff] %vm581_vm0, %v871_v3  ;;  %661 = vst.msk [vmem:[%s918_s27 + $0x270] sm:$0xff] %vm581_vm0, %v871_v3 }
  0x4f   : > { %663 = vst.msk [vmem:[%s918_s27 + $0x280] sm:$0xff] %vm581_vm0, %v871_v3  ;;  %664 = vst.msk [vmem:[%s918_s27 + $0x288] sm:$0xff] %vm581_vm0, %v871_v3 }
  0x50   : > { %665 = vst.msk [vmem:[%s918_s27 + $0x290] sm:$0xff] %vm581_vm0, %v871_v3  ;;  %667 = vst.msk [vmem:[%s918_s27 + $0x2a0] sm:$0xff] %vm581_vm0, %v871_v3 }
  0x51   : > { %668 = vst.msk [vmem:[%s918_s27 + $0x2a8] sm:$0xff] %vm581_vm0, %v871_v3  ;;  %669 = vst.msk [vmem:[%s918_s27 + $0x2b0] sm:$0xff] %vm581_vm0, %v871_v3 }
  0x52   : > { %671 = vst.msk [vmem:[%s918_s27 + $0x2c0] sm:$0xff] %vm581_vm0, %v871_v3  ;;  %672 = vst.msk [vmem:[%s918_s27 + $0x2c8] sm:$0xff] %vm581_vm0, %v871_v3 }
  0x53   : > { %673 = vst.msk [vmem:[%s918_s27 + $0x2d0] sm:$0xff] %vm581_vm0, %v871_v3  ;;  %675 = vst.msk [vmem:[%s918_s27 + $0x2e0] sm:$0xff] %vm581_vm0, %v871_v3 }
  0x54   : > { %676 = vst.msk [vmem:[%s918_s27 + $0x2e8] sm:$0xff] %vm581_vm0, %v871_v3  ;;  %677 = vst.msk [vmem:[%s918_s27 + $0x2f0] sm:$0xff] %vm581_vm0, %v871_v3 }
  0x55   : > { %679 = vst.msk [vmem:[%s918_s27 + $0x300] sm:$0xff] %vm581_vm0, %v871_v3  ;;  %680 = vst.msk [vmem:[%s918_s27 + $0x308] sm:$0xff] %vm581_vm0, %v871_v3 }
  0x56   : > { %681 = vst.msk [vmem:[%s918_s27 + $0x310] sm:$0xff] %vm581_vm0, %v871_v3 }
  0x57   : > { %586 = vst.msk [vmem:[%s918_s27 + $0x18] sm:$0x1] %vm585_vm1, %v871_v3  ;;  %590 = vst.msk [vmem:[%s918_s27 + $0x38] sm:$0x1] %vm585_vm1, %v871_v3 }
  0x58   : > { %594 = vst.msk [vmem:[%s918_s27 + $0x58] sm:$0x1] %vm585_vm1, %v871_v3  ;;  %598 = vst.msk [vmem:[%s918_s27 + $0x78] sm:$0x1] %vm585_vm1, %v871_v3 }
  0x59   : > { %602 = vst.msk [vmem:[%s918_s27 + $0x98] sm:$0x1] %vm585_vm1, %v871_v3  ;;  %606 = vst.msk [vmem:[%s918_s27 + $0xb8] sm:$0x1] %vm585_vm1, %v871_v3 }
  0x5a   : > { %610 = vst.msk [vmem:[%s918_s27 + $0xd8] sm:$0x1] %vm585_vm1, %v871_v3  ;;  %614 = vst.msk [vmem:[%s918_s27 + $0xf8] sm:$0x1] %vm585_vm1, %v871_v3 }
  0x5b   : > { %618 = vst.msk [vmem:[%s918_s27 + $0x118] sm:$0x1] %vm585_vm1, %v871_v3  ;;  %622 = vst.msk [vmem:[%s918_s27 + $0x138] sm:$0x1] %vm585_vm1, %v871_v3 }
  0x5c   : > { %626 = vst.msk [vmem:[%s918_s27 + $0x158] sm:$0x1] %vm585_vm1, %v871_v3  ;;  %630 = vst.msk [vmem:[%s918_s27 + $0x178] sm:$0x1] %vm585_vm1, %v871_v3 }
  0x5d   : > { %634 = vst.msk [vmem:[%s918_s27 + $0x198] sm:$0x1] %vm585_vm1, %v871_v3  ;;  %638 = vst.msk [vmem:[%s918_s27 + $0x1b8] sm:$0x1] %vm585_vm1, %v871_v3 }
  0x5e   : > { %642 = vst.msk [vmem:[%s918_s27 + $0x1d8] sm:$0x1] %vm585_vm1, %v871_v3  ;;  %646 = vst.msk [vmem:[%s918_s27 + $0x1f8] sm:$0x1] %vm585_vm1, %v871_v3 }
  0x5f   : > { %650 = vst.msk [vmem:[%s918_s27 + $0x218] sm:$0x1] %vm585_vm1, %v871_v3  ;;  %654 = vst.msk [vmem:[%s918_s27 + $0x238] sm:$0x1] %vm585_vm1, %v871_v3 }
  0x60   : > { %658 = vst.msk [vmem:[%s918_s27 + $0x258] sm:$0x1] %vm585_vm1, %v871_v3  ;;  %662 = vst.msk [vmem:[%s918_s27 + $0x278] sm:$0x1] %vm585_vm1, %v871_v3 }
  0x61   : > { %666 = vst.msk [vmem:[%s918_s27 + $0x298] sm:$0x1] %vm585_vm1, %v871_v3  ;;  %670 = vst.msk [vmem:[%s918_s27 + $0x2b8] sm:$0x1] %vm585_vm1, %v871_v3 }
  0x62   : > { %674 = vst.msk [vmem:[%s918_s27 + $0x2d8] sm:$0x1] %vm585_vm1, %v871_v3  ;;  %678 = vst.msk [vmem:[%s918_s27 + $0x2f8] sm:$0x1] %vm585_vm1, %v871_v3 }
  0x63   : > { %682 = vst.msk [vmem:[%s918_s27 + $0x318] sm:$0x1] %vm585_vm1, %v871_v3 }
  0x8a   : > { %v257_v36 = vpop.permute.xlu1 %256  ;;  %v247_v37 = vpop.permute.xlu0 %246 }
  0x8b   : > { %v412_v38 = vmul.f32 %v1391_v34, %v257_v36  ;;  %v410_v39 = vmul.f32 %v1391_v34, %v247_v37 }
  0x8d   : > { %v451_v40 = vadd.f32 %v1396_v35, %v412_v38  ;;  %v449_v41 = vadd.f32 %v1396_v35, %v410_v39 }
  0x8e   : > { %v262_v42 = vpop.permute.xlu1 %261  ;;  %v252_v43 = vpop.permute.xlu0 %251 }
  0x8f   : > { %685 = vst [vmem:[%s913_s24 + $0x20] sm:$0xff] %v451_v40  ;;  %717 = vst.msk [vmem:[%s918_s27 + $0x20] sm:$0xff] %vm581_vm0, %v451_v40  ;;  %v413_v44 = vmul.f32 %v1391_v34, %v262_v42  ;;  %v411_v45 = vmul.f32 %v1391_v34, %v252_v43 }
  0x90   : > { %683 = vst [vmem:[%s913_s24] sm:$0xff] %v449_v41  ;;  %715 = vst.msk [vmem:[%s918_s27] sm:$0xff] %vm581_vm0, %v449_v41 }
  0x91   : > { %v452_v46 = vadd.f32 %v1396_v35, %v413_v44  ;;  %v450_v47 = vadd.f32 %v1396_v35, %v411_v45 }
  0x92   : > { %v272_v48 = vpop.permute.xlu1 %271  ;;  %v267_v49 = vpop.permute.xlu0 %266 }
  0x93   : > { %686 = vst [vmem:[%s913_s24 + $0x28] sm:$0xff] %v452_v46  ;;  %718 = vst.msk [vmem:[%s918_s27 + $0x28] sm:$0xff] %vm581_vm0, %v452_v46  ;;  %v415_v50 = vmul.f32 %v1391_v34, %v272_v48  ;;  %v414_v51 = vmul.f32 %v1391_v34, %v267_v49 }
  0x94   : > { %684 = vst [vmem:[%s913_s24 + $0x8] sm:$0xff] %v450_v47  ;;  %716 = vst.msk [vmem:[%s918_s27 + $0x8] sm:$0xff] %vm581_vm0, %v450_v47 }
  0x95   : > { %v454_v52 = vadd.f32 %v1396_v35, %v415_v50  ;;  %v453_v53 = vadd.f32 %v1396_v35, %v414_v51 }
  0x96   : > { %v282_v54 = vpop.permute.xlu1 %281  ;;  %v277_v55 = vpop.permute.xlu0 %276 }
  0x97   : > { %688 = vst [vmem:[%s913_s24 + $0x48] sm:$0xff] %v454_v52  ;;  %720 = vst.msk [vmem:[%s918_s27 + $0x48] sm:$0xff] %vm581_vm0, %v454_v52  ;;  %v417_v56 = vmul.f32 %v1391_v34, %v282_v54  ;;  %v416_v57 = vmul.f32 %v1391_v34, %v277_v55 }
  0x98   : > { %687 = vst [vmem:[%s913_s24 + $0x40] sm:$0xff] %v453_v53  ;;  %719 = vst.msk [vmem:[%s918_s27 + $0x40] sm:$0xff] %vm581_vm0, %v453_v53 }
  0x99   : > { %v456_v58 = vadd.f32 %v1396_v35, %v417_v56  ;;  %v455_v59 = vadd.f32 %v1396_v35, %v416_v57 }
  0x9a   : > { %v292_v60 = vpop.permute.xlu1 %291  ;;  %v287_v61 = vpop.permute.xlu0 %286 }
  0x9b   : > { %690 = vst [vmem:[%s913_s24 + $0x68] sm:$0xff] %v456_v58  ;;  %722 = vst.msk [vmem:[%s918_s27 + $0x68] sm:$0xff] %vm581_vm0, %v456_v58  ;;  %v419_v62 = vmul.f32 %v1391_v34, %v292_v60  ;;  %v418_v63 = vmul.f32 %v1391_v34, %v287_v61 }
  0x9c   : > { %689 = vst [vmem:[%s913_s24 + $0x60] sm:$0xff] %v455_v59  ;;  %721 = vst.msk [vmem:[%s918_s27 + $0x60] sm:$0xff] %vm581_vm0, %v455_v59 }
  0x9d   : > { %v458_v0 = vadd.f32 %v1396_v35, %v419_v62  ;;  %v457_v1 = vadd.f32 %v1396_v35, %v418_v63 }
  0x9e   : > { %v302_v2 = vpop.permute.xlu1 %301  ;;  %v297_v3 = vpop.permute.xlu0 %296 }
  0x9f   : > { %692 = vst [vmem:[%s913_s24 + $0x88] sm:$0xff] %v458_v0  ;;  %724 = vst.msk [vmem:[%s918_s27 + $0x88] sm:$0xff] %vm581_vm0, %v458_v0  ;;  %v421_v4 = vmul.f32 %v1391_v34, %v302_v2  ;;  %v420_v5 = vmul.f32 %v1391_v34, %v297_v3 }
  0xa0   : > { %691 = vst [vmem:[%s913_s24 + $0x80] sm:$0xff] %v457_v1  ;;  %723 = vst.msk [vmem:[%s918_s27 + $0x80] sm:$0xff] %vm581_vm0, %v457_v1 }
  0xa1   : > { %v460_v6 = vadd.f32 %v1396_v35, %v421_v4  ;;  %v459_v7 = vadd.f32 %v1396_v35, %v420_v5 }
  0xa2   : > { %v312_v8 = vpop.permute.xlu1 %311  ;;  %v307_v9 = vpop.permute.xlu0 %306 }
  0xa3   : > { %694 = vst [vmem:[%s913_s24 + $0xa8] sm:$0xff] %v460_v6  ;;  %726 = vst.msk [vmem:[%s918_s27 + $0xa8] sm:$0xff] %vm581_vm0, %v460_v6  ;;  %v423_v10 = vmul.f32 %v1391_v34, %v312_v8  ;;  %v422_v11 = vmul.f32 %v1391_v34, %v307_v9 }
  0xa4   : > { %693 = vst [vmem:[%s913_s24 + $0xa0] sm:$0xff] %v459_v7  ;;  %725 = vst.msk [vmem:[%s918_s27 + $0xa0] sm:$0xff] %vm581_vm0, %v459_v7 }
  0xa5   : > { %v462_v12 = vadd.f32 %v1396_v35, %v423_v10  ;;  %v461_v13 = vadd.f32 %v1396_v35, %v422_v11 }
  0xa6   : > { %v322_v14 = vpop.permute.xlu1 %321  ;;  %v317_v15 = vpop.permute.xlu0 %316 }
  0xa7   : > { %696 = vst [vmem:[%s913_s24 + $0xc8] sm:$0xff] %v462_v12  ;;  %728 = vst.msk [vmem:[%s918_s27 + $0xc8] sm:$0xff] %vm581_vm0, %v462_v12  ;;  %v425_v16 = vmul.f32 %v1391_v34, %v322_v14  ;;  %v424_v17 = vmul.f32 %v1391_v34, %v317_v15 }
  0xa8   : > { %695 = vst [vmem:[%s913_s24 + $0xc0] sm:$0xff] %v461_v13  ;;  %727 = vst.msk [vmem:[%s918_s27 + $0xc0] sm:$0xff] %vm581_vm0, %v461_v13 }
  0xa9   : > { %v464_v18 = vadd.f32 %v1396_v35, %v425_v16  ;;  %v463_v19 = vadd.f32 %v1396_v35, %v424_v17 }
  0xaa   : > { %v332_v20 = vpop.permute.xlu1 %331  ;;  %v327_v21 = vpop.permute.xlu0 %326 }
  0xab   : > { %698 = vst [vmem:[%s913_s24 + $0xe8] sm:$0xff] %v464_v18  ;;  %730 = vst.msk [vmem:[%s918_s27 + $0xe8] sm:$0xff] %vm581_vm0, %v464_v18  ;;  %v427_v22 = vmul.f32 %v1391_v34, %v332_v20  ;;  %v426_v23 = vmul.f32 %v1391_v34, %v327_v21 }
  0xac   : > { %697 = vst [vmem:[%s913_s24 + $0xe0] sm:$0xff] %v463_v19  ;;  %729 = vst.msk [vmem:[%s918_s27 + $0xe0] sm:$0xff] %vm581_vm0, %v463_v19 }
  0xad   : > { %v466_v24 = vadd.f32 %v1396_v35, %v427_v22  ;;  %v465_v25 = vadd.f32 %v1396_v35, %v426_v23 }
  0xae   : > { %v342_v26 = vpop.permute.xlu1 %341  ;;  %v337_v27 = vpop.permute.xlu0 %336 }
  0xaf   : > { %700 = vst [vmem:[%s913_s24 + $0x108] sm:$0xff] %v466_v24  ;;  %732 = vst.msk [vmem:[%s918_s27 + $0x108] sm:$0xff] %vm581_vm0, %v466_v24  ;;  %v429_v28 = vmul.f32 %v1391_v34, %v342_v26  ;;  %v428_v29 = vmul.f32 %v1391_v34, %v337_v27 }
  0xb0   : > { %699 = vst [vmem:[%s913_s24 + $0x100] sm:$0xff] %v465_v25  ;;  %731 = vst.msk [vmem:[%s918_s27 + $0x100] sm:$0xff] %vm581_vm0, %v465_v25 }
  0xb1   : > { %v468_v30 = vadd.f32 %v1396_v35, %v429_v28  ;;  %v467_v31 = vadd.f32 %v1396_v35, %v428_v29 }
  0xb2   : > { %v352_v32 = vpop.permute.xlu1 %351  ;;  %v347_v33 = vpop.permute.xlu0 %346 }
  0xb3   : > { %702 = vst [vmem:[%s913_s24 + $0x128] sm:$0xff] %v468_v30  ;;  %734 = vst.msk [vmem:[%s918_s27 + $0x128] sm:$0xff] %vm581_vm0, %v468_v30  ;;  %v431_v36 = vmul.f32 %v1391_v34, %v352_v32  ;;  %v430_v37 = vmul.f32 %v1391_v34, %v347_v33 }
  0xb4   : > { %701 = vst [vmem:[%s913_s24 + $0x120] sm:$0xff] %v467_v31  ;;  %733 = vst.msk [vmem:[%s918_s27 + $0x120] sm:$0xff] %vm581_vm0, %v467_v31 }
  0xb5   : > { %v470_v38 = vadd.f32 %v1396_v35, %v431_v36  ;;  %v469_v39 = vadd.f32 %v1396_v35, %v430_v37 }
  0xb6   : > { %v362_v40 = vpop.permute.xlu1 %361  ;;  %v357_v41 = vpop.permute.xlu0 %356 }
  0xb7   : > { %704 = vst [vmem:[%s913_s24 + $0x148] sm:$0xff] %v470_v38  ;;  %736 = vst.msk [vmem:[%s918_s27 + $0x148] sm:$0xff] %vm581_vm0, %v470_v38  ;;  %v433_v42 = vmul.f32 %v1391_v34, %v362_v40  ;;  %v432_v43 = vmul.f32 %v1391_v34, %v357_v41 }
  0xb8   : > { %703 = vst [vmem:[%s913_s24 + $0x140] sm:$0xff] %v469_v39  ;;  %735 = vst.msk [vmem:[%s918_s27 + $0x140] sm:$0xff] %vm581_vm0, %v469_v39 }
  0xb9   : > { %v472_v44 = vadd.f32 %v1396_v35, %v433_v42  ;;  %v471_v45 = vadd.f32 %v1396_v35, %v432_v43 }
  0xba   : > { %v372_v46 = vpop.permute.xlu1 %371  ;;  %v367_v47 = vpop.permute.xlu0 %366 }
  0xbb   : > { %706 = vst [vmem:[%s913_s24 + $0x168] sm:$0xff] %v472_v44  ;;  %738 = vst.msk [vmem:[%s918_s27 + $0x168] sm:$0xff] %vm581_vm0, %v472_v44  ;;  %v435_v48 = vmul.f32 %v1391_v34, %v372_v46  ;;  %v434_v49 = vmul.f32 %v1391_v34, %v367_v47 }
  0xbc   : > { %705 = vst [vmem:[%s913_s24 + $0x160] sm:$0xff] %v471_v45  ;;  %737 = vst.msk [vmem:[%s918_s27 + $0x160] sm:$0xff] %vm581_vm0, %v471_v45 }
  0xbd   : > { %v474_v50 = vadd.f32 %v1396_v35, %v435_v48  ;;  %v473_v51 = vadd.f32 %v1396_v35, %v434_v49 }
  0xbe   : > { %v382_v52 = vpop.permute.xlu1 %381  ;;  %v377_v53 = vpop.permute.xlu0 %376 }
  0xbf   : > { %708 = vst [vmem:[%s913_s24 + $0x188] sm:$0xff] %v474_v50  ;;  %740 = vst.msk [vmem:[%s918_s27 + $0x188] sm:$0xff] %vm581_vm0, %v474_v50  ;;  %v437_v54 = vmul.f32 %v1391_v34, %v382_v52  ;;  %v436_v55 = vmul.f32 %v1391_v34, %v377_v53 }
  0xc0   : > { %707 = vst [vmem:[%s913_s24 + $0x180] sm:$0xff] %v473_v51  ;;  %739 = vst.msk [vmem:[%s918_s27 + $0x180] sm:$0xff] %vm581_vm0, %v473_v51 }
  0xc1   : > { %v476_v56 = vadd.f32 %v1396_v35, %v437_v54  ;;  %v475_v57 = vadd.f32 %v1396_v35, %v436_v55 }
  0xc2   : > { %v392_v58 = vpop.permute.xlu1 %391  ;;  %v387_v59 = vpop.permute.xlu0 %386 }
  0xc3   : > { %710 = vst [vmem:[%s913_s24 + $0x1a8] sm:$0xff] %v476_v56  ;;  %742 = vst.msk [vmem:[%s918_s27 + $0x1a8] sm:$0xff] %vm581_vm0, %v476_v56  ;;  %v439_v60 = vmul.f32 %v1391_v34, %v392_v58  ;;  %v438_v61 = vmul.f32 %v1391_v34, %v387_v59 }
  0xc4   : > { %709 = vst [vmem:[%s913_s24 + $0x1a0] sm:$0xff] %v475_v57  ;;  %741 = vst.msk [vmem:[%s918_s27 + $0x1a0] sm:$0xff] %vm581_vm0, %v475_v57 }
  0xc5   : > { %v478_v62 = vadd.f32 %v1396_v35, %v439_v60  ;;  %v477_v63 = vadd.f32 %v1396_v35, %v438_v61 }
  0xc6   : > { %v402_v0 = vpop.permute.xlu1 %401  ;;  %v397_v1 = vpop.permute.xlu0 %396 }
  0xc7   : > { %712 = vst [vmem:[%s913_s24 + $0x1c8] sm:$0xff] %v478_v62  ;;  %744 = vst.msk [vmem:[%s918_s27 + $0x1c8] sm:$0xff] %vm581_vm0, %v478_v62  ;;  %v441_v2 = vmul.f32 %v1391_v34, %v402_v0  ;;  %v440_v3 = vmul.f32 %v1391_v34, %v397_v1 }
  0xc8   : > { %711 = vst [vmem:[%s913_s24 + $0x1c0] sm:$0xff] %v477_v63  ;;  %743 = vst.msk [vmem:[%s918_s27 + $0x1c0] sm:$0xff] %vm581_vm0, %v477_v63 }
  0xc9   : > { %v480_v4 = vadd.f32 %v1396_v35, %v441_v2  ;;  %v479_v5 = vadd.f32 %v1396_v35, %v440_v3 }
  0xcb   : > { %714 = vst [vmem:[%s913_s24 + $0x1e8] sm:$0xff] %v480_v4  ;;  %746 = vst.msk [vmem:[%s918_s27 + $0x1e8] sm:$0xff] %vm581_vm0, %v480_v4 }
  0xcc   : > { %713 = vst [vmem:[%s913_s24 + $0x1e0] sm:$0xff] %v479_v5  ;;  %745 = vst.msk [vmem:[%s918_s27 + $0x1e0] sm:$0xff] %vm581_vm0, %v479_v5 }
  0xcd PF: > { %s15_s15 = sadd.s32 1, %s868_s15  }
  0xce   : > { %p12_p4 = scmp.ge.s32.totalorder %s15_s15, 4  }
  0xd0   :  { %14 = sbr.rel (!%p12_p4) target bundleno = 1 (0x1), region = 74 }

// kernel: custom-call
= control target key start
LH: loop header
LB: loop body
LE: loop exit
PB: predicated region body
PF: predicated region fallthrough
CT: control target
= control target key end

     0   :  { %2 = vsyncpa [#allocation0], 0  ;;  %s47_s0 = inlined_call_operand.hbm [shape: c64[8,8,4,4], index: 0, kind: input, shape index: {}]   ;;  %s48_s1 = inlined_call_operand.vmem [shape: f32[8,8,4,4], index: 1, kind: output, shape index: {}]  }
   0x1   :  { %s3_s8 = sshll.u32 %s48_s1, 4  ;;  %s4_s8 = int_to_ptr.vmem [resolvable:$true] %s3_s8 }
   0x2   :  { %s17_s9 = scalar_lea.vmem %s4_s8, 2048  ;;  %p22_p1 = scmp.lt.s32.totalorder %s4_s8, %s4_s8 }
   0x3   :  { %p18_p0 = scmp.ne.s32.totalorder %s4_s8, %s17_s9  ;;  %p23_p2 = scmp.lt.s32.totalorder %s17_s9, %s17_s9 }
   0x5   :  { %p24_p3 = por %p23_p2, %p22_p1 }
   0x7   :  { %p25_p4 = pnand %p24_p3, %p18_p0 }
   0x9   :  { %28 = shalt.err (!%p25_p4)  }
   0xa   :  { %6 = dma.hbm_to_vmem [thread:$0]  %s47_s0, 2048, %s4_s8, [#allocation0] }
   0xb   :  { %29 = dma.done.wait [#allocation0], 2048  }
   0xc   :  { %30 = vsyncadd [#allocation0], 4294965248 }
   0xd   :  { %8 = vsyncpa [#allocation0], 1 }

// kernel: custom-call.1
= control target key start
LH: loop header
LB: loop body
LE: loop exit
PB: predicated region body
PF: predicated region fallthrough
CT: control target
= control target key end

     0   :  { %s51_s0 = inlined_call_operand.hbm [shape: c64[8,8,4,4], index: 0, kind: input, shape index: {}]   ;;  %s52_s1 = inlined_call_operand.vmem [shape: f32[8,8,4,4], index: 1, kind: output, shape index: {}]  }
   0x1   :  { %s2_s8 = scalar_lea.hbm %s51_s0, 2048 }
   0x2   :  { %3 = vsyncpa [#allocation0], 0  ;;  %s4_s11 = sshll.u32 %s52_s1, 4  ;;  %s5_s11 = int_to_ptr.vmem [resolvable:$true] %s4_s11 }
   0x3   :  { %s20_s12 = scalar_lea.vmem %s5_s11, 2048  ;;  %p25_p1 = scmp.lt.s32.totalorder %s5_s11, %s5_s11 }
   0x4   :  { %p21_p0 = scmp.ne.s32.totalorder %s5_s11, %s20_s12  ;;  %p26_p2 = scmp.lt.s32.totalorder %s20_s12, %s20_s12 }
   0x6   :  { %p27_p3 = por %p26_p2, %p25_p1 }
   0x8   :  { %p28_p4 = pnand %p27_p3, %p21_p0 }
   0xa   :  { %31 = shalt.err (!%p28_p4)  }
   0xb   :  { %7 = dma.hbm_to_vmem [thread:$0]  %s2_s8, 2048, %s5_s11, [#allocation0] }
   0xc   :  { %33 = dma.done.wait [#allocation0], 2048  }
   0xd   :  { %34 = vsyncadd [#allocation0], 4294965248 }
   0xe   :  { %9 = vsyncpa [#allocation0], 1 }

// kernel: reverse.5
= control target key start
LH: loop header
LB: loop body
LE: loop exit
PB: predicated region body
PF: predicated region fallthrough
CT: control target
= control target key end

     0   :  { %v169_v12 = vlaneseq  ;;  %v175_v37 = vld [vmem:[#allocation0 + $0x7] ss:$-1 sm:$0xff]  ;;  %v203_v45 = vld [vmem:[#allocation0 + $0x1f] ss:$-1 sm:$0xff]  ;;  %v231_v53 = vld [vmem:[#allocation0 + $0x37] ss:$-1 sm:$0xff]  ;;  %s1163_s0 = inlined_call_operand.vmem [shape: f32[2,8,25,12], index: 0, kind: input, shape index: {}]   ;;  %s1164_s1 = inlined_call_operand.vmem [shape: f32[2,8,25,12], index: 1, kind: output, shape index: {}]  }
   0x1   :  { %v93_v0 = vld [vmem:[%s1163_s0] sm:$0xff]  ;;  %v95_v1 = vld [vmem:[%s1163_s0 + $0x8] sm:$0xff]  ;;  %v97_v2 = vld [vmem:[%s1163_s0 + $0x10] sm:$0xff]  ;;  %v176_v39 = vrot.slane %v175_v37, 4  ;;  %v204_v47 = vrot.slane %v203_v45, 4  ;;  %v232_v55 = vrot.slane %v231_v53, 4 }
   0x2   :  { %94 = vst [vmem:[#allocation0 + $0x8] sm:$0xff] %v93_v0  ;;  %96 = vst [vmem:[#allocation0 + $0x10] sm:$0xff] %v95_v1  ;;  %v99_v3 = vld [vmem:[%s1163_s0 + $0x18] sm:$0xff]  ;;  %v101_v4 = vld [vmem:[%s1163_s0 + $0x20] sm:$0xff]  ;;  %v976_v25 = vshrl.u32 %v169_v12, 7 }
   0x3   :  { %98 = vst [vmem:[#allocation0 + $0x20] sm:$0xff] %v97_v2  ;;  %v103_v5 = vld [vmem:[%s1163_s0 + $0x28] sm:$0xff]  ;;  %100 = vst [vmem:[#allocation0 + $0x28] sm:$0xff] %v99_v3  ;;  %v105_v6 = vld [vmem:[%s1163_s0 + $0x30] sm:$0xff] }
   0x4   :  { %102 = vst [vmem:[#allocation0 + $0x38] sm:$0xff] %v101_v4  ;;  %104 = vst [vmem:[#allocation0 + $0x40] sm:$0xff] %v103_v5  ;;  %v107_v7 = vld [vmem:[%s1163_s0 + $0x38] sm:$0xff]  ;;  %v109_v8 = vld [vmem:[%s1163_s0 + $0x40] sm:$0xff]  ;;  %vm171_vm0 = vcmp.lt.s32.totalorder %v976_v25, 4 }
   0x5   :  { %106 = vst [vmem:[#allocation0 + $0x50] sm:$0xff] %v105_v6  ;;  %108 = vst [vmem:[#allocation0 + $0x58] sm:$0xff] %v107_v7  ;;  %v111_v9 = vld [vmem:[%s1163_s0 + $0x48] sm:$0xff]  ;;  %v113_v10 = vld [vmem:[%s1163_s0 + $0x50] sm:$0xff] }
   0x6   :  { %110 = vst [vmem:[#allocation0 + $0x68] sm:$0xff] %v109_v8  ;;  %v115_v11 = vld [vmem:[%s1163_s0 + $0x58] sm:$0xff]  ;;  %112 = vst [vmem:[#allocation0 + $0x70] sm:$0xff] %v111_v9  ;;  %v117_v13 = vld [vmem:[%s1163_s0 + $0x60] sm:$0xff] }
   0x7   :  { %114 = vst [vmem:[#allocation0 + $0x80] sm:$0xff] %v113_v10  ;;  %116 = vst [vmem:[#allocation0 + $0x88] sm:$0xff] %v115_v11  ;;  %v119_v14 = vld [vmem:[%s1163_s0 + $0x68] sm:$0xff]  ;;  %v121_v15 = vld [vmem:[%s1163_s0 + $0x70] sm:$0xff] }
   0x8   :  { %118 = vst [vmem:[#allocation0 + $0x98] sm:$0xff] %v117_v13  ;;  %120 = vst [vmem:[#allocation0 + $0xa0] sm:$0xff] %v119_v14  ;;  %v123_v16 = vld [vmem:[%s1163_s0 + $0x78] sm:$0xff]  ;;  %v125_v17 = vld [vmem:[%s1163_s0 + $0x80] sm:$0xff] }
   0x9   :  { %122 = vst [vmem:[#allocation0 + $0xb0] sm:$0xff] %v121_v15  ;;  %v127_v18 = vld [vmem:[%s1163_s0 + $0x88] sm:$0xff]  ;;  %124 = vst [vmem:[#allocation0 + $0xb8] sm:$0xff] %v123_v16  ;;  %v129_v19 = vld [vmem:[%s1163_s0 + $0x90] sm:$0xff] }
   0xa   :  { %126 = vst [vmem:[#allocation0 + $0xc8] sm:$0xff] %v125_v17  ;;  %128 = vst [vmem:[#allocation0 + $0xd0] sm:$0xff] %v127_v18  ;;  %v131_v20 = vld [vmem:[%s1163_s0 + $0x98] sm:$0xff]  ;;  %v133_v21 = vld [vmem:[%s1163_s0 + $0xa0] sm:$0xff] }
   0xb   :  { %130 = vst [vmem:[#allocation0 + $0xe0] sm:$0xff] %v129_v19  ;;  %132 = vst [vmem:[#allocation0 + $0xe8] sm:$0xff] %v131_v20  ;;  %v135_v22 = vld [vmem:[%s1163_s0 + $0xa8] sm:$0xff]  ;;  %v137_v23 = vld [vmem:[%s1163_s0 + $0xb0] sm:$0xff] }
   0xc   :  { %134 = vst [vmem:[#allocation0 + $0xf8] sm:$0xff] %v133_v21  ;;  %v139_v24 = vld [vmem:[%s1163_s0 + $0xb8] sm:$0xff]  ;;  %136 = vst [vmem:[#allocation0 + $0x100] sm:$0xff] %v135_v22  ;;  %v141_v26 = vld [vmem:[%s1163_s0 + $0xc0] sm:$0xff] }
   0xd   :  { %138 = vst [vmem:[#allocation0 + $0x110] sm:$0xff] %v137_v23  ;;  %140 = vst [vmem:[#allocation0 + $0x118] sm:$0xff] %v139_v24  ;;  %v143_v27 = vld [vmem:[%s1163_s0 + $0xc8] sm:$0xff]  ;;  %v145_v28 = vld [vmem:[%s1163_s0 + $0xd0] sm:$0xff] }
   0xe   :  { %142 = vst [vmem:[#allocation0 + $0x128] sm:$0xff] %v141_v26  ;;  %144 = vst [vmem:[#allocation0 + $0x130] sm:$0xff] %v143_v27  ;;  %v147_v29 = vld [vmem:[%s1163_s0 + $0xd8] sm:$0xff]  ;;  %v149_v30 = vld [vmem:[%s1163_s0 + $0xe0] sm:$0xff] }
   0xf   :  { %146 = vst [vmem:[#allocation0 + $0x140] sm:$0xff] %v145_v28  ;;  %v151_v31 = vld [vmem:[%s1163_s0 + $0xe8] sm:$0xff]  ;;  %148 = vst [vmem:[#allocation0 + $0x148] sm:$0xff] %v147_v29  ;;  %v153_v32 = vld [vmem:[%s1163_s0 + $0xf0] sm:$0xff] }
  0x10   :  { %150 = vst [vmem:[#allocation0 + $0x158] sm:$0xff] %v149_v30  ;;  %152 = vst [vmem:[#allocation0 + $0x160] sm:$0xff] %v151_v31  ;;  %v155_v33 = vld [vmem:[%s1163_s0 + $0xf8] sm:$0xff]  ;;  %v162_v34 = vld [vmem:[#allocation0 + $0xf] ss:$-1 sm:$0xff] }
  0x11   :  { %154 = vst [vmem:[#allocation0 + $0x170] sm:$0xff] %v153_v32  ;;  %156 = vst [vmem:[#allocation0 + $0x178] sm:$0xff] %v155_v33  ;;  %v163_v35 = vrot.slane %v162_v34, 4  ;;  %v167_v36 = vld [vmem:[#allocation0 + $0x17] ss:$-1 sm:$0xff] }
  0x12   :  { %v168_v38 = vrot.slane %v167_v36, 4  ;;  %v180_v40 = vld [vmem:[#allocation0 + $0xf] ss:$-1 sm:$0xff]  ;;  %v190_v41 = vld [vmem:[#allocation0 + $0x27] ss:$-1 sm:$0xff]  ;;  %177 = vst [vmem:[#allocation1 + $0x8] sm:$0xff] %v176_v39 }
  0x13   :  { %164 = vst [vmem:[#allocation1] sm:$0xff] %v163_v35  ;;  %v181_v42 = vrot.slane %v180_v40, 4  ;;  %v191_v43 = vrot.slane %v190_v41, 4  ;;  %v195_v44 = vld [vmem:[#allocation0 + $0x2f] ss:$-1 sm:$0xff]  ;;  %205 = vst [vmem:[#allocation1 + $0x18] sm:$0xff] %v204_v47 }
  0x14   :  { %172 = vst.msk [vmem:[#allocation1] sm:$0xff] %vm171_vm0, %v168_v38  ;;  %v196_v46 = vrot.slane %v195_v44, 4  ;;  %v208_v48 = vld [vmem:[#allocation0 + $0x27] ss:$-1 sm:$0xff]  ;;  %v218_v49 = vld [vmem:[#allocation0 + $0x3f] ss:$-1 sm:$0xff] }
  0x15   :  { %185 = vst.msk [vmem:[#allocation1 + $0x8] sm:$0xff] %vm171_vm0, %v181_v42  ;;  %192 = vst [vmem:[#allocation1 + $0x10] sm:$0xff] %v191_v43  ;;  %v209_v50 = vrot.slane %v208_v48, 4  ;;  %v219_v51 = vrot.slane %v218_v49, 4  ;;  %v223_v52 = vld [vmem:[#allocation0 + $0x47] ss:$-1 sm:$0xff] }
  0x16   :  { %200 = vst.msk [vmem:[#allocation1 + $0x10] sm:$0xff] %vm171_vm0, %v196_v46  ;;  %v224_v54 = vrot.slane %v223_v52, 4  ;;  %v236_v56 = vld [vmem:[#allocation0 + $0x3f] ss:$-1 sm:$0xff]  ;;  %v246_v57 = vld [vmem:[#allocation0 + $0x57] ss:$-1 sm:$0xff] }
  0x17   :  { %213 = vst.msk [vmem:[#allocation1 + $0x18] sm:$0xff] %vm171_vm0, %v209_v50  ;;  %220 = vst [vmem:[#allocation1 + $0x20] sm:$0xff] %v219_v51  ;;  %v237_v58 = vrot.slane %v236_v56, 4  ;;  %v247_v59 = vrot.slane %v246_v57, 4  ;;  %v251_v60 = vld [vmem:[#allocation0 + $0x5f] ss:$-1 sm:$0xff] }
  0x18   :  { %v259_v61 = vld [vmem:[#allocation0 + $0x4f] ss:$-1 sm:$0xff]  ;;  %228 = vst.msk [vmem:[#allocation1 + $0x20] sm:$0xff] %vm171_vm0, %v224_v54  ;;  %233 = vst [vmem:[#allocation1 + $0x28] sm:$0xff] %v232_v55  ;;  %v252_v62 = vrot.slane %v251_v60, 4 }
  0x19   :  { %v260_v63 = vrot.slane %v259_v61, 4  ;;  %v264_v0 = vld [vmem:[#allocation0 + $0x57] ss:$-1 sm:$0xff]  ;;  %v274_v1 = vld [vmem:[#allocation0 + $0x6f] ss:$-1 sm:$0xff]  ;;  %241 = vst.msk [vmem:[#allocation1 + $0x28] sm:$0xff] %vm171_vm0, %v237_v58 }
  0x1a   :  { %248 = vst [vmem:[#allocation1 + $0x30] sm:$0xff] %v247_v59  ;;  %v265_v2 = vrot.slane %v264_v0, 4  ;;  %v275_v3 = vrot.slane %v274_v1, 4  ;;  %v279_v4 = vld [vmem:[#allocation0 + $0x77] ss:$-1 sm:$0xff] }
  0x1b   :  { %v287_v5 = vld [vmem:[#allocation0 + $0x67] ss:$-1 sm:$0xff]  ;;  %256 = vst.msk [vmem:[#allocation1 + $0x30] sm:$0xff] %vm171_vm0, %v252_v62  ;;  %261 = vst [vmem:[#allocation1 + $0x38] sm:$0xff] %v260_v63  ;;  %v280_v6 = vrot.slane %v279_v4, 4 }
  0x1c   :  { %v288_v7 = vrot.slane %v287_v5, 4  ;;  %v292_v8 = vld [vmem:[#allocation0 + $0x6f] ss:$-1 sm:$0xff]  ;;  %v302_v9 = vld [vmem:[#allocation0 + $0x87] ss:$-1 sm:$0xff]  ;;  %269 = vst.msk [vmem:[#allocation1 + $0x38] sm:$0xff] %vm171_vm0, %v265_v2 }
  0x1d   :  { %276 = vst [vmem:[#allocation1 + $0x40] sm:$0xff] %v275_v3  ;;  %v293_v10 = vrot.slane %v292_v8, 4  ;;  %v303_v11 = vrot.slane %v302_v9, 4  ;;  %v307_v12 = vld [vmem:[#allocation0 + $0x8f] ss:$-1 sm:$0xff] }
  0x1e   :  { %v315_v13 = vld [vmem:[#allocation0 + $0x7f] ss:$-1 sm:$0xff]  ;;  %284 = vst.msk [vmem:[#allocation1 + $0x40] sm:$0xff] %vm171_vm0, %v280_v6  ;;  %289 = vst [vmem:[#allocation1 + $0x48] sm:$0xff] %v288_v7  ;;  %v308_v14 = vrot.slane %v307_v12, 4 }
  0x1f   :  { %v316_v15 = vrot.slane %v315_v13, 4  ;;  %v320_v16 = vld [vmem:[#allocation0 + $0x87] ss:$-1 sm:$0xff]  ;;  %v330_v17 = vld [vmem:[#allocation0 + $0x9f] ss:$-1 sm:$0xff]  ;;  %297 = vst.msk [vmem:[#allocation1 + $0x48] sm:$0xff] %vm171_vm0, %v293_v10 }
  0x20   :  { %304 = vst [vmem:[#allocation1 + $0x50] sm:$0xff] %v303_v11  ;;  %v321_v18 = vrot.slane %v320_v16, 4  ;;  %v331_v19 = vrot.slane %v330_v17, 4  ;;  %v335_v20 = vld [vmem:[#allocation0 + $0xa7] ss:$-1 sm:$0xff] }
  0x21   :  { %v343_v21 = vld [vmem:[#allocation0 + $0x97] ss:$-1 sm:$0xff]  ;;  %312 = vst.msk [vmem:[#allocation1 + $0x50] sm:$0xff] %vm171_vm0, %v308_v14  ;;  %317 = vst [vmem:[#allocation1 + $0x58] sm:$0xff] %v316_v15  ;;  %v336_v22 = vrot.slane %v335_v20, 4 }
  0x22   :  { %v344_v23 = vrot.slane %v343_v21, 4  ;;  %v348_v24 = vld [vmem:[#allocation0 + $0x9f] ss:$-1 sm:$0xff]  ;;  %v358_v26 = vld [vmem:[#allocation0 + $0xb7] ss:$-1 sm:$0xff]  ;;  %325 = vst.msk [vmem:[#allocation1 + $0x58] sm:$0xff] %vm171_vm0, %v321_v18 }
  0x23   :  { %332 = vst [vmem:[#allocation1 + $0x60] sm:$0xff] %v331_v19  ;;  %v349_v27 = vrot.slane %v348_v24, 4  ;;  %v359_v28 = vrot.slane %v358_v26, 4  ;;  %v363_v29 = vld [vmem:[#allocation0 + $0xbf] ss:$-1 sm:$0xff] }
  0x24   :  { %v371_v30 = vld [vmem:[#allocation0 + $0xaf] ss:$-1 sm:$0xff]  ;;  %340 = vst.msk [vmem:[#allocation1 + $0x60] sm:$0xff] %vm171_vm0, %v336_v22  ;;  %345 = vst [vmem:[#allocation1 + $0x68] sm:$0xff] %v344_v23  ;;  %v364_v31 = vrot.slane %v363_v29, 4 }
  0x25   :  { %v372_v32 = vrot.slane %v371_v30, 4  ;;  %v376_v33 = vld [vmem:[#allocation0 + $0xb7] ss:$-1 sm:$0xff]  ;;  %v386_v34 = vld [vmem:[#allocation0 + $0xcf] ss:$-1 sm:$0xff]  ;;  %353 = vst.msk [vmem:[#allocation1 + $0x68] sm:$0xff] %vm171_vm0, %v349_v27 }
  0x26   :  { %360 = vst [vmem:[#allocation1 + $0x70] sm:$0xff] %v359_v28  ;;  %v377_v35 = vrot.slane %v376_v33, 4  ;;  %v387_v36 = vrot.slane %v386_v34, 4  ;;  %v391_v37 = vld [vmem:[#allocation0 + $0xd7] ss:$-1 sm:$0xff]  ;;  %v712_v25 = vld [vmem:[#allocation1 + $0x40] sm:$0xff] }
  0x27   :  { %v399_v38 = vld [vmem:[#allocation0 + $0xc7] ss:$-1 sm:$0xff]  ;;  %368 = vst.msk [vmem:[#allocation1 + $0x70] sm:$0xff] %vm171_vm0, %v364_v31  ;;  %373 = vst [vmem:[#allocation1 + $0x78] sm:$0xff] %v372_v32  ;;  %v392_v39 = vrot.slane %v391_v37, 4 }
  0x28   :  { %v400_v40 = vrot.slane %v399_v38, 4  ;;  %v404_v41 = vld [vmem:[#allocation0 + $0xcf] ss:$-1 sm:$0xff]  ;;  %v414_v42 = vld [vmem:[#allocation0 + $0xe7] ss:$-1 sm:$0xff]  ;;  %381 = vst.msk [vmem:[#allocation1 + $0x78] sm:$0xff] %vm171_vm0, %v377_v35 }
  0x29   :  { %388 = vst [vmem:[#allocation1 + $0x80] sm:$0xff] %v387_v36  ;;  %v405_v43 = vrot.slane %v404_v41, 4  ;;  %v415_v44 = vrot.slane %v414_v42, 4  ;;  %v419_v45 = vld [vmem:[#allocation0 + $0xef] ss:$-1 sm:$0xff]  ;;  %v696_v35 = vld [vmem:[#allocation1] sm:$0xff] }
  0x2a   :  { %v427_v46 = vld [vmem:[#allocation0 + $0xdf] ss:$-1 sm:$0xff]  ;;  %396 = vst.msk [vmem:[#allocation1 + $0x80] sm:$0xff] %vm171_vm0, %v392_v39  ;;  %401 = vst [vmem:[#allocation1 + $0x88] sm:$0xff] %v400_v40  ;;  %v420_v47 = vrot.slane %v419_v45, 4  ;;  %v698_v36 = vld [vmem:[#allocation1 + $0x8] sm:$0xff] }
  0x2b   :  { %v428_v48 = vrot.slane %v427_v46, 4  ;;  %v432_v49 = vld [vmem:[#allocation0 + $0xe7] ss:$-1 sm:$0xff]  ;;  %v442_v50 = vld [vmem:[#allocation0 + $0xff] ss:$-1 sm:$0xff]  ;;  %409 = vst.msk [vmem:[#allocation1 + $0x88] sm:$0xff] %vm171_vm0, %v405_v43  ;;  %697 = vst [vmem:[%s1164_s1] sm:$0xff] %v696_v35 }
  0x2c   :  { %416 = vst [vmem:[#allocation1 + $0x90] sm:$0xff] %v415_v44  ;;  %v433_v51 = vrot.slane %v432_v49, 4  ;;  %v443_v52 = vrot.slane %v442_v50, 4  ;;  %v447_v53 = vld [vmem:[#allocation0 + $0x107] ss:$-1 sm:$0xff]  ;;  %699 = vst [vmem:[%s1164_s1 + $0x8] sm:$0xff] %v698_v36 }
  0x2d   :  { %v455_v54 = vld [vmem:[#allocation0 + $0xf7] ss:$-1 sm:$0xff]  ;;  %424 = vst.msk [vmem:[#allocation1 + $0x90] sm:$0xff] %vm171_vm0, %v420_v47  ;;  %429 = vst [vmem:[#allocation1 + $0x98] sm:$0xff] %v428_v48  ;;  %v448_v55 = vrot.slane %v447_v53, 4  ;;  %v702_v39 = vld [vmem:[#allocation1 + $0x18] sm:$0xff] }
  0x2e   :  { %v456_v56 = vrot.slane %v455_v54, 4  ;;  %v460_v57 = vld [vmem:[#allocation0 + $0xff] ss:$-1 sm:$0xff]  ;;  %v470_v58 = vld [vmem:[#allocation0 + $0x117] ss:$-1 sm:$0xff]  ;;  %437 = vst.msk [vmem:[#allocation1 + $0x98] sm:$0xff] %vm171_vm0, %v433_v51 }
  0x2f   :  { %444 = vst [vmem:[#allocation1 + $0xa0] sm:$0xff] %v443_v52  ;;  %v461_v59 = vrot.slane %v460_v57, 4  ;;  %v471_v60 = vrot.slane %v470_v58, 4  ;;  %v475_v61 = vld [vmem:[#allocation0 + $0x11f] ss:$-1 sm:$0xff]  ;;  %v700_v38 = vld [vmem:[#allocation1 + $0x10] sm:$0xff] }
  0x30   :  { %v483_v62 = vld [vmem:[#allocation0 + $0x10f] ss:$-1 sm:$0xff]  ;;  %452 = vst.msk [vmem:[#allocation1 + $0xa0] sm:$0xff] %vm171_vm0, %v448_v55  ;;  %457 = vst [vmem:[#allocation1 + $0xa8] sm:$0xff] %v456_v56  ;;  %v476_v63 = vrot.slane %v475_v61, 4  ;;  %v704_v40 = vld [vmem:[#allocation1 + $0x20] sm:$0xff] }
  0x31   :  { %v484_v0 = vrot.slane %v483_v62, 4  ;;  %v488_v1 = vld [vmem:[#allocation0 + $0x117] ss:$-1 sm:$0xff]  ;;  %v498_v2 = vld [vmem:[#allocation0 + $0x12f] ss:$-1 sm:$0xff]  ;;  %465 = vst.msk [vmem:[#allocation1 + $0xa8] sm:$0xff] %vm171_vm0, %v461_v59 }
  0x32   :  { %472 = vst [vmem:[#allocation1 + $0xb0] sm:$0xff] %v471_v60  ;;  %v489_v3 = vrot.slane %v488_v1, 4  ;;  %v499_v4 = vrot.slane %v498_v2, 4  ;;  %v503_v5 = vld [vmem:[#allocation0 + $0x137] ss:$-1 sm:$0xff]  ;;  %701 = vst [vmem:[%s1164_s1 + $0x10] sm:$0xff] %v700_v38 }
  0x33   :  { %v511_v6 = vld [vmem:[#allocation0 + $0x127] ss:$-1 sm:$0xff]  ;;  %480 = vst.msk [vmem:[#allocation1 + $0xb0] sm:$0xff] %vm171_vm0, %v476_v63  ;;  %485 = vst [vmem:[#allocation1 + $0xb8] sm:$0xff] %v484_v0  ;;  %v504_v7 = vrot.slane %v503_v5, 4  ;;  %v706_v41 = vld [vmem:[#allocation1 + $0x28] sm:$0xff] }
  0x34   :  { %v512_v8 = vrot.slane %v511_v6, 4  ;;  %v516_v9 = vld [vmem:[#allocation0 + $0x12f] ss:$-1 sm:$0xff]  ;;  %v526_v10 = vld [vmem:[#allocation0 + $0x147] ss:$-1 sm:$0xff]  ;;  %493 = vst.msk [vmem:[#allocation1 + $0xb8] sm:$0xff] %vm171_vm0, %v489_v3 }
  0x35   :  { %500 = vst [vmem:[#allocation1 + $0xc0] sm:$0xff] %v499_v4  ;;  %v517_v11 = vrot.slane %v516_v9, 4  ;;  %v527_v12 = vrot.slane %v526_v10, 4  ;;  %v531_v13 = vld [vmem:[#allocation0 + $0x14f] ss:$-1 sm:$0xff]  ;;  %703 = vst [vmem:[%s1164_s1 + $0x18] sm:$0xff] %v702_v39 }
  0x36   :  { %v539_v14 = vld [vmem:[#allocation0 + $0x13f] ss:$-1 sm:$0xff]  ;;  %508 = vst.msk [vmem:[#allocation1 + $0xc0] sm:$0xff] %vm171_vm0, %v504_v7  ;;  %513 = vst [vmem:[#allocation1 + $0xc8] sm:$0xff] %v512_v8  ;;  %v532_v15 = vrot.slane %v531_v13, 4  ;;  %v708_v42 = vld [vmem:[#allocation1 + $0x30] sm:$0xff] }
  0x37   :  { %v540_v16 = vrot.slane %v539_v14, 4  ;;  %v544_v17 = vld [vmem:[#allocation0 + $0x147] ss:$-1 sm:$0xff]  ;;  %v554_v18 = vld [vmem:[#allocation0 + $0x15f] ss:$-1 sm:$0xff]  ;;  %521 = vst.msk [vmem:[#allocation1 + $0xc8] sm:$0xff] %vm171_vm0, %v517_v11 }
  0x38   :  { %528 = vst [vmem:[#allocation1 + $0xd0] sm:$0xff] %v527_v12  ;;  %v545_v19 = vrot.slane %v544_v17, 4  ;;  %v555_v20 = vrot.slane %v554_v18, 4  ;;  %v559_v21 = vld [vmem:[#allocation0 + $0x167] ss:$-1 sm:$0xff]  ;;  %705 = vst [vmem:[%s1164_s1 + $0x20] sm:$0xff] %v704_v40 }
  0x39   :  { %v567_v22 = vld [vmem:[#allocation0 + $0x157] ss:$-1 sm:$0xff]  ;;  %536 = vst.msk [vmem:[#allocation1 + $0xd0] sm:$0xff] %vm171_vm0, %v532_v15  ;;  %541 = vst [vmem:[#allocation1 + $0xd8] sm:$0xff] %v540_v16  ;;  %v560_v23 = vrot.slane %v559_v21, 4  ;;  %v710_v43 = vld [vmem:[#allocation1 + $0x38] sm:$0xff] }
  0x3a   :  { %v568_v24 = vrot.slane %v567_v22, 4  ;;  %v572_v26 = vld [vmem:[#allocation0 + $0x15f] ss:$-1 sm:$0xff]  ;;  %v582_v27 = vld [vmem:[#allocation0 + $0x177] ss:$-1 sm:$0xff]  ;;  %549 = vst.msk [vmem:[#allocation1 + $0xd8] sm:$0xff] %vm171_vm0, %v545_v19 }
  0x3b   :  { %556 = vst [vmem:[#allocation1 + $0xe0] sm:$0xff] %v555_v20  ;;  %v573_v28 = vrot.slane %v572_v26, 4  ;;  %v583_v29 = vrot.slane %v582_v27, 4  ;;  %v587_v30 = vld [vmem:[#allocation0 + $0x17f] ss:$-1 sm:$0xff]  ;;  %707 = vst [vmem:[%s1164_s1 + $0x28] sm:$0xff] %v706_v41 }
  0x3c   :  { %v595_v31 = vld [vmem:[#allocation0 + $0x16f] ss:$-1 sm:$0xff]  ;;  %564 = vst.msk [vmem:[#allocation1 + $0xe0] sm:$0xff] %vm171_vm0, %v560_v23  ;;  %569 = vst [vmem:[#allocation1 + $0xe8] sm:$0xff] %v568_v24  ;;  %v588_v32 = vrot.slane %v587_v30, 4  ;;  %v716_v45 = vld [vmem:[#allocation1 + $0x50] sm:$0xff] }
  0x3d   :  { %v596_v33 = vrot.slane %v595_v31, 4  ;;  %v600_v34 = vld [vmem:[#allocation0 + $0x177] ss:$-1 sm:$0xff]  ;;  %577 = vst.msk [vmem:[#allocation1 + $0xe8] sm:$0xff] %vm171_vm0, %v573_v28  ;;  %584 = vst [vmem:[#allocation1 + $0xf0] sm:$0xff] %v583_v29  ;;  %v714_v44 = vld [vmem:[#allocation1 + $0x48] sm:$0xff] }
  0x3e   :  { %v601_v37 = vrot.slane %v600_v34, 4  ;;  %592 = vst.msk [vmem:[#allocation1 + $0xf0] sm:$0xff] %vm171_vm0, %v588_v32  ;;  %709 = vst [vmem:[%s1164_s1 + $0x30] sm:$0xff] %v708_v42  ;;  %v718_v46 = vld [vmem:[#allocation1 + $0x58] sm:$0xff]  ;;  %v720_v47 = vld [vmem:[#allocation1 + $0x60] sm:$0xff] }
  0x3f   :  { %597 = vst [vmem:[#allocation1 + $0xf8] sm:$0xff] %v596_v33  ;;  %711 = vst [vmem:[%s1164_s1 + $0x38] sm:$0xff] %v710_v43  ;;  %v722_v48 = vld [vmem:[#allocation1 + $0x68] sm:$0xff]  ;;  %v724_v49 = vld [vmem:[#allocation1 + $0x70] sm:$0xff] }
  0x40   :  { %605 = vst.msk [vmem:[#allocation1 + $0xf8] sm:$0xff] %vm171_vm0, %v601_v37  ;;  %713 = vst [vmem:[%s1164_s1 + $0x40] sm:$0xff] %v712_v25  ;;  %v726_v50 = vld [vmem:[#allocation1 + $0x78] sm:$0xff]  ;;  %v728_v51 = vld [vmem:[#allocation1 + $0x80] sm:$0xff] }
  0x41   :  { %715 = vst [vmem:[%s1164_s1 + $0x48] sm:$0xff] %v714_v44  ;;  %717 = vst [vmem:[%s1164_s1 + $0x50] sm:$0xff] %v716_v45  ;;  %v730_v52 = vld [vmem:[#allocation1 + $0x88] sm:$0xff]  ;;  %v732_v53 = vld [vmem:[#allocation1 + $0x90] sm:$0xff] }
  0x42   :  { %719 = vst [vmem:[%s1164_s1 + $0x58] sm:$0xff] %v718_v46  ;;  %721 = vst [vmem:[%s1164_s1 + $0x60] sm:$0xff] %v720_v47  ;;  %v734_v54 = vld [vmem:[#allocation1 + $0x98] sm:$0xff]  ;;  %v736_v55 = vld [vmem:[#allocation1 + $0xa0] sm:$0xff] }
  0x43   :  { %723 = vst [vmem:[%s1164_s1 + $0x68] sm:$0xff] %v722_v48  ;;  %725 = vst [vmem:[%s1164_s1 + $0x70] sm:$0xff] %v724_v49  ;;  %v738_v56 = vld [vmem:[#allocation1 + $0xa8] sm:$0xff]  ;;  %v740_v57 = vld [vmem:[#allocation1 + $0xb0] sm:$0xff] }
  0x44   :  { %727 = vst [vmem:[%s1164_s1 + $0x78] sm:$0xff] %v726_v50  ;;  %729 = vst [vmem:[%s1164_s1 + $0x80] sm:$0xff] %v728_v51  ;;  %v742_v58 = vld [vmem:[#allocation1 + $0xb8] sm:$0xff]  ;;  %v744_v59 = vld [vmem:[#allocation1 + $0xc0] sm:$0xff] }
  0x45   :  { %731 = vst [vmem:[%s1164_s1 + $0x88] sm:$0xff] %v730_v52  ;;  %733 = vst [vmem:[%s1164_s1 + $0x90] sm:$0xff] %v732_v53  ;;  %v746_v60 = vld [vmem:[#allocation1 + $0xc8] sm:$0xff]  ;;  %v748_v61 = vld [vmem:[#allocation1 + $0xd0] sm:$0xff] }
  0x46   :  { %735 = vst [vmem:[%s1164_s1 + $0x98] sm:$0xff] %v734_v54  ;;  %737 = vst [vmem:[%s1164_s1 + $0xa0] sm:$0xff] %v736_v55  ;;  %v750_v62 = vld [vmem:[#allocation1 + $0xd8] sm:$0xff]  ;;  %v752_v63 = vld [vmem:[#allocation1 + $0xe0] sm:$0xff] }
  0x47   :  { %739 = vst [vmem:[%s1164_s1 + $0xa8] sm:$0xff] %v738_v56  ;;  %741 = vst [vmem:[%s1164_s1 + $0xb0] sm:$0xff] %v740_v57  ;;  %v754_v0 = vld [vmem:[#allocation1 + $0xe8] sm:$0xff]  ;;  %v756_v1 = vld [vmem:[#allocation1 + $0xf0] sm:$0xff] }
  0x48   :  { %743 = vst [vmem:[%s1164_s1 + $0xb8] sm:$0xff] %v742_v58  ;;  %745 = vst [vmem:[%s1164_s1 + $0xc0] sm:$0xff] %v744_v59  ;;  %v758_v2 = vld [vmem:[#allocation1 + $0xf8] sm:$0xff] }
  0x49   :  { %747 = vst [vmem:[%s1164_s1 + $0xc8] sm:$0xff] %v746_v60  ;;  %749 = vst [vmem:[%s1164_s1 + $0xd0] sm:$0xff] %v748_v61 }
  0x4a   :  { %751 = vst [vmem:[%s1164_s1 + $0xd8] sm:$0xff] %v750_v62  ;;  %753 = vst [vmem:[%s1164_s1 + $0xe0] sm:$0xff] %v752_v63 }
  0x4b   :  { %755 = vst [vmem:[%s1164_s1 + $0xe8] sm:$0xff] %v754_v0  ;;  %757 = vst [vmem:[%s1164_s1 + $0xf0] sm:$0xff] %v756_v1 }
  0x4c   :  { %759 = vst [vmem:[%s1164_s1 + $0xf8] sm:$0xff] %v758_v2 }

// kernel: deeponet_forward.6
= control target key start
LH: loop header
LB: loop body
LE: loop exit
PB: predicated region body
PF: predicated region fallthrough
CT: control target
= control target key end

     0   :  { %s4564_s21 = smov 0   ;;  %s4566_s22 = smov 0   ;;  %s6249_s0 = inlined_call_operand.vmem [shape: f32[1250,128], index: 0, kind: input, shape index: {}]   ;;  %s6250_s1 = inlined_call_operand.vmem [shape: f32[1250,8], index: 1, kind: input, shape index: {}]   ;;  %s6251_s2 = inlined_call_operand.vmem [shape: f32[128,128], index: 2, kind: input, shape index: {}]   ;;  %s6252_s3 = inlined_call_operand.vmem [shape: f32[8,128], index: 3, kind: input, shape index: {}]   ;;  %s6253_s4 = inlined_call_operand.vmem [shape: f32[1,128], index: 4, kind: input, shape index: {}]   ;;  %s6254_s5 = inlined_call_operand.vmem [shape: f32[1250,128], index: 5, kind: output, shape index: {0}]   ;;  %s6255_s6 = inlined_call_operand.vmem [shape: f32[1250,8], index: 6, kind: output, shape index: {1}]  }
   0x1   :  { %s4568_s23 = smov 0  }
   0x2 LB: > { %s4577_s24 = sadd.s32 4294967295, %s4461_s23   ;;  %s4579_s25 = sadd.s32 1, %s4461_s23   ;;  %s4461_s23 = sphi %s4568_s23, %s6269_s23   ;;  %s4457_s22 = sphi %s4566_s22, %s6268_s22   ;;  %s4453_s21 = sphi %s4564_s21, %s6267_s21  }
   0x3   : > { %s136_s26 = ssub.s32 %s4461_s23, %s4579_s25  ;;  %s139_s27 = sadd.s32 1, %s4457_s22 }
   0x4   : > { %p137_p0 = scmp.eq.s32.totalorder %s136_s26, 0  ;;  %p149_p1 = scmp.ne.s32.totalorder %s4457_s22, %s4453_s21 }
   0x5   : > { %p150_p2 = scmp.eq.s32.totalorder %s4577_s24, 1  ;;  %p3228_p3 = scmp.ge.s32.totalorder %s4461_s23, 1 }
   0x6   : > { %s4587_s28 = scalar_select %p137_p0, %s4457_s22, %s139_s27  }
   0x7   : > { %p4589_p4 = por %p150_p2, %p149_p1  ;;  %p243_p5 = scmp.lt.s32.totalorder %s4461_s23, 3 }
   0x9   : > { %p244_p6 = pnand %p3228_p3, %p243_p5 }
   0xa   : > { %s4597_s8 = smul.u32 (!%p244_p6), 79, %s4577_s24  ;;  %s280_s20 = sand.u32 (!%p244_p6), 1, %s4453_s21  }
   0xb   : > { %247 = sbr.rel (%p244_p6) target bundleno = 700 (0x2bc), region = 40 }
   0xc   : > { %p294_p7 = scmp.lt.s32.totalorder (!%p244_p6), %s4597_s8, 156  ;;  %s5170_s21 = smul.u32 (!%p244_p6), 632, %s280_s20 }
   0xe   : > { %s5193_s26 = scalar_lea.vmem (!%p244_p6), [#allocation2], %s5170_s21   ;;  %s5197_s27 = scalar_lea.vmem (!%p244_p6), [#allocation3], %s5170_s21  }
  0x10   : > { %v421_v0 = vld [vmem:[%s6251_s2 + $0x78] sm:$0xff]  ;;  %v4527_v1 = vmov 0.0   ;;  %v420_v2 = vld [vmem:[%s6251_s2 + $0x70] sm:$0xff]  ;;  %v501_v3 = vld [vmem:[%s6252_s3] sm:$0xff]  ;;  %vm4528_vm0 = vmmov 0   ;;  %s4616_s15 = scalar_select %p294_p7, %s4597_s8, 156 }
  0x11   : > { %4028 = vmatprep.subr.mxu1 %v4527_v1  ;;  %3520 = vmatprep.subr.mxu0 %v4527_v1  ;;  %v419_v4 = vld [vmem:[%s6251_s2 + $0x68] sm:$0xff]  ;;  %v418_v5 = vld [vmem:[%s6251_s2 + $0x60] sm:$0xff]  ;;  %vm502_vm1 = vcmask 64512   ;;  %v417_v6 = vld [vmem:[%s6251_s2 + $0x58] sm:$0xff]  ;;  %s2312_s10 = ssub.s32 (%p4589_p4), 157, %s4597_s8  ;;  %s3339_s11 = smul.u32 (%p4589_p4), 632, %s4577_s24 }
  0x12   : > { %4044 = vmatpush3.msra.mxu1 %v421_v0  ;;  %3521 = vmatpush3.msra.mxu0 %v501_v3  ;;  %s3229_s18 = sshll.u32 %s4616_s15, 3  ;;  %v416_v8 = vld [vmem:[%s6251_s2 + $0x50] sm:$0xff]  ;;  %v4649_v10 = vld [vmem:[%s6251_s2 + $0x48] sm:$0xff]  ;;  %v4657_v11 = vld [vmem:[%s6251_s2 + $0x40] sm:$0xff]  ;;  %p2313_p8 = scmp.lt.s32.totalorder (%p4589_p4), %s2312_s10, 79 }
  0x13   : > { %4029 = vmatprep.subr.mxu1 %v4527_v1  ;;  %3522 = vmatprep.mubr.msk.f32.mxu0 %vm4528_vm0, %v4527_v1  ;;  %s4631_s23 = scalar_lea.vmem %s6250_s1, %s3229_s18  ;;  %v4667_v13 = vld [vmem:[%s6251_s2 + $0x38] sm:$0xff]  ;;  %v4676_v14 = vld [vmem:[%s6251_s2 + $0x30] sm:$0xff]  ;;  %v4686_v16 = vld [vmem:[%s6251_s2 + $0x28] sm:$0xff]  ;;  %s4731_s16 = scalar_lea.vmem %s6249_s0, %s3229_s18 }
  0x14   : > { %4045 = vmatpush3.msra.mxu1 %v420_v2  ;;  %3759 = vmatprep.subr.mxu0 %v4527_v1  ;;  %v422_v7 = vld [vmem:[%s4631_s23] sm:$0xff]  ;;  %v423_v9 = vld [vmem:[%s4631_s23 + $0x8] sm:$0xff]  ;;  %v424_v12 = vld [vmem:[%s4631_s23 + $0x10] sm:$0xff]  ;;  %s5854_s14 = scalar_lea.vmem (%p4589_p4), %s6254_s5, %s3339_s11  }
  0x15   : > { %4030 = vmatprep.subr.mxu1 %v4527_v1  ;;  %3800 = vmatprep.mubr.msk.f32.mxu1 %vm4528_vm0, %v4527_v1  ;;  %v425_v15 = vld [vmem:[%s4631_s23 + $0x18] sm:$0xff]  ;;  %v4695_v17 = vld [vmem:[%s6251_s2 + $0x20] sm:$0xff]  ;;  %v4714_v20 = vld [vmem:[%s6251_s2 + $0x10] sm:$0xff] }
  0x16   : > { %4046 = vmatpush3.msra.mxu1 %v419_v4  ;;  %3523 = vmatmul.mubr.msk.f32.vlgmr.msra.gmra.mxu0 %vm502_vm1, %v422_v7  ;;  %v426_v18 = vld [vmem:[%s4631_s23 + $0x20] sm:$0xff]  ;;  %v4705_v19 = vld [vmem:[%s6251_s2 + $0x18] sm:$0xff]  ;;  %v427_v21 = vld [vmem:[%s4631_s23 + $0x28] sm:$0xff] }
  0x17   : > { %4031 = vmatprep.subr.mxu1 %v4527_v1  ;;  %3760 = vmatpush3.msra.mxu0 %v421_v0  ;;  %v4724_v22 = vld [vmem:[%s6251_s2 + $0x8] sm:$0xff]  ;;  %v4740_v23 = vld [vmem:[%s6251_s2] sm:$0xff]  ;;  %v428_v24 = vld [vmem:[%s4631_s23 + $0x30] sm:$0xff] }
  0x18   : > { %4047 = vmatpush3.msra.mxu1 %v418_v5  ;;  %3525 = vmatprep.mubr.msk.f32.mxu0 %vm4528_vm0, %v4527_v1  ;;  %v330_v25 = vld [vmem:[%s4731_s16 + $0x18] sm:$0xff]  ;;  %v331_v27 = vld [vmem:[%s4731_s16 + $0x20] sm:$0xff]  ;;  %v332_v29 = vld [vmem:[%s4731_s16 + $0x28] sm:$0xff] }
  0x19   : > { %4032 = vmatprep.subr.mxu1 %v4527_v1  ;;  %3761 = vmatprep.subr.mxu0 %v4527_v1  ;;  %v429_v26 = vld [vmem:[%s4631_s23 + $0x38] sm:$0xff]  ;;  %v430_v28 = vld [vmem:[%s4631_s23 + $0x40] sm:$0xff]  ;;  %v431_v30 = vld [vmem:[%s4631_s23 + $0x48] sm:$0xff] }
  0x1a   : > { %4048 = vmatpush3.msra.mxu1 %v417_v6  ;;  %3526 = vmatmul.mubr.msk.f32.gmra.mxu0 %vm502_vm1, %v423_v9  ;;  %v333_v31 = vld [vmem:[%s4731_s16 + $0x30] sm:$0xff]  ;;  %v334_v33 = vld [vmem:[%s4731_s16 + $0x38] sm:$0xff]  ;;  %v335_v35 = vld [vmem:[%s4731_s16 + $0x40] sm:$0xff] }
  0x1b   : > { %4033 = vmatprep.subr.mxu1 %v4527_v1  ;;  %3528 = vmatprep.mubr.msk.f32.mxu0 %vm4528_vm0, %v4527_v1  ;;  %v432_v32 = vld [vmem:[%s4631_s23 + $0x50] sm:$0xff]  ;;  %v433_v34 = vld [vmem:[%s4631_s23 + $0x58] sm:$0xff]  ;;  %v434_v36 = vld [vmem:[%s4631_s23 + $0x60] sm:$0xff] }
  0x1c   : > { %4049 = vmatpush3.msra.mxu1 %v416_v8  ;;  %3762 = vmatpush3.msra.mxu0 %v420_v2  ;;  %v336_v37 = vld [vmem:[%s4731_s16 + $0x48] sm:$0xff]  ;;  %v337_v39 = vld [vmem:[%s4731_s16 + $0x50] sm:$0xff]  ;;  %v338_v41 = vld [vmem:[%s4731_s16 + $0x58] sm:$0xff] }
  0x1d   : > { %4034 = vmatprep.subr.mxu1 %v4527_v1  ;;  %3763 = vmatprep.subr.mxu0 %v4527_v1  ;;  %v435_v38 = vld [vmem:[%s4631_s23 + $0x68] sm:$0xff]  ;;  %v436_v40 = vld [vmem:[%s4631_s23 + $0x70] sm:$0xff]  ;;  %v437_v42 = vld [vmem:[%s4631_s23 + $0x78] sm:$0xff] }
  0x1e   : > { %4050 = vmatpush3.msra.mxu1 %v4649_v10  ;;  %3529 = vmatmul.mubr.msk.f32.gmra.mxu0 %vm502_vm1, %v424_v12  ;;  %v339_v43 = vld [vmem:[%s4731_s16 + $0x60] sm:$0xff]  ;;  %v340_v45 = vld [vmem:[%s4731_s16 + $0x68] sm:$0xff]  ;;  %v341_v47 = vld [vmem:[%s4731_s16 + $0x70] sm:$0xff] }
  0x1f   : > { %4035 = vmatprep.subr.mxu1 %v4527_v1  ;;  %3531 = vmatprep.mubr.msk.f32.mxu0 %vm4528_vm0, %v4527_v1  ;;  %v438_v44 = vld [vmem:[%s4631_s23 + $0x80] sm:$0xff]  ;;  %v439_v46 = vld [vmem:[%s4631_s23 + $0x88] sm:$0xff]  ;;  %v440_v48 = vld [vmem:[%s4631_s23 + $0x90] sm:$0xff] }
  0x20   : > { %4051 = vmatpush3.msra.mxu1 %v4657_v11  ;;  %3764 = vmatpush3.msra.mxu0 %v419_v4  ;;  %v342_v49 = vld [vmem:[%s4731_s16 + $0x78] sm:$0xff]  ;;  %v343_v51 = vld [vmem:[%s4731_s16 + $0x80] sm:$0xff]  ;;  %v344_v53 = vld [vmem:[%s4731_s16 + $0x88] sm:$0xff] }
  0x21   : > { %4036 = vmatprep.subr.mxu1 %v4527_v1  ;;  %3765 = vmatprep.subr.mxu0 %v4527_v1  ;;  %v441_v50 = vld [vmem:[%s4631_s23 + $0x98] sm:$0xff]  ;;  %v442_v52 = vld [vmem:[%s4631_s23 + $0xa0] sm:$0xff]  ;;  %v443_v54 = vld [vmem:[%s4631_s23 + $0xa8] sm:$0xff] }
  0x22   : > { %4052 = vmatpush3.msra.mxu1 %v4667_v13  ;;  %3532 = vmatmul.mubr.msk.f32.gmra.mxu0 %vm502_vm1, %v425_v15  ;;  %v345_v55 = vld [vmem:[%s4731_s16 + $0x90] sm:$0xff]  ;;  %v346_v57 = vld [vmem:[%s4731_s16 + $0x98] sm:$0xff]  ;;  %v347_v59 = vld [vmem:[%s4731_s16 + $0xa0] sm:$0xff] }
  0x23   : > { %4037 = vmatprep.subr.mxu1 %v4527_v1  ;;  %3534 = vmatprep.mubr.msk.f32.mxu0 %vm4528_vm0, %v4527_v1  ;;  %v444_v56 = vld [vmem:[%s4631_s23 + $0xb0] sm:$0xff]  ;;  %v445_v58 = vld [vmem:[%s4631_s23 + $0xb8] sm:$0xff]  ;;  %v446_v60 = vld [vmem:[%s4631_s23 + $0xc0] sm:$0xff] }
  0x24   : > { %4053 = vmatpush3.msra.mxu1 %v4676_v14  ;;  %3766 = vmatpush3.msra.mxu0 %v418_v5  ;;  %v348_v61 = vld [vmem:[%s4731_s16 + $0xa8] sm:$0xff]  ;;  %v349_v63 = vld [vmem:[%s4731_s16 + $0xb0] sm:$0xff]  ;;  %v350_v2 = vld [vmem:[%s4731_s16 + $0xb8] sm:$0xff] }
  0x25   : > { %4038 = vmatprep.subr.mxu1 %v4527_v1  ;;  %3767 = vmatprep.subr.mxu0 %v4527_v1  ;;  %v447_v62 = vld [vmem:[%s4631_s23 + $0xc8] sm:$0xff]  ;;  %v448_v0 = vld [vmem:[%s4631_s23 + $0xd0] sm:$0xff]  ;;  %v449_v3 = vld [vmem:[%s4631_s23 + $0xd8] sm:$0xff] }
  0x26   : > { %4054 = vmatpush3.msra.mxu1 %v4686_v16  ;;  %3535 = vmatmul.mubr.msk.f32.gmra.mxu0 %vm502_vm1, %v426_v18  ;;  %v351_v4 = vld [vmem:[%s4731_s16 + $0xc0] sm:$0xff]  ;;  %v451_v7 = vld [vmem:[%s4631_s23 + $0xe8] sm:$0xff]  ;;  %v452_v9 = vld [vmem:[%s4631_s23 + $0xf0] sm:$0xff] }
  0x27   : > { %4039 = vmatprep.subr.mxu1 %v4527_v1  ;;  %3537 = vmatprep.mubr.msk.f32.mxu0 %vm4528_vm0, %v4527_v1  ;;  %v450_v5 = vld [vmem:[%s4631_s23 + $0xe0] sm:$0xff]  ;;  %v455_v15 = vld [vmem:[%s4631_s23 + $0x108] sm:$0xff]  ;;  %v358_v18 = vld [vmem:[%s4731_s16 + $0xf8] sm:$0xff] }
  0x28   : > { %4055 = vmatpush3.msra.mxu1 %v4695_v17  ;;  %3768 = vmatpush3.msra.mxu0 %v417_v6  ;;  %v352_v6 = vld [vmem:[%s4731_s16 + $0xc8] sm:$0xff]  ;;  %v355_v12 = vld [vmem:[%s4731_s16 + $0xe0] sm:$0xff] }
  0x29   : > { %4040 = vmatprep.subr.mxu1 %v4527_v1  ;;  %3769 = vmatprep.subr.mxu0 %v4527_v1 }
  0x2a   : > { %4056 = vmatpush3.msra.mxu1 %v4705_v19  ;;  %3538 = vmatmul.mubr.msk.f32.gmra.mxu0 %vm502_vm1, %v427_v21  ;;  %v458_v21 = vld [vmem:[%s4631_s23 + $0x120] sm:$0xff] }
  0x2b   : > { %4041 = vmatprep.subr.mxu1 %v4527_v1  ;;  %3540 = vmatprep.mubr.msk.f32.mxu0 %vm4528_vm0, %v4527_v1 }
  0x2c   : > { %4057 = vmatpush3.msra.mxu1 %v4714_v20  ;;  %3770 = vmatpush3.msra.mxu0 %v416_v8  ;;  %v353_v8 = vld [vmem:[%s4731_s16 + $0xd0] sm:$0xff] }
  0x2d   : > { %4042 = vmatprep.subr.mxu1 %v4527_v1  ;;  %3771 = vmatprep.subr.mxu0 %v4527_v1 }
  0x2e   : > { %4058 = vmatpush3.msra.mxu1 %v4724_v22  ;;  %3541 = vmatmul.mubr.msk.f32.gmra.mxu0 %vm502_vm1, %v428_v24  ;;  %v361_v24 = vld [vmem:[%s4731_s16 + $0x110] sm:$0xff] }
  0x2f   : > { %4043 = vmatprep.subr.mxu1 %v4527_v1  ;;  %3543 = vmatprep.mubr.msk.f32.mxu0 %vm4528_vm0, %v4527_v1 }
  0x30   : > { %4059 = vmatpush3.msra.mxu1 %v4740_v23  ;;  %3772 = vmatpush3.msra.mxu0 %v4649_v10  ;;  %v354_v10 = vld [vmem:[%s4731_s16 + $0xd8] sm:$0xff] }
  0x31   : > { %3801 = vmatmul.mubr.f32.vlgmr.msra.gmra.mxu1 %v330_v25  ;;  %3773 = vmatprep.subr.mxu0 %v4527_v1  ;;  %v460_v25 = vld [vmem:[%s4631_s23 + $0x130] sm:$0xff] }
  0x32   : > { %3803 = vmatprep.mubr.msk.f32.mxu1 %vm4528_vm0, %v4527_v1  ;;  %3544 = vmatmul.mubr.msk.f32.gmra.mxu0 %vm502_vm1, %v429_v26  ;;  %v362_v26 = vld [vmem:[%s4731_s16 + $0x118] sm:$0xff] }
  0x33   : > { %3546 = vmatprep.mubr.msk.f32.mxu0 %vm4528_vm0, %v4527_v1  ;;  %3774 = vmatpush3.msra.mxu0 %v4657_v11  ;;  %v453_v11 = vld [vmem:[%s4631_s23 + $0xf8] sm:$0xff] }
  0x34   : > { %3775 = vmatprep.subr.mxu0 %v4527_v1 }
  0x35   : > { %3804 = vmatmul.mubr.f32.gmra.mxu1 %v331_v27  ;;  %3776 = vmatpush3.msra.mxu0 %v4667_v13  ;;  %v454_v13 = vld [vmem:[%s4631_s23 + $0x100] sm:$0xff]  ;;  %v461_v27 = vld [vmem:[%s4631_s23 + $0x138] sm:$0xff] }
  0x36   : > { %3806 = vmatprep.mubr.msk.f32.mxu1 %vm4528_vm0, %v4527_v1  ;;  %3547 = vmatmul.mubr.msk.f32.gmra.mxu0 %vm502_vm1, %v430_v28  ;;  %v363_v28 = vld [vmem:[%s4731_s16 + $0x120] sm:$0xff] }
  0x37   : > { %3549 = vmatprep.mubr.msk.f32.mxu0 %vm4528_vm0, %v4527_v1  ;;  %3777 = vmatprep.subr.mxu0 %v4527_v1 }
  0x38   : > { %3778 = vmatpush3.msra.mxu0 %v4676_v14  ;;  %v356_v14 = vld [vmem:[%s4731_s16 + $0xe8] sm:$0xff] }
  0x39   : > { %3807 = vmatmul.mubr.f32.gmra.mxu1 %v332_v29  ;;  %3779 = vmatprep.subr.mxu0 %v4527_v1  ;;  %v462_v29 = vld [vmem:[%s4631_s23 + $0x140] sm:$0xff] }
  0x3a   : > { %3809 = vmatprep.mubr.msk.f32.mxu1 %vm4528_vm0, %v4527_v1  ;;  %3550 = vmatmul.mubr.msk.f32.gmra.mxu0 %vm502_vm1, %v431_v30  ;;  %v364_v30 = vld [vmem:[%s4731_s16 + $0x128] sm:$0xff] }
  0x3b   : > { %3552 = vmatprep.mubr.msk.f32.mxu0 %vm4528_vm0, %v4527_v1  ;;  %3780 = vmatpush3.msra.mxu0 %v4686_v16  ;;  %v357_v16 = vld [vmem:[%s4731_s16 + $0xf0] sm:$0xff] }
  0x3c   : > { %3781 = vmatprep.subr.mxu0 %v4527_v1 }
  0x3d   : > { %3810 = vmatmul.mubr.f32.gmra.mxu1 %v333_v31  ;;  %3782 = vmatpush3.msra.mxu0 %v4695_v17  ;;  %v456_v17 = vld [vmem:[%s4631_s23 + $0x110] sm:$0xff]  ;;  %v463_v31 = vld [vmem:[%s4631_s23 + $0x148] sm:$0xff] }
  0x3e   : > { %3812 = vmatprep.mubr.msk.f32.mxu1 %vm4528_vm0, %v4527_v1  ;;  %3553 = vmatmul.mubr.msk.f32.gmra.mxu0 %vm502_vm1, %v432_v32  ;;  %v365_v32 = vld [vmem:[%s4731_s16 + $0x130] sm:$0xff] }
  0x3f   : > { %3555 = vmatprep.mubr.msk.f32.mxu0 %vm4528_vm0, %v4527_v1  ;;  %3783 = vmatprep.subr.mxu0 %v4527_v1 }
  0x40   : > { %3784 = vmatpush3.msra.mxu0 %v4705_v19  ;;  %v457_v19 = vld [vmem:[%s4631_s23 + $0x118] sm:$0xff] }
  0x41   : > { %3813 = vmatmul.mubr.f32.gmra.mxu1 %v334_v33  ;;  %3785 = vmatprep.subr.mxu0 %v4527_v1  ;;  %v464_v33 = vld [vmem:[%s4631_s23 + $0x150] sm:$0xff] }
  0x42   : > { %3815 = vmatprep.mubr.msk.f32.mxu1 %vm4528_vm0, %v4527_v1  ;;  %3556 = vmatmul.mubr.msk.f32.gmra.mxu0 %vm502_vm1, %v433_v34  ;;  %v366_v34 = vld [vmem:[%s4731_s16 + $0x138] sm:$0xff] }
  0x43   : > { %3558 = vmatprep.mubr.msk.f32.mxu0 %vm4528_vm0, %v4527_v1  ;;  %3786 = vmatpush3.msra.mxu0 %v4714_v20  ;;  %v359_v20 = vld [vmem:[%s4731_s16 + $0x100] sm:$0xff] }
  0x44   : > { %3787 = vmatprep.subr.mxu0 %v4527_v1 }
  0x45   : > { %3816 = vmatmul.mubr.f32.gmra.mxu1 %v335_v35  ;;  %3788 = vmatpush3.msra.mxu0 %v4724_v22  ;;  %v360_v22 = vld [vmem:[%s4731_s16 + $0x108] sm:$0xff]  ;;  %v465_v35 = vld [vmem:[%s4631_s23 + $0x158] sm:$0xff] }
  0x46   : > { %3818 = vmatprep.mubr.msk.f32.mxu1 %vm4528_vm0, %v4527_v1  ;;  %3559 = vmatmul.mubr.msk.f32.gmra.mxu0 %vm502_vm1, %v434_v36  ;;  %v367_v36 = vld [vmem:[%s4731_s16 + $0x140] sm:$0xff] }
  0x47   : > { %3561 = vmatprep.mubr.msk.f32.mxu0 %vm4528_vm0, %v4527_v1  ;;  %3789 = vmatprep.subr.mxu0 %v4527_v1 }
  0x48   : > { %3790 = vmatpush3.msra.mxu0 %v4740_v23  ;;  %v459_v23 = vld [vmem:[%s4631_s23 + $0x128] sm:$0xff] }
  0x49   : > { %3819 = vmatmul.mubr.f32.gmra.mxu1 %v336_v37  ;;  %v466_v37 = vld [vmem:[%s4631_s23 + $0x160] sm:$0xff] }
  0x4a   : > { %3821 = vmatprep.mubr.msk.f32.mxu1 %vm4528_vm0, %v4527_v1  ;;  %3562 = vmatmul.mubr.msk.f32.gmra.mxu0 %vm502_vm1, %v435_v38  ;;  %v368_v38 = vld [vmem:[%s4731_s16 + $0x148] sm:$0xff] }
  0x4b   : > { %3564 = vmatprep.mubr.msk.f32.mxu0 %vm4528_vm0, %v4527_v1 }
  0x4d   : > { %3822 = vmatmul.mubr.f32.gmra.mxu1 %v337_v39  ;;  %v467_v39 = vld [vmem:[%s4631_s23 + $0x168] sm:$0xff] }
  0x4e   : > { %3824 = vmatprep.mubr.msk.f32.mxu1 %vm4528_vm0, %v4527_v1  ;;  %3565 = vmatmul.mubr.msk.f32.gmra.mxu0 %vm502_vm1, %v436_v40  ;;  %v369_v40 = vld [vmem:[%s4731_s16 + $0x150] sm:$0xff] }
  0x4f   : > { %3567 = vmatprep.mubr.msk.f32.mxu0 %vm4528_vm0, %v4527_v1 }
  0x51   : > { %3825 = vmatmul.mubr.f32.gmra.mxu1 %v338_v41  ;;  %v468_v41 = vld [vmem:[%s4631_s23 + $0x170] sm:$0xff] }
  0x52   : > { %3827 = vmatprep.mubr.msk.f32.mxu1 %vm4528_vm0, %v4527_v1  ;;  %3568 = vmatmul.mubr.msk.f32.gmra.mxu0 %vm502_vm1, %v437_v42  ;;  %v370_v42 = vld [vmem:[%s4731_s16 + $0x158] sm:$0xff] }
  0x53   : > { %3570 = vmatprep.mubr.msk.f32.mxu0 %vm4528_vm0, %v4527_v1 }
  0x55   : > { %3828 = vmatmul.mubr.f32.gmra.mxu1 %v339_v43  ;;  %v469_v43 = vld [vmem:[%s4631_s23 + $0x178] sm:$0xff] }
  0x56   : > { %3830 = vmatprep.mubr.msk.f32.mxu1 %vm4528_vm0, %v4527_v1  ;;  %3571 = vmatmul.mubr.msk.f32.gmra.mxu0 %vm502_vm1, %v438_v44  ;;  %v371_v44 = vld [vmem:[%s4731_s16 + $0x160] sm:$0xff] }
  0x57   : > { %3573 = vmatprep.mubr.msk.f32.mxu0 %vm4528_vm0, %v4527_v1 }
  0x59   : > { %3831 = vmatmul.mubr.f32.gmra.mxu1 %v340_v45  ;;  %v470_v45 = vld [vmem:[%s4631_s23 + $0x180] sm:$0xff] }
  0x5a   : > { %3833 = vmatprep.mubr.msk.f32.mxu1 %vm4528_vm0, %v4527_v1  ;;  %3574 = vmatmul.mubr.msk.f32.gmra.mxu0 %vm502_vm1, %v439_v46  ;;  %v372_v46 = vld [vmem:[%s4731_s16 + $0x168] sm:$0xff] }
  0x5b   : > { %3576 = vmatprep.mubr.msk.f32.mxu0 %vm4528_vm0, %v4527_v1 }
  0x5d   : > { %3834 = vmatmul.mubr.f32.gmra.mxu1 %v341_v47 }
  0x5e   : > { %3836 = vmatprep.mubr.msk.f32.mxu1 %vm4528_vm0, %v4527_v1  ;;  %3577 = vmatmul.mubr.msk.f32.gmra.mxu0 %vm502_vm1, %v440_v48  ;;  %v471_v48 = vld [vmem:[%s4631_s23 + $0x188] sm:$0xff] }
  0x5f   : > { %3579 = vmatprep.mubr.msk.f32.mxu0 %vm4528_vm0, %v4527_v1 }
  0x61   : > { %3837 = vmatmul.mubr.f32.gmra.mxu1 %v342_v49  ;;  %v373_v49 = vld [vmem:[%s4731_s16 + $0x170] sm:$0xff] }
  0x62   : > { %3839 = vmatprep.mubr.msk.f32.mxu1 %vm4528_vm0, %v4527_v1  ;;  %3580 = vmatmul.mubr.msk.f32.gmra.mxu0 %vm502_vm1, %v441_v50 }
  0x63   : > { %3582 = vmatprep.mubr.msk.f32.mxu0 %vm4528_vm0, %v4527_v1 }
  0x65   : > { %3840 = vmatmul.mubr.f32.gmra.mxu1 %v343_v51 }
  0x66   : > { %3842 = vmatprep.mubr.msk.f32.mxu1 %vm4528_vm0, %v4527_v1  ;;  %3583 = vmatmul.mubr.msk.f32.gmra.mxu0 %vm502_vm1, %v442_v52  ;;  %v472_v52 = vld [vmem:[%s4631_s23 + $0x190] sm:$0xff] }
  0x67   : > { %3585 = vmatprep.mubr.msk.f32.mxu0 %vm4528_vm0, %v4527_v1 }
  0x69   : > { %3843 = vmatmul.mubr.f32.gmra.mxu1 %v344_v53  ;;  %v374_v53 = vld [vmem:[%s4731_s16 + $0x178] sm:$0xff] }
  0x6a   : > { %3845 = vmatprep.mubr.msk.f32.mxu1 %vm4528_vm0, %v4527_v1  ;;  %3586 = vmatmul.mubr.msk.f32.gmra.mxu0 %vm502_vm1, %v443_v54 }
  0x6b   : > { %3588 = vmatprep.mubr.msk.f32.mxu0 %vm4528_vm0, %v4527_v1 }
  0x6d   : > { %3846 = vmatmul.mubr.f32.gmra.mxu1 %v345_v55 }
  0x6e   : > { %3848 = vmatprep.mubr.msk.f32.mxu1 %vm4528_vm0, %v4527_v1  ;;  %3589 = vmatmul.mubr.msk.f32.gmra.mxu0 %vm502_vm1, %v444_v56  ;;  %v473_v56 = vld [vmem:[%s4631_s23 + $0x198] sm:$0xff] }
  0x6f   : > { %3591 = vmatprep.mubr.msk.f32.mxu0 %vm4528_vm0, %v4527_v1 }
  0x71   : > { %3849 = vmatmul.mubr.f32.gmra.mxu1 %v346_v57  ;;  %v375_v57 = vld [vmem:[%s4731_s16 + $0x180] sm:$0xff] }
  0x72   : > { %3851 = vmatprep.mubr.msk.f32.mxu1 %vm4528_vm0, %v4527_v1  ;;  %3592 = vmatmul.mubr.msk.f32.gmra.mxu0 %vm502_vm1, %v445_v58 }
  0x73   : > { %3594 = vmatprep.mubr.msk.f32.mxu0 %vm4528_vm0, %v4527_v1 }
  0x75   : > { %3852 = vmatmul.mubr.f32.gmra.mxu1 %v347_v59 }
  0x76   : > { %3854 = vmatprep.mubr.msk.f32.mxu1 %vm4528_vm0, %v4527_v1  ;;  %3595 = vmatmul.mubr.msk.f32.gmra.mxu0 %vm502_vm1, %v446_v60  ;;  %v474_v60 = vld [vmem:[%s4631_s23 + $0x1a0] sm:$0xff] }
  0x77   : > { %3597 = vmatprep.mubr.msk.f32.mxu0 %vm4528_vm0, %v4527_v1 }
  0x79   : > { %3855 = vmatmul.mubr.f32.gmra.mxu1 %v348_v61  ;;  %v376_v61 = vld [vmem:[%s4731_s16 + $0x188] sm:$0xff] }
  0x7a   : > { %3857 = vmatprep.mubr.msk.f32.mxu1 %vm4528_vm0, %v4527_v1  ;;  %3598 = vmatmul.mubr.msk.f32.gmra.mxu0 %vm502_vm1, %v447_v62 }
  0x7b   : > { %3600 = vmatprep.mubr.msk.f32.mxu0 %vm4528_vm0, %v4527_v1 }
  0x7d   : > { %3858 = vmatmul.mubr.f32.gmra.mxu1 %v349_v63 }
  0x7e   : > { %3860 = vmatprep.mubr.msk.f32.mxu1 %vm4528_vm0, %v4527_v1  ;;  %3601 = vmatmul.mubr.msk.f32.gmra.mxu0 %vm502_vm1, %v448_v0  ;;  %v475_v0 = vld [vmem:[%s4631_s23 + $0x1a8] sm:$0xff] }
  0x7f   : > { %3603 = vmatprep.mubr.msk.f32.mxu0 %vm4528_vm0, %v4527_v1 }
  0x81   : > { %3861 = vmatmul.mubr.f32.gmra.mxu1 %v350_v2  ;;  %v377_v2 = vld [vmem:[%s4731_s16 + $0x190] sm:$0xff] }
  0x82   : > { %3863 = vmatprep.mubr.msk.f32.mxu1 %vm4528_vm0, %v4527_v1  ;;  %3604 = vmatmul.mubr.msk.f32.gmra.mxu0 %vm502_vm1, %v449_v3 }
  0x83   : > { %3606 = vmatprep.mubr.msk.f32.mxu0 %vm4528_vm0, %v4527_v1 }
  0x85   : > { %3864 = vmatmul.mubr.f32.gmra.mxu1 %v351_v4 }
  0x86   : > { %3866 = vmatprep.mubr.msk.f32.mxu1 %vm4528_vm0, %v4527_v1  ;;  %3607 = vmatmul.mubr.msk.f32.gmra.mxu0 %vm502_vm1, %v450_v5  ;;  %v476_v5 = vld [vmem:[%s4631_s23 + $0x1b0] sm:$0xff] }
  0x87   : > { %3609 = vmatprep.mubr.msk.f32.mxu0 %vm4528_vm0, %v4527_v1 }
  0x89   : > { %3867 = vmatmul.mubr.f32.gmra.mxu1 %v352_v6  ;;  %v378_v6 = vld [vmem:[%s4731_s16 + $0x198] sm:$0xff] }
  0x8a   : > { %3869 = vmatprep.mubr.msk.f32.mxu1 %vm4528_vm0, %v4527_v1  ;;  %3610 = vmatmul.mubr.msk.f32.gmra.mxu0 %vm502_vm1, %v451_v7 }
  0x8b   : > { %3612 = vmatprep.mubr.msk.f32.mxu0 %vm4528_vm0, %v4527_v1 }
  0x8d   : > { %3870 = vmatmul.mubr.f32.gmra.mxu1 %v353_v8 }
  0x8e   : > { %3872 = vmatprep.mubr.msk.f32.mxu1 %vm4528_vm0, %v4527_v1  ;;  %3613 = vmatmul.mubr.msk.f32.gmra.mxu0 %vm502_vm1, %v452_v9 }
  0x8f   : > { %3615 = vmatprep.mubr.msk.f32.mxu0 %vm4528_vm0, %v4527_v1 }
  0x91   : > { %3873 = vmatmul.mubr.f32.gmra.mxu1 %v354_v10  ;;  %v5115_v10 = vld [vmem:[%s6253_s4] ss:$0 sm:$0xff] }
  0x92   : > { %3875 = vmatprep.mubr.msk.f32.mxu1 %vm4528_vm0, %v4527_v1  ;;  %3616 = vmatmul.mubr.msk.f32.gmra.mxu0 %vm502_vm1, %v453_v11 }
  0x93   : > { %3618 = vmatprep.mubr.msk.f32.mxu0 %vm4528_vm0, %v4527_v1 }
  0x95   : > { %3876 = vmatmul.mubr.f32.gmra.mxu1 %v355_v12  ;;  %v477_v12 = vld [vmem:[%s4631_s23 + $0x1b8] sm:$0xff] }
  0x96   : > { %3878 = vmatprep.mubr.msk.f32.mxu1 %vm4528_vm0, %v4527_v1  ;;  %3619 = vmatmul.mubr.msk.f32.gmra.mxu0 %vm502_vm1, %v454_v13  ;;  %v379_v13 = vld [vmem:[%s4731_s16 + $0x1a0] sm:$0xff] }
  0x97   : > { %3621 = vmatprep.mubr.msk.f32.mxu0 %vm4528_vm0, %v4527_v1 }
  0x99   : > { %3879 = vmatmul.mubr.f32.gmra.mxu1 %v356_v14 }
  0x9a   : > { %3881 = vmatprep.mubr.msk.f32.mxu1 %vm4528_vm0, %v4527_v1  ;;  %3622 = vmatmul.mubr.msk.f32.gmra.mxu0 %vm502_vm1, %v455_v15 }
  0x9b   : > { %3624 = vmatprep.mubr.msk.f32.mxu0 %vm4528_vm0, %v4527_v1 }
  0x9d   : > { %3882 = vmatmul.mubr.f32.gmra.mxu1 %v357_v16 }
  0x9e   : > { %3884 = vmatprep.mubr.msk.f32.mxu1 %vm4528_vm0, %v4527_v1  ;;  %3625 = vmatmul.mubr.msk.f32.gmra.mxu0 %vm502_vm1, %v456_v17 }
  0x9f   : > { %3627 = vmatprep.mubr.msk.f32.mxu0 %vm4528_vm0, %v4527_v1 }
  0xa1   : > { %3885 = vmatmul.mubr.f32.gmra.mxu1 %v358_v18 }
  0xa2   : > { %3887 = vmatprep.mubr.msk.f32.mxu1 %vm4528_vm0, %v4527_v1  ;;  %3628 = vmatmul.mubr.msk.f32.gmra.mxu0 %vm502_vm1, %v457_v19 }
  0xa3   : > { %3630 = vmatprep.mubr.msk.f32.mxu0 %vm4528_vm0, %v4527_v1 }
  0xa5   : > { %3888 = vmatmul.mubr.f32.gmra.mxu1 %v359_v20 }
  0xa6   : > { %3890 = vmatprep.mubr.msk.f32.mxu1 %vm4528_vm0, %v4527_v1  ;;  %3631 = vmatmul.mubr.msk.f32.gmra.mxu0 %vm502_vm1, %v458_v21  ;;  %v478_v21 = vld [vmem:[%s4631_s23 + $0x1c0] sm:$0xff] }
  0xa7   : > { %3633 = vmatprep.mubr.msk.f32.mxu0 %vm4528_vm0, %v4527_v1 }
  0xa9   : > { %3891 = vmatmul.mubr.f32.gmra.mxu1 %v360_v22  ;;  %v380_v22 = vld [vmem:[%s4731_s16 + $0x1a8] sm:$0xff] }
  0xaa   : > { %3893 = vmatprep.mubr.msk.f32.mxu1 %vm4528_vm0, %v4527_v1  ;;  %3634 = vmatmul.mubr.msk.f32.gmra.mxu0 %vm502_vm1, %v459_v23 }
  0xab   : > { %3636 = vmatprep.mubr.msk.f32.mxu0 %vm4528_vm0, %v4527_v1 }
  0xad   : > { %3894 = vmatmul.mubr.f32.gmra.mxu1 %v361_v24 }
  0xae   : > { %3896 = vmatprep.mubr.msk.f32.mxu1 %vm4528_vm0, %v4527_v1  ;;  %3637 = vmatmul.mubr.msk.f32.gmra.mxu0 %vm502_vm1, %v460_v25 }
  0xaf   : > { %3639 = vmatprep.mubr.msk.f32.mxu0 %vm4528_vm0, %v4527_v1 }
  0xb1   : > { %3897 = vmatmul.mubr.f32.gmra.mxu1 %v362_v26 }
  0xb2   : > { %3899 = vmatprep.mubr.msk.f32.mxu1 %vm4528_vm0, %v4527_v1  ;;  %3640 = vmatmul.mubr.msk.f32.gmra.mxu0 %vm502_vm1, %v461_v27 }
  0xb3   : > { %3642 = vmatprep.mubr.msk.f32.mxu0 %vm4528_vm0, %v4527_v1 }
  0xb5   : > { %3900 = vmatmul.mubr.f32.gmra.mxu1 %v363_v28 }
  0xb6   : > { %3902 = vmatprep.mubr.msk.f32.mxu1 %vm4528_vm0, %v4527_v1  ;;  %3643 = vmatmul.mubr.msk.f32.gmra.mxu0 %vm502_vm1, %v462_v29 }
  0xb7   : > { %3645 = vmatprep.mubr.msk.f32.mxu0 %vm4528_vm0, %v4527_v1 }
  0xb9   : > { %3903 = vmatmul.mubr.f32.gmra.mxu1 %v364_v30  ;;  %v479_v30 = vld [vmem:[%s4631_s23 + $0x1c8] sm:$0xff] }
  0xba   : > { %3905 = vmatprep.mubr.msk.f32.mxu1 %vm4528_vm0, %v4527_v1  ;;  %3646 = vmatmul.mubr.msk.f32.gmra.mxu0 %vm502_vm1, %v463_v31  ;;  %v381_v31 = vld [vmem:[%s4731_s16 + $0x1b0] sm:$0xff] }
  0xbb   : > { %3648 = vmatprep.mubr.msk.f32.mxu0 %vm4528_vm0, %v4527_v1 }
  0xbd   : > { %3906 = vmatmul.mubr.f32.gmra.mxu1 %v365_v32 }
  0xbe   : > { %3908 = vmatprep.mubr.msk.f32.mxu1 %vm4528_vm0, %v4527_v1  ;;  %3649 = vmatmul.mubr.msk.f32.gmra.mxu0 %vm502_vm1, %v464_v33 }
  0xbf   : > { %3651 = vmatprep.mubr.msk.f32.mxu0 %vm4528_vm0, %v4527_v1 }
  0xc1   : > { %3909 = vmatmul.mubr.f32.gmra.mxu1 %v366_v34 }
  0xc2   : > { %3911 = vmatprep.mubr.msk.f32.mxu1 %vm4528_vm0, %v4527_v1  ;;  %3652 = vmatmul.mubr.msk.f32.gmra.mxu0 %vm502_vm1, %v465_v35 }
  0xc3   : > { %3654 = vmatprep.mubr.msk.f32.mxu0 %vm4528_vm0, %v4527_v1 }
  0xc5   : > { %3912 = vmatmul.mubr.f32.gmra.mxu1 %v367_v36 }
  0xc6   : > { %3914 = vmatprep.mubr.msk.f32.mxu1 %vm4528_vm0, %v4527_v1  ;;  %3655 = vmatmul.mubr.msk.f32.gmra.mxu0 %vm502_vm1, %v466_v37 }
  0xc7   : > { %3657 = vmatprep.mubr.msk.f32.mxu0 %vm4528_vm0, %v4527_v1 }
  0xc9   : > { %3915 = vmatmul.mubr.f32.gmra.mxu1 %v368_v38 }
  0xca   : > { %3917 = vmatprep.mubr.msk.f32.mxu1 %vm4528_vm0, %v4527_v1  ;;  %3658 = vmatmul.mubr.msk.f32.gmra.mxu0 %vm502_vm1, %v467_v39  ;;  %v480_v39 = vld [vmem:[%s4631_s23 + $0x1d0] sm:$0xff] }
  0xcb   : > { %3660 = vmatprep.mubr.msk.f32.mxu0 %vm4528_vm0, %v4527_v1 }
  0xcd   : > { %3918 = vmatmul.mubr.f32.gmra.mxu1 %v369_v40  ;;  %v382_v40 = vld [vmem:[%s4731_s16 + $0x1b8] sm:$0xff] }
  0xce   : > { %3920 = vmatprep.mubr.msk.f32.mxu1 %vm4528_vm0, %v4527_v1  ;;  %3661 = vmatmul.mubr.msk.f32.gmra.mxu0 %vm502_vm1, %v468_v41 }
  0xcf   : > { %3663 = vmatprep.mubr.msk.f32.mxu0 %vm4528_vm0, %v4527_v1 }
  0xd1   : > { %3921 = vmatmul.mubr.f32.gmra.mxu1 %v370_v42 }
  0xd2   : > { %3923 = vmatprep.mubr.msk.f32.mxu1 %vm4528_vm0, %v4527_v1  ;;  %3664 = vmatmul.mubr.msk.f32.gmra.mxu0 %vm502_vm1, %v469_v43 }
  0xd3   : > { %3666 = vmatprep.mubr.msk.f32.mxu0 %vm4528_vm0, %v4527_v1 }
  0xd5   : > { %3924 = vmatmul.mubr.f32.gmra.mxu1 %v371_v44 }
  0xd6   : > { %3926 = vmatprep.mubr.msk.f32.mxu1 %vm4528_vm0, %v4527_v1  ;;  %v5063_v47 = vpop.f32.mrf.mxu0  ;;  %3667 = vmatmul.mubr.msk.f32.gmra.mxu0 %vm502_vm1, %v470_v45 }
  0xd7   : > { %3669 = vmatprep.mubr.msk.f32.mxu0 %vm4528_vm0, %v4527_v1 }
  0xd8   : > { %v3524_v50 = vpop.f32.mrf.mxu0 }
  0xd9   : > { %3927 = vmatmul.mubr.f32.gmra.mxu1 %v372_v46  ;;  %v383_v50 = vld [vmem:[%s4731_s16 + $0x1c0] sm:$0xff] }
  0xda   : > { %3929 = vmatprep.mubr.msk.f32.mxu1 %vm4528_vm0, %v4527_v1  ;;  %v5072_v51 = vpop.f32.mrf.mxu0  ;;  %3670 = vmatmul.mubr.msk.f32.gmra.mxu0 %vm502_vm1, %v471_v48 }
  0xdb   : > { %3672 = vmatprep.mubr.msk.f32.mxu0 %vm4528_vm0, %v4527_v1 }
  0xdc   : > { %v3527_v54 = vpop.f32.mrf.mxu0 }
  0xdd   : > { %3930 = vmatmul.mubr.f32.gmra.mxu1 %v373_v49  ;;  %v481_v49 = vld [vmem:[%s4631_s23 + $0x1d8] sm:$0xff] }
  0xde   : > { %3932 = vmatprep.mubr.msk.f32.mxu1 %vm4528_vm0, %v4527_v1  ;;  %v5081_v55 = vpop.f32.mrf.mxu0  ;;  %3673 = vmatmul.mubr.msk.f32.gmra.mxu0 %vm502_vm1, %v472_v52 }
  0xdf   : > { %3675 = vmatprep.mubr.msk.f32.mxu0 %vm4528_vm0, %v4527_v1 }
  0xe0   : > { %v3530_v58 = vpop.f32.mrf.mxu0 }
  0xe1   : > { %3933 = vmatmul.mubr.f32.gmra.mxu1 %v374_v53 }
  0xe2   : > { %3935 = vmatprep.mubr.msk.f32.mxu1 %vm4528_vm0, %v4527_v1  ;;  %v821_v59 = vpop.f32.mrf.mxu0  ;;  %3676 = vmatmul.mubr.msk.f32.gmra.mxu0 %vm502_vm1, %v473_v56 }
  0xe3   : > { %3678 = vmatprep.mubr.msk.f32.mxu0 %vm4528_vm0, %v4527_v1 }
  0xe4   : > { %v3533_v62 = vpop.f32.mrf.mxu0 }
  0xe5   : > { %3936 = vmatmul.mubr.f32.gmra.mxu1 %v375_v57 }
  0xe6   : > { %3938 = vmatprep.mubr.msk.f32.mxu1 %vm4528_vm0, %v4527_v1  ;;  %v826_v63 = vpop.f32.mrf.mxu0  ;;  %3679 = vmatmul.mubr.msk.f32.gmra.mxu0 %vm502_vm1, %v474_v60 }
  0xe7   : > { %3681 = vmatprep.mubr.msk.f32.mxu0 %vm4528_vm0, %v4527_v1 }
  0xe8   : > { %v3536_v3 = vpop.f32.mrf.mxu0 }
  0xe9   : > { %3939 = vmatmul.mubr.f32.gmra.mxu1 %v376_v61 }
  0xea   : > { %3941 = vmatprep.mubr.msk.f32.mxu1 %vm4528_vm0, %v4527_v1  ;;  %v831_v4 = vpop.f32.mrf.mxu0  ;;  %3682 = vmatmul.mubr.msk.f32.gmra.mxu0 %vm502_vm1, %v475_v0  ;;  %v384_v0 = vld [vmem:[%s4731_s16 + $0x1c8] sm:$0xff] }
  0xeb   : > { %3684 = vmatprep.mubr.msk.f32.mxu0 %vm4528_vm0, %v4527_v1 }
  0xec   : > { %v3539_v7 = vpop.f32.mrf.mxu0 }
  0xed   : > { %3942 = vmatmul.mubr.f32.gmra.mxu1 %v377_v2 }
  0xee   : > { %3944 = vmatprep.mubr.msk.f32.mxu1 %vm4528_vm0, %v4527_v1  ;;  %v836_v8 = vpop.f32.mrf.mxu0  ;;  %3685 = vmatmul.mubr.msk.f32.gmra.mxu0 %vm502_vm1, %v476_v5 }
  0xef   : > { %3687 = vmatprep.mubr.msk.f32.mxu0 %vm4528_vm0, %v4527_v1 }
  0xf0   : > { %v3542_v14 = vpop.f32.mrf.mxu0 }
  0xf1   : > { %v1281_v9 = vpop.f32.mrf.mxu1  ;;  %3945 = vmatmul.mubr.f32.gmra.mxu1 %v378_v6  ;;  %v483_v14 = vld [vmem:[%s4631_s23 + $0x1e8] sm:$0xff] }
  0xf2   : > { %v1282_v11 = vadd.f32 %v1281_v9, %v821_v59  ;;  %3947 = vmatprep.mubr.msk.f32.mxu1 %vm4528_vm0, %v4527_v1  ;;  %v841_v17 = vpop.f32.mrf.mxu0  ;;  %3688 = vmatmul.mubr.msk.f32.gmra.mxu0 %vm502_vm1, %v477_v12 }
  0xf3   : > { %v3802_v15 = vpop.f32.mrf.mxu1  ;;  %3690 = vmatprep.mubr.msk.f32.mxu0 %vm4528_vm0, %v4527_v1 }
  0xf4   : > { %v5124_v16 = vadd.f32 %v5115_v10, %v1282_v11  ;;  %v3545_v23 = vpop.f32.mrf.mxu0  ;;  %v385_v15 = vld [vmem:[%s4731_s16 + $0x1d0] sm:$0xff] }
  0xf5   : > { %v1286_v18 = vpop.f32.mrf.mxu1  ;;  %3948 = vmatmul.mubr.f32.gmra.mxu1 %v379_v13 }
  0xf6   : > { %v1829_v19 = vmul.f32 0.70710677, %v5124_v16  ;;  %v1287_v20 = vadd.f32 %v1286_v18, %v826_v63  ;;  %3950 = vmatprep.mubr.msk.f32.mxu1 %vm4528_vm0, %v4527_v1  ;;  %v846_v26 = vpop.f32.mrf.mxu0  ;;  %3691 = vmatmul.mubr.msk.f32.gmra.mxu0 %vm502_vm1, %v478_v21  ;;  %v1749_v59 = vmul.f32 0.5, %v5124_v16  ;;  %v482_v63 = vld [vmem:[%s4631_s23 + $0x1e0] sm:$0xff] }
  0xf7   : > { %v3805_v24 = vpop.f32.mrf.mxu1  ;;  %3693 = vmatprep.mubr.msk.f32.mxu0 %vm4528_vm0, %v4527_v1 }
  0xf8   : > { %4215 = verf.f32 %v1829_v19  ;;  %v5135_v25 = vadd.f32 %v5115_v10, %v1287_v20  ;;  %v3548_v32 = vpop.f32.mrf.mxu0 }
  0xf9   : > { %v1291_v27 = vpop.f32.mrf.mxu1  ;;  %3951 = vmatmul.mubr.f32.gmra.mxu1 %v380_v22 }
  0xfa   : > { %v1830_v28 = vmul.f32 0.70710677, %v5135_v25  ;;  %v1292_v29 = vadd.f32 %v1291_v27, %v831_v4  ;;  %3953 = vmatprep.mubr.msk.f32.mxu1 %vm4528_vm0, %v4527_v1  ;;  %v851_v35 = vpop.f32.mrf.mxu0  ;;  %3694 = vmatmul.mubr.msk.f32.gmra.mxu0 %vm502_vm1, %v479_v30  ;;  %v1750_v9 = vmul.f32 0.5, %v5135_v25  ;;  %v484_v27 = vld [vmem:[%s4631_s23 + $0x1f0] sm:$0xff] }
  0xfb   : > { %v3808_v33 = vpop.f32.mrf.mxu1  ;;  %3696 = vmatprep.mubr.msk.f32.mxu0 %vm4528_vm0, %v4527_v1 }
  0xfc   : > { %4217 = verf.f32 %v1830_v28  ;;  %v5146_v34 = vadd.f32 %v5115_v10, %v1292_v29  ;;  %v3551_v41 = vpop.f32.mrf.mxu0  ;;  %v386_v28 = vld [vmem:[%s4731_s16 + $0x1d8] sm:$0xff] }
  0xfd   : > { %v1296_v36 = vpop.f32.mrf.mxu1  ;;  %3954 = vmatmul.mubr.f32.gmra.mxu1 %v381_v31  ;;  %v387_v41 = vld [vmem:[%s4731_s16 + $0x1e0] sm:$0xff] }
  0xfe   : > { %v1831_v37 = vmul.f32 0.70710677, %v5146_v34  ;;  %v1297_v38 = vadd.f32 %v1296_v36, %v836_v8  ;;  %3956 = vmatprep.mubr.msk.f32.mxu1 %vm4528_vm0, %v4527_v1  ;;  %v5160_v44 = vpop.f32.mrf.mxu0  ;;  %3697 = vmatmul.mubr.msk.f32.gmra.mxu0 %vm502_vm1, %v480_v39  ;;  %v1751_v23 = vmul.f32 0.5, %v5146_v34 }
  0xff   : > { %v3811_v42 = vpop.f32.mrf.mxu1  ;;  %3699 = vmatprep.mubr.msk.f32.mxu0 %vm4528_vm0, %v4527_v1 }
 0x100   : > { %4219 = verf.f32 %v1831_v37  ;;  %v5158_v43 = vadd.f32 %v5115_v10, %v1297_v38  ;;  %v3554_v52 = vpop.f32.mrf.mxu0 }
 0x101   : > { %v1301_v45 = vpop.f32.mrf.mxu1  ;;  %3957 = vmatmul.mubr.f32.gmra.mxu1 %v382_v40  ;;  %v485_v40 = vld [vmem:[%s4631_s23 + $0x1f8] sm:$0xff] }
 0x102   : > { %v1832_v46 = vmul.f32 0.70710677, %v5158_v43  ;;  %v1302_v48 = vadd.f32 %v1301_v45, %v841_v17  ;;  %3959 = vmatprep.mubr.msk.f32.mxu1 %vm4528_vm0, %v4527_v1  ;;  %v5175_v57 = vpop.f32.mrf.mxu0  ;;  %3700 = vmatmul.mubr.msk.f32.gmra.mxu0 %vm502_vm1, %v481_v49  ;;  %v1752_v36 = vmul.f32 0.5, %v5158_v43 }
 0x103   : > { %v3814_v53 = vpop.f32.mrf.mxu1  ;;  %3702 = vmatprep.mubr.msk.f32.mxu0 %vm4528_vm0, %v4527_v1 }
 0x104   : > { %4221 = verf.f32 %v1832_v46  ;;  %v5173_v54 = vadd.f32 %v5115_v10, %v1302_v48  ;;  %v3557_v2 = vpop.f32.mrf.mxu0 }
 0x105   : > { %v4216_v56 = vpop.eup %4215  ;;  %v1306_v58 = vpop.f32.mrf.mxu1  ;;  %3960 = vmatmul.mubr.f32.gmra.mxu1 %v383_v50 }
 0x106   : > { %v1987_v60 = vadd.f32 1.0, %v4216_v56  ;;  %v1833_v61 = vmul.f32 0.70710677, %v5173_v54  ;;  %v1307_v62 = vadd.f32 %v1306_v58, %v846_v26  ;;  %3962 = vmatprep.mubr.msk.f32.mxu1 %vm4528_vm0, %v4527_v1  ;;  %v5189_v7 = vpop.f32.mrf.mxu0  ;;  %3703 = vmatmul.mubr.msk.f32.gmra.mxu0 %vm502_vm1, %v482_v63  ;;  %v1753_v50 = vmul.f32 0.5, %v5173_v54  ;;  %v388_v58 = vld [vmem:[%s4731_s16 + $0x1e8] sm:$0xff] }
 0x107   : > { %v3817_v3 = vpop.f32.mrf.mxu1  ;;  %3705 = vmatprep.mubr.msk.f32.mxu0 %vm4528_vm0, %v4527_v1 }
 0x108   : > { %v2066_v4 = vmul.f32 %v1987_v60, %v1749_v59  ;;  %4223 = verf.f32 %v1833_v61  ;;  %v5187_v5 = vadd.f32 %v5115_v10, %v1307_v62  ;;  %v3560_v16 = vpop.f32.mrf.mxu0 }
 0x109   : > { %v4218_v6 = vpop.eup %4217  ;;  %v1311_v8 = vpop.f32.mrf.mxu1  ;;  %3963 = vmatmul.mubr.f32.gmra.mxu1 %v384_v0 }
 0x10a   : > { %2145 = vst [vmem:[%s5193_s26 + $0x18] sm:$0xff] %v2066_v4  ;;  %2224 = vst.msk [vmem:[%s5197_s27 + $0x18] sm:$0xff] %vm502_vm1, %v2066_v4  ;;  %v1988_v11 = vadd.f32 1.0, %v4218_v6  ;;  %v1834_v12 = vmul.f32 0.70710677, %v5187_v5  ;;  %v1312_v13 = vadd.f32 %v1311_v8, %v851_v35  ;;  %3965 = vmatprep.mubr.msk.f32.mxu1 %vm4528_vm0, %v4527_v1  ;;  %v5212_v21 = vpop.f32.mrf.mxu0  ;;  %3706 = vmatmul.mubr.msk.f32.gmra.mxu0 %vm502_vm1, %v483_v14  ;;  %v1754_v2 = vmul.f32 0.5, %v5187_v5 }
 0x10b   : > { %v3820_v17 = vpop.f32.mrf.mxu1  ;;  %3708 = vmatprep.mubr.msk.f32.mxu0 %vm4528_vm0, %v4527_v1  ;;  %v389_v8 = vld [vmem:[%s4731_s16 + $0x1f0] sm:$0xff] }
 0x10c   : > { %v2067_v18 = vmul.f32 %v1988_v11, %v1750_v9  ;;  %4225 = verf.f32 %v1834_v12  ;;  %v5210_v19 = vadd.f32 %v5115_v10, %v1312_v13  ;;  %v3563_v29 = vpop.f32.mrf.mxu0 }
 0x10d   : > { %v4220_v20 = vpop.eup %4219  ;;  %v1316_v22 = vpop.f32.mrf.mxu1  ;;  %3966 = vmatmul.mubr.f32.gmra.mxu1 %v385_v15 }
 0x10e   : > { %2146 = vst [vmem:[%s5193_s26 + $0x20] sm:$0xff] %v2067_v18  ;;  %2225 = vst.msk [vmem:[%s5197_s27 + $0x20] sm:$0xff] %vm502_vm1, %v2067_v18  ;;  %v1989_v24 = vadd.f32 1.0, %v4220_v20  ;;  %v1835_v25 = vmul.f32 0.70710677, %v5210_v19  ;;  %v1317_v26 = vadd.f32 %v1316_v22, %v5160_v44  ;;  %3968 = vmatprep.mubr.msk.f32.mxu1 %vm4528_vm0, %v4527_v1  ;;  %v5230_v34 = vpop.f32.mrf.mxu0  ;;  %3709 = vmatmul.mubr.msk.f32.gmra.mxu0 %vm502_vm1, %v484_v27  ;;  %v1755_v16 = vmul.f32 0.5, %v5210_v19 }
 0x10f   : > { %v3823_v30 = vpop.f32.mrf.mxu1  ;;  %3711 = vmatprep.mubr.msk.f32.mxu0 %vm4528_vm0, %v4527_v1  ;;  %v390_v22 = vld [vmem:[%s4731_s16 + $0x1f8] sm:$0xff] }
 0x110   : > { %v2068_v31 = vmul.f32 %v1989_v24, %v1751_v23  ;;  %4227 = verf.f32 %v1835_v25  ;;  %v5228_v32 = vadd.f32 %v5115_v10, %v1317_v26  ;;  %v3566_v42 = vpop.f32.mrf.mxu0 }
 0x111   : > { %v4222_v33 = vpop.eup %4221  ;;  %v1321_v35 = vpop.f32.mrf.mxu1  ;;  %3969 = vmatmul.mubr.f32.gmra.mxu1 %v386_v28 }
 0x112   : > { %2147 = vst [vmem:[%s5193_s26 + $0x28] sm:$0xff] %v2068_v31  ;;  %2226 = vst.msk [vmem:[%s5197_s27 + $0x28] sm:$0xff] %vm502_vm1, %v2068_v31  ;;  %v1990_v37 = vadd.f32 1.0, %v4222_v33  ;;  %v1836_v38 = vmul.f32 0.70710677, %v5228_v32  ;;  %v1322_v39 = vadd.f32 %v1321_v35, %v5175_v57  ;;  %3971 = vmatprep.mubr.msk.f32.mxu1 %vm4528_vm0, %v4527_v1  ;;  %v5248_v48 = vpop.f32.mrf.mxu0  ;;  %3712 = vmatmul.mubr.msk.f32.gmra.mxu0 %vm502_vm1, %v485_v40  ;;  %v486_v57 = vld [vmem:[%s4631_s23 + $0x200] sm:$0xff] }
 0x113   : > { %v3826_v44 = vpop.f32.mrf.mxu1  ;;  %3714 = vmatprep.mubr.msk.f32.mxu0 %vm4528_vm0, %v4527_v1  ;;  %v1756_v29 = vmul.f32 0.5, %v5228_v32  ;;  %v391_v35 = vld [vmem:[%s4731_s16 + $0x200] sm:$0xff] }
 0x114   : > { %v2069_v45 = vmul.f32 %v1990_v37, %v1752_v36  ;;  %4229 = verf.f32 %v1836_v38  ;;  %v5246_v43 = vadd.f32 %v5115_v10, %v1322_v39  ;;  %v3569_v59 = vpop.f32.mrf.mxu0 }
 0x115   : > { %v4224_v46 = vpop.eup %4223  ;;  %v1326_v49 = vpop.f32.mrf.mxu1  ;;  %3972 = vmatmul.mubr.f32.gmra.mxu1 %v387_v41 }
 0x116   : > { %2148 = vst [vmem:[%s5193_s26 + $0x30] sm:$0xff] %v2069_v45  ;;  %2227 = vst.msk [vmem:[%s5197_s27 + $0x30] sm:$0xff] %vm502_vm1, %v2069_v45  ;;  %v1991_v52 = vadd.f32 1.0, %v4224_v46  ;;  %v1837_v53 = vmul.f32 0.70710677, %v5246_v43  ;;  %v1327_v56 = vadd.f32 %v1326_v49, %v5189_v7  ;;  %3974 = vmatprep.mubr.msk.f32.mxu1 %vm4528_vm0, %v4527_v1  ;;  %v5266_v63 = vpop.f32.mrf.mxu0  ;;  %3715 = vmatmul.mubr.msk.f32.gmra.mxu0 %vm502_vm1, %v486_v57  ;;  %v487_v7 = vld [vmem:[%s4631_s23 + $0x208] sm:$0xff] }
 0x117   : > { %v3829_v60 = vpop.f32.mrf.mxu1  ;;  %3717 = vmatprep.mubr.msk.f32.mxu0 %vm4528_vm0, %v4527_v1  ;;  %v1757_v42 = vmul.f32 0.5, %v5246_v43  ;;  %v392_v49 = vld [vmem:[%s4731_s16 + $0x208] sm:$0xff] }
 0x118   : > { %v2070_v61 = vmul.f32 %v1991_v52, %v1753_v50  ;;  %4231 = verf.f32 %v1837_v53  ;;  %v5264_v54 = vadd.f32 %v5115_v10, %v1327_v56  ;;  %v3572_v9 = vpop.f32.mrf.mxu0 }
 0x119   : > { %v4226_v62 = vpop.eup %4225  ;;  %v1331_v0 = vpop.f32.mrf.mxu1  ;;  %3975 = vmatmul.mubr.f32.gmra.mxu1 %v388_v58 }
 0x11a   : > { %2149 = vst [vmem:[%s5193_s26 + $0x38] sm:$0xff] %v2070_v61  ;;  %2228 = vst.msk [vmem:[%s5197_s27 + $0x38] sm:$0xff] %vm502_vm1, %v2070_v61  ;;  %v1992_v3 = vadd.f32 1.0, %v4226_v62  ;;  %v1838_v4 = vmul.f32 0.70710677, %v5264_v54  ;;  %v1332_v6 = vadd.f32 %v1331_v0, %v5212_v21  ;;  %3977 = vmatprep.mubr.msk.f32.mxu1 %vm4528_vm0, %v4527_v1  ;;  %v5284_v14 = vpop.f32.mrf.mxu0  ;;  %3718 = vmatmul.mubr.msk.f32.gmra.mxu0 %vm502_vm1, %v487_v7  ;;  %v488_v21 = vld [vmem:[%s4631_s23 + $0x210] sm:$0xff] }
 0x11b   : > { %v3832_v11 = vpop.f32.mrf.mxu1  ;;  %3720 = vmatprep.mubr.msk.f32.mxu0 %vm4528_vm0, %v4527_v1  ;;  %v1758_v59 = vmul.f32 0.5, %v5264_v54  ;;  %v393_v0 = vld [vmem:[%s4731_s16 + $0x210] sm:$0xff] }
 0x11c   : > { %v2071_v12 = vmul.f32 %v1992_v3, %v1754_v2  ;;  %4233 = verf.f32 %v1838_v4  ;;  %v5282_v5 = vadd.f32 %v5115_v10, %v1332_v6  ;;  %v3575_v23 = vpop.f32.mrf.mxu0 }
 0x11d   : > { %v4228_v13 = vpop.eup %4227  ;;  %v1336_v15 = vpop.f32.mrf.mxu1  ;;  %3978 = vmatmul.mubr.f32.gmra.mxu1 %v389_v8 }
 0x11e   : > { %2150 = vst [vmem:[%s5193_s26 + $0x40] sm:$0xff] %v2071_v12  ;;  %2229 = vst.msk [vmem:[%s5197_s27 + $0x40] sm:$0xff] %vm502_vm1, %v2071_v12  ;;  %v1993_v17 = vadd.f32 1.0, %v4228_v13  ;;  %v1839_v18 = vmul.f32 0.70710677, %v5282_v5  ;;  %v1337_v20 = vadd.f32 %v1336_v15, %v5230_v34  ;;  %3980 = vmatprep.mubr.msk.f32.mxu1 %vm4528_vm0, %v4527_v1  ;;  %v5302_v27 = vpop.f32.mrf.mxu0  ;;  %3721 = vmatmul.mubr.msk.f32.gmra.mxu0 %vm502_vm1, %v488_v21  ;;  %v489_v34 = vld [vmem:[%s4631_s23 + $0x218] sm:$0xff] }
 0x11f   : > { %v3835_v24 = vpop.f32.mrf.mxu1  ;;  %3723 = vmatprep.mubr.msk.f32.mxu0 %vm4528_vm0, %v4527_v1  ;;  %v1759_v9 = vmul.f32 0.5, %v5282_v5  ;;  %v394_v15 = vld [vmem:[%s4731_s16 + $0x218] sm:$0xff] }
 0x120   : > { %v2072_v25 = vmul.f32 %v1993_v17, %v1755_v16  ;;  %4235 = verf.f32 %v1839_v18  ;;  %v5300_v19 = vadd.f32 %v5115_v10, %v1337_v20  ;;  %v3578_v36 = vpop.f32.mrf.mxu0 }
 0x121   : > { %v4230_v26 = vpop.eup %4229  ;;  %v1341_v28 = vpop.f32.mrf.mxu1  ;;  %3981 = vmatmul.mubr.f32.gmra.mxu1 %v390_v22 }
 0x122   : > { %2151 = vst [vmem:[%s5193_s26 + $0x48] sm:$0xff] %v2072_v25  ;;  %2230 = vst.msk [vmem:[%s5197_s27 + $0x48] sm:$0xff] %vm502_vm1, %v2072_v25  ;;  %v1994_v30 = vadd.f32 1.0, %v4230_v26  ;;  %v1840_v31 = vmul.f32 0.70710677, %v5300_v19  ;;  %v1342_v33 = vadd.f32 %v1341_v28, %v5248_v48  ;;  %3983 = vmatprep.mubr.msk.f32.mxu1 %vm4528_vm0, %v4527_v1  ;;  %v5320_v40 = vpop.f32.mrf.mxu0  ;;  %3724 = vmatmul.mubr.msk.f32.gmra.mxu0 %vm502_vm1, %v489_v34  ;;  %v490_v48 = vld [vmem:[%s4631_s23 + $0x220] sm:$0xff] }
 0x123   : > { %v3838_v37 = vpop.f32.mrf.mxu1  ;;  %3726 = vmatprep.mubr.msk.f32.mxu0 %vm4528_vm0, %v4527_v1  ;;  %v1760_v23 = vmul.f32 0.5, %v5300_v19  ;;  %v395_v28 = vld [vmem:[%s4731_s16 + $0x220] sm:$0xff] }
 0x124   : > { %v2073_v38 = vmul.f32 %v1994_v30, %v1756_v29  ;;  %4237 = verf.f32 %v1840_v31  ;;  %v5318_v32 = vadd.f32 %v5115_v10, %v1342_v33  ;;  %v3581_v50 = vpop.f32.mrf.mxu0 }
 0x125   : > { %v4232_v39 = vpop.eup %4231  ;;  %v1346_v41 = vpop.f32.mrf.mxu1  ;;  %3984 = vmatmul.mubr.f32.gmra.mxu1 %v391_v35 }
 0x126   : > { %2152 = vst [vmem:[%s5193_s26 + $0x50] sm:$0xff] %v2073_v38  ;;  %2231 = vst.msk [vmem:[%s5197_s27 + $0x50] sm:$0xff] %vm502_vm1, %v2073_v38  ;;  %v1995_v44 = vadd.f32 1.0, %v4232_v39  ;;  %v1841_v45 = vmul.f32 0.70710677, %v5318_v32  ;;  %v1347_v46 = vadd.f32 %v1346_v41, %v5266_v63  ;;  %3986 = vmatprep.mubr.msk.f32.mxu1 %vm4528_vm0, %v4527_v1  ;;  %v5338_v57 = vpop.f32.mrf.mxu0  ;;  %3727 = vmatmul.mubr.msk.f32.gmra.mxu0 %vm502_vm1, %v490_v48  ;;  %v491_v63 = vld [vmem:[%s4631_s23 + $0x228] sm:$0xff] }
 0x127   : > { %v3841_v52 = vpop.f32.mrf.mxu1  ;;  %3729 = vmatprep.mubr.msk.f32.mxu0 %vm4528_vm0, %v4527_v1  ;;  %v1761_v36 = vmul.f32 0.5, %v5318_v32  ;;  %v396_v41 = vld [vmem:[%s4731_s16 + $0x228] sm:$0xff] }
 0x128   : > { %v2074_v53 = vmul.f32 %v1995_v44, %v1757_v42  ;;  %4239 = verf.f32 %v1841_v45  ;;  %v5336_v43 = vadd.f32 %v5115_v10, %v1347_v46  ;;  %v3584_v2 = vpop.f32.mrf.mxu0 }
 0x129   : > { %v4234_v56 = vpop.eup %4233  ;;  %v1351_v58 = vpop.f32.mrf.mxu1  ;;  %3987 = vmatmul.mubr.f32.gmra.mxu1 %v392_v49 }
 0x12a   : > { %2153 = vst [vmem:[%s5193_s26 + $0x58] sm:$0xff] %v2074_v53  ;;  %2232 = vst.msk [vmem:[%s5197_s27 + $0x58] sm:$0xff] %vm502_vm1, %v2074_v53  ;;  %v1996_v60 = vadd.f32 1.0, %v4234_v56  ;;  %v1842_v61 = vmul.f32 0.70710677, %v5336_v43  ;;  %v1352_v62 = vadd.f32 %v1351_v58, %v5284_v14  ;;  %3989 = vmatprep.mubr.msk.f32.mxu1 %vm4528_vm0, %v4527_v1  ;;  %v5356_v7 = vpop.f32.mrf.mxu0  ;;  %3730 = vmatmul.mubr.msk.f32.gmra.mxu0 %vm502_vm1, %v491_v63  ;;  %v492_v14 = vld [vmem:[%s4631_s23 + $0x230] sm:$0xff] }
 0x12b   : > { %v3844_v3 = vpop.f32.mrf.mxu1  ;;  %3732 = vmatprep.mubr.msk.f32.mxu0 %vm4528_vm0, %v4527_v1  ;;  %v1762_v50 = vmul.f32 0.5, %v5336_v43  ;;  %v397_v58 = vld [vmem:[%s4731_s16 + $0x230] sm:$0xff] }
 0x12c   : > { %v2075_v4 = vmul.f32 %v1996_v60, %v1758_v59  ;;  %4241 = verf.f32 %v1842_v61  ;;  %v5354_v54 = vadd.f32 %v5115_v10, %v1352_v62  ;;  %v3587_v16 = vpop.f32.mrf.mxu0 }
 0x12d   : > { %v4236_v6 = vpop.eup %4235  ;;  %v1356_v8 = vpop.f32.mrf.mxu1  ;;  %3990 = vmatmul.mubr.f32.gmra.mxu1 %v393_v0 }
 0x12e   : > { %2154 = vst [vmem:[%s5193_s26 + $0x60] sm:$0xff] %v2075_v4  ;;  %2233 = vst.msk [vmem:[%s5197_s27 + $0x60] sm:$0xff] %vm502_vm1, %v2075_v4  ;;  %v1997_v11 = vadd.f32 1.0, %v4236_v6  ;;  %v1843_v12 = vmul.f32 0.70710677, %v5354_v54  ;;  %v1357_v13 = vadd.f32 %v1356_v8, %v5302_v27  ;;  %3992 = vmatprep.mubr.msk.f32.mxu1 %vm4528_vm0, %v4527_v1  ;;  %v5374_v21 = vpop.f32.mrf.mxu0  ;;  %3733 = vmatmul.mubr.msk.f32.gmra.mxu0 %vm502_vm1, %v492_v14  ;;  %v493_v27 = vld [vmem:[%s4631_s23 + $0x238] sm:$0xff] }
 0x12f   : > { %v3847_v17 = vpop.f32.mrf.mxu1  ;;  %3735 = vmatprep.mubr.msk.f32.mxu0 %vm4528_vm0, %v4527_v1  ;;  %v1763_v2 = vmul.f32 0.5, %v5354_v54  ;;  %v398_v8 = vld [vmem:[%s4731_s16 + $0x238] sm:$0xff] }
 0x130   : > { %v2076_v18 = vmul.f32 %v1997_v11, %v1759_v9  ;;  %4243 = verf.f32 %v1843_v12  ;;  %v5372_v5 = vadd.f32 %v5115_v10, %v1357_v13  ;;  %v3590_v29 = vpop.f32.mrf.mxu0 }
 0x131   : > { %v4238_v20 = vpop.eup %4237  ;;  %v1361_v22 = vpop.f32.mrf.mxu1  ;;  %3993 = vmatmul.mubr.f32.gmra.mxu1 %v394_v15 }
 0x132   : > { %2155 = vst [vmem:[%s5193_s26 + $0x68] sm:$0xff] %v2076_v18  ;;  %2234 = vst.msk [vmem:[%s5197_s27 + $0x68] sm:$0xff] %vm502_vm1, %v2076_v18  ;;  %v1998_v24 = vadd.f32 1.0, %v4238_v20  ;;  %v1844_v25 = vmul.f32 0.70710677, %v5372_v5  ;;  %v1362_v26 = vadd.f32 %v1361_v22, %v5320_v40  ;;  %3995 = vmatprep.mubr.msk.f32.mxu1 %vm4528_vm0, %v4527_v1  ;;  %v5392_v34 = vpop.f32.mrf.mxu0  ;;  %3736 = vmatmul.mubr.msk.f32.gmra.mxu0 %vm502_vm1, %v493_v27  ;;  %v494_v40 = vld [vmem:[%s4631_s23 + $0x240] sm:$0xff] }
 0x133   : > { %v3850_v30 = vpop.f32.mrf.mxu1  ;;  %3738 = vmatprep.mubr.msk.f32.mxu0 %vm4528_vm0, %v4527_v1  ;;  %v1764_v16 = vmul.f32 0.5, %v5372_v5  ;;  %v399_v22 = vld [vmem:[%s4731_s16 + $0x240] sm:$0xff] }
 0x134   : > { %v2077_v31 = vmul.f32 %v1998_v24, %v1760_v23  ;;  %4245 = verf.f32 %v1844_v25  ;;  %v5390_v19 = vadd.f32 %v5115_v10, %v1362_v26  ;;  %v3593_v42 = vpop.f32.mrf.mxu0 }
 0x135   : > { %v4240_v33 = vpop.eup %4239  ;;  %v1366_v35 = vpop.f32.mrf.mxu1  ;;  %3996 = vmatmul.mubr.f32.gmra.mxu1 %v395_v28 }
 0x136   : > { %2156 = vst [vmem:[%s5193_s26 + $0x70] sm:$0xff] %v2077_v31  ;;  %2235 = vst.msk [vmem:[%s5197_s27 + $0x70] sm:$0xff] %vm502_vm1, %v2077_v31  ;;  %v1999_v37 = vadd.f32 1.0, %v4240_v33  ;;  %v1845_v38 = vmul.f32 0.70710677, %v5390_v19  ;;  %v1367_v39 = vadd.f32 %v1366_v35, %v5338_v57  ;;  %3998 = vmatprep.mubr.msk.f32.mxu1 %vm4528_vm0, %v4527_v1  ;;  %v5410_v48 = vpop.f32.mrf.mxu0  ;;  %3739 = vmatmul.mubr.msk.f32.gmra.mxu0 %vm502_vm1, %v494_v40  ;;  %v495_v57 = vld [vmem:[%s4631_s23 + $0x248] sm:$0xff] }
 0x137   : > { %v3853_v44 = vpop.f32.mrf.mxu1  ;;  %3741 = vmatprep.mubr.msk.f32.mxu0 %vm4528_vm0, %v4527_v1  ;;  %v1765_v29 = vmul.f32 0.5, %v5390_v19  ;;  %v400_v35 = vld [vmem:[%s4731_s16 + $0x248] sm:$0xff] }
 0x138   : > { %v2078_v45 = vmul.f32 %v1999_v37, %v1761_v36  ;;  %4247 = verf.f32 %v1845_v38  ;;  %v5408_v32 = vadd.f32 %v5115_v10, %v1367_v39  ;;  %v3596_v59 = vpop.f32.mrf.mxu0 }
 0x139   : > { %v4242_v46 = vpop.eup %4241  ;;  %v1371_v49 = vpop.f32.mrf.mxu1  ;;  %3999 = vmatmul.mubr.f32.gmra.mxu1 %v396_v41 }
 0x13a   : > { %2157 = vst [vmem:[%s5193_s26 + $0x78] sm:$0xff] %v2078_v45  ;;  %2236 = vst.msk [vmem:[%s5197_s27 + $0x78] sm:$0xff] %vm502_vm1, %v2078_v45  ;;  %v2000_v52 = vadd.f32 1.0, %v4242_v46  ;;  %v1846_v53 = vmul.f32 0.70710677, %v5408_v32  ;;  %v1372_v56 = vadd.f32 %v1371_v49, %v5356_v7  ;;  %4001 = vmatprep.mubr.msk.f32.mxu1 %vm4528_vm0, %v4527_v1  ;;  %v5428_v63 = vpop.f32.mrf.mxu0  ;;  %3742 = vmatmul.mubr.msk.f32.gmra.mxu0 %vm502_vm1, %v495_v57  ;;  %v496_v7 = vld [vmem:[%s4631_s23 + $0x250] sm:$0xff] }
 0x13b   : > { %v3856_v60 = vpop.f32.mrf.mxu1  ;;  %3744 = vmatprep.mubr.msk.f32.mxu0 %vm4528_vm0, %v4527_v1  ;;  %v1766_v42 = vmul.f32 0.5, %v5408_v32  ;;  %v401_v49 = vld [vmem:[%s4731_s16 + $0x250] sm:$0xff] }
 0x13c   : > { %v2079_v61 = vmul.f32 %v2000_v52, %v1762_v50  ;;  %4249 = verf.f32 %v1846_v53  ;;  %v5426_v43 = vadd.f32 %v5115_v10, %v1372_v56  ;;  %v3599_v9 = vpop.f32.mrf.mxu0 }
 0x13d   : > { %v4244_v62 = vpop.eup %4243  ;;  %v1376_v0 = vpop.f32.mrf.mxu1  ;;  %4002 = vmatmul.mubr.f32.gmra.mxu1 %v397_v58 }
 0x13e   : > { %2158 = vst [vmem:[%s5193_s26 + $0x80] sm:$0xff] %v2079_v61  ;;  %2237 = vst.msk [vmem:[%s5197_s27 + $0x80] sm:$0xff] %vm502_vm1, %v2079_v61  ;;  %v2001_v3 = vadd.f32 1.0, %v4244_v62  ;;  %v1847_v4 = vmul.f32 0.70710677, %v5426_v43  ;;  %v1377_v6 = vadd.f32 %v1376_v0, %v5374_v21  ;;  %4004 = vmatprep.mubr.msk.f32.mxu1 %vm4528_vm0, %v4527_v1  ;;  %v5446_v14 = vpop.f32.mrf.mxu0  ;;  %3745 = vmatmul.mubr.msk.f32.gmra.mxu0 %vm502_vm1, %v496_v7  ;;  %v497_v21 = vld [vmem:[%s4631_s23 + $0x258] sm:$0xff] }
 0x13f   : > { %v3859_v11 = vpop.f32.mrf.mxu1  ;;  %3747 = vmatprep.mubr.msk.f32.mxu0 %vm4528_vm0, %v4527_v1  ;;  %v1767_v59 = vmul.f32 0.5, %v5426_v43  ;;  %v402_v0 = vld [vmem:[%s4731_s16 + $0x258] sm:$0xff] }
 0x140   : > { %v2080_v12 = vmul.f32 %v2001_v3, %v1763_v2  ;;  %4251 = verf.f32 %v1847_v4  ;;  %v5444_v54 = vadd.f32 %v5115_v10, %v1377_v6  ;;  %v3602_v23 = vpop.f32.mrf.mxu0 }
 0x141   : > { %v4246_v13 = vpop.eup %4245  ;;  %v1381_v15 = vpop.f32.mrf.mxu1  ;;  %4005 = vmatmul.mubr.f32.gmra.mxu1 %v398_v8 }
 0x142   : > { %2159 = vst [vmem:[%s5193_s26 + $0x88] sm:$0xff] %v2080_v12  ;;  %2238 = vst.msk [vmem:[%s5197_s27 + $0x88] sm:$0xff] %vm502_vm1, %v2080_v12  ;;  %v2002_v17 = vadd.f32 1.0, %v4246_v13  ;;  %v1848_v18 = vmul.f32 0.70710677, %v5444_v54  ;;  %v1382_v20 = vadd.f32 %v1381_v15, %v5392_v34  ;;  %4007 = vmatprep.mubr.msk.f32.mxu1 %vm4528_vm0, %v4527_v1  ;;  %v5464_v27 = vpop.f32.mrf.mxu0  ;;  %3748 = vmatmul.mubr.msk.f32.gmra.mxu0 %vm502_vm1, %v497_v21  ;;  %v498_v34 = vld [vmem:[%s4631_s23 + $0x260] sm:$0xff] }
 0x143   : > { %v3862_v24 = vpop.f32.mrf.mxu1  ;;  %3750 = vmatprep.mubr.msk.f32.mxu0 %vm4528_vm0, %v4527_v1  ;;  %v1768_v9 = vmul.f32 0.5, %v5444_v54  ;;  %v403_v15 = vld [vmem:[%s4731_s16 + $0x260] sm:$0xff] }
 0x144   : > { %v2081_v25 = vmul.f32 %v2002_v17, %v1764_v16  ;;  %4253 = verf.f32 %v1848_v18  ;;  %v5462_v5 = vadd.f32 %v5115_v10, %v1382_v20  ;;  %v3605_v36 = vpop.f32.mrf.mxu0 }
 0x145   : > { %v4248_v26 = vpop.eup %4247  ;;  %v1386_v28 = vpop.f32.mrf.mxu1  ;;  %4008 = vmatmul.mubr.f32.gmra.mxu1 %v399_v22 }
 0x146   : > { %2160 = vst [vmem:[%s5193_s26 + $0x90] sm:$0xff] %v2081_v25  ;;  %2239 = vst.msk [vmem:[%s5197_s27 + $0x90] sm:$0xff] %vm502_vm1, %v2081_v25  ;;  %v2003_v30 = vadd.f32 1.0, %v4248_v26  ;;  %v1849_v31 = vmul.f32 0.70710677, %v5462_v5  ;;  %v1387_v33 = vadd.f32 %v1386_v28, %v5410_v48  ;;  %4010 = vmatprep.mubr.msk.f32.mxu1 %vm4528_vm0, %v4527_v1  ;;  %v5482_v40 = vpop.f32.mrf.mxu0  ;;  %3751 = vmatmul.mubr.msk.f32.gmra.mxu0 %vm502_vm1, %v498_v34  ;;  %v499_v48 = vld [vmem:[%s4631_s23 + $0x268] sm:$0xff] }
 0x147   : > { %v3865_v37 = vpop.f32.mrf.mxu1  ;;  %3753 = vmatprep.mubr.msk.f32.mxu0 %vm4528_vm0, %v4527_v1  ;;  %v1769_v23 = vmul.f32 0.5, %v5462_v5  ;;  %v404_v28 = vld [vmem:[%s4731_s16 + $0x268] sm:$0xff] }
 0x148   : > { %v2082_v38 = vmul.f32 %v2003_v30, %v1765_v29  ;;  %4255 = verf.f32 %v1849_v31  ;;  %v5480_v19 = vadd.f32 %v5115_v10, %v1387_v33  ;;  %v3608_v50 = vpop.f32.mrf.mxu0 }
 0x149   : > { %v4250_v39 = vpop.eup %4249  ;;  %v1391_v41 = vpop.f32.mrf.mxu1  ;;  %4011 = vmatmul.mubr.f32.gmra.mxu1 %v400_v35 }
 0x14a   : > { %2161 = vst [vmem:[%s5193_s26 + $0x98] sm:$0xff] %v2082_v38  ;;  %2240 = vst.msk [vmem:[%s5197_s27 + $0x98] sm:$0xff] %vm502_vm1, %v2082_v38  ;;  %v2004_v44 = vadd.f32 1.0, %v4250_v39  ;;  %v1850_v45 = vmul.f32 0.70710677, %v5480_v19  ;;  %v1392_v46 = vadd.f32 %v1391_v41, %v5428_v63  ;;  %4013 = vmatprep.mubr.msk.f32.mxu1 %vm4528_vm0, %v4527_v1  ;;  %v5500_v57 = vpop.f32.mrf.mxu0  ;;  %3754 = vmatmul.mubr.msk.f32.gmra.mxu0 %vm502_vm1, %v499_v48  ;;  %v500_v63 = vld [vmem:[%s4631_s23 + $0x270] sm:$0xff] }
 0x14b   : > { %v3868_v52 = vpop.f32.mrf.mxu1  ;;  %3756 = vmatprep.mubr.msk.f32.mxu0 %vm4528_vm0, %v4527_v1  ;;  %v1770_v36 = vmul.f32 0.5, %v5480_v19  ;;  %v405_v41 = vld [vmem:[%s4731_s16 + $0x270] sm:$0xff] }
 0x14c   : > { %v2083_v53 = vmul.f32 %v2004_v44, %v1766_v42  ;;  %4257 = verf.f32 %v1850_v45  ;;  %v5498_v32 = vadd.f32 %v5115_v10, %v1392_v46  ;;  %v3611_v2 = vpop.f32.mrf.mxu0 }
 0x14d   : > { %v4252_v56 = vpop.eup %4251  ;;  %v1396_v58 = vpop.f32.mrf.mxu1  ;;  %4014 = vmatmul.mubr.f32.gmra.mxu1 %v401_v49 }
 0x14e   : > { %2162 = vst [vmem:[%s5193_s26 + $0xa0] sm:$0xff] %v2083_v53  ;;  %2241 = vst.msk [vmem:[%s5197_s27 + $0xa0] sm:$0xff] %vm502_vm1, %v2083_v53  ;;  %v2005_v60 = vadd.f32 1.0, %v4252_v56  ;;  %v1851_v61 = vmul.f32 0.70710677, %v5498_v32  ;;  %v1397_v62 = vadd.f32 %v1396_v58, %v5446_v14  ;;  %4016 = vmatprep.mubr.msk.f32.mxu1 %vm4528_vm0, %v4527_v1  ;;  %v5518_v7 = vpop.f32.mrf.mxu0  ;;  %3757 = vmatmul.mubr.msk.f32.gmra.mxu0 %vm502_vm1, %v500_v63  ;;  %v327_v14 = vld [vmem:[%s4731_s16] sm:$0xff] }
 0x14f   : > { %v3871_v3 = vpop.f32.mrf.mxu1  ;;  %3791 = vmatprep.mubr.msk.f32.mxu0 %vm4528_vm0, %v4527_v1  ;;  %v5577_v58 = vld [vmem:[%s6253_s4] ss:$0 sm:$0xff] }
 0x150   : > { %v2084_v4 = vmul.f32 %v2005_v60, %v1767_v59  ;;  %4259 = verf.f32 %v1851_v61  ;;  %v5516_v43 = vadd.f32 %v5115_v10, %v1397_v62  ;;  %v3614_v16 = vpop.f32.mrf.mxu0 }
 0x151   : > { %v4254_v6 = vpop.eup %4253  ;;  %v1401_v8 = vpop.f32.mrf.mxu1  ;;  %4017 = vmatmul.mubr.f32.gmra.mxu1 %v402_v0 }
 0x152   : > { %2163 = vst [vmem:[%s5193_s26 + $0xa8] sm:$0xff] %v2084_v4  ;;  %2242 = vst.msk [vmem:[%s5197_s27 + $0xa8] sm:$0xff] %vm502_vm1, %v2084_v4  ;;  %v2006_v11 = vadd.f32 1.0, %v4254_v6  ;;  %v1852_v12 = vmul.f32 0.70710677, %v5516_v43  ;;  %v1402_v13 = vadd.f32 %v1401_v8, %v5464_v27  ;;  %4019 = vmatprep.mubr.msk.f32.mxu1 %vm4528_vm0, %v4527_v1  ;;  %v5536_v21 = vpop.f32.mrf.mxu0  ;;  %3792 = vmatmul.mubr.f32.vlgmr.msra.gmra.mxu0 %v327_v14  ;;  %v328_v27 = vld [vmem:[%s4731_s16 + $0x8] sm:$0xff] }
 0x153   : > { %v3874_v17 = vpop.f32.mrf.mxu1  ;;  %3794 = vmatprep.mubr.msk.f32.mxu0 %vm4528_vm0, %v4527_v1  ;;  %v1772_v62 = vmul.f32 0.5, %v5516_v43 }
 0x154   : > { %v2085_v18 = vmul.f32 %v2006_v11, %v1768_v9  ;;  %4261 = verf.f32 %v1852_v12  ;;  %v5534_v54 = vadd.f32 %v5115_v10, %v1402_v13  ;;  %v3617_v29 = vpop.f32.mrf.mxu0 }
 0x155   : > { %v4256_v20 = vpop.eup %4255  ;;  %v1406_v22 = vpop.f32.mrf.mxu1  ;;  %4020 = vmatmul.mubr.f32.gmra.mxu1 %v403_v15 }
 0x156   : > { %2164 = vst [vmem:[%s5193_s26 + $0xb0] sm:$0xff] %v2085_v18  ;;  %2243 = vst.msk [vmem:[%s5197_s27 + $0xb0] sm:$0xff] %vm502_vm1, %v2085_v18  ;;  %v2007_v24 = vadd.f32 1.0, %v4256_v20  ;;  %v1853_v25 = vmul.f32 0.70710677, %v5534_v54  ;;  %v1407_v26 = vadd.f32 %v1406_v22, %v5482_v40  ;;  %4022 = vmatprep.mubr.msk.f32.mxu1 %vm4528_vm0, %v4527_v1  ;;  %v966_v34 = vpop.f32.mrf.mxu0  ;;  %3795 = vmatmul.mubr.f32.gmra.mxu0 %v328_v27  ;;  %v329_v40 = vld [vmem:[%s4731_s16 + $0x10] sm:$0xff] }
 0x157   : > { %v3877_v30 = vpop.f32.mrf.mxu1  ;;  %3797 = vmatprep.mubr.msk.f32.mxu0 %vm4528_vm0, %v4527_v1  ;;  %v1773_v43 = vmul.f32 0.5, %v5534_v54 }
 0x158   : > { %v2086_v31 = vmul.f32 %v2007_v24, %v1769_v23  ;;  %4263 = verf.f32 %v1853_v25  ;;  %v5551_v5 = vadd.f32 %v5115_v10, %v1407_v26  ;;  %v3620_v42 = vpop.f32.mrf.mxu0 }
 0x159   : > { %v4258_v33 = vpop.eup %4257  ;;  %v1411_v35 = vpop.f32.mrf.mxu1  ;;  %4023 = vmatmul.mubr.f32.gmra.mxu1 %v404_v28 }
 0x15a   : > { %2165 = vst [vmem:[%s5193_s26 + $0xb8] sm:$0xff] %v2086_v31  ;;  %2244 = vst.msk [vmem:[%s5197_s27 + $0xb8] sm:$0xff] %vm502_vm1, %v2086_v31  ;;  %v2008_v37 = vadd.f32 1.0, %v4258_v33  ;;  %v1854_v38 = vmul.f32 0.70710677, %v5551_v5  ;;  %v1412_v39 = vadd.f32 %v1411_v35, %v5500_v57  ;;  %4025 = vmatprep.mubr.msk.f32.mxu1 %vm4528_vm0, %v4527_v1  ;;  %v971_v48 = vpop.f32.mrf.mxu0  ;;  %3798 = vmatmul.mubr.f32.gmra.mxu0 %v329_v40  ;;  %v1771_v1 = vmul.f32 0.5, %v5498_v32 }
 0x15b   : > { %v3880_v44 = vpop.f32.mrf.mxu1  ;;  %v1774_v23 = vmul.f32 0.5, %v5551_v5 }
 0x15c   : > { %v2087_v45 = vmul.f32 %v2008_v37, %v1770_v36  ;;  %4265 = verf.f32 %v1854_v38  ;;  %v5566_v19 = vadd.f32 %v5115_v10, %v1412_v39  ;;  %v3623_v56 = vpop.f32.mrf.mxu0 }
 0x15d   : > { %v4260_v46 = vpop.eup %4259  ;;  %v1416_v49 = vpop.f32.mrf.mxu1  ;;  %4026 = vmatmul.mubr.f32.gmra.mxu1 %v405_v41 }
 0x15e   : > { %2166 = vst [vmem:[%s5193_s26 + $0xc0] sm:$0xff] %v2087_v45  ;;  %2245 = vst.msk [vmem:[%s5197_s27 + $0xc0] sm:$0xff] %vm502_vm1, %v2087_v45  ;;  %v2009_v50 = vadd.f32 1.0, %v4260_v46  ;;  %v1855_v52 = vmul.f32 0.70710677, %v5566_v19  ;;  %v1417_v53 = vadd.f32 %v1416_v49, %v5518_v7  ;;  %v976_v61 = vpop.f32.mrf.mxu0 }
 0x15f   : > { %v3883_v10 = vpop.f32.mrf.mxu1 }
 0x160   : > { %v2088_v57 = vmul.f32 %v2009_v50, %v1771_v1  ;;  %4267 = verf.f32 %v1855_v52  ;;  %v1697_v59 = vadd.f32 %v5577_v58, %v1417_v53  ;;  %v3626_v3 = vpop.f32.mrf.mxu0 }
 0x161   : > { %v4262_v60 = vpop.eup %4261  ;;  %v1421_v32 = vpop.f32.mrf.mxu1 }
 0x162   : > { %2167 = vst [vmem:[%s5193_s26 + $0xc8] sm:$0xff] %v2088_v57  ;;  %2246 = vst.msk [vmem:[%s5197_s27 + $0xc8] sm:$0xff] %vm502_vm1, %v2088_v57  ;;  %v2010_v63 = vadd.f32 1.0, %v4262_v60  ;;  %v1856_v0 = vmul.f32 0.70710677, %v1697_v59  ;;  %v1422_v2 = vadd.f32 %v1421_v32, %v5536_v21  ;;  %v981_v9 = vpop.f32.mrf.mxu0  ;;  %v1776_v45 = vmul.f32 0.5, %v1697_v59 }
 0x163   : > { %v3886_v4 = vpop.f32.mrf.mxu1 }
 0x164   : > { %v2089_v6 = vmul.f32 %v2010_v63, %v1772_v62  ;;  %4269 = verf.f32 %v1856_v0  ;;  %v1698_v7 = vadd.f32 %v5577_v58, %v1422_v2  ;;  %v3629_v15 = vpop.f32.mrf.mxu0 }
 0x165   : > { %v4264_v8 = vpop.eup %4263  ;;  %v1426_v11 = vpop.f32.mrf.mxu1 }
 0x166   : > { %2168 = vst [vmem:[%s5193_s26 + $0xd0] sm:$0xff] %v2089_v6  ;;  %2247 = vst.msk [vmem:[%s5197_s27 + $0xd0] sm:$0xff] %vm502_vm1, %v2089_v6  ;;  %v2011_v12 = vadd.f32 1.0, %v4264_v8  ;;  %v1857_v13 = vmul.f32 0.70710677, %v1698_v7  ;;  %v1427_v14 = vadd.f32 %v1426_v11, %v966_v34  ;;  %v986_v21 = vpop.f32.mrf.mxu0  ;;  %v1775_v34 = vmul.f32 0.5, %v5566_v19 }
 0x167   : > { %v3889_v16 = vpop.f32.mrf.mxu1  ;;  %v1777_v57 = vmul.f32 0.5, %v1698_v7 }
 0x168   : > { %v2090_v17 = vmul.f32 %v2011_v12, %v1773_v43  ;;  %4271 = verf.f32 %v1857_v13  ;;  %v1699_v18 = vadd.f32 %v5577_v58, %v1427_v14  ;;  %v3632_v26 = vpop.f32.mrf.mxu0 }
 0x169   : > { %v4266_v20 = vpop.eup %4265  ;;  %v1431_v22 = vpop.f32.mrf.mxu1 }
 0x16a   : > { %2169 = vst [vmem:[%s5193_s26 + $0xd8] sm:$0xff] %v2090_v17  ;;  %2248 = vst.msk [vmem:[%s5197_s27 + $0xd8] sm:$0xff] %vm502_vm1, %v2090_v17  ;;  %v2012_v54 = vadd.f32 1.0, %v4266_v20  ;;  %v1858_v24 = vmul.f32 0.70710677, %v1699_v18  ;;  %v1432_v25 = vadd.f32 %v1431_v22, %v971_v48  ;;  %v991_v31 = vpop.f32.mrf.mxu0  ;;  %v1778_v6 = vmul.f32 0.5, %v1699_v18 }
 0x16b   : > { %v3892_v27 = vpop.f32.mrf.mxu1 }
 0x16c   : > { %v2091_v28 = vmul.f32 %v2012_v54, %v1774_v23  ;;  %4273 = verf.f32 %v1858_v24  ;;  %v1700_v29 = vadd.f32 %v5577_v58, %v1432_v25  ;;  %v3635_v37 = vpop.f32.mrf.mxu0 }
 0x16d   : > { %v4268_v30 = vpop.eup %4267  ;;  %v1436_v33 = vpop.f32.mrf.mxu1 }
 0x16e   : > { %2170 = vst [vmem:[%s5193_s26 + $0xe0] sm:$0xff] %v2091_v28  ;;  %2249 = vst.msk [vmem:[%s5197_s27 + $0xe0] sm:$0xff] %vm502_vm1, %v2091_v28  ;;  %v2013_v5 = vadd.f32 1.0, %v4268_v30  ;;  %v1859_v35 = vmul.f32 0.70710677, %v1700_v29  ;;  %v1437_v36 = vadd.f32 %v1436_v33, %v976_v61  ;;  %v996_v42 = vpop.f32.mrf.mxu0  ;;  %v1779_v17 = vmul.f32 0.5, %v1700_v29 }
 0x16f   : > { %v3895_v38 = vpop.f32.mrf.mxu1 }
 0x170   : > { %v2092_v39 = vmul.f32 %v2013_v5, %v1775_v34  ;;  %4275 = verf.f32 %v1859_v35  ;;  %v1701_v40 = vadd.f32 %v5577_v58, %v1437_v36  ;;  %v3638_v49 = vpop.f32.mrf.mxu0 }
 0x171   : > { %v4270_v41 = vpop.eup %4269  ;;  %v1441_v44 = vpop.f32.mrf.mxu1 }
 0x172   : > { %2171 = vst [vmem:[%s5193_s26 + $0xe8] sm:$0xff] %v2092_v39  ;;  %2250 = vst.msk [vmem:[%s5197_s27 + $0xe8] sm:$0xff] %vm502_vm1, %v2092_v39  ;;  %v2014_v46 = vadd.f32 1.0, %v4270_v41  ;;  %v1860_v19 = vmul.f32 0.70710677, %v1701_v40  ;;  %v1442_v48 = vadd.f32 %v1441_v44, %v981_v9  ;;  %v1001_v56 = vpop.f32.mrf.mxu0  ;;  %v1780_v28 = vmul.f32 0.5, %v1701_v40 }
 0x173   : > { %v3898_v1 = vpop.f32.mrf.mxu1 }
 0x174   : > { %v2093_v50 = vmul.f32 %v2014_v46, %v1776_v45  ;;  %4277 = verf.f32 %v1860_v19  ;;  %v1702_v52 = vadd.f32 %v5577_v58, %v1442_v48  ;;  %v3641_v32 = vpop.f32.mrf.mxu0 }
 0x175   : > { %v4272_v53 = vpop.eup %4271  ;;  %v1446_v10 = vpop.f32.mrf.mxu1 }
 0x176   : > { %2172 = vst [vmem:[%s5193_s26 + $0xf0] sm:$0xff] %v2093_v50  ;;  %2251 = vst.msk [vmem:[%s5197_s27 + $0xf0] sm:$0xff] %vm502_vm1, %v2093_v50  ;;  %v2015_v60 = vadd.f32 1.0, %v4272_v53  ;;  %v1861_v59 = vmul.f32 0.70710677, %v1702_v52  ;;  %v1447_v61 = vadd.f32 %v1446_v10, %v986_v21  ;;  %v1006_v3 = vpop.f32.mrf.mxu0  ;;  %v1781_v39 = vmul.f32 0.5, %v1702_v52 }
 0x177   : > { %v3901_v62 = vpop.f32.mrf.mxu1 }
 0x178   : > { %v2094_v63 = vmul.f32 %v2015_v60, %v1777_v57  ;;  %4279 = verf.f32 %v1861_v59  ;;  %v1703_v0 = vadd.f32 %v5577_v58, %v1447_v61  ;;  %v3644_v11 = vpop.f32.mrf.mxu0 }
 0x179   : > { %v4274_v2 = vpop.eup %4273  ;;  %v1451_v4 = vpop.f32.mrf.mxu1 }
 0x17a   : > { %2173 = vst [vmem:[%s5193_s26 + $0xf8] sm:$0xff] %v2094_v63  ;;  %2252 = vst.msk [vmem:[%s5197_s27 + $0xf8] sm:$0xff] %vm502_vm1, %v2094_v63  ;;  %v2016_v8 = vadd.f32 1.0, %v4274_v2  ;;  %v1862_v7 = vmul.f32 0.70710677, %v1703_v0  ;;  %v1452_v9 = vadd.f32 %v1451_v4, %v991_v31  ;;  %v1011_v15 = vpop.f32.mrf.mxu0  ;;  %v1782_v50 = vmul.f32 0.5, %v1703_v0 }
 0x17b   : > { %v3904_v43 = vpop.f32.mrf.mxu1 }
 0x17c   : > { %v2095_v12 = vmul.f32 %v2016_v8, %v1778_v6  ;;  %4281 = verf.f32 %v1862_v7  ;;  %v1704_v13 = vadd.f32 %v5577_v58, %v1452_v9  ;;  %v3647_v22 = vpop.f32.mrf.mxu0 }
 0x17d   : > { %v4276_v14 = vpop.eup %4275  ;;  %v1456_v16 = vpop.f32.mrf.mxu1 }
 0x17e   : > { %2174 = vst [vmem:[%s5193_s26 + $0x100] sm:$0xff] %v2095_v12  ;;  %2253 = vst.msk [vmem:[%s5197_s27 + $0x100] sm:$0xff] %vm502_vm1, %v2095_v12  ;;  %v2017_v20 = vadd.f32 1.0, %v4276_v14  ;;  %v1863_v18 = vmul.f32 0.70710677, %v1704_v13  ;;  %v1457_v21 = vadd.f32 %v1456_v16, %v996_v42  ;;  %v1016_v26 = vpop.f32.mrf.mxu0  ;;  %v1783_v63 = vmul.f32 0.5, %v1704_v13 }
 0x17f   : > { %v3907_v23 = vpop.f32.mrf.mxu1 }
 0x180   : > { %v2096_v54 = vmul.f32 %v2017_v20, %v1779_v17  ;;  %4283 = verf.f32 %v1863_v18  ;;  %v1705_v24 = vadd.f32 %v5577_v58, %v1457_v21  ;;  %v3650_v33 = vpop.f32.mrf.mxu0 }
 0x181   : > { %v4278_v25 = vpop.eup %4277  ;;  %v1461_v27 = vpop.f32.mrf.mxu1 }
 0x182   : > { %2175 = vst [vmem:[%s5193_s26 + $0x108] sm:$0xff] %v2096_v54  ;;  %2254 = vst.msk [vmem:[%s5197_s27 + $0x108] sm:$0xff] %vm502_vm1, %v2096_v54  ;;  %v2018_v30 = vadd.f32 1.0, %v4278_v25  ;;  %v1864_v29 = vmul.f32 0.70710677, %v1705_v24  ;;  %v1462_v31 = vadd.f32 %v1461_v27, %v1001_v56  ;;  %v1021_v37 = vpop.f32.mrf.mxu0  ;;  %v1784_v12 = vmul.f32 0.5, %v1705_v24 }
 0x183   : > { %v3910_v34 = vpop.f32.mrf.mxu1 }
 0x184   : > { %v2097_v5 = vmul.f32 %v2018_v30, %v1780_v28  ;;  %4285 = verf.f32 %v1864_v29  ;;  %v1706_v35 = vadd.f32 %v5577_v58, %v1462_v31  ;;  %v3653_v44 = vpop.f32.mrf.mxu0 }
 0x185   : > { %v4280_v36 = vpop.eup %4279  ;;  %v1466_v38 = vpop.f32.mrf.mxu1 }
 0x186   : > { %2176 = vst [vmem:[%s5193_s26 + $0x110] sm:$0xff] %v2097_v5  ;;  %2255 = vst.msk [vmem:[%s5197_s27 + $0x110] sm:$0xff] %vm502_vm1, %v2097_v5  ;;  %v2019_v41 = vadd.f32 1.0, %v4280_v36  ;;  %v1865_v40 = vmul.f32 0.70710677, %v1706_v35  ;;  %v1467_v42 = vadd.f32 %v1466_v38, %v1006_v3  ;;  %v1026_v49 = vpop.f32.mrf.mxu0  ;;  %v1785_v54 = vmul.f32 0.5, %v1706_v35 }
 0x187   : > { %v3913_v45 = vpop.f32.mrf.mxu1 }
 0x188   : > { %v2098_v46 = vmul.f32 %v2019_v41, %v1781_v39  ;;  %4287 = verf.f32 %v1865_v40  ;;  %v1707_v19 = vadd.f32 %v5577_v58, %v1467_v42  ;;  %v3656_v10 = vpop.f32.mrf.mxu0 }
 0x189   : > { %v4282_v48 = vpop.eup %4281  ;;  %v1471_v1 = vpop.f32.mrf.mxu1 }
 0x18a   : > { %2177 = vst [vmem:[%s5193_s26 + $0x118] sm:$0xff] %v2098_v46  ;;  %2256 = vst.msk [vmem:[%s5197_s27 + $0x118] sm:$0xff] %vm502_vm1, %v2098_v46  ;;  %v2020_v53 = vadd.f32 1.0, %v4282_v48  ;;  %v1866_v52 = vmul.f32 0.70710677, %v1707_v19  ;;  %v1472_v56 = vadd.f32 %v1471_v1, %v1011_v15  ;;  %v1031_v32 = vpop.f32.mrf.mxu0  ;;  %v1786_v5 = vmul.f32 0.5, %v1707_v19 }
 0x18b   : > { %v3916_v57 = vpop.f32.mrf.mxu1 }
 0x18c   : > { %v2099_v60 = vmul.f32 %v2020_v53, %v1782_v50  ;;  %4289 = verf.f32 %v1866_v52  ;;  %v1708_v59 = vadd.f32 %v5577_v58, %v1472_v56  ;;  %v3659_v4 = vpop.f32.mrf.mxu0 }
 0x18d   : > { %v4284_v61 = vpop.eup %4283  ;;  %v1476_v62 = vpop.f32.mrf.mxu1 }
 0x18e   : > { %2178 = vst [vmem:[%s5193_s26 + $0x120] sm:$0xff] %v2099_v60  ;;  %2257 = vst.msk [vmem:[%s5197_s27 + $0x120] sm:$0xff] %vm502_vm1, %v2099_v60  ;;  %v2021_v2 = vadd.f32 1.0, %v4284_v61  ;;  %v1867_v0 = vmul.f32 0.70710677, %v1708_v59  ;;  %v1477_v3 = vadd.f32 %v1476_v62, %v1016_v26  ;;  %v1036_v11 = vpop.f32.mrf.mxu0  ;;  %v1787_v46 = vmul.f32 0.5, %v1708_v59 }
 0x18f   : > { %v3919_v6 = vpop.f32.mrf.mxu1 }
 0x190   : > { %v2100_v8 = vmul.f32 %v2021_v2, %v1783_v63  ;;  %4291 = verf.f32 %v1867_v0  ;;  %v1709_v7 = vadd.f32 %v5577_v58, %v1477_v3  ;;  %v3662_v16 = vpop.f32.mrf.mxu0 }
 0x191   : > { %v4286_v9 = vpop.eup %4285  ;;  %v1481_v43 = vpop.f32.mrf.mxu1 }
 0x192   : > { %2179 = vst [vmem:[%s5193_s26 + $0x128] sm:$0xff] %v2100_v8  ;;  %2258 = vst.msk [vmem:[%s5197_s27 + $0x128] sm:$0xff] %vm502_vm1, %v2100_v8  ;;  %v2022_v14 = vadd.f32 1.0, %v4286_v9  ;;  %v1868_v13 = vmul.f32 0.70710677, %v1709_v7  ;;  %v1482_v15 = vadd.f32 %v1481_v43, %v1021_v37  ;;  %v1041_v22 = vpop.f32.mrf.mxu0  ;;  %v1788_v60 = vmul.f32 0.5, %v1709_v7 }
 0x193   : > { %v3922_v17 = vpop.f32.mrf.mxu1 }
 0x194   : > { %v2101_v20 = vmul.f32 %v2022_v14, %v1784_v12  ;;  %4293 = verf.f32 %v1868_v13  ;;  %v1710_v18 = vadd.f32 %v5577_v58, %v1482_v15  ;;  %v3665_v27 = vpop.f32.mrf.mxu0 }
 0x195   : > { %v4288_v21 = vpop.eup %4287  ;;  %v1486_v23 = vpop.f32.mrf.mxu1 }
 0x196   : > { %2180 = vst [vmem:[%s5193_s26 + $0x130] sm:$0xff] %v2101_v20  ;;  %2259 = vst.msk [vmem:[%s5197_s27 + $0x130] sm:$0xff] %vm502_vm1, %v2101_v20  ;;  %v2023_v25 = vadd.f32 1.0, %v4288_v21  ;;  %v1869_v24 = vmul.f32 0.70710677, %v1710_v18  ;;  %v1487_v26 = vadd.f32 %v1486_v23, %v1026_v49  ;;  %v1046_v33 = vpop.f32.mrf.mxu0  ;;  %v1789_v8 = vmul.f32 0.5, %v1710_v18 }
 0x197   : > { %v3925_v28 = vpop.f32.mrf.mxu1 }
 0x198   : > { %v2102_v30 = vmul.f32 %v2023_v25, %v1785_v54  ;;  %4295 = verf.f32 %v1869_v24  ;;  %v1711_v29 = vadd.f32 %v5577_v58, %v1487_v26  ;;  %v3668_v38 = vpop.f32.mrf.mxu0 }
 0x199   : > { %v4290_v31 = vpop.eup %4289  ;;  %v1491_v34 = vpop.f32.mrf.mxu1 }
 0x19a   : > { %2181 = vst [vmem:[%s5193_s26 + $0x138] sm:$0xff] %v2102_v30  ;;  %2260 = vst.msk [vmem:[%s5197_s27 + $0x138] sm:$0xff] %vm502_vm1, %v2102_v30  ;;  %v2024_v36 = vadd.f32 1.0, %v4290_v31  ;;  %v1870_v35 = vmul.f32 0.70710677, %v1711_v29  ;;  %v1492_v37 = vadd.f32 %v1491_v34, %v1031_v32  ;;  %v1051_v44 = vpop.f32.mrf.mxu0  ;;  %v1790_v20 = vmul.f32 0.5, %v1711_v29 }
 0x19b   : > { %v3928_v39 = vpop.f32.mrf.mxu1 }
 0x19c   : > { %v2103_v41 = vmul.f32 %v2024_v36, %v1786_v5  ;;  %4297 = verf.f32 %v1870_v35  ;;  %v1712_v40 = vadd.f32 %v5577_v58, %v1492_v37  ;;  %v3671_v1 = vpop.f32.mrf.mxu0 }
 0x19d   : > { %v4292_v42 = vpop.eup %4291  ;;  %v1496_v45 = vpop.f32.mrf.mxu1 }
 0x19e   : > { %2182 = vst [vmem:[%s5193_s26 + $0x140] sm:$0xff] %v2103_v41  ;;  %2261 = vst.msk [vmem:[%s5197_s27 + $0x140] sm:$0xff] %vm502_vm1, %v2103_v41  ;;  %v2025_v48 = vadd.f32 1.0, %v4292_v42  ;;  %v1871_v19 = vmul.f32 0.70710677, %v1712_v40  ;;  %v1497_v49 = vadd.f32 %v1496_v45, %v1036_v11  ;;  %v1056_v10 = vpop.f32.mrf.mxu0  ;;  %v1791_v30 = vmul.f32 0.5, %v1712_v40 }
 0x19f   : > { %v3931_v50 = vpop.f32.mrf.mxu1 }
 0x1a0   : > { %v2104_v53 = vmul.f32 %v2025_v48, %v1787_v46  ;;  %4299 = verf.f32 %v1871_v19  ;;  %v1713_v52 = vadd.f32 %v5577_v58, %v1497_v49  ;;  %v3674_v62 = vpop.f32.mrf.mxu0 }
 0x1a1   : > { %v4294_v56 = vpop.eup %4293  ;;  %v1501_v57 = vpop.f32.mrf.mxu1 }
 0x1a2   : > { %2183 = vst [vmem:[%s5193_s26 + $0x148] sm:$0xff] %v2104_v53  ;;  %2262 = vst.msk [vmem:[%s5197_s27 + $0x148] sm:$0xff] %vm502_vm1, %v2104_v53  ;;  %v2026_v61 = vadd.f32 1.0, %v4294_v56  ;;  %v1872_v59 = vmul.f32 0.70710677, %v1713_v52  ;;  %v1502_v32 = vadd.f32 %v1501_v57, %v1041_v22  ;;  %v1061_v4 = vpop.f32.mrf.mxu0  ;;  %v1792_v41 = vmul.f32 0.5, %v1713_v52 }
 0x1a3   : > { %v3934_v63 = vpop.f32.mrf.mxu1 }
 0x1a4   : > { %v2105_v2 = vmul.f32 %v2026_v61, %v1788_v60  ;;  %4301 = verf.f32 %v1872_v59  ;;  %v1714_v0 = vadd.f32 %v5577_v58, %v1502_v32  ;;  %v3677_v43 = vpop.f32.mrf.mxu0 }
 0x1a5   : > { %v4296_v3 = vpop.eup %4295  ;;  %v1506_v6 = vpop.f32.mrf.mxu1 }
 0x1a6   : > { %2184 = vst [vmem:[%s5193_s26 + $0x150] sm:$0xff] %v2105_v2  ;;  %2263 = vst.msk [vmem:[%s5197_s27 + $0x150] sm:$0xff] %vm502_vm1, %v2105_v2  ;;  %v2027_v9 = vadd.f32 1.0, %v4296_v3  ;;  %v1873_v7 = vmul.f32 0.70710677, %v1714_v0  ;;  %v1507_v11 = vadd.f32 %v1506_v6, %v1046_v33  ;;  %v1066_v16 = vpop.f32.mrf.mxu0  ;;  %v1793_v53 = vmul.f32 0.5, %v1714_v0 }
 0x1a7   : > { %v3937_v12 = vpop.f32.mrf.mxu1 }
 0x1a8   : > { %v2106_v14 = vmul.f32 %v2027_v9, %v1789_v8  ;;  %4303 = verf.f32 %v1873_v7  ;;  %v1715_v13 = vadd.f32 %v5577_v58, %v1507_v11  ;;  %v3680_v23 = vpop.f32.mrf.mxu0 }
 0x1a9   : > { %v4298_v15 = vpop.eup %4297  ;;  %v1511_v17 = vpop.f32.mrf.mxu1 }
 0x1aa   : > { %2185 = vst [vmem:[%s5193_s26 + $0x158] sm:$0xff] %v2106_v14  ;;  %2264 = vst.msk [vmem:[%s5197_s27 + $0x158] sm:$0xff] %vm502_vm1, %v2106_v14  ;;  %v2028_v21 = vadd.f32 1.0, %v4298_v15  ;;  %v1874_v18 = vmul.f32 0.70710677, %v1715_v13  ;;  %v1512_v22 = vadd.f32 %v1511_v17, %v1051_v44  ;;  %v1071_v27 = vpop.f32.mrf.mxu0  ;;  %v1794_v2 = vmul.f32 0.5, %v1715_v13 }
 0x1ab   : > { %v3940_v54 = vpop.f32.mrf.mxu1 }
 0x1ac   : > { %v2107_v25 = vmul.f32 %v2028_v21, %v1790_v20  ;;  %4305 = verf.f32 %v1874_v18  ;;  %v1716_v24 = vadd.f32 %v5577_v58, %v1512_v22  ;;  %v3683_v34 = vpop.f32.mrf.mxu0 }
 0x1ad   : > { %v4300_v26 = vpop.eup %4299  ;;  %v1516_v28 = vpop.f32.mrf.mxu1 }
 0x1ae   : > { %2186 = vst [vmem:[%s5193_s26 + $0x160] sm:$0xff] %v2107_v25  ;;  %2265 = vst.msk [vmem:[%s5197_s27 + $0x160] sm:$0xff] %vm502_vm1, %v2107_v25  ;;  %v2029_v31 = vadd.f32 1.0, %v4300_v26  ;;  %v1875_v29 = vmul.f32 0.70710677, %v1716_v24  ;;  %v1517_v33 = vadd.f32 %v1516_v28, %v1056_v10  ;;  %v1076_v38 = vpop.f32.mrf.mxu0  ;;  %v1795_v14 = vmul.f32 0.5, %v1716_v24 }
 0x1af   : > { %v3943_v5 = vpop.f32.mrf.mxu1 }
 0x1b0   : > { %v2108_v36 = vmul.f32 %v2029_v31, %v1791_v30  ;;  %4307 = verf.f32 %v1875_v29  ;;  %v1717_v35 = vadd.f32 %v5577_v58, %v1517_v33  ;;  %v3686_v45 = vpop.f32.mrf.mxu0 }
 0x1b1   : > { %v4302_v37 = vpop.eup %4301  ;;  %v1521_v39 = vpop.f32.mrf.mxu1 }
 0x1b2   : > { %2187 = vst [vmem:[%s5193_s26 + $0x168] sm:$0xff] %v2108_v36  ;;  %2266 = vst.msk [vmem:[%s5197_s27 + $0x168] sm:$0xff] %vm502_vm1, %v2108_v36  ;;  %v2030_v42 = vadd.f32 1.0, %v4302_v37  ;;  %v1876_v40 = vmul.f32 0.70710677, %v1717_v35  ;;  %v1522_v44 = vadd.f32 %v1521_v39, %v1061_v4  ;;  %v1081_v1 = vpop.f32.mrf.mxu0  ;;  %v1796_v25 = vmul.f32 0.5, %v1717_v35 }
 0x1b3   : > { %v3946_v46 = vpop.f32.mrf.mxu1 }
 0x1b4   : > { %v2109_v48 = vmul.f32 %v2030_v42, %v1792_v41  ;;  %4309 = verf.f32 %v1876_v40  ;;  %v1718_v19 = vadd.f32 %v5577_v58, %v1522_v44  ;;  %v3689_v57 = vpop.f32.mrf.mxu0 }
 0x1b5   : > { %v4304_v49 = vpop.eup %4303  ;;  %v1526_v50 = vpop.f32.mrf.mxu1 }
 0x1b6   : > { %2188 = vst [vmem:[%s5193_s26 + $0x170] sm:$0xff] %v2109_v48  ;;  %2267 = vst.msk [vmem:[%s5197_s27 + $0x170] sm:$0xff] %vm502_vm1, %v2109_v48  ;;  %v2031_v56 = vadd.f32 1.0, %v4304_v49  ;;  %v1877_v52 = vmul.f32 0.70710677, %v1718_v19  ;;  %v1527_v10 = vadd.f32 %v1526_v50, %v1066_v16  ;;  %v1086_v62 = vpop.f32.mrf.mxu0  ;;  %v1797_v36 = vmul.f32 0.5, %v1718_v19 }
 0x1b7   : > { %v3949_v60 = vpop.f32.mrf.mxu1 }
 0x1b8   : > { %v2110_v61 = vmul.f32 %v2031_v56, %v1793_v53  ;;  %4311 = verf.f32 %v1877_v52  ;;  %v1719_v59 = vadd.f32 %v5577_v58, %v1527_v10  ;;  %v3692_v6 = vpop.f32.mrf.mxu0 }
 0x1b9   : > { %v4306_v32 = vpop.eup %4305  ;;  %v1531_v63 = vpop.f32.mrf.mxu1 }
 0x1ba   : > { %2189 = vst [vmem:[%s5193_s26 + $0x178] sm:$0xff] %v2110_v61  ;;  %2268 = vst.msk [vmem:[%s5197_s27 + $0x178] sm:$0xff] %vm502_vm1, %v2110_v61  ;;  %v2032_v3 = vadd.f32 1.0, %v4306_v32  ;;  %v1878_v0 = vmul.f32 0.70710677, %v1719_v59  ;;  %v1532_v4 = vadd.f32 %v1531_v63, %v1071_v27  ;;  %v1091_v43 = vpop.f32.mrf.mxu0  ;;  %v1798_v48 = vmul.f32 0.5, %v1719_v59 }
 0x1bb   : > { %v3952_v8 = vpop.f32.mrf.mxu1 }
 0x1bc   : > { %v2111_v9 = vmul.f32 %v2032_v3, %v1794_v2  ;;  %4313 = verf.f32 %v1878_v0  ;;  %v1720_v7 = vadd.f32 %v5577_v58, %v1532_v4  ;;  %v3695_v17 = vpop.f32.mrf.mxu0 }
 0x1bd   : > { %v4308_v11 = vpop.eup %4307  ;;  %v1536_v12 = vpop.f32.mrf.mxu1 }
 0x1be   : > { %2190 = vst [vmem:[%s5193_s26 + $0x180] sm:$0xff] %v2111_v9  ;;  %2269 = vst.msk [vmem:[%s5197_s27 + $0x180] sm:$0xff] %vm502_vm1, %v2111_v9  ;;  %v2033_v15 = vadd.f32 1.0, %v4308_v11  ;;  %v1879_v13 = vmul.f32 0.70710677, %v1720_v7  ;;  %v1537_v16 = vadd.f32 %v1536_v12, %v1076_v38  ;;  %v1096_v23 = vpop.f32.mrf.mxu0  ;;  %v1799_v61 = vmul.f32 0.5, %v1720_v7 }
 0x1bf   : > { %v3955_v20 = vpop.f32.mrf.mxu1 }
 0x1c0   : > { %v2112_v21 = vmul.f32 %v2033_v15, %v1795_v14  ;;  %4315 = verf.f32 %v1879_v13  ;;  %v1721_v18 = vadd.f32 %v5577_v58, %v1537_v16  ;;  %v3698_v28 = vpop.f32.mrf.mxu0 }
 0x1c1   : > { %v4310_v22 = vpop.eup %4309  ;;  %v1541_v54 = vpop.f32.mrf.mxu1 }
 0x1c2   : > { %2191 = vst [vmem:[%s5193_s26 + $0x188] sm:$0xff] %v2112_v21  ;;  %2270 = vst.msk [vmem:[%s5197_s27 + $0x188] sm:$0xff] %vm502_vm1, %v2112_v21  ;;  %v2034_v26 = vadd.f32 1.0, %v4310_v22  ;;  %v1880_v24 = vmul.f32 0.70710677, %v1721_v18  ;;  %v1542_v27 = vadd.f32 %v1541_v54, %v1081_v1  ;;  %v1101_v34 = vpop.f32.mrf.mxu0  ;;  %v1800_v9 = vmul.f32 0.5, %v1721_v18 }
 0x1c3   : > { %v3958_v30 = vpop.f32.mrf.mxu1 }
 0x1c4   : > { %v2113_v31 = vmul.f32 %v2034_v26, %v1796_v25  ;;  %4317 = verf.f32 %v1880_v24  ;;  %v1722_v29 = vadd.f32 %v5577_v58, %v1542_v27  ;;  %v3701_v39 = vpop.f32.mrf.mxu0 }
 0x1c5   : > { %v4312_v33 = vpop.eup %4311  ;;  %v1546_v5 = vpop.f32.mrf.mxu1 }
 0x1c6   : > { %2192 = vst [vmem:[%s5193_s26 + $0x190] sm:$0xff] %v2113_v31  ;;  %2271 = vst.msk [vmem:[%s5197_s27 + $0x190] sm:$0xff] %vm502_vm1, %v2113_v31  ;;  %v2035_v37 = vadd.f32 1.0, %v4312_v33  ;;  %v1881_v35 = vmul.f32 0.70710677, %v1722_v29  ;;  %v1547_v38 = vadd.f32 %v1546_v5, %v1086_v62  ;;  %v1106_v45 = vpop.f32.mrf.mxu0  ;;  %v1801_v21 = vmul.f32 0.5, %v1722_v29 }
 0x1c7   : > { %v3961_v41 = vpop.f32.mrf.mxu1 }
 0x1c8   : > { %v2114_v42 = vmul.f32 %v2035_v37, %v1797_v36  ;;  %4319 = verf.f32 %v1881_v35  ;;  %v1723_v40 = vadd.f32 %v5577_v58, %v1547_v38  ;;  %v3704_v50 = vpop.f32.mrf.mxu0 }
 0x1c9   : > { %v4314_v44 = vpop.eup %4313  ;;  %v1551_v46 = vpop.f32.mrf.mxu1 }
 0x1ca   : > { %2193 = vst [vmem:[%s5193_s26 + $0x198] sm:$0xff] %v2114_v42  ;;  %2272 = vst.msk [vmem:[%s5197_s27 + $0x198] sm:$0xff] %vm502_vm1, %v2114_v42  ;;  %v2036_v49 = vadd.f32 1.0, %v4314_v44  ;;  %v1882_v19 = vmul.f32 0.70710677, %v1723_v40  ;;  %v1552_v1 = vadd.f32 %v1551_v46, %v1091_v43  ;;  %v1111_v57 = vpop.f32.mrf.mxu0  ;;  %v1802_v31 = vmul.f32 0.5, %v1723_v40 }
 0x1cb   : > { %v3964_v53 = vpop.f32.mrf.mxu1 }
 0x1cc   : > { %v2115_v56 = vmul.f32 %v2036_v49, %v1798_v48  ;;  %4321 = verf.f32 %v1882_v19  ;;  %v1724_v52 = vadd.f32 %v5577_v58, %v1552_v1  ;;  %v3707_v63 = vpop.f32.mrf.mxu0 }
 0x1cd   : > { %v4316_v10 = vpop.eup %4315  ;;  %v1556_v60 = vpop.f32.mrf.mxu1 }
 0x1ce   : > { %2194 = vst [vmem:[%s5193_s26 + $0x1a0] sm:$0xff] %v2115_v56  ;;  %2273 = vst.msk [vmem:[%s5197_s27 + $0x1a0] sm:$0xff] %vm502_vm1, %v2115_v56  ;;  %v2037_v32 = vadd.f32 1.0, %v4316_v10  ;;  %v1883_v59 = vmul.f32 0.70710677, %v1724_v52  ;;  %v1557_v62 = vadd.f32 %v1556_v60, %v1096_v23  ;;  %v1116_v6 = vpop.f32.mrf.mxu0  ;;  %v1803_v42 = vmul.f32 0.5, %v1724_v52 }
 0x1cf   : > { %v3967_v2 = vpop.f32.mrf.mxu1 }
 0x1d0   : > { %v2116_v3 = vmul.f32 %v2037_v32, %v1799_v61  ;;  %4323 = verf.f32 %v1883_v59  ;;  %v1725_v0 = vadd.f32 %v5577_v58, %v1557_v62  ;;  %v3710_v12 = vpop.f32.mrf.mxu0 }
 0x1d1   : > { %v4318_v4 = vpop.eup %4317  ;;  %v1561_v8 = vpop.f32.mrf.mxu1 }
 0x1d2   : > { %2195 = vst [vmem:[%s5193_s26 + $0x1a8] sm:$0xff] %v2116_v3  ;;  %2274 = vst.msk [vmem:[%s5197_s27 + $0x1a8] sm:$0xff] %vm502_vm1, %v2116_v3  ;;  %v2038_v11 = vadd.f32 1.0, %v4318_v4  ;;  %v1884_v7 = vmul.f32 0.70710677, %v1725_v0  ;;  %v1562_v43 = vadd.f32 %v1561_v8, %v1101_v34  ;;  %v1121_v17 = vpop.f32.mrf.mxu0  ;;  %v1804_v56 = vmul.f32 0.5, %v1725_v0 }
 0x1d3   : > { %v3970_v14 = vpop.f32.mrf.mxu1 }
 0x1d4   : > { %v2117_v15 = vmul.f32 %v2038_v11, %v1800_v9  ;;  %4325 = verf.f32 %v1884_v7  ;;  %v1726_v13 = vadd.f32 %v5577_v58, %v1562_v43  ;;  %v3713_v54 = vpop.f32.mrf.mxu0 }
 0x1d5   : > { %v4320_v16 = vpop.eup %4319  ;;  %v1566_v20 = vpop.f32.mrf.mxu1 }
 0x1d6   : > { %2196 = vst [vmem:[%s5193_s26 + $0x1b0] sm:$0xff] %v2117_v15  ;;  %2275 = vst.msk [vmem:[%s5197_s27 + $0x1b0] sm:$0xff] %vm502_vm1, %v2117_v15  ;;  %v2039_v22 = vadd.f32 1.0, %v4320_v16  ;;  %v1885_v18 = vmul.f32 0.70710677, %v1726_v13  ;;  %v1567_v23 = vadd.f32 %v1566_v20, %v1106_v45  ;;  %v1126_v28 = vpop.f32.mrf.mxu0  ;;  %v1805_v3 = vmul.f32 0.5, %v1726_v13 }
 0x1d7   : > { %v3973_v25 = vpop.f32.mrf.mxu1 }
 0x1d8   : > { %v2118_v26 = vmul.f32 %v2039_v22, %v1801_v21  ;;  %4327 = verf.f32 %v1885_v18  ;;  %v1727_v24 = vadd.f32 %v5577_v58, %v1567_v23  ;;  %v3716_v5 = vpop.f32.mrf.mxu0 }
 0x1d9   : > { %v4322_v27 = vpop.eup %4321  ;;  %v1571_v30 = vpop.f32.mrf.mxu1 }
 0x1da   : > { %2197 = vst [vmem:[%s5193_s26 + $0x1b8] sm:$0xff] %v2118_v26  ;;  %2276 = vst.msk [vmem:[%s5197_s27 + $0x1b8] sm:$0xff] %vm502_vm1, %v2118_v26  ;;  %v2040_v33 = vadd.f32 1.0, %v4322_v27  ;;  %v1886_v29 = vmul.f32 0.70710677, %v1727_v24  ;;  %v1572_v34 = vadd.f32 %v1571_v30, %v1111_v57  ;;  %v1131_v39 = vpop.f32.mrf.mxu0  ;;  %v1806_v15 = vmul.f32 0.5, %v1727_v24 }
 0x1db   : > { %v3976_v36 = vpop.f32.mrf.mxu1 }
 0x1dc   : > { %v2119_v37 = vmul.f32 %v2040_v33, %v1802_v31  ;;  %4329 = verf.f32 %v1886_v29  ;;  %v1728_v35 = vadd.f32 %v5577_v58, %v1572_v34  ;;  %v3719_v46 = vpop.f32.mrf.mxu0 }
 0x1dd   : > { %v4324_v38 = vpop.eup %4323  ;;  %v1576_v41 = vpop.f32.mrf.mxu1 }
 0x1de   : > { %2198 = vst [vmem:[%s5193_s26 + $0x1c0] sm:$0xff] %v2119_v37  ;;  %2277 = vst.msk [vmem:[%s5197_s27 + $0x1c0] sm:$0xff] %vm502_vm1, %v2119_v37  ;;  %v2041_v44 = vadd.f32 1.0, %v4324_v38  ;;  %v1887_v40 = vmul.f32 0.70710677, %v1728_v35  ;;  %v1577_v45 = vadd.f32 %v1576_v41, %v1116_v6  ;;  %v1136_v50 = vpop.f32.mrf.mxu0  ;;  %v1807_v26 = vmul.f32 0.5, %v1728_v35 }
 0x1df   : > { %v3979_v48 = vpop.f32.mrf.mxu1 }
 0x1e0   : > { %v2120_v49 = vmul.f32 %v2041_v44, %v1803_v42  ;;  %4331 = verf.f32 %v1887_v40  ;;  %v1729_v19 = vadd.f32 %v5577_v58, %v1577_v45  ;;  %v3722_v60 = vpop.f32.mrf.mxu0 }
 0x1e1   : > { %v4326_v1 = vpop.eup %4325  ;;  %v1581_v53 = vpop.f32.mrf.mxu1 }
 0x1e2   : > { %2199 = vst [vmem:[%s5193_s26 + $0x1c8] sm:$0xff] %v2120_v49  ;;  %2278 = vst.msk [vmem:[%s5197_s27 + $0x1c8] sm:$0xff] %vm502_vm1, %v2120_v49  ;;  %v2042_v10 = vadd.f32 1.0, %v4326_v1  ;;  %v1888_v52 = vmul.f32 0.70710677, %v1729_v19  ;;  %v1582_v57 = vadd.f32 %v1581_v53, %v1121_v17  ;;  %v1141_v63 = vpop.f32.mrf.mxu0  ;;  %v1808_v37 = vmul.f32 0.5, %v1729_v19 }
 0x1e3   : > { %v3982_v61 = vpop.f32.mrf.mxu1 }
 0x1e4   : > { %v2121_v32 = vmul.f32 %v2042_v10, %v1804_v56  ;;  %4333 = verf.f32 %v1888_v52  ;;  %v5717_v59 = vadd.f32 %v5577_v58, %v1582_v57  ;;  %v3725_v8 = vpop.f32.mrf.mxu0 }
 0x1e5   : > { %v4328_v62 = vpop.eup %4327  ;;  %v1586_v2 = vpop.f32.mrf.mxu1 }
 0x1e6   : > { %2200 = vst [vmem:[%s5193_s26 + $0x1d0] sm:$0xff] %v2121_v32  ;;  %2279 = vst.msk [vmem:[%s5197_s27 + $0x1d0] sm:$0xff] %vm502_vm1, %v2121_v32  ;;  %v2043_v0 = vadd.f32 1.0, %v4328_v62  ;;  %v1889_v4 = vmul.f32 0.70710677, %v5717_v59  ;;  %v1587_v6 = vadd.f32 %v1586_v2, %v1126_v28  ;;  %v1146_v12 = vpop.f32.mrf.mxu0  ;;  %v1809_v49 = vmul.f32 0.5, %v5717_v59 }
 0x1e7   : > { %v3985_v9 = vpop.f32.mrf.mxu1 }
 0x1e8   : > { %v2122_v11 = vmul.f32 %v2043_v0, %v1805_v3  ;;  %4335 = verf.f32 %v1889_v4  ;;  %v5724_v7 = vadd.f32 %v5577_v58, %v1587_v6  ;;  %v3728_v20 = vpop.f32.mrf.mxu0 }
 0x1e9   : > { %v4330_v43 = vpop.eup %4329  ;;  %v1591_v14 = vpop.f32.mrf.mxu1 }
 0x1ea   : > { %2201 = vst [vmem:[%s5193_s26 + $0x1d8] sm:$0xff] %v2122_v11  ;;  %2280 = vst.msk [vmem:[%s5197_s27 + $0x1d8] sm:$0xff] %vm502_vm1, %v2122_v11  ;;  %v2044_v13 = vadd.f32 1.0, %v4330_v43  ;;  %v1890_v16 = vmul.f32 0.70710677, %v5724_v7  ;;  %v1592_v17 = vadd.f32 %v1591_v14, %v1131_v39  ;;  %v1151_v54 = vpop.f32.mrf.mxu0  ;;  %v1810_v32 = vmul.f32 0.5, %v5724_v7 }
 0x1eb   : > { %v3988_v21 = vpop.f32.mrf.mxu1 }
 0x1ec   : > { %v2123_v22 = vmul.f32 %v2044_v13, %v1806_v15  ;;  %4337 = verf.f32 %v1890_v16  ;;  %v5731_v18 = vadd.f32 %v5577_v58, %v1592_v17  ;;  %v3731_v30 = vpop.f32.mrf.mxu0 }
 0x1ed   : > { %v4332_v23 = vpop.eup %4331  ;;  %v1596_v25 = vpop.f32.mrf.mxu1 }
 0x1ee   : > { %2202 = vst [vmem:[%s5193_s26 + $0x1e0] sm:$0xff] %v2123_v22  ;;  %2281 = vst.msk [vmem:[%s5197_s27 + $0x1e0] sm:$0xff] %vm502_vm1, %v2123_v22  ;;  %v2045_v24 = vadd.f32 1.0, %v4332_v23  ;;  %v1891_v27 = vmul.f32 0.70710677, %v5731_v18  ;;  %v1597_v28 = vadd.f32 %v1596_v25, %v1136_v50  ;;  %v1156_v5 = vpop.f32.mrf.mxu0  ;;  %v1811_v11 = vmul.f32 0.5, %v5731_v18 }
 0x1ef   : > { %v3991_v31 = vpop.f32.mrf.mxu1 }
 0x1f0   : > { %v2124_v33 = vmul.f32 %v2045_v24, %v1807_v26  ;;  %4339 = verf.f32 %v1891_v27  ;;  %v5738_v29 = vadd.f32 %v5577_v58, %v1597_v28  ;;  %v3734_v41 = vpop.f32.mrf.mxu0  ;;  %v5747_v58 = vld [vmem:[%s6253_s4] ss:$0 sm:$0xff] }
 0x1f1   : > { %v4334_v34 = vpop.eup %4333  ;;  %v1601_v36 = vpop.f32.mrf.mxu1 }
 0x1f2   : > { %2203 = vst [vmem:[%s5193_s26 + $0x1e8] sm:$0xff] %v2124_v33  ;;  %2282 = vst.msk [vmem:[%s5197_s27 + $0x1e8] sm:$0xff] %vm502_vm1, %v2124_v33  ;;  %v2046_v35 = vadd.f32 1.0, %v4334_v34  ;;  %v1892_v38 = vmul.f32 0.70710677, %v5738_v29  ;;  %v1602_v39 = vadd.f32 %v1601_v36, %v1141_v63  ;;  %v1161_v46 = vpop.f32.mrf.mxu0  ;;  %v1812_v22 = vmul.f32 0.5, %v5738_v29 }
 0x1f3   : > { %v3994_v42 = vpop.f32.mrf.mxu1 }
 0x1f4   : > { %v2125_v44 = vmul.f32 %v2046_v35, %v1808_v37  ;;  %4341 = verf.f32 %v1892_v38  ;;  %v1734_v40 = vadd.f32 %v5747_v58, %v1602_v39  ;;  %v3737_v53 = vpop.f32.mrf.mxu0 }
 0x1f5   : > { %v4336_v45 = vpop.eup %4335  ;;  %v1606_v48 = vpop.f32.mrf.mxu1 }
 0x1f6   : > { %2204 = vst [vmem:[%s5193_s26 + $0x1f0] sm:$0xff] %v2125_v44  ;;  %2283 = vst.msk [vmem:[%s5197_s27 + $0x1f0] sm:$0xff] %vm502_vm1, %v2125_v44  ;;  %v2047_v19 = vadd.f32 1.0, %v4336_v45  ;;  %v1893_v1 = vmul.f32 0.70710677, %v1734_v40  ;;  %v1607_v50 = vadd.f32 %v1606_v48, %v1146_v12  ;;  %v1166_v60 = vpop.f32.mrf.mxu0  ;;  %v1813_v33 = vmul.f32 0.5, %v1734_v40 }
 0x1f7   : > { %v3997_v56 = vpop.f32.mrf.mxu1 }
 0x1f8   : > { %v2126_v10 = vmul.f32 %v2047_v19, %v1809_v49  ;;  %4343 = verf.f32 %v1893_v1  ;;  %v1735_v52 = vadd.f32 %v5747_v58, %v1607_v50  ;;  %v3740_v2 = vpop.f32.mrf.mxu0 }
 0x1f9   : > { %v4338_v57 = vpop.eup %4337  ;;  %v1611_v61 = vpop.f32.mrf.mxu1 }
 0x1fa   : > { %2205 = vst [vmem:[%s5193_s26 + $0x1f8] sm:$0xff] %v2126_v10  ;;  %2284 = vst.msk [vmem:[%s5197_s27 + $0x1f8] sm:$0xff] %vm502_vm1, %v2126_v10  ;;  %v2048_v59 = vadd.f32 1.0, %v4338_v57  ;;  %v1894_v62 = vmul.f32 0.70710677, %v1735_v52  ;;  %v1612_v63 = vadd.f32 %v1611_v61, %v1151_v54  ;;  %v1171_v8 = vpop.f32.mrf.mxu0  ;;  %v1814_v44 = vmul.f32 0.5, %v1735_v52 }
 0x1fb   : > { %v4000_v3 = vpop.f32.mrf.mxu1 }
 0x1fc   : > { %v2127_v0 = vmul.f32 %v2048_v59, %v1810_v32  ;;  %4345 = verf.f32 %v1894_v62  ;;  %v1736_v4 = vadd.f32 %v5747_v58, %v1612_v63  ;;  %v3743_v14 = vpop.f32.mrf.mxu0 }
 0x1fd   : > { %v4340_v6 = vpop.eup %4339  ;;  %v1616_v9 = vpop.f32.mrf.mxu1 }
 0x1fe   : > { %2206 = vst [vmem:[%s5193_s26 + $0x200] sm:$0xff] %v2127_v0  ;;  %2285 = vst.msk [vmem:[%s5197_s27 + $0x200] sm:$0xff] %vm502_vm1, %v2127_v0  ;;  %v2049_v7 = vadd.f32 1.0, %v4340_v6  ;;  %v1895_v43 = vmul.f32 0.70710677, %v1736_v4  ;;  %v1617_v12 = vadd.f32 %v1616_v9, %v1156_v5  ;;  %v1176_v20 = vpop.f32.mrf.mxu0  ;;  %v1815_v10 = vmul.f32 0.5, %v1736_v4 }
 0x1ff   : > { %v4003_v15 = vpop.f32.mrf.mxu1 }
 0x200   : > { %v2128_v13 = vmul.f32 %v2049_v7, %v1811_v11  ;;  %4347 = verf.f32 %v1895_v43  ;;  %v1737_v16 = vadd.f32 %v5747_v58, %v1617_v12  ;;  %v3746_v25 = vpop.f32.mrf.mxu0 }
 0x201   : > { %v4342_v17 = vpop.eup %4341  ;;  %v1621_v21 = vpop.f32.mrf.mxu1 }
 0x202   : > { %2207 = vst [vmem:[%s5193_s26 + $0x208] sm:$0xff] %v2128_v13  ;;  %2286 = vst.msk [vmem:[%s5197_s27 + $0x208] sm:$0xff] %vm502_vm1, %v2128_v13  ;;  %v2050_v18 = vadd.f32 1.0, %v4342_v17  ;;  %v1896_v23 = vmul.f32 0.70710677, %v1737_v16  ;;  %v1622_v54 = vadd.f32 %v1621_v21, %v1161_v46  ;;  %v1181_v30 = vpop.f32.mrf.mxu0  ;;  %v1816_v0 = vmul.f32 0.5, %v1737_v16 }
 0x203   : > { %v4006_v26 = vpop.f32.mrf.mxu1 }
 0x204   : > { %v2129_v24 = vmul.f32 %v2050_v18, %v1812_v22  ;;  %4349 = verf.f32 %v1896_v23  ;;  %v1738_v27 = vadd.f32 %v5747_v58, %v1622_v54  ;;  %v3749_v36 = vpop.f32.mrf.mxu0 }
 0x205   : > { %v4344_v28 = vpop.eup %4343  ;;  %v1626_v31 = vpop.f32.mrf.mxu1 }
 0x206   : > { %2208 = vst [vmem:[%s5193_s26 + $0x210] sm:$0xff] %v2129_v24  ;;  %2287 = vst.msk [vmem:[%s5197_s27 + $0x210] sm:$0xff] %vm502_vm1, %v2129_v24  ;;  %v2051_v34 = vadd.f32 1.0, %v4344_v28  ;;  %v1897_v29 = vmul.f32 0.70710677, %v1738_v27  ;;  %v1627_v5 = vadd.f32 %v1626_v31, %v1166_v60  ;;  %v1186_v41 = vpop.f32.mrf.mxu0  ;;  %v1817_v13 = vmul.f32 0.5, %v1738_v27 }
 0x207   : > { %v4009_v37 = vpop.f32.mrf.mxu1 }
 0x208   : > { %v2130_v35 = vmul.f32 %v2051_v34, %v1813_v33  ;;  %4351 = verf.f32 %v1897_v29  ;;  %v5774_v38 = vadd.f32 %v5747_v58, %v1627_v5  ;;  %v3752_v48 = vpop.f32.mrf.mxu0 }
 0x209   : > { %v4346_v39 = vpop.eup %4345  ;;  %v1631_v42 = vpop.f32.mrf.mxu1 }
 0x20a   : > { %2209 = vst [vmem:[%s5193_s26 + $0x218] sm:$0xff] %v2130_v35  ;;  %2288 = vst.msk [vmem:[%s5197_s27 + $0x218] sm:$0xff] %vm502_vm1, %v2130_v35  ;;  %v2052_v40 = vadd.f32 1.0, %v4346_v39  ;;  %v1898_v45 = vmul.f32 0.70710677, %v5774_v38  ;;  %v1632_v46 = vadd.f32 %v1631_v42, %v1171_v8  ;;  %v1191_v53 = vpop.f32.mrf.mxu0  ;;  %v1818_v27 = vmul.f32 0.5, %v5774_v38 }
 0x20b   : > { %v4012_v49 = vpop.f32.mrf.mxu1 }
 0x20c   : > { %v2131_v19 = vmul.f32 %v2052_v40, %v1814_v44  ;;  %4353 = verf.f32 %v1898_v45  ;;  %v5781_v1 = vadd.f32 %v5747_v58, %v1632_v46  ;;  %v3755_v61 = vpop.f32.mrf.mxu0 }
 0x20d   : > { %v4348_v50 = vpop.eup %4347  ;;  %v1636_v56 = vpop.f32.mrf.mxu1 }
 0x20e   : > { %2210 = vst [vmem:[%s5193_s26 + $0x220] sm:$0xff] %v2131_v19  ;;  %2289 = vst.msk [vmem:[%s5197_s27 + $0x220] sm:$0xff] %vm502_vm1, %v2131_v19  ;;  %v2053_v52 = vadd.f32 1.0, %v4348_v50  ;;  %v1899_v57 = vmul.f32 0.70710677, %v5781_v1  ;;  %v1637_v60 = vadd.f32 %v1636_v56, %v1176_v20  ;;  %v1196_v2 = vpop.f32.mrf.mxu0 }
 0x20f   : > { %v4015_v32 = vpop.f32.mrf.mxu1 }
 0x210   : > { %v2132_v59 = vmul.f32 %v2053_v52, %v1815_v10  ;;  %4355 = verf.f32 %v1899_v57  ;;  %v5788_v62 = vadd.f32 %v5747_v58, %v1637_v60  ;;  %v3758_v9 = vpop.f32.mrf.mxu0 }
 0x211   : > { %v4350_v63 = vpop.eup %4349  ;;  %v1641_v3 = vpop.f32.mrf.mxu1 }
 0x212   : > { %2211 = vst [vmem:[%s5193_s26 + $0x228] sm:$0xff] %v2132_v59  ;;  %2290 = vst.msk [vmem:[%s5197_s27 + $0x228] sm:$0xff] %vm502_vm1, %v2132_v59  ;;  %v2054_v4 = vadd.f32 1.0, %v4350_v63  ;;  %v1900_v6 = vmul.f32 0.70710677, %v5788_v62  ;;  %v1642_v8 = vadd.f32 %v1641_v3, %v1181_v30  ;;  %v1266_v14 = vpop.f32.mrf.mxu0 }
 0x213   : > { %v4018_v11 = vpop.f32.mrf.mxu1  ;;  %v1267_v20 = vadd.f32 %v1266_v14, %v5063_v47 }
 0x214   : > { %v2133_v7 = vmul.f32 %v2054_v4, %v1816_v0  ;;  %4357 = verf.f32 %v1900_v6  ;;  %v5795_v43 = vadd.f32 %v5747_v58, %v1642_v8  ;;  %v3793_v22 = vpop.f32.mrf.mxu0 }
 0x215   : > { %v4352_v12 = vpop.eup %4351  ;;  %v1646_v15 = vpop.f32.mrf.mxu1  ;;  %v1667_v54 = vadd.f32 %v5747_v58, %v1267_v20 }
 0x216   : > { %2212 = vst [vmem:[%s5193_s26 + $0x230] sm:$0xff] %v2133_v7  ;;  %2291 = vst.msk [vmem:[%s5197_s27 + $0x230] sm:$0xff] %vm502_vm1, %v2133_v7  ;;  %v2055_v16 = vadd.f32 1.0, %v4352_v12  ;;  %v1901_v17 = vmul.f32 0.70710677, %v5795_v43  ;;  %v1647_v21 = vadd.f32 %v1646_v15, %v1186_v41  ;;  %v1271_v24 = vpop.f32.mrf.mxu0 }
 0x217   : > { %v4021_v18 = vpop.f32.mrf.mxu1  ;;  %v1826_v47 = vmul.f32 0.70710677, %v1667_v54  ;;  %v1272_v31 = vadd.f32 %v1271_v24, %v5072_v51  ;;  %v1819_v51 = vmul.f32 0.5, %v5781_v1  ;;  %v1746_v63 = vmul.f32 0.5, %v1667_v54 }
 0x218   : > { %v2134_v23 = vmul.f32 %v2055_v16, %v1817_v13  ;;  %4359 = verf.f32 %v1901_v17  ;;  %v1743_v26 = vadd.f32 %v5747_v58, %v1647_v21  ;;  %v3796_v29 = vpop.f32.mrf.mxu0 }
 0x219   : > { %v4354_v25 = vpop.eup %4353  ;;  %v1651_v28 = vpop.f32.mrf.mxu1  ;;  %4361 = verf.f32 %v1826_v47  ;;  %v1668_v37 = vadd.f32 %v5747_v58, %v1272_v31 }
 0x21a   : > { %2213 = vst [vmem:[%s5193_s26 + $0x238] sm:$0xff] %v2134_v23  ;;  %2292 = vst.msk [vmem:[%s5197_s27 + $0x238] sm:$0xff] %vm502_vm1, %v2134_v23  ;;  %v2056_v30 = vadd.f32 1.0, %v4354_v25  ;;  %v1902_v33 = vmul.f32 0.70710677, %v1743_v26  ;;  %v1652_v34 = vadd.f32 %v1651_v28, %v1191_v53  ;;  %v1276_v41 = vpop.f32.mrf.mxu0  ;;  %v1822_v3 = vmul.f32 0.5, %v1743_v26 }
 0x21b   : > { %v4024_v5 = vpop.f32.mrf.mxu1  ;;  %v1827_v44 = vmul.f32 0.70710677, %v1668_v37  ;;  %v1277_v40 = vadd.f32 %v1276_v41, %v5081_v55  ;;  %v1820_v55 = vmul.f32 0.5, %v5788_v62  ;;  %v1747_v11 = vmul.f32 0.5, %v1668_v37 }
 0x21c   : > { %v2135_v36 = vmul.f32 %v2056_v30, %v1818_v27  ;;  %4363 = verf.f32 %v1902_v33  ;;  %v1744_v39 = vadd.f32 %v5747_v58, %v1652_v34  ;;  %v3799_v48 = vpop.f32.mrf.mxu0 }
 0x21d   : > { %v4356_v35 = vpop.eup %4355  ;;  %v1656_v38 = vpop.f32.mrf.mxu1  ;;  %4365 = verf.f32 %v1827_v44  ;;  %v1669_v50 = vadd.f32 %v5747_v58, %v1277_v40 }
 0x21e   : > { %2214 = vst [vmem:[%s5193_s26 + $0x240] sm:$0xff] %v2135_v36  ;;  %2293 = vst.msk [vmem:[%s5197_s27 + $0x240] sm:$0xff] %vm502_vm1, %v2135_v36  ;;  %v2057_v42 = vadd.f32 1.0, %v4356_v35  ;;  %v1903_v45 = vmul.f32 0.70710677, %v1744_v39  ;;  %v1657_v46 = vadd.f32 %v1656_v38, %v1196_v2 }
 0x21f   : > { %v4027_v49 = vpop.f32.mrf.mxu1  ;;  %v1828_v10 = vmul.f32 0.70710677, %v1669_v50  ;;  %v1748_v17 = vmul.f32 0.5, %v1669_v50 }
 0x220   : > { %v2136_v19 = vmul.f32 %v2057_v42, %v1819_v51  ;;  %4367 = verf.f32 %v1903_v45  ;;  %v1745_v56 = vadd.f32 %v5747_v58, %v1657_v46  ;;  %v1821_v58 = vmul.f32 0.5, %v5795_v43 }
 0x221   : > { %v4358_v53 = vpop.eup %4357  ;;  %4369 = verf.f32 %v1828_v10  ;;  %v1823_v43 = vmul.f32 0.5, %v1744_v39 }
 0x222   : > { %2215 = vst [vmem:[%s5193_s26 + $0x248] sm:$0xff] %v2136_v19  ;;  %2294 = vst.msk [vmem:[%s5197_s27 + $0x248] sm:$0xff] %vm502_vm1, %v2136_v19  ;;  %v2058_v1 = vadd.f32 1.0, %v4358_v53  ;;  %v1904_v52 = vmul.f32 0.70710677, %v1745_v56  ;;  %v1824_v21 = vmul.f32 0.5, %v1745_v56 }
 0x224   : > { %v2137_v57 = vmul.f32 %v2058_v1, %v1820_v55  ;;  %4371 = verf.f32 %v1904_v52 }
 0x225   : > { %v4360_v60 = vpop.eup %4359 }
 0x226   : > { %2216 = vst [vmem:[%s5193_s26 + $0x250] sm:$0xff] %v2137_v57  ;;  %2295 = vst.msk [vmem:[%s5197_s27 + $0x250] sm:$0xff] %vm502_vm1, %v2137_v57  ;;  %v2059_v61 = vadd.f32 1.0, %v4360_v60  ;;  %v4362_v59 = vpop.eup %4361 }
 0x227   : > { %v1984_v2 = vadd.f32 1.0, %v4362_v59 }
 0x228   : > { %v2138_v32 = vmul.f32 %v2059_v61, %v1821_v58 }
 0x229   : > { %v4364_v62 = vpop.eup %4363  ;;  %v2063_v4 = vmul.f32 %v1984_v2, %v1746_v63 }
 0x22a   : > { %2217 = vst [vmem:[%s5193_s26 + $0x258] sm:$0xff] %v2138_v32  ;;  %2296 = vst.msk [vmem:[%s5197_s27 + $0x258] sm:$0xff] %vm502_vm1, %v2138_v32  ;;  %v2060_v0 = vadd.f32 1.0, %v4364_v62  ;;  %v4366_v6 = vpop.eup %4365 }
 0x22b   : > { %2142 = vst [vmem:[%s5193_s26] sm:$0xff] %v2063_v4  ;;  %2221 = vst.msk [vmem:[%s5197_s27] sm:$0xff] %vm502_vm1, %v2063_v4  ;;  %v1985_v7 = vadd.f32 1.0, %v4366_v6 }
 0x22c   : > { %v2139_v8 = vmul.f32 %v2060_v0, %v1822_v3 }
 0x22d   : > { %v4368_v9 = vpop.eup %4367  ;;  %v2064_v14 = vmul.f32 %v1985_v7, %v1747_v11 }
 0x22e   : > { %2218 = vst [vmem:[%s5193_s26 + $0x260] sm:$0xff] %v2139_v8  ;;  %2297 = vst.msk [vmem:[%s5197_s27 + $0x260] sm:$0xff] %vm502_vm1, %v2139_v8  ;;  %v2061_v12 = vadd.f32 1.0, %v4368_v9  ;;  %v4370_v15 = vpop.eup %4369 }
 0x22f   : > { %2143 = vst [vmem:[%s5193_s26 + $0x8] sm:$0xff] %v2064_v14  ;;  %2222 = vst.msk [vmem:[%s5197_s27 + $0x8] sm:$0xff] %vm502_vm1, %v2064_v14  ;;  %v1986_v20 = vadd.f32 1.0, %v4370_v15 }
 0x230   : > { %v2140_v13 = vmul.f32 %v2061_v12, %v1823_v43 }
 0x231   : > { %v4372_v16 = vpop.eup %4371  ;;  %v2065_v18 = vmul.f32 %v1986_v20, %v1748_v17 }
 0x232   : > { %2219 = vst [vmem:[%s5193_s26 + $0x268] sm:$0xff] %v2140_v13  ;;  %2298 = vst.msk [vmem:[%s5197_s27 + $0x268] sm:$0xff] %vm502_vm1, %v2140_v13  ;;  %v2062_v22 = vadd.f32 1.0, %v4372_v16  ;;  %2310 = sbr.rel (!%p4589_p4) target bundleno = 631 (0x277), region = 44 }
 0x233   : > { %2144 = vst [vmem:[%s5193_s26 + $0x10] sm:$0xff] %v2065_v18  ;;  %2223 = vst.msk [vmem:[%s5197_s27 + $0x10] sm:$0xff] %vm502_vm1, %v2065_v18 }
 0x234   : > { %v2141_v23 = vmul.f32 %v2062_v22, %v1824_v21 }
 0x236   : > { %2220 = vst [vmem:[%s5193_s26 + $0x270] sm:$0xff] %v2141_v23  ;;  %2299 = vst.msk [vmem:[%s5197_s27 + $0x270] sm:$0xff] %vm502_vm1, %v2141_v23 }
 0x237   : > { %s6271_s10 = smov (!%p2313_p8, %s2312_s10), 79 }
 0x238   : > { %s3311_s16 = sshll.u32 %s6271_s10, 7 }
 0x239   : > { %p3314_p9 = scmp.eq.s32.totalorder %s3311_s16, 0 }
 0x23a   : > { %s5860_s17 = sshrl.u32 (!%p3314_p9), %s6271_s10, 6 }
 0x23b   : > { %2321 = sbr.rel (%p3314_p9) target bundleno = 631 (0x277), region = 48  ;;  %p3315_p10 = scmp.le.s32.totalorder (!%p3314_p9), %s5860_s17, 0 }
 0x240   : > { %3138 = sbr.rel (%p3315_p10) target bundleno = 614 (0x266), region = 199  ;;  %s6257_s19 = smov (!%p3315_p10), %s5854_s14 }
 0x241   : > { %s6258_s15 = smov (!%p3315_p10), %s5193_s26  ;;  %s5869_s18 = smov (!%p3315_p10), 0  }
 0x242   : > { %s5871_s20 = smov (!%p3315_p10), 0  }
 0x245 LB: >> { %v2510_v54 = vld [vmem:[%s4469_s15] sm:$0xff]  ;;  %v2512_v25 = vld [vmem:[%s4469_s15 + $0x8] sm:$0xff]  ;;  %v2514_v26 = vld [vmem:[%s4469_s15 + $0x10] sm:$0xff]  ;;  %s2638_s21 = sadd.s32 1, %s4473_s18  ;;  %s2504_s20 = sadd.s32 1, %s4477_s20   ;;  %s4477_s20 = sphi %s5871_s20, %s2504_s20   ;;  %s4473_s18 = sphi %s5869_s18, %s6261_s18   ;;  %s4469_s15 = sphi %s6258_s15, %s6260_s15   ;;  %s4465_s19 = sphi %s6257_s19, %s6259_s19  }
 0x246   : >> { %2511 = vst [vmem:[%s4465_s19] sm:$0xff] %v2510_v54  ;;  %2513 = vst [vmem:[%s4465_s19 + $0x8] sm:$0xff] %v2512_v25  ;;  %v2516_v24 = vld [vmem:[%s4469_s15 + $0x18] sm:$0xff]  ;;  %v2518_v28 = vld [vmem:[%s4469_s15 + $0x20] sm:$0xff]  ;;  %p2639_p11 = scmp.ge.s32.totalorder %s2638_s21, %s5860_s17  ;;  %p2503_p12 = scmp.ge.s32.totalorder %s2504_s20, %s5860_s17 }
 0x247   : >> { %2515 = vst [vmem:[%s4465_s19 + $0x10] sm:$0xff] %v2514_v26  ;;  %v2520_v27 = vld [vmem:[%s4469_s15 + $0x28] sm:$0xff]  ;;  %2517 = vst [vmem:[%s4465_s19 + $0x18] sm:$0xff] %v2516_v24  ;;  %v2522_v30 = vld [vmem:[%s4469_s15 + $0x30] sm:$0xff] }
 0x248   : >> { %2519 = vst [vmem:[%s4465_s19 + $0x20] sm:$0xff] %v2518_v28  ;;  %2521 = vst [vmem:[%s4465_s19 + $0x28] sm:$0xff] %v2520_v27  ;;  %v2524_v47 = vld [vmem:[%s4469_s15 + $0x38] sm:$0xff]  ;;  %v2526_v31 = vld [vmem:[%s4469_s15 + $0x40] sm:$0xff]  ;;  %s6273_s21 = smov (%p2639_p11, %s2638_s21), 0 }
 0x249   : >> { %2523 = vst [vmem:[%s4465_s19 + $0x30] sm:$0xff] %v2522_v30  ;;  %2525 = vst [vmem:[%s4465_s19 + $0x38] sm:$0xff] %v2524_v47  ;;  %v2528_v33 = vld [vmem:[%s4469_s15 + $0x48] sm:$0xff]  ;;  %v2530_v34 = vld [vmem:[%s4469_s15 + $0x50] sm:$0xff]  ;;  %s3316_s23 = sshll.u32 %s6273_s21, 9  ;;  %s6261_s18 = smov %s6273_s21 }
 0x24a   : >> { %2527 = vst [vmem:[%s4465_s19 + $0x40] sm:$0xff] %v2526_v31  ;;  %v2532_v29 = vld [vmem:[%s4469_s15 + $0x58] sm:$0xff]  ;;  %2529 = vst [vmem:[%s4465_s19 + $0x48] sm:$0xff] %v2528_v33  ;;  %v2534_v5 = vld [vmem:[%s4469_s15 + $0x60] sm:$0xff]  ;;  %s5927_s30 = scalar_lea.vmem %s5193_s26, %s3316_s23 [#allocation2]   ;;  %s5930_s7 = scalar_lea.vmem %s5854_s14, %s3316_s23  }
 0x24b   : >> { %2531 = vst [vmem:[%s4465_s19 + $0x50] sm:$0xff] %v2530_v34  ;;  %2533 = vst [vmem:[%s4465_s19 + $0x58] sm:$0xff] %v2532_v29  ;;  %v2536_v36 = vld [vmem:[%s4469_s15 + $0x68] sm:$0xff]  ;;  %v2538_v37 = vld [vmem:[%s4469_s15 + $0x70] sm:$0xff] }
 0x24c   : >> { %2535 = vst [vmem:[%s4465_s19 + $0x60] sm:$0xff] %v2534_v5  ;;  %2537 = vst [vmem:[%s4465_s19 + $0x68] sm:$0xff] %v2536_v36  ;;  %v2540_v35 = vld [vmem:[%s4469_s15 + $0x78] sm:$0xff]  ;;  %v2542_v39 = vld [vmem:[%s4469_s15 + $0x80] sm:$0xff] }
 0x24d   : >> { %2539 = vst [vmem:[%s4465_s19 + $0x70] sm:$0xff] %v2538_v37  ;;  %v2544_v41 = vld [vmem:[%s4469_s15 + $0x88] sm:$0xff]  ;;  %2541 = vst [vmem:[%s4465_s19 + $0x78] sm:$0xff] %v2540_v35  ;;  %v2546_v38 = vld [vmem:[%s4469_s15 + $0x90] sm:$0xff] }
 0x24e   : >> { %2543 = vst [vmem:[%s4465_s19 + $0x80] sm:$0xff] %v2542_v39  ;;  %2545 = vst [vmem:[%s4465_s19 + $0x88] sm:$0xff] %v2544_v41  ;;  %v2548_v51 = vld [vmem:[%s4469_s15 + $0x98] sm:$0xff]  ;;  %v2550_v42 = vld [vmem:[%s4469_s15 + $0xa0] sm:$0xff] }
 0x24f   : >> { %2547 = vst [vmem:[%s4465_s19 + $0x90] sm:$0xff] %v2546_v38  ;;  %2549 = vst [vmem:[%s4465_s19 + $0x98] sm:$0xff] %v2548_v51  ;;  %v2552_v44 = vld [vmem:[%s4469_s15 + $0xa8] sm:$0xff]  ;;  %v2554_v40 = vld [vmem:[%s4469_s15 + $0xb0] sm:$0xff] }
 0x250   : >> { %2551 = vst [vmem:[%s4465_s19 + $0xa0] sm:$0xff] %v2550_v42  ;;  %v2556_v45 = vld [vmem:[%s4469_s15 + $0xb8] sm:$0xff]  ;;  %2553 = vst [vmem:[%s4465_s19 + $0xa8] sm:$0xff] %v2552_v44  ;;  %v2558_v46 = vld [vmem:[%s4469_s15 + $0xc0] sm:$0xff] }
 0x251   : >> { %2555 = vst [vmem:[%s4465_s19 + $0xb0] sm:$0xff] %v2554_v40  ;;  %2557 = vst [vmem:[%s4465_s19 + $0xb8] sm:$0xff] %v2556_v45  ;;  %v2560_v48 = vld [vmem:[%s4469_s15 + $0xc8] sm:$0xff]  ;;  %v2562_v49 = vld [vmem:[%s4469_s15 + $0xd0] sm:$0xff] }
 0x252   : >> { %2559 = vst [vmem:[%s4465_s19 + $0xc0] sm:$0xff] %v2558_v46  ;;  %2561 = vst [vmem:[%s4465_s19 + $0xc8] sm:$0xff] %v2560_v48  ;;  %v2564_v19 = vld [vmem:[%s4469_s15 + $0xd8] sm:$0xff]  ;;  %v2566_v50 = vld [vmem:[%s4469_s15 + $0xe0] sm:$0xff] }
 0x253   : >> { %2563 = vst [vmem:[%s4465_s19 + $0xd0] sm:$0xff] %v2562_v49  ;;  %v2568_v53 = vld [vmem:[%s4469_s15 + $0xe8] sm:$0xff]  ;;  %2565 = vst [vmem:[%s4465_s19 + $0xd8] sm:$0xff] %v2564_v19  ;;  %v2570_v56 = vld [vmem:[%s4469_s15 + $0xf0] sm:$0xff] }
 0x254   : >> { %2567 = vst [vmem:[%s4465_s19 + $0xe0] sm:$0xff] %v2566_v50  ;;  %2569 = vst [vmem:[%s4465_s19 + $0xe8] sm:$0xff] %v2568_v53  ;;  %v2572_v55 = vld [vmem:[%s4469_s15 + $0xf8] sm:$0xff]  ;;  %v2574_v1 = vld [vmem:[%s4469_s15 + $0x100] sm:$0xff] }
 0x255   : >> { %2571 = vst [vmem:[%s4465_s19 + $0xf0] sm:$0xff] %v2570_v56  ;;  %2573 = vst [vmem:[%s4465_s19 + $0xf8] sm:$0xff] %v2572_v55  ;;  %v2576_v10 = vld [vmem:[%s4469_s15 + $0x108] sm:$0xff]  ;;  %v2578_v52 = vld [vmem:[%s4469_s15 + $0x110] sm:$0xff] }
 0x256   : >> { %2575 = vst [vmem:[%s4465_s19 + $0x100] sm:$0xff] %v2574_v1  ;;  %v2580_v57 = vld [vmem:[%s4469_s15 + $0x118] sm:$0xff]  ;;  %2577 = vst [vmem:[%s4465_s19 + $0x108] sm:$0xff] %v2576_v10  ;;  %v2582_v60 = vld [vmem:[%s4469_s15 + $0x120] sm:$0xff] }
 0x257   : >> { %2579 = vst [vmem:[%s4465_s19 + $0x110] sm:$0xff] %v2578_v52  ;;  %2581 = vst [vmem:[%s4465_s19 + $0x118] sm:$0xff] %v2580_v57  ;;  %v2584_v58 = vld [vmem:[%s4469_s15 + $0x128] sm:$0xff]  ;;  %v2586_v61 = vld [vmem:[%s4469_s15 + $0x130] sm:$0xff] }
 0x258   : >> { %2583 = vst [vmem:[%s4465_s19 + $0x120] sm:$0xff] %v2582_v60  ;;  %2585 = vst [vmem:[%s4465_s19 + $0x128] sm:$0xff] %v2584_v58  ;;  %v2588_v32 = vld [vmem:[%s4469_s15 + $0x138] sm:$0xff]  ;;  %v2590_v59 = vld [vmem:[%s4469_s15 + $0x140] sm:$0xff] }
 0x259   : >> { %2587 = vst [vmem:[%s4465_s19 + $0x130] sm:$0xff] %v2586_v61  ;;  %v2592_v62 = vld [vmem:[%s4469_s15 + $0x148] sm:$0xff]  ;;  %2589 = vst [vmem:[%s4465_s19 + $0x138] sm:$0xff] %v2588_v32  ;;  %v2594_v63 = vld [vmem:[%s4469_s15 + $0x150] sm:$0xff] }
 0x25a   : >> { %2591 = vst [vmem:[%s4465_s19 + $0x140] sm:$0xff] %v2590_v59  ;;  %2593 = vst [vmem:[%s4465_s19 + $0x148] sm:$0xff] %v2592_v62  ;;  %v2596_v2 = vld [vmem:[%s4469_s15 + $0x158] sm:$0xff]  ;;  %v2598_v3 = vld [vmem:[%s4469_s15 + $0x160] sm:$0xff] }
 0x25b   : >> { %2595 = vst [vmem:[%s4465_s19 + $0x150] sm:$0xff] %v2594_v63  ;;  %2597 = vst [vmem:[%s4465_s19 + $0x158] sm:$0xff] %v2596_v2  ;;  %v2600_v0 = vld [vmem:[%s4469_s15 + $0x168] sm:$0xff]  ;;  %v2602_v4 = vld [vmem:[%s4469_s15 + $0x170] sm:$0xff] }
 0x25c   : >> { %2599 = vst [vmem:[%s4465_s19 + $0x160] sm:$0xff] %v2598_v3  ;;  %v2604_v6 = vld [vmem:[%s4469_s15 + $0x178] sm:$0xff]  ;;  %2601 = vst [vmem:[%s4465_s19 + $0x168] sm:$0xff] %v2600_v0  ;;  %v2606_v8 = vld [vmem:[%s4469_s15 + $0x180] sm:$0xff] }
 0x25d   : >> { %2603 = vst [vmem:[%s4465_s19 + $0x170] sm:$0xff] %v2602_v4  ;;  %2605 = vst [vmem:[%s4465_s19 + $0x178] sm:$0xff] %v2604_v6  ;;  %v2608_v9 = vld [vmem:[%s4469_s15 + $0x188] sm:$0xff]  ;;  %v2610_v11 = vld [vmem:[%s4469_s15 + $0x190] sm:$0xff] }
 0x25e   : >> { %2607 = vst [vmem:[%s4465_s19 + $0x180] sm:$0xff] %v2606_v8  ;;  %2609 = vst [vmem:[%s4465_s19 + $0x188] sm:$0xff] %v2608_v9  ;;  %v2612_v7 = vld [vmem:[%s4469_s15 + $0x198] sm:$0xff]  ;;  %v2614_v43 = vld [vmem:[%s4469_s15 + $0x1a0] sm:$0xff] }
 0x25f   : >> { %2611 = vst [vmem:[%s4465_s19 + $0x190] sm:$0xff] %v2610_v11  ;;  %v2616_v12 = vld [vmem:[%s4469_s15 + $0x1a8] sm:$0xff]  ;;  %2613 = vst [vmem:[%s4465_s19 + $0x198] sm:$0xff] %v2612_v7  ;;  %v2618_v14 = vld [vmem:[%s4469_s15 + $0x1b0] sm:$0xff] }
 0x260   : >> { %2615 = vst [vmem:[%s4465_s19 + $0x1a0] sm:$0xff] %v2614_v43  ;;  %2617 = vst [vmem:[%s4465_s19 + $0x1a8] sm:$0xff] %v2616_v12  ;;  %v2620_v15 = vld [vmem:[%s4469_s15 + $0x1b8] sm:$0xff]  ;;  %v2622_v13 = vld [vmem:[%s4469_s15 + $0x1c0] sm:$0xff] }
 0x261   : >> { %2619 = vst [vmem:[%s4465_s19 + $0x1b0] sm:$0xff] %v2618_v14  ;;  %2621 = vst [vmem:[%s4465_s19 + $0x1b8] sm:$0xff] %v2620_v15  ;;  %v2624_v16 = vld [vmem:[%s4469_s15 + $0x1c8] sm:$0xff]  ;;  %v2626_v17 = vld [vmem:[%s4469_s15 + $0x1d0] sm:$0xff]  ;;  %2506 = sbr.rel (!%p2503_p12) target bundleno = 581 (0x245), region = 205 }
 0x262   : >> { %2623 = vst [vmem:[%s4465_s19 + $0x1c0] sm:$0xff] %v2622_v13  ;;  %v2628_v20 = vld [vmem:[%s4469_s15 + $0x1d8] sm:$0xff]  ;;  %2625 = vst [vmem:[%s4465_s19 + $0x1c8] sm:$0xff] %v2624_v16  ;;  %v2630_v21 = vld [vmem:[%s4469_s15 + $0x1e0] sm:$0xff] }
 0x263   : >> { %2627 = vst [vmem:[%s4465_s19 + $0x1d0] sm:$0xff] %v2626_v17  ;;  %2629 = vst [vmem:[%s4465_s19 + $0x1d8] sm:$0xff] %v2628_v20  ;;  %v2632_v22 = vld [vmem:[%s4469_s15 + $0x1e8] sm:$0xff]  ;;  %v2634_v18 = vld [vmem:[%s4469_s15 + $0x1f0] sm:$0xff] }
 0x264   : >> { %2631 = vst [vmem:[%s4465_s19 + $0x1e0] sm:$0xff] %v2630_v21  ;;  %2633 = vst [vmem:[%s4465_s19 + $0x1e8] sm:$0xff] %v2632_v22  ;;  %v2636_v23 = vld [vmem:[%s4469_s15 + $0x1f8] sm:$0xff]  ;;  %s6260_s15 = smov %s5927_s30 }
 0x265   : >> { %2635 = vst [vmem:[%s4465_s19 + $0x1f0] sm:$0xff] %v2634_v18  ;;  %2637 = vst [vmem:[%s4465_s19 + $0x1f8] sm:$0xff] %v2636_v23  ;;  %s6259_s19 = smov %s5930_s7 }
 0x266 PF: > { %s6035_s9 = sand.u32 63, %s6271_s10   ;;  %s3340_s11 = sshll.u32 %s5860_s17, 9 }
 0x267   : > { %s2649_s12 = scalar_lea.vmem %s5193_s26, %s3340_s11 [#allocation2]   ;;  %s2651_s13 = scalar_lea.vmem %s5854_s14, %s3340_s11  }
 0x268   : > { %p3321_p13 = scmp.le.s32.totalorder %s6035_s9, 0 }
 0x269   : > { %s4479_s16 = smov (!%p3321_p13), %s2651_s13   ;;  %s4483_s23 = smov (!%p3321_p13), %s2649_s12  }
 0x26a   : > { %3152 = sbr.rel (%p3321_p13) target bundleno = 631 (0x277), region = 210  ;;  %s4487_s30 = smov (!%p3321_p13), 0  }
 0x26b   : > { %s4491_s21 = smov (!%p3321_p13), 0  }
 0x26f LB: >> { %v2661_v54 = vld [vmem:[%s4485_s23] sm:$0xff]  ;;  %s2663_s10 = sadd.s32 1, %s4489_s30  ;;  %s2655_s21 = sadd.s32 1, %s4493_s21   ;;  %s4493_s21 = sphi %s4491_s21, %s2655_s21   ;;  %s4489_s30 = sphi %s4487_s30, %s4488_s30   ;;  %s4485_s23 = sphi %s4483_s23, %s2668_s23   ;;  %s4481_s16 = sphi %s4479_s16, %s2669_s16  }
 0x270   : >> { %2662 = vst [vmem:[%s4481_s16] sm:$0xff] %v2661_v54  ;;  %p2664_p0 = scmp.ge.s32.totalorder %s2663_s10, %s6035_s9  ;;  %p2654_p1 = scmp.ge.s32.totalorder %s2655_s21, %s6035_s9 }
 0x272   : >> { %s6275_s10 = smov (%p2664_p0, %s2663_s10), 0  ;;  %2657 = sbr.rel (!%p2654_p1) target bundleno = 623 (0x26f), region = 216 }
 0x273   : >> { %s3322_s26 = sshll.u32 %s6275_s10, 3  ;;  %s4488_s30 = smov %s6275_s10  }
 0x274   : >> { %s2668_s23 = scalar_lea.vmem %s2649_s12, %s3322_s26 [#allocation2]   ;;  %s2669_s16 = scalar_lea.vmem %s2651_s13, %s3322_s26  }
 0x277 PF: > { %2675 = sbr.rel (!%p4589_p4) target bundleno = 700 (0x2bc), region = 96  ;;  %s2677_s14 = ssub.s32 (%p4589_p4), 157, %s4597_s8 }
 0x278   : > { %s3342_s17 = smul.u32 (%p4589_p4), 632, %s4577_s24  ;;  %p2678_p2 = scmp.lt.s32.totalorder (%p4589_p4), %s2677_s14, 79 }
 0x27a   : > { %s6050_s18 = scalar_lea.vmem (%p4589_p4), %s6255_s6, %s3342_s17  }
 0x27c   : > { %s6277_s14 = smov (!%p2678_p2, %s2677_s14), 79 }
 0x27d   : > { %s3324_s20 = sshll.u32 %s6277_s14, 7 }
 0x27e   : > { %p3327_p3 = scmp.eq.s32.totalorder %s3324_s20, 0 }
 0x27f   : > { %s6056_s7 = sshrl.u32 (!%p3327_p3), %s6277_s14, 6 }
 0x280   : > { %2686 = sbr.rel (%p3327_p3) target bundleno = 700 (0x2bc), region = 100  ;;  %p3328_p4 = scmp.le.s32.totalorder (!%p3327_p3), %s6056_s7, 0 }
 0x285   : > { %3166 = sbr.rel (%p3328_p4) target bundleno = 683 (0x2ab), region = 221  ;;  %s6262_s24 = smov (!%p3328_p4), %s6050_s18 }
 0x286   : > { %s6263_s29 = smov (!%p3328_p4), %s5197_s27  ;;  %s6065_s8 = smov (!%p3328_p4), 0  }
 0x287   : > { %s6067_s9 = smov (!%p3328_p4), 0  }
 0x28a LB: >> { %v2875_v25 = vld [vmem:[%s4501_s29] sm:$0xff]  ;;  %v2877_v26 = vld [vmem:[%s4501_s29 + $0x8] sm:$0xff]  ;;  %v2879_v24 = vld [vmem:[%s4501_s29 + $0x10] sm:$0xff]  ;;  %s3003_s11 = sadd.s32 1, %s4505_s8  ;;  %s2869_s9 = sadd.s32 1, %s4509_s9   ;;  %s4509_s9 = sphi %s6067_s9, %s2869_s9   ;;  %s4505_s8 = sphi %s6065_s8, %s6266_s8   ;;  %s4501_s29 = sphi %s6263_s29, %s6265_s29   ;;  %s4497_s24 = sphi %s6262_s24, %s6264_s24  }
 0x28b   : >> { %2876 = vst [vmem:[%s4497_s24] sm:$0xff] %v2875_v25  ;;  %2878 = vst [vmem:[%s4497_s24 + $0x8] sm:$0xff] %v2877_v26  ;;  %v2881_v28 = vld [vmem:[%s4501_s29 + $0x18] sm:$0xff]  ;;  %v2883_v27 = vld [vmem:[%s4501_s29 + $0x20] sm:$0xff]  ;;  %p3004_p5 = scmp.ge.s32.totalorder %s3003_s11, %s6056_s7  ;;  %p2868_p6 = scmp.ge.s32.totalorder %s2869_s9, %s6056_s7 }
 0x28c   : >> { %2880 = vst [vmem:[%s4497_s24 + $0x10] sm:$0xff] %v2879_v24  ;;  %v2885_v30 = vld [vmem:[%s4501_s29 + $0x28] sm:$0xff]  ;;  %2882 = vst [vmem:[%s4497_s24 + $0x18] sm:$0xff] %v2881_v28  ;;  %v2887_v47 = vld [vmem:[%s4501_s29 + $0x30] sm:$0xff] }
 0x28d   : >> { %2884 = vst [vmem:[%s4497_s24 + $0x20] sm:$0xff] %v2883_v27  ;;  %2886 = vst [vmem:[%s4497_s24 + $0x28] sm:$0xff] %v2885_v30  ;;  %v2889_v31 = vld [vmem:[%s4501_s29 + $0x38] sm:$0xff]  ;;  %v2891_v33 = vld [vmem:[%s4501_s29 + $0x40] sm:$0xff]  ;;  %s6279_s11 = smov (%p3004_p5, %s3003_s11), 0 }
 0x28e   : >> { %2888 = vst [vmem:[%s4497_s24 + $0x30] sm:$0xff] %v2887_v47  ;;  %2890 = vst [vmem:[%s4497_s24 + $0x38] sm:$0xff] %v2889_v31  ;;  %v2893_v34 = vld [vmem:[%s4501_s29 + $0x48] sm:$0xff]  ;;  %v2895_v29 = vld [vmem:[%s4501_s29 + $0x50] sm:$0xff]  ;;  %s3329_s12 = sshll.u32 %s6279_s11, 9  ;;  %s6266_s8 = smov %s6279_s11 }
 0x28f   : >> { %2892 = vst [vmem:[%s4497_s24 + $0x40] sm:$0xff] %v2891_v33  ;;  %v2897_v5 = vld [vmem:[%s4501_s29 + $0x58] sm:$0xff]  ;;  %2894 = vst [vmem:[%s4497_s24 + $0x48] sm:$0xff] %v2893_v34  ;;  %v2899_v36 = vld [vmem:[%s4501_s29 + $0x60] sm:$0xff]  ;;  %s6123_s13 = scalar_lea.vmem %s5197_s27, %s3329_s12 [#allocation3]   ;;  %s6126_s16 = scalar_lea.vmem %s6050_s18, %s3329_s12  }
 0x290   : >> { %2896 = vst [vmem:[%s4497_s24 + $0x50] sm:$0xff] %v2895_v29  ;;  %2898 = vst [vmem:[%s4497_s24 + $0x58] sm:$0xff] %v2897_v5  ;;  %v2901_v37 = vld [vmem:[%s4501_s29 + $0x68] sm:$0xff]  ;;  %v2903_v35 = vld [vmem:[%s4501_s29 + $0x70] sm:$0xff] }
 0x291   : >> { %2900 = vst [vmem:[%s4497_s24 + $0x60] sm:$0xff] %v2899_v36  ;;  %2902 = vst [vmem:[%s4497_s24 + $0x68] sm:$0xff] %v2901_v37  ;;  %v2905_v39 = vld [vmem:[%s4501_s29 + $0x78] sm:$0xff]  ;;  %v2907_v41 = vld [vmem:[%s4501_s29 + $0x80] sm:$0xff] }
 0x292   : >> { %2904 = vst [vmem:[%s4497_s24 + $0x70] sm:$0xff] %v2903_v35  ;;  %v2909_v38 = vld [vmem:[%s4501_s29 + $0x88] sm:$0xff]  ;;  %2906 = vst [vmem:[%s4497_s24 + $0x78] sm:$0xff] %v2905_v39  ;;  %v2911_v51 = vld [vmem:[%s4501_s29 + $0x90] sm:$0xff] }
 0x293   : >> { %2908 = vst [vmem:[%s4497_s24 + $0x80] sm:$0xff] %v2907_v41  ;;  %2910 = vst [vmem:[%s4497_s24 + $0x88] sm:$0xff] %v2909_v38  ;;  %v2913_v42 = vld [vmem:[%s4501_s29 + $0x98] sm:$0xff]  ;;  %v2915_v44 = vld [vmem:[%s4501_s29 + $0xa0] sm:$0xff] }
 0x294   : >> { %2912 = vst [vmem:[%s4497_s24 + $0x90] sm:$0xff] %v2911_v51  ;;  %2914 = vst [vmem:[%s4497_s24 + $0x98] sm:$0xff] %v2913_v42  ;;  %v2917_v40 = vld [vmem:[%s4501_s29 + $0xa8] sm:$0xff]  ;;  %v2919_v45 = vld [vmem:[%s4501_s29 + $0xb0] sm:$0xff] }
 0x295   : >> { %2916 = vst [vmem:[%s4497_s24 + $0xa0] sm:$0xff] %v2915_v44  ;;  %v2921_v46 = vld [vmem:[%s4501_s29 + $0xb8] sm:$0xff]  ;;  %2918 = vst [vmem:[%s4497_s24 + $0xa8] sm:$0xff] %v2917_v40  ;;  %v2923_v48 = vld [vmem:[%s4501_s29 + $0xc0] sm:$0xff] }
 0x296   : >> { %2920 = vst [vmem:[%s4497_s24 + $0xb0] sm:$0xff] %v2919_v45  ;;  %2922 = vst [vmem:[%s4497_s24 + $0xb8] sm:$0xff] %v2921_v46  ;;  %v2925_v49 = vld [vmem:[%s4501_s29 + $0xc8] sm:$0xff]  ;;  %v2927_v19 = vld [vmem:[%s4501_s29 + $0xd0] sm:$0xff] }
 0x297   : >> { %2924 = vst [vmem:[%s4497_s24 + $0xc0] sm:$0xff] %v2923_v48  ;;  %2926 = vst [vmem:[%s4497_s24 + $0xc8] sm:$0xff] %v2925_v49  ;;  %v2929_v50 = vld [vmem:[%s4501_s29 + $0xd8] sm:$0xff]  ;;  %v2931_v53 = vld [vmem:[%s4501_s29 + $0xe0] sm:$0xff] }
 0x298   : >> { %2928 = vst [vmem:[%s4497_s24 + $0xd0] sm:$0xff] %v2927_v19  ;;  %v2933_v56 = vld [vmem:[%s4501_s29 + $0xe8] sm:$0xff]  ;;  %2930 = vst [vmem:[%s4497_s24 + $0xd8] sm:$0xff] %v2929_v50  ;;  %v2935_v55 = vld [vmem:[%s4501_s29 + $0xf0] sm:$0xff] }
 0x299   : >> { %2932 = vst [vmem:[%s4497_s24 + $0xe0] sm:$0xff] %v2931_v53  ;;  %2934 = vst [vmem:[%s4497_s24 + $0xe8] sm:$0xff] %v2933_v56  ;;  %v2937_v1 = vld [vmem:[%s4501_s29 + $0xf8] sm:$0xff]  ;;  %v2939_v10 = vld [vmem:[%s4501_s29 + $0x100] sm:$0xff] }
 0x29a   : >> { %2936 = vst [vmem:[%s4497_s24 + $0xf0] sm:$0xff] %v2935_v55  ;;  %2938 = vst [vmem:[%s4497_s24 + $0xf8] sm:$0xff] %v2937_v1  ;;  %v2941_v52 = vld [vmem:[%s4501_s29 + $0x108] sm:$0xff]  ;;  %v2943_v57 = vld [vmem:[%s4501_s29 + $0x110] sm:$0xff] }
 0x29b   : >> { %2940 = vst [vmem:[%s4497_s24 + $0x100] sm:$0xff] %v2939_v10  ;;  %v2945_v60 = vld [vmem:[%s4501_s29 + $0x118] sm:$0xff]  ;;  %2942 = vst [vmem:[%s4497_s24 + $0x108] sm:$0xff] %v2941_v52  ;;  %v2947_v58 = vld [vmem:[%s4501_s29 + $0x120] sm:$0xff] }
 0x29c   : >> { %2944 = vst [vmem:[%s4497_s24 + $0x110] sm:$0xff] %v2943_v57  ;;  %2946 = vst [vmem:[%s4497_s24 + $0x118] sm:$0xff] %v2945_v60  ;;  %v2949_v61 = vld [vmem:[%s4501_s29 + $0x128] sm:$0xff]  ;;  %v2951_v32 = vld [vmem:[%s4501_s29 + $0x130] sm:$0xff] }
 0x29d   : >> { %2948 = vst [vmem:[%s4497_s24 + $0x120] sm:$0xff] %v2947_v58  ;;  %2950 = vst [vmem:[%s4497_s24 + $0x128] sm:$0xff] %v2949_v61  ;;  %v2953_v59 = vld [vmem:[%s4501_s29 + $0x138] sm:$0xff]  ;;  %v2955_v62 = vld [vmem:[%s4501_s29 + $0x140] sm:$0xff] }
 0x29e   : >> { %2952 = vst [vmem:[%s4497_s24 + $0x130] sm:$0xff] %v2951_v32  ;;  %v2957_v63 = vld [vmem:[%s4501_s29 + $0x148] sm:$0xff]  ;;  %2954 = vst [vmem:[%s4497_s24 + $0x138] sm:$0xff] %v2953_v59  ;;  %v2959_v2 = vld [vmem:[%s4501_s29 + $0x150] sm:$0xff] }
 0x29f   : >> { %2956 = vst [vmem:[%s4497_s24 + $0x140] sm:$0xff] %v2955_v62  ;;  %2958 = vst [vmem:[%s4497_s24 + $0x148] sm:$0xff] %v2957_v63  ;;  %v2961_v3 = vld [vmem:[%s4501_s29 + $0x158] sm:$0xff]  ;;  %v2963_v0 = vld [vmem:[%s4501_s29 + $0x160] sm:$0xff] }
 0x2a0   : >> { %2960 = vst [vmem:[%s4497_s24 + $0x150] sm:$0xff] %v2959_v2  ;;  %2962 = vst [vmem:[%s4497_s24 + $0x158] sm:$0xff] %v2961_v3  ;;  %v2965_v4 = vld [vmem:[%s4501_s29 + $0x168] sm:$0xff]  ;;  %v2967_v6 = vld [vmem:[%s4501_s29 + $0x170] sm:$0xff] }
 0x2a1   : >> { %2964 = vst [vmem:[%s4497_s24 + $0x160] sm:$0xff] %v2963_v0  ;;  %v2969_v8 = vld [vmem:[%s4501_s29 + $0x178] sm:$0xff]  ;;  %2966 = vst [vmem:[%s4497_s24 + $0x168] sm:$0xff] %v2965_v4  ;;  %v2971_v9 = vld [vmem:[%s4501_s29 + $0x180] sm:$0xff] }
 0x2a2   : >> { %2968 = vst [vmem:[%s4497_s24 + $0x170] sm:$0xff] %v2967_v6  ;;  %2970 = vst [vmem:[%s4497_s24 + $0x178] sm:$0xff] %v2969_v8  ;;  %v2973_v11 = vld [vmem:[%s4501_s29 + $0x188] sm:$0xff]  ;;  %v2975_v7 = vld [vmem:[%s4501_s29 + $0x190] sm:$0xff] }
 0x2a3   : >> { %2972 = vst [vmem:[%s4497_s24 + $0x180] sm:$0xff] %v2971_v9  ;;  %2974 = vst [vmem:[%s4497_s24 + $0x188] sm:$0xff] %v2973_v11  ;;  %v2977_v43 = vld [vmem:[%s4501_s29 + $0x198] sm:$0xff]  ;;  %v2979_v12 = vld [vmem:[%s4501_s29 + $0x1a0] sm:$0xff] }
 0x2a4   : >> { %2976 = vst [vmem:[%s4497_s24 + $0x190] sm:$0xff] %v2975_v7  ;;  %v2981_v14 = vld [vmem:[%s4501_s29 + $0x1a8] sm:$0xff]  ;;  %2978 = vst [vmem:[%s4497_s24 + $0x198] sm:$0xff] %v2977_v43  ;;  %v2983_v15 = vld [vmem:[%s4501_s29 + $0x1b0] sm:$0xff] }
 0x2a5   : >> { %2980 = vst [vmem:[%s4497_s24 + $0x1a0] sm:$0xff] %v2979_v12  ;;  %2982 = vst [vmem:[%s4497_s24 + $0x1a8] sm:$0xff] %v2981_v14  ;;  %v2985_v13 = vld [vmem:[%s4501_s29 + $0x1b8] sm:$0xff]  ;;  %v2987_v16 = vld [vmem:[%s4501_s29 + $0x1c0] sm:$0xff] }
 0x2a6   : >> { %2984 = vst [vmem:[%s4497_s24 + $0x1b0] sm:$0xff] %v2983_v15  ;;  %2986 = vst [vmem:[%s4497_s24 + $0x1b8] sm:$0xff] %v2985_v13  ;;  %v2989_v17 = vld [vmem:[%s4501_s29 + $0x1c8] sm:$0xff]  ;;  %v2991_v20 = vld [vmem:[%s4501_s29 + $0x1d0] sm:$0xff]  ;;  %2871 = sbr.rel (!%p2868_p6) target bundleno = 650 (0x28a), region = 227 }
 0x2a7   : >> { %2988 = vst [vmem:[%s4497_s24 + $0x1c0] sm:$0xff] %v2987_v16  ;;  %v2993_v21 = vld [vmem:[%s4501_s29 + $0x1d8] sm:$0xff]  ;;  %2990 = vst [vmem:[%s4497_s24 + $0x1c8] sm:$0xff] %v2989_v17  ;;  %v2995_v22 = vld [vmem:[%s4501_s29 + $0x1e0] sm:$0xff] }
 0x2a8   : >> { %2992 = vst [vmem:[%s4497_s24 + $0x1d0] sm:$0xff] %v2991_v20  ;;  %2994 = vst [vmem:[%s4497_s24 + $0x1d8] sm:$0xff] %v2993_v21  ;;  %v2997_v18 = vld [vmem:[%s4501_s29 + $0x1e8] sm:$0xff]  ;;  %v2999_v23 = vld [vmem:[%s4501_s29 + $0x1f0] sm:$0xff] }
 0x2a9   : >> { %2996 = vst [vmem:[%s4497_s24 + $0x1e0] sm:$0xff] %v2995_v22  ;;  %2998 = vst [vmem:[%s4497_s24 + $0x1e8] sm:$0xff] %v2997_v18  ;;  %v3001_v54 = vld [vmem:[%s4501_s29 + $0x1f8] sm:$0xff]  ;;  %s6265_s29 = smov %s6123_s13 }
 0x2aa   : >> { %3000 = vst [vmem:[%s4497_s24 + $0x1f0] sm:$0xff] %v2999_v23  ;;  %3002 = vst [vmem:[%s4497_s24 + $0x1f8] sm:$0xff] %v3001_v54  ;;  %s6264_s24 = smov %s6126_s16 }
 0x2ab PF: > { %s6231_s23 = sand.u32 63, %s6277_s14   ;;  %s3343_s30 = sshll.u32 %s6056_s7, 9 }
 0x2ac   : > { %s3014_s21 = scalar_lea.vmem %s5197_s27, %s3343_s30 [#allocation3]   ;;  %s3016_s10 = scalar_lea.vmem %s6050_s18, %s3343_s30  }
 0x2ad   : > { %p3334_p7 = scmp.le.s32.totalorder %s6231_s23, 0 }
 0x2ae   : > { %s4511_s26 = smov (!%p3334_p7), %s3016_s10   ;;  %s4515_s17 = smov (!%p3334_p7), %s3014_s21  }
 0x2af   : > { %3180 = sbr.rel (%p3334_p7) target bundleno = 700 (0x2bc), region = 232  ;;  %s4519_s19 = smov (!%p3334_p7), 0  }
 0x2b0   : > { %s4523_s15 = smov (!%p3334_p7), 0  }
 0x2b4 LB: >> { %v3026_v25 = vld [vmem:[%s4517_s17] sm:$0xff]  ;;  %s3028_s14 = sadd.s32 1, %s4521_s19  ;;  %s3020_s15 = sadd.s32 1, %s4525_s15   ;;  %s4525_s15 = sphi %s4523_s15, %s3020_s15   ;;  %s4521_s19 = sphi %s4519_s19, %s4520_s19   ;;  %s4517_s17 = sphi %s4515_s17, %s3033_s17   ;;  %s4513_s26 = sphi %s4511_s26, %s3034_s26  }
 0x2b5   : >> { %3027 = vst [vmem:[%s4513_s26] sm:$0xff] %v3026_v25  ;;  %p3029_p8 = scmp.ge.s32.totalorder %s3028_s14, %s6231_s23  ;;  %p3019_p9 = scmp.ge.s32.totalorder %s3020_s15, %s6231_s23 }
 0x2b7   : >> { %s6281_s14 = smov (%p3029_p8, %s3028_s14), 0  ;;  %3022 = sbr.rel (!%p3019_p9) target bundleno = 692 (0x2b4), region = 238 }
 0x2b8   : >> { %s3335_s27 = sshll.u32 %s6281_s14, 3  ;;  %s4520_s19 = smov %s6281_s14  }
 0x2b9   : >> { %s3033_s17 = scalar_lea.vmem %s3014_s21, %s3335_s27 [#allocation3]   ;;  %s3034_s26 = scalar_lea.vmem %s3016_s10, %s3335_s27  }
 0x2bc PF: > { %p14_p10 = scmp.ge.s32.totalorder %s4579_s25, 4   ;;  %s6267_s21 = smov %s4457_s22 }
 0x2bd   : > { %s6268_s22 = smov %s4587_s28  ;;  %s6269_s23 = smov %s4579_s25 }
 0x2be   :  { %16 = sbr.rel (!%p14_p10) target bundleno = 2 (0x2), region = 249 }

// kernel: deeponet_forward.7
= control target key start
LH: loop header
LB: loop body
LE: loop exit
PB: predicated region body
PF: predicated region fallthrough
CT: control target
= control target key end

     0   :  { %s3852_s18 = smov 0   ;;  %s3854_s19 = smov 0   ;;  %s5139_s0 = inlined_call_operand.vmem [shape: f32[1250,128], index: 0, kind: input, shape index: {}]   ;;  %s5140_s1 = inlined_call_operand.vmem [shape: f32[1250,8], index: 1, kind: input, shape index: {}]   ;;  %s5141_s2 = inlined_call_operand.vmem [shape: f32[128,128], index: 2, kind: input, shape index: {}]   ;;  %s5142_s3 = inlined_call_operand.vmem [shape: f32[8,128], index: 3, kind: input, shape index: {}]   ;;  %s5143_s4 = inlined_call_operand.vmem [shape: f32[1,128], index: 4, kind: input, shape index: {}]   ;;  %s5144_s5 = inlined_call_operand.vmem [shape: f32[1250,128], index: 5, kind: output, shape index: {}]  }
   0x1   :  { %s3856_s20 = smov 0  }
   0x2 LB: > { %s3865_s21 = sadd.s32 4294967295, %s3786_s20   ;;  %s3867_s22 = sadd.s32 1, %s3786_s20   ;;  %s3786_s20 = sphi %s3856_s20, %s5153_s20   ;;  %s3782_s19 = sphi %s3854_s19, %s5152_s19   ;;  %s3778_s18 = sphi %s3852_s18, %s5151_s18  }
   0x3   : > { %s134_s23 = ssub.s32 %s3786_s20, %s3867_s22  ;;  %s137_s24 = sadd.s32 1, %s3782_s19 }
   0x4   : > { %p135_p0 = scmp.eq.s32.totalorder %s134_s23, 0  ;;  %p147_p1 = scmp.ne.s32.totalorder %s3782_s19, %s3778_s18 }
   0x5   : > { %p148_p2 = scmp.eq.s32.totalorder %s3865_s21, 1  ;;  %p2665_p3 = scmp.ge.s32.totalorder %s3786_s20, 1 }
   0x6   : > { %s3875_s25 = scalar_select %p135_p0, %s3782_s19, %s137_s24  }
   0x7   : > { %p3877_p4 = por %p148_p2, %p147_p1  ;;  %p215_p5 = scmp.lt.s32.totalorder %s3786_s20, 3 }
   0x9   : > { %p216_p6 = pnand %p2665_p3, %p215_p5 }
   0xa   : > { %s3885_s29 = smul.u32 (!%p216_p6), 79, %s3865_s21  ;;  %s252_s13 = sand.u32 (!%p216_p6), 1, %s3778_s18  }
   0xb   : > { %219 = sbr.rel (%p216_p6) target bundleno = 631 (0x277), region = 40 }
   0xc   : > { %p260_p7 = scmp.lt.s32.totalorder (!%p216_p6), %s3885_s29, 156  ;;  %s3481_s18 = smul.u32 (!%p216_p6), 632, %s252_s13 }
   0xe   : > { %s4476_s15 = scalar_lea.vmem (!%p216_p6), [#allocation2], %s3481_s18  }
  0x10   : > { %v382_v0 = vld [vmem:[%s5141_s2 + $0x78] sm:$0xff]  ;;  %v3820_v1 = vmov 0.0   ;;  %v381_v2 = vld [vmem:[%s5141_s2 + $0x70] sm:$0xff]  ;;  %v462_v3 = vld [vmem:[%s5142_s3] sm:$0xff]  ;;  %vm3821_vm0 = vmmov 0   ;;  %s3904_s11 = scalar_select %p260_p7, %s3885_s29, 156 }
  0x11   : > { %3449 = vmatprep.subr.mxu1 %v3820_v1  ;;  %2941 = vmatprep.subr.mxu0 %v3820_v1  ;;  %v380_v4 = vld [vmem:[%s5141_s2 + $0x68] sm:$0xff]  ;;  %v379_v5 = vld [vmem:[%s5141_s2 + $0x60] sm:$0xff]  ;;  %vm463_vm1 = vcmask 64512   ;;  %v378_v6 = vld [vmem:[%s5141_s2 + $0x58] sm:$0xff]  ;;  %s2190_s24 = ssub.s32 (%p3877_p4), 157, %s3885_s29  ;;  %s2763_s27 = smul.u32 (%p3877_p4), 632, %s3865_s21 }
  0x12   : > { %3465 = vmatpush3.msra.mxu1 %v382_v0  ;;  %2942 = vmatpush3.msra.mxu0 %v462_v3  ;;  %s2666_s14 = sshll.u32 %s3904_s11, 3  ;;  %v377_v8 = vld [vmem:[%s5141_s2 + $0x50] sm:$0xff]  ;;  %v3937_v10 = vld [vmem:[%s5141_s2 + $0x48] sm:$0xff]  ;;  %v3945_v11 = vld [vmem:[%s5141_s2 + $0x40] sm:$0xff]  ;;  %p2191_p8 = scmp.lt.s32.totalorder (%p3877_p4), %s2190_s24, 79 }
  0x13   : > { %3450 = vmatprep.subr.mxu1 %v3820_v1  ;;  %2943 = vmatprep.mubr.msk.f32.mxu0 %vm3821_vm0, %v3820_v1  ;;  %s3919_s17 = scalar_lea.vmem %s5140_s1, %s2666_s14  ;;  %v3955_v13 = vld [vmem:[%s5141_s2 + $0x38] sm:$0xff]  ;;  %v3964_v14 = vld [vmem:[%s5141_s2 + $0x30] sm:$0xff]  ;;  %v3974_v16 = vld [vmem:[%s5141_s2 + $0x28] sm:$0xff]  ;;  %s4019_s9 = scalar_lea.vmem %s5139_s0, %s2666_s14 }
  0x14   : > { %3466 = vmatpush3.msra.mxu1 %v381_v2  ;;  %3180 = vmatprep.subr.mxu0 %v3820_v1  ;;  %v383_v7 = vld [vmem:[%s3919_s17] sm:$0xff]  ;;  %v384_v9 = vld [vmem:[%s3919_s17 + $0x8] sm:$0xff]  ;;  %v385_v12 = vld [vmem:[%s3919_s17 + $0x10] sm:$0xff]  ;;  %s4940_s6 = scalar_lea.vmem (%p3877_p4), %s5144_s5, %s2763_s27  }
  0x15   : > { %3451 = vmatprep.subr.mxu1 %v3820_v1  ;;  %3221 = vmatprep.mubr.msk.f32.mxu1 %vm3821_vm0, %v3820_v1  ;;  %v386_v15 = vld [vmem:[%s3919_s17 + $0x18] sm:$0xff]  ;;  %v3983_v17 = vld [vmem:[%s5141_s2 + $0x20] sm:$0xff]  ;;  %v4002_v20 = vld [vmem:[%s5141_s2 + $0x10] sm:$0xff] }
  0x16   : > { %3467 = vmatpush3.msra.mxu1 %v380_v4  ;;  %2944 = vmatmul.mubr.msk.f32.vlgmr.msra.gmra.mxu0 %vm463_vm1, %v383_v7  ;;  %v387_v18 = vld [vmem:[%s3919_s17 + $0x20] sm:$0xff]  ;;  %v3993_v19 = vld [vmem:[%s5141_s2 + $0x18] sm:$0xff]  ;;  %v388_v21 = vld [vmem:[%s3919_s17 + $0x28] sm:$0xff] }
  0x17   : > { %3452 = vmatprep.subr.mxu1 %v3820_v1  ;;  %3181 = vmatpush3.msra.mxu0 %v382_v0  ;;  %v4012_v22 = vld [vmem:[%s5141_s2 + $0x8] sm:$0xff]  ;;  %v4028_v23 = vld [vmem:[%s5141_s2] sm:$0xff]  ;;  %v389_v24 = vld [vmem:[%s3919_s17 + $0x30] sm:$0xff] }
  0x18   : > { %3468 = vmatpush3.msra.mxu1 %v379_v5  ;;  %2946 = vmatprep.mubr.msk.f32.mxu0 %vm3821_vm0, %v3820_v1  ;;  %v291_v25 = vld [vmem:[%s4019_s9 + $0x18] sm:$0xff]  ;;  %v292_v27 = vld [vmem:[%s4019_s9 + $0x20] sm:$0xff]  ;;  %v293_v29 = vld [vmem:[%s4019_s9 + $0x28] sm:$0xff] }
  0x19   : > { %3453 = vmatprep.subr.mxu1 %v3820_v1  ;;  %3182 = vmatprep.subr.mxu0 %v3820_v1  ;;  %v390_v26 = vld [vmem:[%s3919_s17 + $0x38] sm:$0xff]  ;;  %v391_v28 = vld [vmem:[%s3919_s17 + $0x40] sm:$0xff]  ;;  %v392_v30 = vld [vmem:[%s3919_s17 + $0x48] sm:$0xff] }
  0x1a   : > { %3469 = vmatpush3.msra.mxu1 %v378_v6  ;;  %2947 = vmatmul.mubr.msk.f32.gmra.mxu0 %vm463_vm1, %v384_v9  ;;  %v294_v31 = vld [vmem:[%s4019_s9 + $0x30] sm:$0xff]  ;;  %v295_v33 = vld [vmem:[%s4019_s9 + $0x38] sm:$0xff]  ;;  %v296_v35 = vld [vmem:[%s4019_s9 + $0x40] sm:$0xff] }
  0x1b   : > { %3454 = vmatprep.subr.mxu1 %v3820_v1  ;;  %2949 = vmatprep.mubr.msk.f32.mxu0 %vm3821_vm0, %v3820_v1  ;;  %v393_v32 = vld [vmem:[%s3919_s17 + $0x50] sm:$0xff]  ;;  %v394_v34 = vld [vmem:[%s3919_s17 + $0x58] sm:$0xff]  ;;  %v395_v36 = vld [vmem:[%s3919_s17 + $0x60] sm:$0xff] }
  0x1c   : > { %3470 = vmatpush3.msra.mxu1 %v377_v8  ;;  %3183 = vmatpush3.msra.mxu0 %v381_v2  ;;  %v297_v37 = vld [vmem:[%s4019_s9 + $0x48] sm:$0xff]  ;;  %v298_v39 = vld [vmem:[%s4019_s9 + $0x50] sm:$0xff]  ;;  %v299_v41 = vld [vmem:[%s4019_s9 + $0x58] sm:$0xff] }
  0x1d   : > { %3455 = vmatprep.subr.mxu1 %v3820_v1  ;;  %3184 = vmatprep.subr.mxu0 %v3820_v1  ;;  %v396_v38 = vld [vmem:[%s3919_s17 + $0x68] sm:$0xff]  ;;  %v397_v40 = vld [vmem:[%s3919_s17 + $0x70] sm:$0xff]  ;;  %v398_v42 = vld [vmem:[%s3919_s17 + $0x78] sm:$0xff] }
  0x1e   : > { %3471 = vmatpush3.msra.mxu1 %v3937_v10  ;;  %2950 = vmatmul.mubr.msk.f32.gmra.mxu0 %vm463_vm1, %v385_v12  ;;  %v300_v43 = vld [vmem:[%s4019_s9 + $0x60] sm:$0xff]  ;;  %v301_v45 = vld [vmem:[%s4019_s9 + $0x68] sm:$0xff]  ;;  %v302_v47 = vld [vmem:[%s4019_s9 + $0x70] sm:$0xff] }
  0x1f   : > { %3456 = vmatprep.subr.mxu1 %v3820_v1  ;;  %2952 = vmatprep.mubr.msk.f32.mxu0 %vm3821_vm0, %v3820_v1  ;;  %v399_v44 = vld [vmem:[%s3919_s17 + $0x80] sm:$0xff]  ;;  %v400_v46 = vld [vmem:[%s3919_s17 + $0x88] sm:$0xff]  ;;  %v401_v48 = vld [vmem:[%s3919_s17 + $0x90] sm:$0xff] }
  0x20   : > { %3472 = vmatpush3.msra.mxu1 %v3945_v11  ;;  %3185 = vmatpush3.msra.mxu0 %v380_v4  ;;  %v303_v49 = vld [vmem:[%s4019_s9 + $0x78] sm:$0xff]  ;;  %v304_v51 = vld [vmem:[%s4019_s9 + $0x80] sm:$0xff]  ;;  %v305_v53 = vld [vmem:[%s4019_s9 + $0x88] sm:$0xff] }
  0x21   : > { %3457 = vmatprep.subr.mxu1 %v3820_v1  ;;  %3186 = vmatprep.subr.mxu0 %v3820_v1  ;;  %v402_v50 = vld [vmem:[%s3919_s17 + $0x98] sm:$0xff]  ;;  %v403_v52 = vld [vmem:[%s3919_s17 + $0xa0] sm:$0xff]  ;;  %v404_v54 = vld [vmem:[%s3919_s17 + $0xa8] sm:$0xff] }
  0x22   : > { %3473 = vmatpush3.msra.mxu1 %v3955_v13  ;;  %2953 = vmatmul.mubr.msk.f32.gmra.mxu0 %vm463_vm1, %v386_v15  ;;  %v306_v55 = vld [vmem:[%s4019_s9 + $0x90] sm:$0xff]  ;;  %v307_v57 = vld [vmem:[%s4019_s9 + $0x98] sm:$0xff]  ;;  %v308_v59 = vld [vmem:[%s4019_s9 + $0xa0] sm:$0xff] }
  0x23   : > { %3458 = vmatprep.subr.mxu1 %v3820_v1  ;;  %2955 = vmatprep.mubr.msk.f32.mxu0 %vm3821_vm0, %v3820_v1  ;;  %v405_v56 = vld [vmem:[%s3919_s17 + $0xb0] sm:$0xff]  ;;  %v406_v58 = vld [vmem:[%s3919_s17 + $0xb8] sm:$0xff]  ;;  %v407_v60 = vld [vmem:[%s3919_s17 + $0xc0] sm:$0xff] }
  0x24   : > { %3474 = vmatpush3.msra.mxu1 %v3964_v14  ;;  %3187 = vmatpush3.msra.mxu0 %v379_v5  ;;  %v309_v61 = vld [vmem:[%s4019_s9 + $0xa8] sm:$0xff]  ;;  %v310_v63 = vld [vmem:[%s4019_s9 + $0xb0] sm:$0xff]  ;;  %v311_v2 = vld [vmem:[%s4019_s9 + $0xb8] sm:$0xff] }
  0x25   : > { %3459 = vmatprep.subr.mxu1 %v3820_v1  ;;  %3188 = vmatprep.subr.mxu0 %v3820_v1  ;;  %v408_v62 = vld [vmem:[%s3919_s17 + $0xc8] sm:$0xff]  ;;  %v409_v0 = vld [vmem:[%s3919_s17 + $0xd0] sm:$0xff]  ;;  %v410_v3 = vld [vmem:[%s3919_s17 + $0xd8] sm:$0xff] }
  0x26   : > { %3475 = vmatpush3.msra.mxu1 %v3974_v16  ;;  %2956 = vmatmul.mubr.msk.f32.gmra.mxu0 %vm463_vm1, %v387_v18  ;;  %v312_v4 = vld [vmem:[%s4019_s9 + $0xc0] sm:$0xff]  ;;  %v412_v7 = vld [vmem:[%s3919_s17 + $0xe8] sm:$0xff]  ;;  %v413_v9 = vld [vmem:[%s3919_s17 + $0xf0] sm:$0xff] }
  0x27   : > { %3460 = vmatprep.subr.mxu1 %v3820_v1  ;;  %2958 = vmatprep.mubr.msk.f32.mxu0 %vm3821_vm0, %v3820_v1  ;;  %v411_v5 = vld [vmem:[%s3919_s17 + $0xe0] sm:$0xff]  ;;  %v416_v15 = vld [vmem:[%s3919_s17 + $0x108] sm:$0xff]  ;;  %v319_v18 = vld [vmem:[%s4019_s9 + $0xf8] sm:$0xff] }
  0x28   : > { %3476 = vmatpush3.msra.mxu1 %v3983_v17  ;;  %3189 = vmatpush3.msra.mxu0 %v378_v6  ;;  %v313_v6 = vld [vmem:[%s4019_s9 + $0xc8] sm:$0xff]  ;;  %v316_v12 = vld [vmem:[%s4019_s9 + $0xe0] sm:$0xff] }
  0x29   : > { %3461 = vmatprep.subr.mxu1 %v3820_v1  ;;  %3190 = vmatprep.subr.mxu0 %v3820_v1 }
  0x2a   : > { %3477 = vmatpush3.msra.mxu1 %v3993_v19  ;;  %2959 = vmatmul.mubr.msk.f32.gmra.mxu0 %vm463_vm1, %v388_v21  ;;  %v419_v21 = vld [vmem:[%s3919_s17 + $0x120] sm:$0xff] }
  0x2b   : > { %3462 = vmatprep.subr.mxu1 %v3820_v1  ;;  %2961 = vmatprep.mubr.msk.f32.mxu0 %vm3821_vm0, %v3820_v1 }
  0x2c   : > { %3478 = vmatpush3.msra.mxu1 %v4002_v20  ;;  %3191 = vmatpush3.msra.mxu0 %v377_v8  ;;  %v314_v8 = vld [vmem:[%s4019_s9 + $0xd0] sm:$0xff] }
  0x2d   : > { %3463 = vmatprep.subr.mxu1 %v3820_v1  ;;  %3192 = vmatprep.subr.mxu0 %v3820_v1 }
  0x2e   : > { %3479 = vmatpush3.msra.mxu1 %v4012_v22  ;;  %2962 = vmatmul.mubr.msk.f32.gmra.mxu0 %vm463_vm1, %v389_v24  ;;  %v322_v24 = vld [vmem:[%s4019_s9 + $0x110] sm:$0xff] }
  0x2f   : > { %3464 = vmatprep.subr.mxu1 %v3820_v1  ;;  %2964 = vmatprep.mubr.msk.f32.mxu0 %vm3821_vm0, %v3820_v1 }
  0x30   : > { %3480 = vmatpush3.msra.mxu1 %v4028_v23  ;;  %3193 = vmatpush3.msra.mxu0 %v3937_v10  ;;  %v315_v10 = vld [vmem:[%s4019_s9 + $0xd8] sm:$0xff] }
  0x31   : > { %3222 = vmatmul.mubr.f32.vlgmr.msra.gmra.mxu1 %v291_v25  ;;  %3194 = vmatprep.subr.mxu0 %v3820_v1  ;;  %v421_v25 = vld [vmem:[%s3919_s17 + $0x130] sm:$0xff] }
  0x32   : > { %3224 = vmatprep.mubr.msk.f32.mxu1 %vm3821_vm0, %v3820_v1  ;;  %2965 = vmatmul.mubr.msk.f32.gmra.mxu0 %vm463_vm1, %v390_v26  ;;  %v323_v26 = vld [vmem:[%s4019_s9 + $0x118] sm:$0xff] }
  0x33   : > { %2967 = vmatprep.mubr.msk.f32.mxu0 %vm3821_vm0, %v3820_v1  ;;  %3195 = vmatpush3.msra.mxu0 %v3945_v11  ;;  %v414_v11 = vld [vmem:[%s3919_s17 + $0xf8] sm:$0xff] }
  0x34   : > { %3196 = vmatprep.subr.mxu0 %v3820_v1 }
  0x35   : > { %3225 = vmatmul.mubr.f32.gmra.mxu1 %v292_v27  ;;  %3197 = vmatpush3.msra.mxu0 %v3955_v13  ;;  %v415_v13 = vld [vmem:[%s3919_s17 + $0x100] sm:$0xff]  ;;  %v422_v27 = vld [vmem:[%s3919_s17 + $0x138] sm:$0xff] }
  0x36   : > { %3227 = vmatprep.mubr.msk.f32.mxu1 %vm3821_vm0, %v3820_v1  ;;  %2968 = vmatmul.mubr.msk.f32.gmra.mxu0 %vm463_vm1, %v391_v28  ;;  %v324_v28 = vld [vmem:[%s4019_s9 + $0x120] sm:$0xff] }
  0x37   : > { %2970 = vmatprep.mubr.msk.f32.mxu0 %vm3821_vm0, %v3820_v1  ;;  %3198 = vmatprep.subr.mxu0 %v3820_v1 }
  0x38   : > { %3199 = vmatpush3.msra.mxu0 %v3964_v14  ;;  %v317_v14 = vld [vmem:[%s4019_s9 + $0xe8] sm:$0xff] }
  0x39   : > { %3228 = vmatmul.mubr.f32.gmra.mxu1 %v293_v29  ;;  %3200 = vmatprep.subr.mxu0 %v3820_v1  ;;  %v423_v29 = vld [vmem:[%s3919_s17 + $0x140] sm:$0xff] }
  0x3a   : > { %3230 = vmatprep.mubr.msk.f32.mxu1 %vm3821_vm0, %v3820_v1  ;;  %2971 = vmatmul.mubr.msk.f32.gmra.mxu0 %vm463_vm1, %v392_v30  ;;  %v325_v30 = vld [vmem:[%s4019_s9 + $0x128] sm:$0xff] }
  0x3b   : > { %2973 = vmatprep.mubr.msk.f32.mxu0 %vm3821_vm0, %v3820_v1  ;;  %3201 = vmatpush3.msra.mxu0 %v3974_v16  ;;  %v318_v16 = vld [vmem:[%s4019_s9 + $0xf0] sm:$0xff] }
  0x3c   : > { %3202 = vmatprep.subr.mxu0 %v3820_v1 }
  0x3d   : > { %3231 = vmatmul.mubr.f32.gmra.mxu1 %v294_v31  ;;  %3203 = vmatpush3.msra.mxu0 %v3983_v17  ;;  %v417_v17 = vld [vmem:[%s3919_s17 + $0x110] sm:$0xff]  ;;  %v424_v31 = vld [vmem:[%s3919_s17 + $0x148] sm:$0xff] }
  0x3e   : > { %3233 = vmatprep.mubr.msk.f32.mxu1 %vm3821_vm0, %v3820_v1  ;;  %2974 = vmatmul.mubr.msk.f32.gmra.mxu0 %vm463_vm1, %v393_v32  ;;  %v326_v32 = vld [vmem:[%s4019_s9 + $0x130] sm:$0xff] }
  0x3f   : > { %2976 = vmatprep.mubr.msk.f32.mxu0 %vm3821_vm0, %v3820_v1  ;;  %3204 = vmatprep.subr.mxu0 %v3820_v1 }
  0x40   : > { %3205 = vmatpush3.msra.mxu0 %v3993_v19  ;;  %v418_v19 = vld [vmem:[%s3919_s17 + $0x118] sm:$0xff] }
  0x41   : > { %3234 = vmatmul.mubr.f32.gmra.mxu1 %v295_v33  ;;  %3206 = vmatprep.subr.mxu0 %v3820_v1  ;;  %v425_v33 = vld [vmem:[%s3919_s17 + $0x150] sm:$0xff] }
  0x42   : > { %3236 = vmatprep.mubr.msk.f32.mxu1 %vm3821_vm0, %v3820_v1  ;;  %2977 = vmatmul.mubr.msk.f32.gmra.mxu0 %vm463_vm1, %v394_v34  ;;  %v327_v34 = vld [vmem:[%s4019_s9 + $0x138] sm:$0xff] }
  0x43   : > { %2979 = vmatprep.mubr.msk.f32.mxu0 %vm3821_vm0, %v3820_v1  ;;  %3207 = vmatpush3.msra.mxu0 %v4002_v20  ;;  %v320_v20 = vld [vmem:[%s4019_s9 + $0x100] sm:$0xff] }
  0x44   : > { %3208 = vmatprep.subr.mxu0 %v3820_v1 }
  0x45   : > { %3237 = vmatmul.mubr.f32.gmra.mxu1 %v296_v35  ;;  %3209 = vmatpush3.msra.mxu0 %v4012_v22  ;;  %v321_v22 = vld [vmem:[%s4019_s9 + $0x108] sm:$0xff]  ;;  %v426_v35 = vld [vmem:[%s3919_s17 + $0x158] sm:$0xff] }
  0x46   : > { %3239 = vmatprep.mubr.msk.f32.mxu1 %vm3821_vm0, %v3820_v1  ;;  %2980 = vmatmul.mubr.msk.f32.gmra.mxu0 %vm463_vm1, %v395_v36  ;;  %v328_v36 = vld [vmem:[%s4019_s9 + $0x140] sm:$0xff] }
  0x47   : > { %2982 = vmatprep.mubr.msk.f32.mxu0 %vm3821_vm0, %v3820_v1  ;;  %3210 = vmatprep.subr.mxu0 %v3820_v1 }
  0x48   : > { %3211 = vmatpush3.msra.mxu0 %v4028_v23  ;;  %v420_v23 = vld [vmem:[%s3919_s17 + $0x128] sm:$0xff] }
  0x49   : > { %3240 = vmatmul.mubr.f32.gmra.mxu1 %v297_v37  ;;  %v427_v37 = vld [vmem:[%s3919_s17 + $0x160] sm:$0xff] }
  0x4a   : > { %3242 = vmatprep.mubr.msk.f32.mxu1 %vm3821_vm0, %v3820_v1  ;;  %2983 = vmatmul.mubr.msk.f32.gmra.mxu0 %vm463_vm1, %v396_v38  ;;  %v329_v38 = vld [vmem:[%s4019_s9 + $0x148] sm:$0xff] }
  0x4b   : > { %2985 = vmatprep.mubr.msk.f32.mxu0 %vm3821_vm0, %v3820_v1 }
  0x4d   : > { %3243 = vmatmul.mubr.f32.gmra.mxu1 %v298_v39  ;;  %v428_v39 = vld [vmem:[%s3919_s17 + $0x168] sm:$0xff] }
  0x4e   : > { %3245 = vmatprep.mubr.msk.f32.mxu1 %vm3821_vm0, %v3820_v1  ;;  %2986 = vmatmul.mubr.msk.f32.gmra.mxu0 %vm463_vm1, %v397_v40  ;;  %v330_v40 = vld [vmem:[%s4019_s9 + $0x150] sm:$0xff] }
  0x4f   : > { %2988 = vmatprep.mubr.msk.f32.mxu0 %vm3821_vm0, %v3820_v1 }
  0x51   : > { %3246 = vmatmul.mubr.f32.gmra.mxu1 %v299_v41  ;;  %v429_v41 = vld [vmem:[%s3919_s17 + $0x170] sm:$0xff] }
  0x52   : > { %3248 = vmatprep.mubr.msk.f32.mxu1 %vm3821_vm0, %v3820_v1  ;;  %2989 = vmatmul.mubr.msk.f32.gmra.mxu0 %vm463_vm1, %v398_v42  ;;  %v331_v42 = vld [vmem:[%s4019_s9 + $0x158] sm:$0xff] }
  0x53   : > { %2991 = vmatprep.mubr.msk.f32.mxu0 %vm3821_vm0, %v3820_v1 }
  0x55   : > { %3249 = vmatmul.mubr.f32.gmra.mxu1 %v300_v43  ;;  %v430_v43 = vld [vmem:[%s3919_s17 + $0x178] sm:$0xff] }
  0x56   : > { %3251 = vmatprep.mubr.msk.f32.mxu1 %vm3821_vm0, %v3820_v1  ;;  %2992 = vmatmul.mubr.msk.f32.gmra.mxu0 %vm463_vm1, %v399_v44  ;;  %v332_v44 = vld [vmem:[%s4019_s9 + $0x160] sm:$0xff] }
  0x57   : > { %2994 = vmatprep.mubr.msk.f32.mxu0 %vm3821_vm0, %v3820_v1 }
  0x59   : > { %3252 = vmatmul.mubr.f32.gmra.mxu1 %v301_v45  ;;  %v431_v45 = vld [vmem:[%s3919_s17 + $0x180] sm:$0xff] }
  0x5a   : > { %3254 = vmatprep.mubr.msk.f32.mxu1 %vm3821_vm0, %v3820_v1  ;;  %2995 = vmatmul.mubr.msk.f32.gmra.mxu0 %vm463_vm1, %v400_v46  ;;  %v333_v46 = vld [vmem:[%s4019_s9 + $0x168] sm:$0xff] }
  0x5b   : > { %2997 = vmatprep.mubr.msk.f32.mxu0 %vm3821_vm0, %v3820_v1 }
  0x5d   : > { %3255 = vmatmul.mubr.f32.gmra.mxu1 %v302_v47 }
  0x5e   : > { %3257 = vmatprep.mubr.msk.f32.mxu1 %vm3821_vm0, %v3820_v1  ;;  %2998 = vmatmul.mubr.msk.f32.gmra.mxu0 %vm463_vm1, %v401_v48  ;;  %v432_v48 = vld [vmem:[%s3919_s17 + $0x188] sm:$0xff] }
  0x5f   : > { %3000 = vmatprep.mubr.msk.f32.mxu0 %vm3821_vm0, %v3820_v1 }
  0x61   : > { %3258 = vmatmul.mubr.f32.gmra.mxu1 %v303_v49  ;;  %v334_v49 = vld [vmem:[%s4019_s9 + $0x170] sm:$0xff] }
  0x62   : > { %3260 = vmatprep.mubr.msk.f32.mxu1 %vm3821_vm0, %v3820_v1  ;;  %3001 = vmatmul.mubr.msk.f32.gmra.mxu0 %vm463_vm1, %v402_v50 }
  0x63   : > { %3003 = vmatprep.mubr.msk.f32.mxu0 %vm3821_vm0, %v3820_v1 }
  0x65   : > { %3261 = vmatmul.mubr.f32.gmra.mxu1 %v304_v51 }
  0x66   : > { %3263 = vmatprep.mubr.msk.f32.mxu1 %vm3821_vm0, %v3820_v1  ;;  %3004 = vmatmul.mubr.msk.f32.gmra.mxu0 %vm463_vm1, %v403_v52  ;;  %v433_v52 = vld [vmem:[%s3919_s17 + $0x190] sm:$0xff] }
  0x67   : > { %3006 = vmatprep.mubr.msk.f32.mxu0 %vm3821_vm0, %v3820_v1 }
  0x69   : > { %3264 = vmatmul.mubr.f32.gmra.mxu1 %v305_v53  ;;  %v335_v53 = vld [vmem:[%s4019_s9 + $0x178] sm:$0xff] }
  0x6a   : > { %3266 = vmatprep.mubr.msk.f32.mxu1 %vm3821_vm0, %v3820_v1  ;;  %3007 = vmatmul.mubr.msk.f32.gmra.mxu0 %vm463_vm1, %v404_v54 }
  0x6b   : > { %3009 = vmatprep.mubr.msk.f32.mxu0 %vm3821_vm0, %v3820_v1 }
  0x6d   : > { %3267 = vmatmul.mubr.f32.gmra.mxu1 %v306_v55 }
  0x6e   : > { %3269 = vmatprep.mubr.msk.f32.mxu1 %vm3821_vm0, %v3820_v1  ;;  %3010 = vmatmul.mubr.msk.f32.gmra.mxu0 %vm463_vm1, %v405_v56  ;;  %v434_v56 = vld [vmem:[%s3919_s17 + $0x198] sm:$0xff] }
  0x6f   : > { %3012 = vmatprep.mubr.msk.f32.mxu0 %vm3821_vm0, %v3820_v1 }
  0x71   : > { %3270 = vmatmul.mubr.f32.gmra.mxu1 %v307_v57  ;;  %v336_v57 = vld [vmem:[%s4019_s9 + $0x180] sm:$0xff] }
  0x72   : > { %3272 = vmatprep.mubr.msk.f32.mxu1 %vm3821_vm0, %v3820_v1  ;;  %3013 = vmatmul.mubr.msk.f32.gmra.mxu0 %vm463_vm1, %v406_v58 }
  0x73   : > { %3015 = vmatprep.mubr.msk.f32.mxu0 %vm3821_vm0, %v3820_v1 }
  0x75   : > { %3273 = vmatmul.mubr.f32.gmra.mxu1 %v308_v59 }
  0x76   : > { %3275 = vmatprep.mubr.msk.f32.mxu1 %vm3821_vm0, %v3820_v1  ;;  %3016 = vmatmul.mubr.msk.f32.gmra.mxu0 %vm463_vm1, %v407_v60  ;;  %v435_v60 = vld [vmem:[%s3919_s17 + $0x1a0] sm:$0xff] }
  0x77   : > { %3018 = vmatprep.mubr.msk.f32.mxu0 %vm3821_vm0, %v3820_v1 }
  0x79   : > { %3276 = vmatmul.mubr.f32.gmra.mxu1 %v309_v61  ;;  %v337_v61 = vld [vmem:[%s4019_s9 + $0x188] sm:$0xff] }
  0x7a   : > { %3278 = vmatprep.mubr.msk.f32.mxu1 %vm3821_vm0, %v3820_v1  ;;  %3019 = vmatmul.mubr.msk.f32.gmra.mxu0 %vm463_vm1, %v408_v62 }
  0x7b   : > { %3021 = vmatprep.mubr.msk.f32.mxu0 %vm3821_vm0, %v3820_v1 }
  0x7d   : > { %3279 = vmatmul.mubr.f32.gmra.mxu1 %v310_v63 }
  0x7e   : > { %3281 = vmatprep.mubr.msk.f32.mxu1 %vm3821_vm0, %v3820_v1  ;;  %3022 = vmatmul.mubr.msk.f32.gmra.mxu0 %vm463_vm1, %v409_v0  ;;  %v436_v0 = vld [vmem:[%s3919_s17 + $0x1a8] sm:$0xff] }
  0x7f   : > { %3024 = vmatprep.mubr.msk.f32.mxu0 %vm3821_vm0, %v3820_v1 }
  0x81   : > { %3282 = vmatmul.mubr.f32.gmra.mxu1 %v311_v2  ;;  %v338_v2 = vld [vmem:[%s4019_s9 + $0x190] sm:$0xff] }
  0x82   : > { %3284 = vmatprep.mubr.msk.f32.mxu1 %vm3821_vm0, %v3820_v1  ;;  %3025 = vmatmul.mubr.msk.f32.gmra.mxu0 %vm463_vm1, %v410_v3 }
  0x83   : > { %3027 = vmatprep.mubr.msk.f32.mxu0 %vm3821_vm0, %v3820_v1 }
  0x85   : > { %3285 = vmatmul.mubr.f32.gmra.mxu1 %v312_v4 }
  0x86   : > { %3287 = vmatprep.mubr.msk.f32.mxu1 %vm3821_vm0, %v3820_v1  ;;  %3028 = vmatmul.mubr.msk.f32.gmra.mxu0 %vm463_vm1, %v411_v5  ;;  %v437_v5 = vld [vmem:[%s3919_s17 + $0x1b0] sm:$0xff] }
  0x87   : > { %3030 = vmatprep.mubr.msk.f32.mxu0 %vm3821_vm0, %v3820_v1 }
  0x89   : > { %3288 = vmatmul.mubr.f32.gmra.mxu1 %v313_v6  ;;  %v339_v6 = vld [vmem:[%s4019_s9 + $0x198] sm:$0xff] }
  0x8a   : > { %3290 = vmatprep.mubr.msk.f32.mxu1 %vm3821_vm0, %v3820_v1  ;;  %3031 = vmatmul.mubr.msk.f32.gmra.mxu0 %vm463_vm1, %v412_v7 }
  0x8b   : > { %3033 = vmatprep.mubr.msk.f32.mxu0 %vm3821_vm0, %v3820_v1 }
  0x8d   : > { %3291 = vmatmul.mubr.f32.gmra.mxu1 %v314_v8 }
  0x8e   : > { %3293 = vmatprep.mubr.msk.f32.mxu1 %vm3821_vm0, %v3820_v1  ;;  %3034 = vmatmul.mubr.msk.f32.gmra.mxu0 %vm463_vm1, %v413_v9 }
  0x8f   : > { %3036 = vmatprep.mubr.msk.f32.mxu0 %vm3821_vm0, %v3820_v1 }
  0x91   : > { %3294 = vmatmul.mubr.f32.gmra.mxu1 %v315_v10  ;;  %v4403_v10 = vld [vmem:[%s5143_s4] ss:$0 sm:$0xff] }
  0x92   : > { %3296 = vmatprep.mubr.msk.f32.mxu1 %vm3821_vm0, %v3820_v1  ;;  %3037 = vmatmul.mubr.msk.f32.gmra.mxu0 %vm463_vm1, %v414_v11 }
  0x93   : > { %3039 = vmatprep.mubr.msk.f32.mxu0 %vm3821_vm0, %v3820_v1 }
  0x95   : > { %3297 = vmatmul.mubr.f32.gmra.mxu1 %v316_v12  ;;  %v438_v12 = vld [vmem:[%s3919_s17 + $0x1b8] sm:$0xff] }
  0x96   : > { %3299 = vmatprep.mubr.msk.f32.mxu1 %vm3821_vm0, %v3820_v1  ;;  %3040 = vmatmul.mubr.msk.f32.gmra.mxu0 %vm463_vm1, %v415_v13  ;;  %v340_v13 = vld [vmem:[%s4019_s9 + $0x1a0] sm:$0xff] }
  0x97   : > { %3042 = vmatprep.mubr.msk.f32.mxu0 %vm3821_vm0, %v3820_v1 }
  0x99   : > { %3300 = vmatmul.mubr.f32.gmra.mxu1 %v317_v14 }
  0x9a   : > { %3302 = vmatprep.mubr.msk.f32.mxu1 %vm3821_vm0, %v3820_v1  ;;  %3043 = vmatmul.mubr.msk.f32.gmra.mxu0 %vm463_vm1, %v416_v15 }
  0x9b   : > { %3045 = vmatprep.mubr.msk.f32.mxu0 %vm3821_vm0, %v3820_v1 }
  0x9d   : > { %3303 = vmatmul.mubr.f32.gmra.mxu1 %v318_v16 }
  0x9e   : > { %3305 = vmatprep.mubr.msk.f32.mxu1 %vm3821_vm0, %v3820_v1  ;;  %3046 = vmatmul.mubr.msk.f32.gmra.mxu0 %vm463_vm1, %v417_v17 }
  0x9f   : > { %3048 = vmatprep.mubr.msk.f32.mxu0 %vm3821_vm0, %v3820_v1 }
  0xa1   : > { %3306 = vmatmul.mubr.f32.gmra.mxu1 %v319_v18 }
  0xa2   : > { %3308 = vmatprep.mubr.msk.f32.mxu1 %vm3821_vm0, %v3820_v1  ;;  %3049 = vmatmul.mubr.msk.f32.gmra.mxu0 %vm463_vm1, %v418_v19 }
  0xa3   : > { %3051 = vmatprep.mubr.msk.f32.mxu0 %vm3821_vm0, %v3820_v1 }
  0xa5   : > { %3309 = vmatmul.mubr.f32.gmra.mxu1 %v320_v20 }
  0xa6   : > { %3311 = vmatprep.mubr.msk.f32.mxu1 %vm3821_vm0, %v3820_v1  ;;  %3052 = vmatmul.mubr.msk.f32.gmra.mxu0 %vm463_vm1, %v419_v21  ;;  %v439_v21 = vld [vmem:[%s3919_s17 + $0x1c0] sm:$0xff] }
  0xa7   : > { %3054 = vmatprep.mubr.msk.f32.mxu0 %vm3821_vm0, %v3820_v1 }
  0xa9   : > { %3312 = vmatmul.mubr.f32.gmra.mxu1 %v321_v22  ;;  %v341_v22 = vld [vmem:[%s4019_s9 + $0x1a8] sm:$0xff] }
  0xaa   : > { %3314 = vmatprep.mubr.msk.f32.mxu1 %vm3821_vm0, %v3820_v1  ;;  %3055 = vmatmul.mubr.msk.f32.gmra.mxu0 %vm463_vm1, %v420_v23 }
  0xab   : > { %3057 = vmatprep.mubr.msk.f32.mxu0 %vm3821_vm0, %v3820_v1 }
  0xad   : > { %3315 = vmatmul.mubr.f32.gmra.mxu1 %v322_v24 }
  0xae   : > { %3317 = vmatprep.mubr.msk.f32.mxu1 %vm3821_vm0, %v3820_v1  ;;  %3058 = vmatmul.mubr.msk.f32.gmra.mxu0 %vm463_vm1, %v421_v25 }
  0xaf   : > { %3060 = vmatprep.mubr.msk.f32.mxu0 %vm3821_vm0, %v3820_v1 }
  0xb1   : > { %3318 = vmatmul.mubr.f32.gmra.mxu1 %v323_v26 }
  0xb2   : > { %3320 = vmatprep.mubr.msk.f32.mxu1 %vm3821_vm0, %v3820_v1  ;;  %3061 = vmatmul.mubr.msk.f32.gmra.mxu0 %vm463_vm1, %v422_v27 }
  0xb3   : > { %3063 = vmatprep.mubr.msk.f32.mxu0 %vm3821_vm0, %v3820_v1 }
  0xb5   : > { %3321 = vmatmul.mubr.f32.gmra.mxu1 %v324_v28 }
  0xb6   : > { %3323 = vmatprep.mubr.msk.f32.mxu1 %vm3821_vm0, %v3820_v1  ;;  %3064 = vmatmul.mubr.msk.f32.gmra.mxu0 %vm463_vm1, %v423_v29 }
  0xb7   : > { %3066 = vmatprep.mubr.msk.f32.mxu0 %vm3821_vm0, %v3820_v1 }
  0xb9   : > { %3324 = vmatmul.mubr.f32.gmra.mxu1 %v325_v30  ;;  %v440_v30 = vld [vmem:[%s3919_s17 + $0x1c8] sm:$0xff] }
  0xba   : > { %3326 = vmatprep.mubr.msk.f32.mxu1 %vm3821_vm0, %v3820_v1  ;;  %3067 = vmatmul.mubr.msk.f32.gmra.mxu0 %vm463_vm1, %v424_v31  ;;  %v342_v31 = vld [vmem:[%s4019_s9 + $0x1b0] sm:$0xff] }
  0xbb   : > { %3069 = vmatprep.mubr.msk.f32.mxu0 %vm3821_vm0, %v3820_v1 }
  0xbd   : > { %3327 = vmatmul.mubr.f32.gmra.mxu1 %v326_v32 }
  0xbe   : > { %3329 = vmatprep.mubr.msk.f32.mxu1 %vm3821_vm0, %v3820_v1  ;;  %3070 = vmatmul.mubr.msk.f32.gmra.mxu0 %vm463_vm1, %v425_v33 }
  0xbf   : > { %3072 = vmatprep.mubr.msk.f32.mxu0 %vm3821_vm0, %v3820_v1 }
  0xc1   : > { %3330 = vmatmul.mubr.f32.gmra.mxu1 %v327_v34 }
  0xc2   : > { %3332 = vmatprep.mubr.msk.f32.mxu1 %vm3821_vm0, %v3820_v1  ;;  %3073 = vmatmul.mubr.msk.f32.gmra.mxu0 %vm463_vm1, %v426_v35 }
  0xc3   : > { %3075 = vmatprep.mubr.msk.f32.mxu0 %vm3821_vm0, %v3820_v1 }
  0xc5   : > { %3333 = vmatmul.mubr.f32.gmra.mxu1 %v328_v36 }
  0xc6   : > { %3335 = vmatprep.mubr.msk.f32.mxu1 %vm3821_vm0, %v3820_v1  ;;  %3076 = vmatmul.mubr.msk.f32.gmra.mxu0 %vm463_vm1, %v427_v37 }
  0xc7   : > { %3078 = vmatprep.mubr.msk.f32.mxu0 %vm3821_vm0, %v3820_v1 }
  0xc9   : > { %3336 = vmatmul.mubr.f32.gmra.mxu1 %v329_v38 }
  0xca   : > { %3338 = vmatprep.mubr.msk.f32.mxu1 %vm3821_vm0, %v3820_v1  ;;  %3079 = vmatmul.mubr.msk.f32.gmra.mxu0 %vm463_vm1, %v428_v39  ;;  %v441_v39 = vld [vmem:[%s3919_s17 + $0x1d0] sm:$0xff] }
  0xcb   : > { %3081 = vmatprep.mubr.msk.f32.mxu0 %vm3821_vm0, %v3820_v1 }
  0xcd   : > { %3339 = vmatmul.mubr.f32.gmra.mxu1 %v330_v40  ;;  %v343_v40 = vld [vmem:[%s4019_s9 + $0x1b8] sm:$0xff] }
  0xce   : > { %3341 = vmatprep.mubr.msk.f32.mxu1 %vm3821_vm0, %v3820_v1  ;;  %3082 = vmatmul.mubr.msk.f32.gmra.mxu0 %vm463_vm1, %v429_v41 }
  0xcf   : > { %3084 = vmatprep.mubr.msk.f32.mxu0 %vm3821_vm0, %v3820_v1 }
  0xd1   : > { %3342 = vmatmul.mubr.f32.gmra.mxu1 %v331_v42 }
  0xd2   : > { %3344 = vmatprep.mubr.msk.f32.mxu1 %vm3821_vm0, %v3820_v1  ;;  %3085 = vmatmul.mubr.msk.f32.gmra.mxu0 %vm463_vm1, %v430_v43 }
  0xd3   : > { %3087 = vmatprep.mubr.msk.f32.mxu0 %vm3821_vm0, %v3820_v1 }
  0xd5   : > { %3345 = vmatmul.mubr.f32.gmra.mxu1 %v332_v44 }
  0xd6   : > { %3347 = vmatprep.mubr.msk.f32.mxu1 %vm3821_vm0, %v3820_v1  ;;  %v4351_v47 = vpop.f32.mrf.mxu0  ;;  %3088 = vmatmul.mubr.msk.f32.gmra.mxu0 %vm463_vm1, %v431_v45 }
  0xd7   : > { %3090 = vmatprep.mubr.msk.f32.mxu0 %vm3821_vm0, %v3820_v1 }
  0xd8   : > { %v2945_v50 = vpop.f32.mrf.mxu0 }
  0xd9   : > { %3348 = vmatmul.mubr.f32.gmra.mxu1 %v333_v46  ;;  %v344_v50 = vld [vmem:[%s4019_s9 + $0x1c0] sm:$0xff] }
  0xda   : > { %3350 = vmatprep.mubr.msk.f32.mxu1 %vm3821_vm0, %v3820_v1  ;;  %v4360_v51 = vpop.f32.mrf.mxu0  ;;  %3091 = vmatmul.mubr.msk.f32.gmra.mxu0 %vm463_vm1, %v432_v48 }
  0xdb   : > { %3093 = vmatprep.mubr.msk.f32.mxu0 %vm3821_vm0, %v3820_v1 }
  0xdc   : > { %v2948_v54 = vpop.f32.mrf.mxu0 }
  0xdd   : > { %3351 = vmatmul.mubr.f32.gmra.mxu1 %v334_v49  ;;  %v442_v49 = vld [vmem:[%s3919_s17 + $0x1d8] sm:$0xff] }
  0xde   : > { %3353 = vmatprep.mubr.msk.f32.mxu1 %vm3821_vm0, %v3820_v1  ;;  %v4369_v55 = vpop.f32.mrf.mxu0  ;;  %3094 = vmatmul.mubr.msk.f32.gmra.mxu0 %vm463_vm1, %v433_v52 }
  0xdf   : > { %3096 = vmatprep.mubr.msk.f32.mxu0 %vm3821_vm0, %v3820_v1 }
  0xe0   : > { %v2951_v58 = vpop.f32.mrf.mxu0 }
  0xe1   : > { %3354 = vmatmul.mubr.f32.gmra.mxu1 %v335_v53 }
  0xe2   : > { %3356 = vmatprep.mubr.msk.f32.mxu1 %vm3821_vm0, %v3820_v1  ;;  %v782_v59 = vpop.f32.mrf.mxu0  ;;  %3097 = vmatmul.mubr.msk.f32.gmra.mxu0 %vm463_vm1, %v434_v56 }
  0xe3   : > { %3099 = vmatprep.mubr.msk.f32.mxu0 %vm3821_vm0, %v3820_v1 }
  0xe4   : > { %v2954_v62 = vpop.f32.mrf.mxu0 }
  0xe5   : > { %3357 = vmatmul.mubr.f32.gmra.mxu1 %v336_v57 }
  0xe6   : > { %3359 = vmatprep.mubr.msk.f32.mxu1 %vm3821_vm0, %v3820_v1  ;;  %v787_v63 = vpop.f32.mrf.mxu0  ;;  %3100 = vmatmul.mubr.msk.f32.gmra.mxu0 %vm463_vm1, %v435_v60 }
  0xe7   : > { %3102 = vmatprep.mubr.msk.f32.mxu0 %vm3821_vm0, %v3820_v1 }
  0xe8   : > { %v2957_v3 = vpop.f32.mrf.mxu0 }
  0xe9   : > { %3360 = vmatmul.mubr.f32.gmra.mxu1 %v337_v61 }
  0xea   : > { %3362 = vmatprep.mubr.msk.f32.mxu1 %vm3821_vm0, %v3820_v1  ;;  %v792_v4 = vpop.f32.mrf.mxu0  ;;  %3103 = vmatmul.mubr.msk.f32.gmra.mxu0 %vm463_vm1, %v436_v0  ;;  %v345_v0 = vld [vmem:[%s4019_s9 + $0x1c8] sm:$0xff] }
  0xeb   : > { %3105 = vmatprep.mubr.msk.f32.mxu0 %vm3821_vm0, %v3820_v1 }
  0xec   : > { %v2960_v7 = vpop.f32.mrf.mxu0 }
  0xed   : > { %3363 = vmatmul.mubr.f32.gmra.mxu1 %v338_v2 }
  0xee   : > { %3365 = vmatprep.mubr.msk.f32.mxu1 %vm3821_vm0, %v3820_v1  ;;  %v797_v8 = vpop.f32.mrf.mxu0  ;;  %3106 = vmatmul.mubr.msk.f32.gmra.mxu0 %vm463_vm1, %v437_v5 }
  0xef   : > { %3108 = vmatprep.mubr.msk.f32.mxu0 %vm3821_vm0, %v3820_v1 }
  0xf0   : > { %v2963_v14 = vpop.f32.mrf.mxu0 }
  0xf1   : > { %v1242_v9 = vpop.f32.mrf.mxu1  ;;  %3366 = vmatmul.mubr.f32.gmra.mxu1 %v339_v6  ;;  %v444_v14 = vld [vmem:[%s3919_s17 + $0x1e8] sm:$0xff] }
  0xf2   : > { %v1243_v11 = vadd.f32 %v1242_v9, %v782_v59  ;;  %3368 = vmatprep.mubr.msk.f32.mxu1 %vm3821_vm0, %v3820_v1  ;;  %v802_v17 = vpop.f32.mrf.mxu0  ;;  %3109 = vmatmul.mubr.msk.f32.gmra.mxu0 %vm463_vm1, %v438_v12 }
  0xf3   : > { %v3223_v15 = vpop.f32.mrf.mxu1  ;;  %3111 = vmatprep.mubr.msk.f32.mxu0 %vm3821_vm0, %v3820_v1 }
  0xf4   : > { %v4412_v16 = vadd.f32 %v4403_v10, %v1243_v11  ;;  %v2966_v23 = vpop.f32.mrf.mxu0  ;;  %v346_v15 = vld [vmem:[%s4019_s9 + $0x1d0] sm:$0xff] }
  0xf5   : > { %v1247_v18 = vpop.f32.mrf.mxu1  ;;  %3369 = vmatmul.mubr.f32.gmra.mxu1 %v340_v13 }
  0xf6   : > { %v1790_v19 = vmul.f32 0.70710677, %v4412_v16  ;;  %v1248_v20 = vadd.f32 %v1247_v18, %v787_v63  ;;  %3371 = vmatprep.mubr.msk.f32.mxu1 %vm3821_vm0, %v3820_v1  ;;  %v807_v26 = vpop.f32.mrf.mxu0  ;;  %3112 = vmatmul.mubr.msk.f32.gmra.mxu0 %vm463_vm1, %v439_v21  ;;  %v1710_v59 = vmul.f32 0.5, %v4412_v16  ;;  %v443_v63 = vld [vmem:[%s3919_s17 + $0x1e0] sm:$0xff] }
  0xf7   : > { %v3226_v24 = vpop.f32.mrf.mxu1  ;;  %3114 = vmatprep.mubr.msk.f32.mxu0 %vm3821_vm0, %v3820_v1 }
  0xf8   : > { %3572 = verf.f32 %v1790_v19  ;;  %v4423_v25 = vadd.f32 %v4403_v10, %v1248_v20  ;;  %v2969_v32 = vpop.f32.mrf.mxu0 }
  0xf9   : > { %v1252_v27 = vpop.f32.mrf.mxu1  ;;  %3372 = vmatmul.mubr.f32.gmra.mxu1 %v341_v22 }
  0xfa   : > { %v1791_v28 = vmul.f32 0.70710677, %v4423_v25  ;;  %v1253_v29 = vadd.f32 %v1252_v27, %v792_v4  ;;  %3374 = vmatprep.mubr.msk.f32.mxu1 %vm3821_vm0, %v3820_v1  ;;  %v812_v35 = vpop.f32.mrf.mxu0  ;;  %3115 = vmatmul.mubr.msk.f32.gmra.mxu0 %vm463_vm1, %v440_v30  ;;  %v1711_v9 = vmul.f32 0.5, %v4423_v25  ;;  %v445_v27 = vld [vmem:[%s3919_s17 + $0x1f0] sm:$0xff] }
  0xfb   : > { %v3229_v33 = vpop.f32.mrf.mxu1  ;;  %3117 = vmatprep.mubr.msk.f32.mxu0 %vm3821_vm0, %v3820_v1 }
  0xfc   : > { %3574 = verf.f32 %v1791_v28  ;;  %v4434_v34 = vadd.f32 %v4403_v10, %v1253_v29  ;;  %v2972_v41 = vpop.f32.mrf.mxu0  ;;  %v347_v28 = vld [vmem:[%s4019_s9 + $0x1d8] sm:$0xff] }
  0xfd   : > { %v1257_v36 = vpop.f32.mrf.mxu1  ;;  %3375 = vmatmul.mubr.f32.gmra.mxu1 %v342_v31  ;;  %v348_v41 = vld [vmem:[%s4019_s9 + $0x1e0] sm:$0xff] }
  0xfe   : > { %v1792_v37 = vmul.f32 0.70710677, %v4434_v34  ;;  %v1258_v38 = vadd.f32 %v1257_v36, %v797_v8  ;;  %3377 = vmatprep.mubr.msk.f32.mxu1 %vm3821_vm0, %v3820_v1  ;;  %v817_v44 = vpop.f32.mrf.mxu0  ;;  %3118 = vmatmul.mubr.msk.f32.gmra.mxu0 %vm463_vm1, %v441_v39  ;;  %v1712_v23 = vmul.f32 0.5, %v4434_v34 }
  0xff   : > { %v3232_v42 = vpop.f32.mrf.mxu1  ;;  %3120 = vmatprep.mubr.msk.f32.mxu0 %vm3821_vm0, %v3820_v1 }
 0x100   : > { %3576 = verf.f32 %v1792_v37  ;;  %v4446_v43 = vadd.f32 %v4403_v10, %v1258_v38  ;;  %v2975_v52 = vpop.f32.mrf.mxu0 }
 0x101   : > { %v1262_v45 = vpop.f32.mrf.mxu1  ;;  %3378 = vmatmul.mubr.f32.gmra.mxu1 %v343_v40  ;;  %v446_v40 = vld [vmem:[%s3919_s17 + $0x1f8] sm:$0xff] }
 0x102   : > { %v1793_v46 = vmul.f32 0.70710677, %v4446_v43  ;;  %v1263_v48 = vadd.f32 %v1262_v45, %v802_v17  ;;  %3380 = vmatprep.mubr.msk.f32.mxu1 %vm3821_vm0, %v3820_v1  ;;  %v4459_v57 = vpop.f32.mrf.mxu0  ;;  %3121 = vmatmul.mubr.msk.f32.gmra.mxu0 %vm463_vm1, %v442_v49  ;;  %v1713_v36 = vmul.f32 0.5, %v4446_v43 }
 0x103   : > { %v3235_v53 = vpop.f32.mrf.mxu1  ;;  %3123 = vmatprep.mubr.msk.f32.mxu0 %vm3821_vm0, %v3820_v1 }
 0x104   : > { %3578 = verf.f32 %v1793_v46  ;;  %v4457_v54 = vadd.f32 %v4403_v10, %v1263_v48  ;;  %v2978_v2 = vpop.f32.mrf.mxu0 }
 0x105   : > { %v3573_v56 = vpop.eup %3572  ;;  %v1267_v58 = vpop.f32.mrf.mxu1  ;;  %3381 = vmatmul.mubr.f32.gmra.mxu1 %v344_v50 }
 0x106   : > { %v1948_v60 = vadd.f32 1.0, %v3573_v56  ;;  %v1794_v61 = vmul.f32 0.70710677, %v4457_v54  ;;  %v1268_v62 = vadd.f32 %v1267_v58, %v807_v26  ;;  %3383 = vmatprep.mubr.msk.f32.mxu1 %vm3821_vm0, %v3820_v1  ;;  %v4473_v7 = vpop.f32.mrf.mxu0  ;;  %3124 = vmatmul.mubr.msk.f32.gmra.mxu0 %vm463_vm1, %v443_v63  ;;  %v1714_v50 = vmul.f32 0.5, %v4457_v54  ;;  %v349_v58 = vld [vmem:[%s4019_s9 + $0x1e8] sm:$0xff] }
 0x107   : > { %v3238_v3 = vpop.f32.mrf.mxu1  ;;  %3126 = vmatprep.mubr.msk.f32.mxu0 %vm3821_vm0, %v3820_v1 }
 0x108   : > { %v2027_v4 = vmul.f32 %v1948_v60, %v1710_v59  ;;  %3580 = verf.f32 %v1794_v61  ;;  %v4471_v5 = vadd.f32 %v4403_v10, %v1268_v62  ;;  %v2981_v16 = vpop.f32.mrf.mxu0 }
 0x109   : > { %v3575_v6 = vpop.eup %3574  ;;  %v1272_v8 = vpop.f32.mrf.mxu1  ;;  %3384 = vmatmul.mubr.f32.gmra.mxu1 %v345_v0 }
 0x10a   : > { %2106 = vst [vmem:[%s4476_s15 + $0x18] sm:$0xff] %v2027_v4  ;;  %v1949_v11 = vadd.f32 1.0, %v3575_v6  ;;  %v1795_v12 = vmul.f32 0.70710677, %v4471_v5  ;;  %v1273_v13 = vadd.f32 %v1272_v8, %v812_v35  ;;  %3386 = vmatprep.mubr.msk.f32.mxu1 %vm3821_vm0, %v3820_v1  ;;  %v4490_v21 = vpop.f32.mrf.mxu0  ;;  %3127 = vmatmul.mubr.msk.f32.gmra.mxu0 %vm463_vm1, %v444_v14  ;;  %v1715_v2 = vmul.f32 0.5, %v4471_v5  ;;  %v350_v8 = vld [vmem:[%s4019_s9 + $0x1f0] sm:$0xff] }
 0x10b   : > { %v3241_v17 = vpop.f32.mrf.mxu1  ;;  %3129 = vmatprep.mubr.msk.f32.mxu0 %vm3821_vm0, %v3820_v1 }
 0x10c   : > { %v2028_v18 = vmul.f32 %v1949_v11, %v1711_v9  ;;  %3582 = verf.f32 %v1795_v12  ;;  %v4488_v19 = vadd.f32 %v4403_v10, %v1273_v13  ;;  %v2984_v29 = vpop.f32.mrf.mxu0 }
 0x10d   : > { %v3577_v20 = vpop.eup %3576  ;;  %v1277_v22 = vpop.f32.mrf.mxu1  ;;  %3387 = vmatmul.mubr.f32.gmra.mxu1 %v346_v15 }
 0x10e   : > { %2107 = vst [vmem:[%s4476_s15 + $0x20] sm:$0xff] %v2028_v18  ;;  %v1950_v24 = vadd.f32 1.0, %v3577_v20  ;;  %v1796_v25 = vmul.f32 0.70710677, %v4488_v19  ;;  %v1278_v26 = vadd.f32 %v1277_v22, %v817_v44  ;;  %3389 = vmatprep.mubr.msk.f32.mxu1 %vm3821_vm0, %v3820_v1  ;;  %v4505_v34 = vpop.f32.mrf.mxu0  ;;  %3130 = vmatmul.mubr.msk.f32.gmra.mxu0 %vm463_vm1, %v445_v27  ;;  %v1716_v16 = vmul.f32 0.5, %v4488_v19  ;;  %v351_v22 = vld [vmem:[%s4019_s9 + $0x1f8] sm:$0xff] }
 0x10f   : > { %v3244_v30 = vpop.f32.mrf.mxu1  ;;  %3132 = vmatprep.mubr.msk.f32.mxu0 %vm3821_vm0, %v3820_v1 }
 0x110   : > { %v2029_v31 = vmul.f32 %v1950_v24, %v1712_v23  ;;  %3584 = verf.f32 %v1796_v25  ;;  %v4503_v32 = vadd.f32 %v4403_v10, %v1278_v26  ;;  %v2987_v42 = vpop.f32.mrf.mxu0 }
 0x111   : > { %v3579_v33 = vpop.eup %3578  ;;  %v1282_v35 = vpop.f32.mrf.mxu1  ;;  %3390 = vmatmul.mubr.f32.gmra.mxu1 %v347_v28 }
 0x112   : > { %2108 = vst [vmem:[%s4476_s15 + $0x28] sm:$0xff] %v2029_v31  ;;  %v1951_v37 = vadd.f32 1.0, %v3579_v33  ;;  %v1797_v38 = vmul.f32 0.70710677, %v4503_v32  ;;  %v1283_v39 = vadd.f32 %v1282_v35, %v4459_v57  ;;  %3392 = vmatprep.mubr.msk.f32.mxu1 %vm3821_vm0, %v3820_v1  ;;  %v4521_v48 = vpop.f32.mrf.mxu0  ;;  %3133 = vmatmul.mubr.msk.f32.gmra.mxu0 %vm463_vm1, %v446_v40  ;;  %v447_v57 = vld [vmem:[%s3919_s17 + $0x200] sm:$0xff]  ;;  %v1717_v29 = vmul.f32 0.5, %v4503_v32 }
 0x113   : > { %v3247_v44 = vpop.f32.mrf.mxu1  ;;  %3135 = vmatprep.mubr.msk.f32.mxu0 %vm3821_vm0, %v3820_v1  ;;  %v352_v35 = vld [vmem:[%s4019_s9 + $0x200] sm:$0xff] }
 0x114   : > { %v2030_v45 = vmul.f32 %v1951_v37, %v1713_v36  ;;  %3586 = verf.f32 %v1797_v38  ;;  %v4519_v43 = vadd.f32 %v4403_v10, %v1283_v39  ;;  %v2990_v59 = vpop.f32.mrf.mxu0 }
 0x115   : > { %v3581_v46 = vpop.eup %3580  ;;  %v1287_v49 = vpop.f32.mrf.mxu1  ;;  %3393 = vmatmul.mubr.f32.gmra.mxu1 %v348_v41 }
 0x116   : > { %2109 = vst [vmem:[%s4476_s15 + $0x30] sm:$0xff] %v2030_v45  ;;  %v1952_v52 = vadd.f32 1.0, %v3581_v46  ;;  %v1798_v53 = vmul.f32 0.70710677, %v4519_v43  ;;  %v1288_v56 = vadd.f32 %v1287_v49, %v4473_v7  ;;  %3395 = vmatprep.mubr.msk.f32.mxu1 %vm3821_vm0, %v3820_v1  ;;  %v4537_v63 = vpop.f32.mrf.mxu0  ;;  %3136 = vmatmul.mubr.msk.f32.gmra.mxu0 %vm463_vm1, %v447_v57  ;;  %v448_v7 = vld [vmem:[%s3919_s17 + $0x208] sm:$0xff]  ;;  %v1718_v42 = vmul.f32 0.5, %v4519_v43 }
 0x117   : > { %v3250_v60 = vpop.f32.mrf.mxu1  ;;  %3138 = vmatprep.mubr.msk.f32.mxu0 %vm3821_vm0, %v3820_v1  ;;  %v353_v49 = vld [vmem:[%s4019_s9 + $0x208] sm:$0xff] }
 0x118   : > { %v2031_v61 = vmul.f32 %v1952_v52, %v1714_v50  ;;  %3588 = verf.f32 %v1798_v53  ;;  %v4535_v54 = vadd.f32 %v4403_v10, %v1288_v56  ;;  %v2993_v9 = vpop.f32.mrf.mxu0 }
 0x119   : > { %v3583_v62 = vpop.eup %3582  ;;  %v1292_v0 = vpop.f32.mrf.mxu1  ;;  %3396 = vmatmul.mubr.f32.gmra.mxu1 %v349_v58 }
 0x11a   : > { %2110 = vst [vmem:[%s4476_s15 + $0x38] sm:$0xff] %v2031_v61  ;;  %v1953_v3 = vadd.f32 1.0, %v3583_v62  ;;  %v1799_v4 = vmul.f32 0.70710677, %v4535_v54  ;;  %v1293_v6 = vadd.f32 %v1292_v0, %v4490_v21  ;;  %3398 = vmatprep.mubr.msk.f32.mxu1 %vm3821_vm0, %v3820_v1  ;;  %v4553_v14 = vpop.f32.mrf.mxu0  ;;  %3139 = vmatmul.mubr.msk.f32.gmra.mxu0 %vm463_vm1, %v448_v7  ;;  %v449_v21 = vld [vmem:[%s3919_s17 + $0x210] sm:$0xff]  ;;  %v1719_v59 = vmul.f32 0.5, %v4535_v54 }
 0x11b   : > { %v3253_v11 = vpop.f32.mrf.mxu1  ;;  %3141 = vmatprep.mubr.msk.f32.mxu0 %vm3821_vm0, %v3820_v1  ;;  %v354_v0 = vld [vmem:[%s4019_s9 + $0x210] sm:$0xff] }
 0x11c   : > { %v2032_v12 = vmul.f32 %v1953_v3, %v1715_v2  ;;  %3590 = verf.f32 %v1799_v4  ;;  %v4551_v5 = vadd.f32 %v4403_v10, %v1293_v6  ;;  %v2996_v23 = vpop.f32.mrf.mxu0 }
 0x11d   : > { %v3585_v13 = vpop.eup %3584  ;;  %v1297_v15 = vpop.f32.mrf.mxu1  ;;  %3399 = vmatmul.mubr.f32.gmra.mxu1 %v350_v8 }
 0x11e   : > { %2111 = vst [vmem:[%s4476_s15 + $0x40] sm:$0xff] %v2032_v12  ;;  %v1954_v17 = vadd.f32 1.0, %v3585_v13  ;;  %v1800_v18 = vmul.f32 0.70710677, %v4551_v5  ;;  %v1298_v20 = vadd.f32 %v1297_v15, %v4505_v34  ;;  %3401 = vmatprep.mubr.msk.f32.mxu1 %vm3821_vm0, %v3820_v1  ;;  %v4569_v27 = vpop.f32.mrf.mxu0  ;;  %3142 = vmatmul.mubr.msk.f32.gmra.mxu0 %vm463_vm1, %v449_v21  ;;  %v450_v34 = vld [vmem:[%s3919_s17 + $0x218] sm:$0xff]  ;;  %v1720_v9 = vmul.f32 0.5, %v4551_v5 }
 0x11f   : > { %v3256_v24 = vpop.f32.mrf.mxu1  ;;  %3144 = vmatprep.mubr.msk.f32.mxu0 %vm3821_vm0, %v3820_v1  ;;  %v355_v15 = vld [vmem:[%s4019_s9 + $0x218] sm:$0xff] }
 0x120   : > { %v2033_v25 = vmul.f32 %v1954_v17, %v1716_v16  ;;  %3592 = verf.f32 %v1800_v18  ;;  %v4567_v19 = vadd.f32 %v4403_v10, %v1298_v20  ;;  %v2999_v36 = vpop.f32.mrf.mxu0 }
 0x121   : > { %v3587_v26 = vpop.eup %3586  ;;  %v1302_v28 = vpop.f32.mrf.mxu1  ;;  %3402 = vmatmul.mubr.f32.gmra.mxu1 %v351_v22 }
 0x122   : > { %2112 = vst [vmem:[%s4476_s15 + $0x48] sm:$0xff] %v2033_v25  ;;  %v1955_v30 = vadd.f32 1.0, %v3587_v26  ;;  %v1801_v31 = vmul.f32 0.70710677, %v4567_v19  ;;  %v1303_v33 = vadd.f32 %v1302_v28, %v4521_v48  ;;  %3404 = vmatprep.mubr.msk.f32.mxu1 %vm3821_vm0, %v3820_v1  ;;  %v4585_v40 = vpop.f32.mrf.mxu0  ;;  %3145 = vmatmul.mubr.msk.f32.gmra.mxu0 %vm463_vm1, %v450_v34  ;;  %v451_v48 = vld [vmem:[%s3919_s17 + $0x220] sm:$0xff]  ;;  %v1721_v23 = vmul.f32 0.5, %v4567_v19 }
 0x123   : > { %v3259_v37 = vpop.f32.mrf.mxu1  ;;  %3147 = vmatprep.mubr.msk.f32.mxu0 %vm3821_vm0, %v3820_v1  ;;  %v356_v28 = vld [vmem:[%s4019_s9 + $0x220] sm:$0xff] }
 0x124   : > { %v2034_v38 = vmul.f32 %v1955_v30, %v1717_v29  ;;  %3594 = verf.f32 %v1801_v31  ;;  %v4583_v32 = vadd.f32 %v4403_v10, %v1303_v33  ;;  %v3002_v50 = vpop.f32.mrf.mxu0 }
 0x125   : > { %v3589_v39 = vpop.eup %3588  ;;  %v1307_v41 = vpop.f32.mrf.mxu1  ;;  %3405 = vmatmul.mubr.f32.gmra.mxu1 %v352_v35 }
 0x126   : > { %2113 = vst [vmem:[%s4476_s15 + $0x50] sm:$0xff] %v2034_v38  ;;  %v1956_v44 = vadd.f32 1.0, %v3589_v39  ;;  %v1802_v45 = vmul.f32 0.70710677, %v4583_v32  ;;  %v1308_v46 = vadd.f32 %v1307_v41, %v4537_v63  ;;  %3407 = vmatprep.mubr.msk.f32.mxu1 %vm3821_vm0, %v3820_v1  ;;  %v4601_v57 = vpop.f32.mrf.mxu0  ;;  %3148 = vmatmul.mubr.msk.f32.gmra.mxu0 %vm463_vm1, %v451_v48  ;;  %v452_v63 = vld [vmem:[%s3919_s17 + $0x228] sm:$0xff]  ;;  %v1722_v36 = vmul.f32 0.5, %v4583_v32 }
 0x127   : > { %v3262_v52 = vpop.f32.mrf.mxu1  ;;  %3150 = vmatprep.mubr.msk.f32.mxu0 %vm3821_vm0, %v3820_v1  ;;  %v357_v41 = vld [vmem:[%s4019_s9 + $0x228] sm:$0xff] }
 0x128   : > { %v2035_v53 = vmul.f32 %v1956_v44, %v1718_v42  ;;  %3596 = verf.f32 %v1802_v45  ;;  %v4599_v43 = vadd.f32 %v4403_v10, %v1308_v46  ;;  %v3005_v2 = vpop.f32.mrf.mxu0 }
 0x129   : > { %v3591_v56 = vpop.eup %3590  ;;  %v1312_v58 = vpop.f32.mrf.mxu1  ;;  %3408 = vmatmul.mubr.f32.gmra.mxu1 %v353_v49 }
 0x12a   : > { %2114 = vst [vmem:[%s4476_s15 + $0x58] sm:$0xff] %v2035_v53  ;;  %v1957_v60 = vadd.f32 1.0, %v3591_v56  ;;  %v1803_v61 = vmul.f32 0.70710677, %v4599_v43  ;;  %v1313_v62 = vadd.f32 %v1312_v58, %v4553_v14  ;;  %3410 = vmatprep.mubr.msk.f32.mxu1 %vm3821_vm0, %v3820_v1  ;;  %v4617_v7 = vpop.f32.mrf.mxu0  ;;  %3151 = vmatmul.mubr.msk.f32.gmra.mxu0 %vm463_vm1, %v452_v63  ;;  %v453_v14 = vld [vmem:[%s3919_s17 + $0x230] sm:$0xff]  ;;  %v1723_v50 = vmul.f32 0.5, %v4599_v43 }
 0x12b   : > { %v3265_v3 = vpop.f32.mrf.mxu1  ;;  %3153 = vmatprep.mubr.msk.f32.mxu0 %vm3821_vm0, %v3820_v1  ;;  %v358_v58 = vld [vmem:[%s4019_s9 + $0x230] sm:$0xff] }
 0x12c   : > { %v2036_v4 = vmul.f32 %v1957_v60, %v1719_v59  ;;  %3598 = verf.f32 %v1803_v61  ;;  %v4615_v54 = vadd.f32 %v4403_v10, %v1313_v62  ;;  %v3008_v16 = vpop.f32.mrf.mxu0 }
 0x12d   : > { %v3593_v6 = vpop.eup %3592  ;;  %v1317_v8 = vpop.f32.mrf.mxu1  ;;  %3411 = vmatmul.mubr.f32.gmra.mxu1 %v354_v0 }
 0x12e   : > { %2115 = vst [vmem:[%s4476_s15 + $0x60] sm:$0xff] %v2036_v4  ;;  %v1958_v11 = vadd.f32 1.0, %v3593_v6  ;;  %v1804_v12 = vmul.f32 0.70710677, %v4615_v54  ;;  %v1318_v13 = vadd.f32 %v1317_v8, %v4569_v27  ;;  %3413 = vmatprep.mubr.msk.f32.mxu1 %vm3821_vm0, %v3820_v1  ;;  %v4633_v21 = vpop.f32.mrf.mxu0  ;;  %3154 = vmatmul.mubr.msk.f32.gmra.mxu0 %vm463_vm1, %v453_v14  ;;  %v454_v27 = vld [vmem:[%s3919_s17 + $0x238] sm:$0xff]  ;;  %v1724_v2 = vmul.f32 0.5, %v4615_v54 }
 0x12f   : > { %v3268_v17 = vpop.f32.mrf.mxu1  ;;  %3156 = vmatprep.mubr.msk.f32.mxu0 %vm3821_vm0, %v3820_v1  ;;  %v359_v8 = vld [vmem:[%s4019_s9 + $0x238] sm:$0xff] }
 0x130   : > { %v2037_v18 = vmul.f32 %v1958_v11, %v1720_v9  ;;  %3600 = verf.f32 %v1804_v12  ;;  %v4631_v5 = vadd.f32 %v4403_v10, %v1318_v13  ;;  %v3011_v29 = vpop.f32.mrf.mxu0 }
 0x131   : > { %v3595_v20 = vpop.eup %3594  ;;  %v1322_v22 = vpop.f32.mrf.mxu1  ;;  %3414 = vmatmul.mubr.f32.gmra.mxu1 %v355_v15 }
 0x132   : > { %2116 = vst [vmem:[%s4476_s15 + $0x68] sm:$0xff] %v2037_v18  ;;  %v1959_v24 = vadd.f32 1.0, %v3595_v20  ;;  %v1805_v25 = vmul.f32 0.70710677, %v4631_v5  ;;  %v1323_v26 = vadd.f32 %v1322_v22, %v4585_v40  ;;  %3416 = vmatprep.mubr.msk.f32.mxu1 %vm3821_vm0, %v3820_v1  ;;  %v4649_v34 = vpop.f32.mrf.mxu0  ;;  %3157 = vmatmul.mubr.msk.f32.gmra.mxu0 %vm463_vm1, %v454_v27  ;;  %v455_v40 = vld [vmem:[%s3919_s17 + $0x240] sm:$0xff]  ;;  %v1725_v16 = vmul.f32 0.5, %v4631_v5 }
 0x133   : > { %v3271_v30 = vpop.f32.mrf.mxu1  ;;  %3159 = vmatprep.mubr.msk.f32.mxu0 %vm3821_vm0, %v3820_v1  ;;  %v360_v22 = vld [vmem:[%s4019_s9 + $0x240] sm:$0xff] }
 0x134   : > { %v2038_v31 = vmul.f32 %v1959_v24, %v1721_v23  ;;  %3602 = verf.f32 %v1805_v25  ;;  %v4647_v19 = vadd.f32 %v4403_v10, %v1323_v26  ;;  %v3014_v42 = vpop.f32.mrf.mxu0 }
 0x135   : > { %v3597_v33 = vpop.eup %3596  ;;  %v1327_v35 = vpop.f32.mrf.mxu1  ;;  %3417 = vmatmul.mubr.f32.gmra.mxu1 %v356_v28 }
 0x136   : > { %2117 = vst [vmem:[%s4476_s15 + $0x70] sm:$0xff] %v2038_v31  ;;  %v1960_v37 = vadd.f32 1.0, %v3597_v33  ;;  %v1806_v38 = vmul.f32 0.70710677, %v4647_v19  ;;  %v1328_v39 = vadd.f32 %v1327_v35, %v4601_v57  ;;  %3419 = vmatprep.mubr.msk.f32.mxu1 %vm3821_vm0, %v3820_v1  ;;  %v4665_v48 = vpop.f32.mrf.mxu0  ;;  %3160 = vmatmul.mubr.msk.f32.gmra.mxu0 %vm463_vm1, %v455_v40  ;;  %v456_v57 = vld [vmem:[%s3919_s17 + $0x248] sm:$0xff]  ;;  %v1726_v29 = vmul.f32 0.5, %v4647_v19 }
 0x137   : > { %v3274_v44 = vpop.f32.mrf.mxu1  ;;  %3162 = vmatprep.mubr.msk.f32.mxu0 %vm3821_vm0, %v3820_v1  ;;  %v361_v35 = vld [vmem:[%s4019_s9 + $0x248] sm:$0xff] }
 0x138   : > { %v2039_v45 = vmul.f32 %v1960_v37, %v1722_v36  ;;  %3604 = verf.f32 %v1806_v38  ;;  %v4663_v32 = vadd.f32 %v4403_v10, %v1328_v39  ;;  %v3017_v59 = vpop.f32.mrf.mxu0 }
 0x139   : > { %v3599_v46 = vpop.eup %3598  ;;  %v1332_v49 = vpop.f32.mrf.mxu1  ;;  %3420 = vmatmul.mubr.f32.gmra.mxu1 %v357_v41 }
 0x13a   : > { %2118 = vst [vmem:[%s4476_s15 + $0x78] sm:$0xff] %v2039_v45  ;;  %v1961_v52 = vadd.f32 1.0, %v3599_v46  ;;  %v1807_v53 = vmul.f32 0.70710677, %v4663_v32  ;;  %v1333_v56 = vadd.f32 %v1332_v49, %v4617_v7  ;;  %3422 = vmatprep.mubr.msk.f32.mxu1 %vm3821_vm0, %v3820_v1  ;;  %v4681_v63 = vpop.f32.mrf.mxu0  ;;  %3163 = vmatmul.mubr.msk.f32.gmra.mxu0 %vm463_vm1, %v456_v57  ;;  %v457_v7 = vld [vmem:[%s3919_s17 + $0x250] sm:$0xff]  ;;  %v1727_v42 = vmul.f32 0.5, %v4663_v32 }
 0x13b   : > { %v3277_v60 = vpop.f32.mrf.mxu1  ;;  %3165 = vmatprep.mubr.msk.f32.mxu0 %vm3821_vm0, %v3820_v1  ;;  %v362_v49 = vld [vmem:[%s4019_s9 + $0x250] sm:$0xff] }
 0x13c   : > { %v2040_v61 = vmul.f32 %v1961_v52, %v1723_v50  ;;  %3606 = verf.f32 %v1807_v53  ;;  %v4679_v43 = vadd.f32 %v4403_v10, %v1333_v56  ;;  %v3020_v9 = vpop.f32.mrf.mxu0 }
 0x13d   : > { %v3601_v62 = vpop.eup %3600  ;;  %v1337_v0 = vpop.f32.mrf.mxu1  ;;  %3423 = vmatmul.mubr.f32.gmra.mxu1 %v358_v58 }
 0x13e   : > { %2119 = vst [vmem:[%s4476_s15 + $0x80] sm:$0xff] %v2040_v61  ;;  %v1962_v3 = vadd.f32 1.0, %v3601_v62  ;;  %v1808_v4 = vmul.f32 0.70710677, %v4679_v43  ;;  %v1338_v6 = vadd.f32 %v1337_v0, %v4633_v21  ;;  %3425 = vmatprep.mubr.msk.f32.mxu1 %vm3821_vm0, %v3820_v1  ;;  %v4697_v14 = vpop.f32.mrf.mxu0  ;;  %3166 = vmatmul.mubr.msk.f32.gmra.mxu0 %vm463_vm1, %v457_v7  ;;  %v458_v21 = vld [vmem:[%s3919_s17 + $0x258] sm:$0xff]  ;;  %v1728_v59 = vmul.f32 0.5, %v4679_v43 }
 0x13f   : > { %v3280_v11 = vpop.f32.mrf.mxu1  ;;  %3168 = vmatprep.mubr.msk.f32.mxu0 %vm3821_vm0, %v3820_v1  ;;  %v363_v0 = vld [vmem:[%s4019_s9 + $0x258] sm:$0xff] }
 0x140   : > { %v2041_v12 = vmul.f32 %v1962_v3, %v1724_v2  ;;  %3608 = verf.f32 %v1808_v4  ;;  %v4695_v54 = vadd.f32 %v4403_v10, %v1338_v6  ;;  %v3023_v23 = vpop.f32.mrf.mxu0 }
 0x141   : > { %v3603_v13 = vpop.eup %3602  ;;  %v1342_v15 = vpop.f32.mrf.mxu1  ;;  %3426 = vmatmul.mubr.f32.gmra.mxu1 %v359_v8 }
 0x142   : > { %2120 = vst [vmem:[%s4476_s15 + $0x88] sm:$0xff] %v2041_v12  ;;  %v1963_v17 = vadd.f32 1.0, %v3603_v13  ;;  %v1809_v18 = vmul.f32 0.70710677, %v4695_v54  ;;  %v1343_v20 = vadd.f32 %v1342_v15, %v4649_v34  ;;  %3428 = vmatprep.mubr.msk.f32.mxu1 %vm3821_vm0, %v3820_v1  ;;  %v4713_v27 = vpop.f32.mrf.mxu0  ;;  %3169 = vmatmul.mubr.msk.f32.gmra.mxu0 %vm463_vm1, %v458_v21  ;;  %v459_v34 = vld [vmem:[%s3919_s17 + $0x260] sm:$0xff]  ;;  %v1729_v9 = vmul.f32 0.5, %v4695_v54 }
 0x143   : > { %v3283_v24 = vpop.f32.mrf.mxu1  ;;  %3171 = vmatprep.mubr.msk.f32.mxu0 %vm3821_vm0, %v3820_v1  ;;  %v364_v15 = vld [vmem:[%s4019_s9 + $0x260] sm:$0xff] }
 0x144   : > { %v2042_v25 = vmul.f32 %v1963_v17, %v1725_v16  ;;  %3610 = verf.f32 %v1809_v18  ;;  %v4711_v5 = vadd.f32 %v4403_v10, %v1343_v20  ;;  %v3026_v36 = vpop.f32.mrf.mxu0 }
 0x145   : > { %v3605_v26 = vpop.eup %3604  ;;  %v1347_v28 = vpop.f32.mrf.mxu1  ;;  %3429 = vmatmul.mubr.f32.gmra.mxu1 %v360_v22 }
 0x146   : > { %2121 = vst [vmem:[%s4476_s15 + $0x90] sm:$0xff] %v2042_v25  ;;  %v1964_v30 = vadd.f32 1.0, %v3605_v26  ;;  %v1810_v31 = vmul.f32 0.70710677, %v4711_v5  ;;  %v1348_v33 = vadd.f32 %v1347_v28, %v4665_v48  ;;  %3431 = vmatprep.mubr.msk.f32.mxu1 %vm3821_vm0, %v3820_v1  ;;  %v4729_v40 = vpop.f32.mrf.mxu0  ;;  %3172 = vmatmul.mubr.msk.f32.gmra.mxu0 %vm463_vm1, %v459_v34  ;;  %v460_v48 = vld [vmem:[%s3919_s17 + $0x268] sm:$0xff]  ;;  %v1730_v23 = vmul.f32 0.5, %v4711_v5 }
 0x147   : > { %v3286_v37 = vpop.f32.mrf.mxu1  ;;  %3174 = vmatprep.mubr.msk.f32.mxu0 %vm3821_vm0, %v3820_v1  ;;  %v365_v28 = vld [vmem:[%s4019_s9 + $0x268] sm:$0xff] }
 0x148   : > { %v2043_v38 = vmul.f32 %v1964_v30, %v1726_v29  ;;  %3612 = verf.f32 %v1810_v31  ;;  %v4727_v19 = vadd.f32 %v4403_v10, %v1348_v33  ;;  %v3029_v50 = vpop.f32.mrf.mxu0 }
 0x149   : > { %v3607_v39 = vpop.eup %3606  ;;  %v1352_v41 = vpop.f32.mrf.mxu1  ;;  %3432 = vmatmul.mubr.f32.gmra.mxu1 %v361_v35 }
 0x14a   : > { %2122 = vst [vmem:[%s4476_s15 + $0x98] sm:$0xff] %v2043_v38  ;;  %v1965_v44 = vadd.f32 1.0, %v3607_v39  ;;  %v1811_v45 = vmul.f32 0.70710677, %v4727_v19  ;;  %v1353_v46 = vadd.f32 %v1352_v41, %v4681_v63  ;;  %3434 = vmatprep.mubr.msk.f32.mxu1 %vm3821_vm0, %v3820_v1  ;;  %v4745_v57 = vpop.f32.mrf.mxu0  ;;  %3175 = vmatmul.mubr.msk.f32.gmra.mxu0 %vm463_vm1, %v460_v48  ;;  %v461_v63 = vld [vmem:[%s3919_s17 + $0x270] sm:$0xff]  ;;  %v1731_v36 = vmul.f32 0.5, %v4727_v19 }
 0x14b   : > { %v3289_v52 = vpop.f32.mrf.mxu1  ;;  %3177 = vmatprep.mubr.msk.f32.mxu0 %vm3821_vm0, %v3820_v1  ;;  %v366_v41 = vld [vmem:[%s4019_s9 + $0x270] sm:$0xff] }
 0x14c   : > { %v2044_v53 = vmul.f32 %v1965_v44, %v1727_v42  ;;  %3614 = verf.f32 %v1811_v45  ;;  %v4743_v32 = vadd.f32 %v4403_v10, %v1353_v46  ;;  %v3032_v2 = vpop.f32.mrf.mxu0 }
 0x14d   : > { %v3609_v56 = vpop.eup %3608  ;;  %v1357_v58 = vpop.f32.mrf.mxu1  ;;  %3435 = vmatmul.mubr.f32.gmra.mxu1 %v362_v49 }
 0x14e   : > { %2123 = vst [vmem:[%s4476_s15 + $0xa0] sm:$0xff] %v2044_v53  ;;  %v1966_v60 = vadd.f32 1.0, %v3609_v56  ;;  %v1812_v61 = vmul.f32 0.70710677, %v4743_v32  ;;  %v1358_v62 = vadd.f32 %v1357_v58, %v4697_v14  ;;  %3437 = vmatprep.mubr.msk.f32.mxu1 %vm3821_vm0, %v3820_v1  ;;  %v4761_v7 = vpop.f32.mrf.mxu0  ;;  %3178 = vmatmul.mubr.msk.f32.gmra.mxu0 %vm463_vm1, %v461_v63  ;;  %v288_v14 = vld [vmem:[%s4019_s9] sm:$0xff]  ;;  %v1732_v50 = vmul.f32 0.5, %v4743_v32 }
 0x14f   : > { %v3292_v3 = vpop.f32.mrf.mxu1  ;;  %3212 = vmatprep.mubr.msk.f32.mxu0 %vm3821_vm0, %v3820_v1 }
 0x150   : > { %v2045_v4 = vmul.f32 %v1966_v60, %v1728_v59  ;;  %3616 = verf.f32 %v1812_v61  ;;  %v4759_v43 = vadd.f32 %v4403_v10, %v1358_v62  ;;  %v3035_v16 = vpop.f32.mrf.mxu0 }
 0x151   : > { %v3611_v6 = vpop.eup %3610  ;;  %v1362_v8 = vpop.f32.mrf.mxu1  ;;  %3438 = vmatmul.mubr.f32.gmra.mxu1 %v363_v0 }
 0x152   : > { %2124 = vst [vmem:[%s4476_s15 + $0xa8] sm:$0xff] %v2045_v4  ;;  %v1967_v11 = vadd.f32 1.0, %v3611_v6  ;;  %v1813_v12 = vmul.f32 0.70710677, %v4759_v43  ;;  %v1363_v13 = vadd.f32 %v1362_v8, %v4713_v27  ;;  %3440 = vmatprep.mubr.msk.f32.mxu1 %vm3821_vm0, %v3820_v1  ;;  %v922_v21 = vpop.f32.mrf.mxu0  ;;  %3213 = vmatmul.mubr.f32.vlgmr.msra.gmra.mxu0 %v288_v14  ;;  %v289_v27 = vld [vmem:[%s4019_s9 + $0x8] sm:$0xff]  ;;  %v1733_v63 = vmul.f32 0.5, %v4759_v43 }
 0x153   : > { %v3295_v17 = vpop.f32.mrf.mxu1  ;;  %3215 = vmatprep.mubr.msk.f32.mxu0 %vm3821_vm0, %v3820_v1 }
 0x154   : > { %v2046_v18 = vmul.f32 %v1967_v11, %v1729_v9  ;;  %3618 = verf.f32 %v1813_v12  ;;  %v4775_v54 = vadd.f32 %v4403_v10, %v1363_v13  ;;  %v3038_v29 = vpop.f32.mrf.mxu0 }
 0x155   : > { %v3613_v20 = vpop.eup %3612  ;;  %v1367_v22 = vpop.f32.mrf.mxu1  ;;  %3441 = vmatmul.mubr.f32.gmra.mxu1 %v364_v15 }
 0x156   : > { %2125 = vst [vmem:[%s4476_s15 + $0xb0] sm:$0xff] %v2046_v18  ;;  %v1968_v24 = vadd.f32 1.0, %v3613_v20  ;;  %v1814_v25 = vmul.f32 0.70710677, %v4775_v54  ;;  %v1368_v26 = vadd.f32 %v1367_v22, %v4729_v40  ;;  %3443 = vmatprep.mubr.msk.f32.mxu1 %vm3821_vm0, %v3820_v1  ;;  %v927_v34 = vpop.f32.mrf.mxu0  ;;  %3216 = vmatmul.mubr.f32.gmra.mxu0 %v289_v27  ;;  %v290_v40 = vld [vmem:[%s4019_s9 + $0x10] sm:$0xff]  ;;  %v1734_v43 = vmul.f32 0.5, %v4775_v54 }
 0x157   : > { %v3298_v30 = vpop.f32.mrf.mxu1  ;;  %3218 = vmatprep.mubr.msk.f32.mxu0 %vm3821_vm0, %v3820_v1 }
 0x158   : > { %v2047_v31 = vmul.f32 %v1968_v24, %v1730_v23  ;;  %3620 = verf.f32 %v1814_v25  ;;  %v4788_v5 = vadd.f32 %v4403_v10, %v1368_v26  ;;  %v3041_v42 = vpop.f32.mrf.mxu0 }
 0x159   : > { %v3615_v33 = vpop.eup %3614  ;;  %v1372_v35 = vpop.f32.mrf.mxu1  ;;  %3444 = vmatmul.mubr.f32.gmra.mxu1 %v365_v28 }
 0x15a   : > { %2126 = vst [vmem:[%s4476_s15 + $0xb8] sm:$0xff] %v2047_v31  ;;  %v1969_v37 = vadd.f32 1.0, %v3615_v33  ;;  %v1815_v38 = vmul.f32 0.70710677, %v4788_v5  ;;  %v1373_v39 = vadd.f32 %v1372_v35, %v4745_v57  ;;  %3446 = vmatprep.mubr.msk.f32.mxu1 %vm3821_vm0, %v3820_v1  ;;  %v932_v48 = vpop.f32.mrf.mxu0  ;;  %3219 = vmatmul.mubr.f32.gmra.mxu0 %v290_v40  ;;  %v1735_v23 = vmul.f32 0.5, %v4788_v5 }
 0x15b   : > { %v3301_v44 = vpop.f32.mrf.mxu1 }
 0x15c   : > { %v2048_v45 = vmul.f32 %v1969_v37, %v1731_v36  ;;  %3622 = verf.f32 %v1815_v38  ;;  %v1657_v19 = vadd.f32 %v4403_v10, %v1373_v39  ;;  %v3044_v56 = vpop.f32.mrf.mxu0 }
 0x15d   : > { %v3617_v46 = vpop.eup %3616  ;;  %v1377_v49 = vpop.f32.mrf.mxu1  ;;  %3447 = vmatmul.mubr.f32.gmra.mxu1 %v366_v41 }
 0x15e   : > { %2127 = vst [vmem:[%s4476_s15 + $0xc0] sm:$0xff] %v2048_v45  ;;  %v1970_v52 = vadd.f32 1.0, %v3617_v46  ;;  %v1816_v53 = vmul.f32 0.70710677, %v1657_v19  ;;  %v1378_v1 = vadd.f32 %v1377_v49, %v4761_v7  ;;  %v937_v61 = vpop.f32.mrf.mxu0  ;;  %v4810_v7 = vld [vmem:[%s5143_s4] ss:$0 sm:$0xff] }
 0x15f   : > { %v3304_v57 = vpop.f32.mrf.mxu1 }
 0x160   : > { %v2049_v58 = vmul.f32 %v1970_v52, %v1732_v50  ;;  %3624 = verf.f32 %v1816_v53  ;;  %v1658_v59 = vadd.f32 %v4403_v10, %v1378_v1  ;;  %v3047_v3 = vpop.f32.mrf.mxu0 }
 0x161   : > { %v3619_v60 = vpop.eup %3618  ;;  %v1382_v62 = vpop.f32.mrf.mxu1 }
 0x162   : > { %2128 = vst [vmem:[%s4476_s15 + $0xc8] sm:$0xff] %v2049_v58  ;;  %v1971_v0 = vadd.f32 1.0, %v3619_v60  ;;  %v1817_v2 = vmul.f32 0.70710677, %v1658_v59  ;;  %v1383_v32 = vadd.f32 %v1382_v62, %v922_v21  ;;  %v942_v9 = vpop.f32.mrf.mxu0  ;;  %v1737_v45 = vmul.f32 0.5, %v1658_v59 }
 0x163   : > { %v3307_v4 = vpop.f32.mrf.mxu1 }
 0x164   : > { %v2050_v6 = vmul.f32 %v1971_v0, %v1733_v63  ;;  %3626 = verf.f32 %v1817_v2  ;;  %v1659_v10 = vadd.f32 %v4810_v7, %v1383_v32  ;;  %v3050_v15 = vpop.f32.mrf.mxu0 }
 0x165   : > { %v3621_v8 = vpop.eup %3620  ;;  %v1387_v11 = vpop.f32.mrf.mxu1 }
 0x166   : > { %2129 = vst [vmem:[%s4476_s15 + $0xd0] sm:$0xff] %v2050_v6  ;;  %v1972_v12 = vadd.f32 1.0, %v3621_v8  ;;  %v1818_v13 = vmul.f32 0.70710677, %v1659_v10  ;;  %v1388_v14 = vadd.f32 %v1387_v11, %v927_v34  ;;  %v947_v21 = vpop.f32.mrf.mxu0  ;;  %v1736_v34 = vmul.f32 0.5, %v1657_v19 }
 0x167   : > { %v3310_v16 = vpop.f32.mrf.mxu1  ;;  %v1738_v58 = vmul.f32 0.5, %v1659_v10 }
 0x168   : > { %v2051_v17 = vmul.f32 %v1972_v12, %v1734_v43  ;;  %3628 = verf.f32 %v1818_v13  ;;  %v1660_v18 = vadd.f32 %v4810_v7, %v1388_v14  ;;  %v3053_v54 = vpop.f32.mrf.mxu0 }
 0x169   : > { %v3623_v20 = vpop.eup %3622  ;;  %v1392_v22 = vpop.f32.mrf.mxu1 }
 0x16a   : > { %2130 = vst [vmem:[%s4476_s15 + $0xd8] sm:$0xff] %v2051_v17  ;;  %v1973_v24 = vadd.f32 1.0, %v3623_v20  ;;  %v1819_v25 = vmul.f32 0.70710677, %v1660_v18  ;;  %v1393_v26 = vadd.f32 %v1392_v22, %v932_v48  ;;  %v952_v31 = vpop.f32.mrf.mxu0  ;;  %v1739_v6 = vmul.f32 0.5, %v1660_v18 }
 0x16b   : > { %v3313_v27 = vpop.f32.mrf.mxu1 }
 0x16c   : > { %v2052_v28 = vmul.f32 %v1973_v24, %v1735_v23  ;;  %3630 = verf.f32 %v1819_v25  ;;  %v1661_v29 = vadd.f32 %v4810_v7, %v1393_v26  ;;  %v3056_v38 = vpop.f32.mrf.mxu0 }
 0x16d   : > { %v3625_v30 = vpop.eup %3624  ;;  %v1397_v33 = vpop.f32.mrf.mxu1 }
 0x16e   : > { %2131 = vst [vmem:[%s4476_s15 + $0xe0] sm:$0xff] %v2052_v28  ;;  %v1974_v35 = vadd.f32 1.0, %v3625_v30  ;;  %v1820_v36 = vmul.f32 0.70710677, %v1661_v29  ;;  %v1398_v37 = vadd.f32 %v1397_v33, %v937_v61  ;;  %v957_v42 = vpop.f32.mrf.mxu0  ;;  %v1740_v17 = vmul.f32 0.5, %v1661_v29 }
 0x16f   : > { %v3316_v5 = vpop.f32.mrf.mxu1 }
 0x170   : > { %v2053_v39 = vmul.f32 %v1974_v35, %v1736_v34  ;;  %3632 = verf.f32 %v1820_v36  ;;  %v1662_v40 = vadd.f32 %v4810_v7, %v1398_v37  ;;  %v3059_v50 = vpop.f32.mrf.mxu0 }
 0x171   : > { %v3627_v41 = vpop.eup %3626  ;;  %v1402_v44 = vpop.f32.mrf.mxu1 }
 0x172   : > { %2132 = vst [vmem:[%s4476_s15 + $0xe8] sm:$0xff] %v2053_v39  ;;  %v1975_v46 = vadd.f32 1.0, %v3627_v41  ;;  %v1821_v48 = vmul.f32 0.70710677, %v1662_v40  ;;  %v1403_v49 = vadd.f32 %v1402_v44, %v942_v9  ;;  %v962_v56 = vpop.f32.mrf.mxu0  ;;  %v1741_v28 = vmul.f32 0.5, %v1662_v40 }
 0x173   : > { %v3319_v19 = vpop.f32.mrf.mxu1 }
 0x174   : > { %v2054_v52 = vmul.f32 %v1975_v46, %v1737_v45  ;;  %3634 = verf.f32 %v1821_v48  ;;  %v1663_v53 = vadd.f32 %v4810_v7, %v1403_v49  ;;  %v3062_v63 = vpop.f32.mrf.mxu0 }
 0x175   : > { %v3629_v1 = vpop.eup %3628  ;;  %v1407_v57 = vpop.f32.mrf.mxu1 }
 0x176   : > { %2133 = vst [vmem:[%s4476_s15 + $0xf0] sm:$0xff] %v2054_v52  ;;  %v1976_v60 = vadd.f32 1.0, %v3629_v1  ;;  %v1822_v61 = vmul.f32 0.70710677, %v1663_v53  ;;  %v1408_v62 = vadd.f32 %v1407_v57, %v947_v21  ;;  %v967_v3 = vpop.f32.mrf.mxu0  ;;  %v1742_v39 = vmul.f32 0.5, %v1663_v53 }
 0x177   : > { %v3322_v59 = vpop.f32.mrf.mxu1 }
 0x178   : > { %v2055_v0 = vmul.f32 %v1976_v60, %v1738_v58  ;;  %3636 = verf.f32 %v1822_v61  ;;  %v1664_v2 = vadd.f32 %v4810_v7, %v1408_v62  ;;  %v3065_v43 = vpop.f32.mrf.mxu0 }
 0x179   : > { %v3631_v32 = vpop.eup %3630  ;;  %v1412_v4 = vpop.f32.mrf.mxu1 }
 0x17a   : > { %2134 = vst [vmem:[%s4476_s15 + $0xf8] sm:$0xff] %v2055_v0  ;;  %v1977_v8 = vadd.f32 1.0, %v3631_v32  ;;  %v1823_v9 = vmul.f32 0.70710677, %v1664_v2  ;;  %v1413_v11 = vadd.f32 %v1412_v4, %v952_v31  ;;  %v972_v15 = vpop.f32.mrf.mxu0  ;;  %v1743_v52 = vmul.f32 0.5, %v1664_v2 }
 0x17b   : > { %v3325_v10 = vpop.f32.mrf.mxu1 }
 0x17c   : > { %v2056_v12 = vmul.f32 %v1977_v8, %v1739_v6  ;;  %3638 = verf.f32 %v1823_v9  ;;  %v1665_v13 = vadd.f32 %v4810_v7, %v1413_v11  ;;  %v3068_v23 = vpop.f32.mrf.mxu0 }
 0x17d   : > { %v3633_v14 = vpop.eup %3632  ;;  %v1417_v16 = vpop.f32.mrf.mxu1 }
 0x17e   : > { %2135 = vst [vmem:[%s4476_s15 + $0x100] sm:$0xff] %v2056_v12  ;;  %v1978_v20 = vadd.f32 1.0, %v3633_v14  ;;  %v1824_v21 = vmul.f32 0.70710677, %v1665_v13  ;;  %v1418_v22 = vadd.f32 %v1417_v16, %v957_v42  ;;  %v977_v54 = vpop.f32.mrf.mxu0  ;;  %v1744_v0 = vmul.f32 0.5, %v1665_v13 }
 0x17f   : > { %v3328_v18 = vpop.f32.mrf.mxu1 }
 0x180   : > { %v2057_v24 = vmul.f32 %v1978_v20, %v1740_v17  ;;  %3640 = verf.f32 %v1824_v21  ;;  %v1666_v25 = vadd.f32 %v4810_v7, %v1418_v22  ;;  %v3071_v34 = vpop.f32.mrf.mxu0 }
 0x181   : > { %v3635_v26 = vpop.eup %3634  ;;  %v1422_v27 = vpop.f32.mrf.mxu1 }
 0x182   : > { %2136 = vst [vmem:[%s4476_s15 + $0x108] sm:$0xff] %v2057_v24  ;;  %v1979_v30 = vadd.f32 1.0, %v3635_v26  ;;  %v1825_v31 = vmul.f32 0.70710677, %v1666_v25  ;;  %v1423_v33 = vadd.f32 %v1422_v27, %v962_v56  ;;  %v982_v38 = vpop.f32.mrf.mxu0  ;;  %v1745_v12 = vmul.f32 0.5, %v1666_v25 }
 0x183   : > { %v3331_v29 = vpop.f32.mrf.mxu1 }
 0x184   : > { %v2058_v35 = vmul.f32 %v1979_v30, %v1741_v28  ;;  %3642 = verf.f32 %v1825_v31  ;;  %v1667_v36 = vadd.f32 %v4810_v7, %v1423_v33  ;;  %v3074_v45 = vpop.f32.mrf.mxu0 }
 0x185   : > { %v3637_v37 = vpop.eup %3636  ;;  %v1427_v5 = vpop.f32.mrf.mxu1 }
 0x186   : > { %2137 = vst [vmem:[%s4476_s15 + $0x110] sm:$0xff] %v2058_v35  ;;  %v1980_v41 = vadd.f32 1.0, %v3637_v37  ;;  %v1826_v42 = vmul.f32 0.70710677, %v1667_v36  ;;  %v1428_v44 = vadd.f32 %v1427_v5, %v967_v3  ;;  %v987_v50 = vpop.f32.mrf.mxu0  ;;  %v1746_v24 = vmul.f32 0.5, %v1667_v36 }
 0x187   : > { %v3334_v40 = vpop.f32.mrf.mxu1 }
 0x188   : > { %v2059_v46 = vmul.f32 %v1980_v41, %v1742_v39  ;;  %3644 = verf.f32 %v1826_v42  ;;  %v1668_v48 = vadd.f32 %v4810_v7, %v1428_v44  ;;  %v3077_v58 = vpop.f32.mrf.mxu0 }
 0x189   : > { %v3639_v49 = vpop.eup %3638  ;;  %v1432_v19 = vpop.f32.mrf.mxu1 }
 0x18a   : > { %2138 = vst [vmem:[%s4476_s15 + $0x118] sm:$0xff] %v2059_v46  ;;  %v1981_v1 = vadd.f32 1.0, %v3639_v49  ;;  %v1827_v56 = vmul.f32 0.70710677, %v1668_v48  ;;  %v1433_v57 = vadd.f32 %v1432_v19, %v972_v15  ;;  %v992_v63 = vpop.f32.mrf.mxu0  ;;  %v1747_v35 = vmul.f32 0.5, %v1668_v48 }
 0x18b   : > { %v3337_v53 = vpop.f32.mrf.mxu1 }
 0x18c   : > { %v2060_v60 = vmul.f32 %v1981_v1, %v1743_v52  ;;  %3646 = verf.f32 %v1827_v56  ;;  %v1669_v61 = vadd.f32 %v4810_v7, %v1433_v57  ;;  %v3080_v6 = vpop.f32.mrf.mxu0 }
 0x18d   : > { %v3641_v62 = vpop.eup %3640  ;;  %v1437_v59 = vpop.f32.mrf.mxu1 }
 0x18e   : > { %2139 = vst [vmem:[%s4476_s15 + $0x120] sm:$0xff] %v2060_v60  ;;  %v1982_v32 = vadd.f32 1.0, %v3641_v62  ;;  %v1828_v3 = vmul.f32 0.70710677, %v1669_v61  ;;  %v1438_v4 = vadd.f32 %v1437_v59, %v977_v54  ;;  %v997_v43 = vpop.f32.mrf.mxu0  ;;  %v1748_v46 = vmul.f32 0.5, %v1669_v61 }
 0x18f   : > { %v3340_v2 = vpop.f32.mrf.mxu1 }
 0x190   : > { %v2061_v8 = vmul.f32 %v1982_v32, %v1744_v0  ;;  %3648 = verf.f32 %v1828_v3  ;;  %v1670_v9 = vadd.f32 %v4810_v7, %v1438_v4  ;;  %v3083_v17 = vpop.f32.mrf.mxu0 }
 0x191   : > { %v3643_v11 = vpop.eup %3642  ;;  %v1442_v10 = vpop.f32.mrf.mxu1 }
 0x192   : > { %2140 = vst [vmem:[%s4476_s15 + $0x128] sm:$0xff] %v2061_v8  ;;  %v1983_v14 = vadd.f32 1.0, %v3643_v11  ;;  %v1829_v15 = vmul.f32 0.70710677, %v1670_v9  ;;  %v1443_v16 = vadd.f32 %v1442_v10, %v982_v38  ;;  %v1002_v23 = vpop.f32.mrf.mxu0  ;;  %v1749_v60 = vmul.f32 0.5, %v1670_v9 }
 0x193   : > { %v3343_v13 = vpop.f32.mrf.mxu1 }
 0x194   : > { %v2062_v20 = vmul.f32 %v1983_v14, %v1745_v12  ;;  %3650 = verf.f32 %v1829_v15  ;;  %v1671_v21 = vadd.f32 %v4810_v7, %v1443_v16  ;;  %v3086_v28 = vpop.f32.mrf.mxu0 }
 0x195   : > { %v3645_v22 = vpop.eup %3644  ;;  %v1447_v18 = vpop.f32.mrf.mxu1 }
 0x196   : > { %2141 = vst [vmem:[%s4476_s15 + $0x130] sm:$0xff] %v2062_v20  ;;  %v1984_v26 = vadd.f32 1.0, %v3645_v22  ;;  %v1830_v54 = vmul.f32 0.70710677, %v1671_v21  ;;  %v1448_v27 = vadd.f32 %v1447_v18, %v987_v50  ;;  %v1007_v34 = vpop.f32.mrf.mxu0  ;;  %v1750_v8 = vmul.f32 0.5, %v1671_v21 }
 0x197   : > { %v3346_v25 = vpop.f32.mrf.mxu1 }
 0x198   : > { %v2063_v30 = vmul.f32 %v1984_v26, %v1746_v24  ;;  %3652 = verf.f32 %v1830_v54  ;;  %v1672_v31 = vadd.f32 %v4810_v7, %v1448_v27  ;;  %v3089_v39 = vpop.f32.mrf.mxu0 }
 0x199   : > { %v3647_v33 = vpop.eup %3646  ;;  %v1452_v29 = vpop.f32.mrf.mxu1 }
 0x19a   : > { %2142 = vst [vmem:[%s4476_s15 + $0x138] sm:$0xff] %v2063_v30  ;;  %v1985_v37 = vadd.f32 1.0, %v3647_v33  ;;  %v1831_v38 = vmul.f32 0.70710677, %v1672_v31  ;;  %v1453_v5 = vadd.f32 %v1452_v29, %v992_v63  ;;  %v1012_v45 = vpop.f32.mrf.mxu0  ;;  %v1751_v20 = vmul.f32 0.5, %v1672_v31 }
 0x19b   : > { %v3349_v36 = vpop.f32.mrf.mxu1 }
 0x19c   : > { %v2064_v41 = vmul.f32 %v1985_v37, %v1747_v35  ;;  %3654 = verf.f32 %v1831_v38  ;;  %v1673_v42 = vadd.f32 %v4810_v7, %v1453_v5  ;;  %v3092_v52 = vpop.f32.mrf.mxu0 }
 0x19d   : > { %v3649_v44 = vpop.eup %3648  ;;  %v1457_v40 = vpop.f32.mrf.mxu1 }
 0x19e   : > { %2143 = vst [vmem:[%s4476_s15 + $0x140] sm:$0xff] %v2064_v41  ;;  %v1986_v49 = vadd.f32 1.0, %v3649_v44  ;;  %v1832_v50 = vmul.f32 0.70710677, %v1673_v42  ;;  %v1458_v19 = vadd.f32 %v1457_v40, %v997_v43  ;;  %v1017_v58 = vpop.f32.mrf.mxu0  ;;  %v1752_v30 = vmul.f32 0.5, %v1673_v42 }
 0x19f   : > { %v3352_v48 = vpop.f32.mrf.mxu1 }
 0x1a0   : > { %v2065_v1 = vmul.f32 %v1986_v49, %v1748_v46  ;;  %3656 = verf.f32 %v1832_v50  ;;  %v1674_v56 = vadd.f32 %v4810_v7, %v1458_v19  ;;  %v3095_v0 = vpop.f32.mrf.mxu0 }
 0x1a1   : > { %v3651_v57 = vpop.eup %3650  ;;  %v1462_v53 = vpop.f32.mrf.mxu1 }
 0x1a2   : > { %2144 = vst [vmem:[%s4476_s15 + $0x148] sm:$0xff] %v2065_v1  ;;  %v1987_v62 = vadd.f32 1.0, %v3651_v57  ;;  %v1833_v63 = vmul.f32 0.70710677, %v1674_v56  ;;  %v1463_v59 = vadd.f32 %v1462_v53, %v1002_v23  ;;  %v1022_v6 = vpop.f32.mrf.mxu0  ;;  %v1753_v41 = vmul.f32 0.5, %v1674_v56 }
 0x1a3   : > { %v3355_v61 = vpop.f32.mrf.mxu1 }
 0x1a4   : > { %v2066_v32 = vmul.f32 %v1987_v62, %v1749_v60  ;;  %3658 = verf.f32 %v1833_v63  ;;  %v1675_v3 = vadd.f32 %v4810_v7, %v1463_v59  ;;  %v3098_v12 = vpop.f32.mrf.mxu0 }
 0x1a5   : > { %v3653_v4 = vpop.eup %3652  ;;  %v1467_v2 = vpop.f32.mrf.mxu1 }
 0x1a6   : > { %2145 = vst [vmem:[%s4476_s15 + $0x150] sm:$0xff] %v2066_v32  ;;  %v1988_v11 = vadd.f32 1.0, %v3653_v4  ;;  %v1834_v43 = vmul.f32 0.70710677, %v1675_v3  ;;  %v1468_v10 = vadd.f32 %v1467_v2, %v1007_v34  ;;  %v1027_v17 = vpop.f32.mrf.mxu0  ;;  %v1754_v1 = vmul.f32 0.5, %v1675_v3 }
 0x1a7   : > { %v3358_v9 = vpop.f32.mrf.mxu1 }
 0x1a8   : > { %v2067_v14 = vmul.f32 %v1988_v11, %v1750_v8  ;;  %3660 = verf.f32 %v1834_v43  ;;  %v1676_v15 = vadd.f32 %v4810_v7, %v1468_v10  ;;  %v3101_v24 = vpop.f32.mrf.mxu0 }
 0x1a9   : > { %v3655_v16 = vpop.eup %3654  ;;  %v1472_v13 = vpop.f32.mrf.mxu1 }
 0x1aa   : > { %2146 = vst [vmem:[%s4476_s15 + $0x158] sm:$0xff] %v2067_v14  ;;  %v1989_v22 = vadd.f32 1.0, %v3655_v16  ;;  %v1835_v23 = vmul.f32 0.70710677, %v1676_v15  ;;  %v1473_v18 = vadd.f32 %v1472_v13, %v1012_v45  ;;  %v1032_v28 = vpop.f32.mrf.mxu0  ;;  %v1755_v32 = vmul.f32 0.5, %v1676_v15 }
 0x1ab   : > { %v3361_v21 = vpop.f32.mrf.mxu1 }
 0x1ac   : > { %v2068_v26 = vmul.f32 %v1989_v22, %v1751_v20  ;;  %3662 = verf.f32 %v1835_v23  ;;  %v1677_v54 = vadd.f32 %v4810_v7, %v1473_v18  ;;  %v3104_v35 = vpop.f32.mrf.mxu0 }
 0x1ad   : > { %v3657_v27 = vpop.eup %3656  ;;  %v1477_v25 = vpop.f32.mrf.mxu1 }
 0x1ae   : > { %2147 = vst [vmem:[%s4476_s15 + $0x160] sm:$0xff] %v2068_v26  ;;  %v1990_v33 = vadd.f32 1.0, %v3657_v27  ;;  %v1836_v34 = vmul.f32 0.70710677, %v1677_v54  ;;  %v1478_v29 = vadd.f32 %v1477_v25, %v1017_v58  ;;  %v1037_v39 = vpop.f32.mrf.mxu0  ;;  %v1756_v14 = vmul.f32 0.5, %v1677_v54 }
 0x1af   : > { %v3364_v31 = vpop.f32.mrf.mxu1 }
 0x1b0   : > { %v2069_v37 = vmul.f32 %v1990_v33, %v1752_v30  ;;  %3664 = verf.f32 %v1836_v34  ;;  %v1678_v38 = vadd.f32 %v4810_v7, %v1478_v29  ;;  %v3107_v46 = vpop.f32.mrf.mxu0 }
 0x1b1   : > { %v3659_v5 = vpop.eup %3658  ;;  %v1482_v36 = vpop.f32.mrf.mxu1 }
 0x1b2   : > { %2148 = vst [vmem:[%s4476_s15 + $0x168] sm:$0xff] %v2069_v37  ;;  %v1991_v44 = vadd.f32 1.0, %v3659_v5  ;;  %v1837_v45 = vmul.f32 0.70710677, %v1678_v38  ;;  %v1483_v40 = vadd.f32 %v1482_v36, %v1022_v6  ;;  %v1042_v52 = vpop.f32.mrf.mxu0  ;;  %v1757_v26 = vmul.f32 0.5, %v1678_v38 }
 0x1b3   : > { %v3367_v42 = vpop.f32.mrf.mxu1 }
 0x1b4   : > { %v2070_v49 = vmul.f32 %v1991_v44, %v1753_v41  ;;  %3666 = verf.f32 %v1837_v45  ;;  %v1679_v50 = vadd.f32 %v4810_v7, %v1483_v40  ;;  %v3110_v60 = vpop.f32.mrf.mxu0 }
 0x1b5   : > { %v3661_v19 = vpop.eup %3660  ;;  %v1487_v48 = vpop.f32.mrf.mxu1 }
 0x1b6   : > { %2149 = vst [vmem:[%s4476_s15 + $0x170] sm:$0xff] %v2070_v49  ;;  %v1992_v57 = vadd.f32 1.0, %v3661_v19  ;;  %v1838_v58 = vmul.f32 0.70710677, %v1679_v50  ;;  %v1488_v53 = vadd.f32 %v1487_v48, %v1027_v17  ;;  %v1047_v0 = vpop.f32.mrf.mxu0  ;;  %v1758_v37 = vmul.f32 0.5, %v1679_v50 }
 0x1b7   : > { %v3370_v56 = vpop.f32.mrf.mxu1 }
 0x1b8   : > { %v2071_v62 = vmul.f32 %v1992_v57, %v1754_v1  ;;  %3668 = verf.f32 %v1838_v58  ;;  %v1680_v63 = vadd.f32 %v4810_v7, %v1488_v53  ;;  %v3113_v8 = vpop.f32.mrf.mxu0 }
 0x1b9   : > { %v3663_v59 = vpop.eup %3662  ;;  %v1492_v61 = vpop.f32.mrf.mxu1 }
 0x1ba   : > { %2150 = vst [vmem:[%s4476_s15 + $0x178] sm:$0xff] %v2071_v62  ;;  %v1993_v4 = vadd.f32 1.0, %v3663_v59  ;;  %v1839_v6 = vmul.f32 0.70710677, %v1680_v63  ;;  %v1493_v2 = vadd.f32 %v1492_v61, %v1032_v28  ;;  %v1052_v12 = vpop.f32.mrf.mxu0  ;;  %v1759_v49 = vmul.f32 0.5, %v1680_v63 }
 0x1bb   : > { %v3373_v3 = vpop.f32.mrf.mxu1 }
 0x1bc   : > { %v2072_v11 = vmul.f32 %v1993_v4, %v1755_v32  ;;  %3670 = verf.f32 %v1839_v6  ;;  %v1681_v43 = vadd.f32 %v4810_v7, %v1493_v2  ;;  %v3116_v20 = vpop.f32.mrf.mxu0 }
 0x1bd   : > { %v3665_v10 = vpop.eup %3664  ;;  %v1497_v9 = vpop.f32.mrf.mxu1 }
 0x1be   : > { %2151 = vst [vmem:[%s4476_s15 + $0x180] sm:$0xff] %v2072_v11  ;;  %v1994_v16 = vadd.f32 1.0, %v3665_v10  ;;  %v1840_v17 = vmul.f32 0.70710677, %v1681_v43  ;;  %v1498_v13 = vadd.f32 %v1497_v9, %v1037_v39  ;;  %v1057_v24 = vpop.f32.mrf.mxu0  ;;  %v1760_v62 = vmul.f32 0.5, %v1681_v43 }
 0x1bf   : > { %v3376_v15 = vpop.f32.mrf.mxu1 }
 0x1c0   : > { %v2073_v22 = vmul.f32 %v1994_v16, %v1756_v14  ;;  %3672 = verf.f32 %v1840_v17  ;;  %v1682_v23 = vadd.f32 %v4810_v7, %v1498_v13  ;;  %v3119_v30 = vpop.f32.mrf.mxu0 }
 0x1c1   : > { %v3667_v18 = vpop.eup %3666  ;;  %v1502_v21 = vpop.f32.mrf.mxu1 }
 0x1c2   : > { %2152 = vst [vmem:[%s4476_s15 + $0x188] sm:$0xff] %v2073_v22  ;;  %v1995_v27 = vadd.f32 1.0, %v3667_v18  ;;  %v1841_v28 = vmul.f32 0.70710677, %v1682_v23  ;;  %v1503_v25 = vadd.f32 %v1502_v21, %v1042_v52  ;;  %v1062_v35 = vpop.f32.mrf.mxu0  ;;  %v1761_v11 = vmul.f32 0.5, %v1682_v23 }
 0x1c3   : > { %v3379_v54 = vpop.f32.mrf.mxu1 }
 0x1c4   : > { %v2074_v33 = vmul.f32 %v1995_v27, %v1757_v26  ;;  %3674 = verf.f32 %v1841_v28  ;;  %v1683_v34 = vadd.f32 %v4810_v7, %v1503_v25  ;;  %v3122_v41 = vpop.f32.mrf.mxu0 }
 0x1c5   : > { %v3669_v29 = vpop.eup %3668  ;;  %v1507_v31 = vpop.f32.mrf.mxu1 }
 0x1c6   : > { %2153 = vst [vmem:[%s4476_s15 + $0x190] sm:$0xff] %v2074_v33  ;;  %v1996_v5 = vadd.f32 1.0, %v3669_v29  ;;  %v1842_v39 = vmul.f32 0.70710677, %v1683_v34  ;;  %v1508_v36 = vadd.f32 %v1507_v31, %v1047_v0  ;;  %v1067_v46 = vpop.f32.mrf.mxu0  ;;  %v1762_v22 = vmul.f32 0.5, %v1683_v34 }
 0x1c7   : > { %v3382_v38 = vpop.f32.mrf.mxu1 }
 0x1c8   : > { %v2075_v44 = vmul.f32 %v1996_v5, %v1758_v37  ;;  %3676 = verf.f32 %v1842_v39  ;;  %v1684_v45 = vadd.f32 %v4810_v7, %v1508_v36  ;;  %v3125_v1 = vpop.f32.mrf.mxu0 }
 0x1c9   : > { %v3671_v40 = vpop.eup %3670  ;;  %v1512_v42 = vpop.f32.mrf.mxu1 }
 0x1ca   : > { %2154 = vst [vmem:[%s4476_s15 + $0x198] sm:$0xff] %v2075_v44  ;;  %v1997_v19 = vadd.f32 1.0, %v3671_v40  ;;  %v1843_v52 = vmul.f32 0.70710677, %v1684_v45  ;;  %v1513_v48 = vadd.f32 %v1512_v42, %v1052_v12  ;;  %v1072_v60 = vpop.f32.mrf.mxu0  ;;  %v1763_v33 = vmul.f32 0.5, %v1684_v45 }
 0x1cb   : > { %v3385_v50 = vpop.f32.mrf.mxu1 }
 0x1cc   : > { %v2076_v57 = vmul.f32 %v1997_v19, %v1759_v49  ;;  %3678 = verf.f32 %v1843_v52  ;;  %v1685_v58 = vadd.f32 %v4810_v7, %v1513_v48  ;;  %v3128_v32 = vpop.f32.mrf.mxu0 }
 0x1cd   : > { %v3673_v53 = vpop.eup %3672  ;;  %v1517_v56 = vpop.f32.mrf.mxu1 }
 0x1ce   : > { %2155 = vst [vmem:[%s4476_s15 + $0x1a0] sm:$0xff] %v2076_v57  ;;  %v1998_v59 = vadd.f32 1.0, %v3673_v53  ;;  %v1844_v0 = vmul.f32 0.70710677, %v1685_v58  ;;  %v1518_v61 = vadd.f32 %v1517_v56, %v1057_v24  ;;  %v1077_v8 = vpop.f32.mrf.mxu0  ;;  %v1764_v44 = vmul.f32 0.5, %v1685_v58 }
 0x1cf   : > { %v3388_v63 = vpop.f32.mrf.mxu1 }
 0x1d0   : > { %v2077_v4 = vmul.f32 %v1998_v59, %v1760_v62  ;;  %3680 = verf.f32 %v1844_v0  ;;  %v1686_v6 = vadd.f32 %v4810_v7, %v1518_v61  ;;  %v3131_v14 = vpop.f32.mrf.mxu0 }
 0x1d1   : > { %v3675_v2 = vpop.eup %3674  ;;  %v1522_v3 = vpop.f32.mrf.mxu1 }
 0x1d2   : > { %2156 = vst [vmem:[%s4476_s15 + $0x1a8] sm:$0xff] %v2077_v4  ;;  %v1999_v10 = vadd.f32 1.0, %v3675_v2  ;;  %v1845_v12 = vmul.f32 0.70710677, %v1686_v6  ;;  %v1523_v9 = vadd.f32 %v1522_v3, %v1062_v35  ;;  %v1082_v20 = vpop.f32.mrf.mxu0  ;;  %v1765_v57 = vmul.f32 0.5, %v1686_v6 }
 0x1d3   : > { %v3391_v43 = vpop.f32.mrf.mxu1 }
 0x1d4   : > { %v2078_v16 = vmul.f32 %v1999_v10, %v1761_v11  ;;  %3682 = verf.f32 %v1845_v12  ;;  %v1687_v17 = vadd.f32 %v4810_v7, %v1523_v9  ;;  %v3134_v26 = vpop.f32.mrf.mxu0 }
 0x1d5   : > { %v3677_v13 = vpop.eup %3676  ;;  %v1527_v15 = vpop.f32.mrf.mxu1 }
 0x1d6   : > { %2157 = vst [vmem:[%s4476_s15 + $0x1b0] sm:$0xff] %v2078_v16  ;;  %v2000_v18 = vadd.f32 1.0, %v3677_v13  ;;  %v1846_v24 = vmul.f32 0.70710677, %v1687_v17  ;;  %v1528_v21 = vadd.f32 %v1527_v15, %v1067_v46  ;;  %v1087_v30 = vpop.f32.mrf.mxu0  ;;  %v1766_v4 = vmul.f32 0.5, %v1687_v17 }
 0x1d7   : > { %v3394_v23 = vpop.f32.mrf.mxu1 }
 0x1d8   : > { %v2079_v27 = vmul.f32 %v2000_v18, %v1762_v22  ;;  %3684 = verf.f32 %v1846_v24  ;;  %v1688_v28 = vadd.f32 %v4810_v7, %v1528_v21  ;;  %v3137_v37 = vpop.f32.mrf.mxu0 }
 0x1d9   : > { %v3679_v25 = vpop.eup %3678  ;;  %v1532_v54 = vpop.f32.mrf.mxu1 }
 0x1da   : > { %2158 = vst [vmem:[%s4476_s15 + $0x1b8] sm:$0xff] %v2079_v27  ;;  %v2001_v29 = vadd.f32 1.0, %v3679_v25  ;;  %v1847_v35 = vmul.f32 0.70710677, %v1688_v28  ;;  %v1533_v31 = vadd.f32 %v1532_v54, %v1072_v60  ;;  %v1092_v41 = vpop.f32.mrf.mxu0  ;;  %v1767_v16 = vmul.f32 0.5, %v1688_v28 }
 0x1db   : > { %v3397_v34 = vpop.f32.mrf.mxu1 }
 0x1dc   : > { %v2080_v5 = vmul.f32 %v2001_v29, %v1763_v33  ;;  %3686 = verf.f32 %v1847_v35  ;;  %v1689_v39 = vadd.f32 %v4810_v7, %v1533_v31  ;;  %v3140_v49 = vpop.f32.mrf.mxu0 }
 0x1dd   : > { %v3681_v36 = vpop.eup %3680  ;;  %v1537_v38 = vpop.f32.mrf.mxu1 }
 0x1de   : > { %2159 = vst [vmem:[%s4476_s15 + $0x1c0] sm:$0xff] %v2080_v5  ;;  %v2002_v40 = vadd.f32 1.0, %v3681_v36  ;;  %v1848_v46 = vmul.f32 0.70710677, %v1689_v39  ;;  %v1538_v42 = vadd.f32 %v1537_v38, %v1077_v8  ;;  %v1097_v1 = vpop.f32.mrf.mxu0  ;;  %v1768_v27 = vmul.f32 0.5, %v1689_v39 }
 0x1df   : > { %v3400_v45 = vpop.f32.mrf.mxu1 }
 0x1e0   : > { %v2081_v19 = vmul.f32 %v2002_v40, %v1764_v44  ;;  %3688 = verf.f32 %v1848_v46  ;;  %v1690_v52 = vadd.f32 %v4810_v7, %v1538_v42  ;;  %v3143_v62 = vpop.f32.mrf.mxu0 }
 0x1e1   : > { %v3683_v48 = vpop.eup %3682  ;;  %v1542_v50 = vpop.f32.mrf.mxu1 }
 0x1e2   : > { %2160 = vst [vmem:[%s4476_s15 + $0x1c8] sm:$0xff] %v2081_v19  ;;  %v2003_v53 = vadd.f32 1.0, %v3683_v48  ;;  %v1849_v60 = vmul.f32 0.70710677, %v1690_v52  ;;  %v1543_v56 = vadd.f32 %v1542_v50, %v1082_v20  ;;  %v1102_v32 = vpop.f32.mrf.mxu0  ;;  %v1769_v5 = vmul.f32 0.5, %v1690_v52 }
 0x1e3   : > { %v3403_v58 = vpop.f32.mrf.mxu1 }
 0x1e4   : > { %v2082_v59 = vmul.f32 %v2003_v53, %v1765_v57  ;;  %3690 = verf.f32 %v1849_v60  ;;  %v1691_v0 = vadd.f32 %v4810_v7, %v1543_v56  ;;  %v3146_v11 = vpop.f32.mrf.mxu0 }
 0x1e5   : > { %v3685_v61 = vpop.eup %3684  ;;  %v1547_v63 = vpop.f32.mrf.mxu1 }
 0x1e6   : > { %2161 = vst [vmem:[%s4476_s15 + $0x1d0] sm:$0xff] %v2082_v59  ;;  %v2004_v2 = vadd.f32 1.0, %v3685_v61  ;;  %v1850_v8 = vmul.f32 0.70710677, %v1691_v0  ;;  %v1548_v3 = vadd.f32 %v1547_v63, %v1087_v30  ;;  %v1107_v14 = vpop.f32.mrf.mxu0  ;;  %v1770_v19 = vmul.f32 0.5, %v1691_v0 }
 0x1e7   : > { %v3406_v6 = vpop.f32.mrf.mxu1 }
 0x1e8   : > { %v2083_v10 = vmul.f32 %v2004_v2, %v1766_v4  ;;  %3692 = verf.f32 %v1850_v8  ;;  %v1692_v12 = vadd.f32 %v4810_v7, %v1548_v3  ;;  %v3149_v22 = vpop.f32.mrf.mxu0 }
 0x1e9   : > { %v3687_v9 = vpop.eup %3686  ;;  %v1552_v43 = vpop.f32.mrf.mxu1 }
 0x1ea   : > { %2162 = vst [vmem:[%s4476_s15 + $0x1d8] sm:$0xff] %v2083_v10  ;;  %v2005_v13 = vadd.f32 1.0, %v3687_v9  ;;  %v1851_v20 = vmul.f32 0.70710677, %v1692_v12  ;;  %v1553_v15 = vadd.f32 %v1552_v43, %v1092_v41  ;;  %v1112_v26 = vpop.f32.mrf.mxu0  ;;  %v1771_v59 = vmul.f32 0.5, %v1692_v12 }
 0x1eb   : > { %v3409_v17 = vpop.f32.mrf.mxu1 }
 0x1ec   : > { %v2084_v18 = vmul.f32 %v2005_v13, %v1767_v16  ;;  %3694 = verf.f32 %v1851_v20  ;;  %v1693_v24 = vadd.f32 %v4810_v7, %v1553_v15  ;;  %v3152_v33 = vpop.f32.mrf.mxu0 }
 0x1ed   : > { %v3689_v21 = vpop.eup %3688  ;;  %v1557_v23 = vpop.f32.mrf.mxu1 }
 0x1ee   : > { %2163 = vst [vmem:[%s4476_s15 + $0x1e0] sm:$0xff] %v2084_v18  ;;  %v2006_v25 = vadd.f32 1.0, %v3689_v21  ;;  %v1852_v30 = vmul.f32 0.70710677, %v1693_v24  ;;  %v1558_v54 = vadd.f32 %v1557_v23, %v1097_v1  ;;  %v1117_v37 = vpop.f32.mrf.mxu0  ;;  %v1772_v10 = vmul.f32 0.5, %v1693_v24 }
 0x1ef   : > { %v3412_v28 = vpop.f32.mrf.mxu1 }
 0x1f0   : > { %v2085_v29 = vmul.f32 %v2006_v25, %v1768_v27  ;;  %3696 = verf.f32 %v1852_v30  ;;  %v1694_v35 = vadd.f32 %v4810_v7, %v1558_v54  ;;  %v3155_v44 = vpop.f32.mrf.mxu0  ;;  %v4897_v30 = vld [vmem:[%s5143_s4] ss:$0 sm:$0xff] }
 0x1f1   : > { %v3691_v31 = vpop.eup %3690  ;;  %v1562_v34 = vpop.f32.mrf.mxu1 }
 0x1f2   : > { %2164 = vst [vmem:[%s4476_s15 + $0x1e8] sm:$0xff] %v2085_v29  ;;  %v2007_v36 = vadd.f32 1.0, %v3691_v31  ;;  %v1853_v41 = vmul.f32 0.70710677, %v1694_v35  ;;  %v1563_v38 = vadd.f32 %v1562_v34, %v1102_v32  ;;  %v1122_v49 = vpop.f32.mrf.mxu0  ;;  %v1773_v18 = vmul.f32 0.5, %v1694_v35 }
 0x1f3   : > { %v3415_v39 = vpop.f32.mrf.mxu1 }
 0x1f4   : > { %v2086_v40 = vmul.f32 %v2007_v36, %v1769_v5  ;;  %3698 = verf.f32 %v1853_v41  ;;  %v1695_v46 = vadd.f32 %v4810_v7, %v1563_v38  ;;  %v3158_v57 = vpop.f32.mrf.mxu0 }
 0x1f5   : > { %v3693_v42 = vpop.eup %3692  ;;  %v1567_v45 = vpop.f32.mrf.mxu1 }
 0x1f6   : > { %2165 = vst [vmem:[%s4476_s15 + $0x1f0] sm:$0xff] %v2086_v40  ;;  %v2008_v48 = vadd.f32 1.0, %v3693_v42  ;;  %v1854_v1 = vmul.f32 0.70710677, %v1695_v46  ;;  %v1568_v50 = vadd.f32 %v1567_v45, %v1107_v14  ;;  %v1127_v62 = vpop.f32.mrf.mxu0  ;;  %v1774_v29 = vmul.f32 0.5, %v1695_v46 }
 0x1f7   : > { %v3418_v52 = vpop.f32.mrf.mxu1 }
 0x1f8   : > { %v2087_v53 = vmul.f32 %v2008_v48, %v1770_v19  ;;  %3700 = verf.f32 %v1854_v1  ;;  %v1696_v60 = vadd.f32 %v4810_v7, %v1568_v50  ;;  %v3161_v4 = vpop.f32.mrf.mxu0 }
 0x1f9   : > { %v3695_v56 = vpop.eup %3694  ;;  %v1572_v58 = vpop.f32.mrf.mxu1 }
 0x1fa   : > { %2166 = vst [vmem:[%s4476_s15 + $0x1f8] sm:$0xff] %v2087_v53  ;;  %v2009_v61 = vadd.f32 1.0, %v3695_v56  ;;  %v1855_v32 = vmul.f32 0.70710677, %v1696_v60  ;;  %v1573_v63 = vadd.f32 %v1572_v58, %v1112_v26  ;;  %v1132_v11 = vpop.f32.mrf.mxu0  ;;  %v1775_v40 = vmul.f32 0.5, %v1696_v60 }
 0x1fb   : > { %v3421_v0 = vpop.f32.mrf.mxu1 }
 0x1fc   : > { %v2088_v2 = vmul.f32 %v2009_v61, %v1771_v59  ;;  %3702 = verf.f32 %v1855_v32  ;;  %v1697_v8 = vadd.f32 %v4810_v7, %v1573_v63  ;;  %v3164_v16 = vpop.f32.mrf.mxu0 }
 0x1fd   : > { %v3697_v3 = vpop.eup %3696  ;;  %v1577_v6 = vpop.f32.mrf.mxu1 }
 0x1fe   : > { %2167 = vst [vmem:[%s4476_s15 + $0x200] sm:$0xff] %v2088_v2  ;;  %v2010_v9 = vadd.f32 1.0, %v3697_v3  ;;  %v1856_v14 = vmul.f32 0.70710677, %v1697_v8  ;;  %v1578_v43 = vadd.f32 %v1577_v6, %v1117_v37  ;;  %v1137_v22 = vpop.f32.mrf.mxu0  ;;  %v1776_v53 = vmul.f32 0.5, %v1697_v8 }
 0x1ff   : > { %v3424_v12 = vpop.f32.mrf.mxu1 }
 0x200   : > { %v2089_v13 = vmul.f32 %v2010_v9, %v1772_v10  ;;  %3704 = verf.f32 %v1856_v14  ;;  %v1698_v20 = vadd.f32 %v4810_v7, %v1578_v43  ;;  %v3167_v27 = vpop.f32.mrf.mxu0 }
 0x201   : > { %v3699_v15 = vpop.eup %3698  ;;  %v1582_v17 = vpop.f32.mrf.mxu1 }
 0x202   : > { %2168 = vst [vmem:[%s4476_s15 + $0x208] sm:$0xff] %v2089_v13  ;;  %v2011_v21 = vadd.f32 1.0, %v3699_v15  ;;  %v1857_v26 = vmul.f32 0.70710677, %v1698_v20  ;;  %v1583_v23 = vadd.f32 %v1582_v17, %v1122_v49  ;;  %v1142_v33 = vpop.f32.mrf.mxu0  ;;  %v1777_v2 = vmul.f32 0.5, %v1698_v20 }
 0x203   : > { %v3427_v24 = vpop.f32.mrf.mxu1 }
 0x204   : > { %v2090_v25 = vmul.f32 %v2011_v21, %v1773_v18  ;;  %3706 = verf.f32 %v1857_v26  ;;  %v1699_v7 = vadd.f32 %v4897_v30, %v1583_v23  ;;  %v3170_v34 = vpop.f32.mrf.mxu0 }
 0x205   : > { %v3701_v54 = vpop.eup %3700  ;;  %v1587_v28 = vpop.f32.mrf.mxu1 }
 0x206   : > { %2169 = vst [vmem:[%s4476_s15 + $0x210] sm:$0xff] %v2090_v25  ;;  %v2012_v35 = vadd.f32 1.0, %v3701_v54  ;;  %v1858_v31 = vmul.f32 0.70710677, %v1699_v7  ;;  %v1588_v37 = vadd.f32 %v1587_v28, %v1127_v62  ;;  %v1147_v44 = vpop.f32.mrf.mxu0  ;;  %v1778_v13 = vmul.f32 0.5, %v1699_v7 }
 0x207   : > { %v3430_v5 = vpop.f32.mrf.mxu1 }
 0x208   : > { %v2091_v36 = vmul.f32 %v2012_v35, %v1774_v29  ;;  %3708 = verf.f32 %v1858_v31  ;;  %v1700_v41 = vadd.f32 %v4897_v30, %v1588_v37  ;;  %v3173_v19 = vpop.f32.mrf.mxu0 }
 0x209   : > { %v3703_v38 = vpop.eup %3702  ;;  %v1592_v39 = vpop.f32.mrf.mxu1 }
 0x20a   : > { %2170 = vst [vmem:[%s4476_s15 + $0x218] sm:$0xff] %v2091_v36  ;;  %v2013_v42 = vadd.f32 1.0, %v3703_v38  ;;  %v1859_v49 = vmul.f32 0.70710677, %v1700_v41  ;;  %v1593_v45 = vadd.f32 %v1592_v39, %v1132_v11  ;;  %v1152_v57 = vpop.f32.mrf.mxu0 }
 0x20b   : > { %v3433_v46 = vpop.f32.mrf.mxu1 }
 0x20c   : > { %v2092_v48 = vmul.f32 %v2013_v42, %v1775_v40  ;;  %3710 = verf.f32 %v1859_v49  ;;  %v1701_v1 = vadd.f32 %v4897_v30, %v1593_v45  ;;  %v3176_v59 = vpop.f32.mrf.mxu0 }
 0x20d   : > { %v3705_v50 = vpop.eup %3704  ;;  %v1597_v52 = vpop.f32.mrf.mxu1 }
 0x20e   : > { %2171 = vst [vmem:[%s4476_s15 + $0x220] sm:$0xff] %v2092_v48  ;;  %v2014_v56 = vadd.f32 1.0, %v3705_v50  ;;  %v1860_v62 = vmul.f32 0.70710677, %v1701_v1  ;;  %v1598_v58 = vadd.f32 %v1597_v52, %v1137_v22  ;;  %v1157_v4 = vpop.f32.mrf.mxu0 }
 0x20f   : > { %v3436_v60 = vpop.f32.mrf.mxu1 }
 0x210   : > { %v2093_v61 = vmul.f32 %v2014_v56, %v1776_v53  ;;  %3712 = verf.f32 %v1860_v62  ;;  %v4906_v32 = vadd.f32 %v4897_v30, %v1598_v58  ;;  %v3179_v6 = vpop.f32.mrf.mxu0 }
 0x211   : > { %v3707_v63 = vpop.eup %3706  ;;  %v1602_v0 = vpop.f32.mrf.mxu1 }
 0x212   : > { %2172 = vst [vmem:[%s4476_s15 + $0x228] sm:$0xff] %v2093_v61  ;;  %v2015_v3 = vadd.f32 1.0, %v3707_v63  ;;  %v1861_v11 = vmul.f32 0.70710677, %v4906_v32  ;;  %v1603_v8 = vadd.f32 %v1602_v0, %v1142_v33  ;;  %v1227_v16 = vpop.f32.mrf.mxu0  ;;  %v1779_v33 = vmul.f32 0.5, %v1700_v41 }
 0x213   : > { %v3439_v10 = vpop.f32.mrf.mxu1  ;;  %v1228_v20 = vadd.f32 %v1227_v16, %v4351_v47  ;;  %v1780_v41 = vmul.f32 0.5, %v1701_v1  ;;  %v1781_v1 = vmul.f32 0.5, %v4906_v32 }
 0x214   : > { %v2094_v9 = vmul.f32 %v2015_v3, %v1777_v2  ;;  %3714 = verf.f32 %v1861_v11  ;;  %v1703_v14 = vadd.f32 %v4897_v30, %v1603_v8  ;;  %v3214_v18 = vpop.f32.mrf.mxu0 }
 0x215   : > { %v3709_v43 = vpop.eup %3708  ;;  %v1607_v12 = vpop.f32.mrf.mxu1  ;;  %v1628_v23 = vadd.f32 %v4897_v30, %v1228_v20 }
 0x216   : > { %2173 = vst [vmem:[%s4476_s15 + $0x230] sm:$0xff] %v2094_v9  ;;  %v2016_v15 = vadd.f32 1.0, %v3709_v43  ;;  %v1862_v22 = vmul.f32 0.70710677, %v1703_v14  ;;  %v1608_v17 = vadd.f32 %v1607_v12, %v1147_v44  ;;  %v1232_v25 = vpop.f32.mrf.mxu0  ;;  %v1782_v59 = vmul.f32 0.5, %v1703_v14 }
 0x217   : > { %v3442_v21 = vpop.f32.mrf.mxu1  ;;  %v1787_v28 = vmul.f32 0.70710677, %v1628_v23  ;;  %v1233_v29 = vadd.f32 %v1232_v25, %v4360_v51 }
 0x218   : > { %v2095_v26 = vmul.f32 %v2016_v15, %v1778_v13  ;;  %3716 = verf.f32 %v1862_v22  ;;  %v1704_v24 = vadd.f32 %v4897_v30, %v1608_v17  ;;  %v3217_v31 = vpop.f32.mrf.mxu0 }
 0x219   : > { %v3711_v27 = vpop.eup %3710  ;;  %v1612_v54 = vpop.f32.mrf.mxu1  ;;  %3718 = verf.f32 %v1787_v28  ;;  %v1629_v5 = vadd.f32 %v4897_v30, %v1233_v29 }
 0x21a   : > { %2174 = vst [vmem:[%s4476_s15 + $0x238] sm:$0xff] %v2095_v26  ;;  %v2017_v7 = vadd.f32 1.0, %v3711_v27  ;;  %v1863_v47 = vmul.f32 0.70710677, %v1704_v24  ;;  %v1613_v35 = vadd.f32 %v1612_v54, %v1152_v57  ;;  %v1237_v44 = vpop.f32.mrf.mxu0  ;;  %v1783_v2 = vmul.f32 0.5, %v1704_v24 }
 0x21b   : > { %v3445_v37 = vpop.f32.mrf.mxu1  ;;  %v1788_v42 = vmul.f32 0.70710677, %v1629_v5  ;;  %v1238_v51 = vadd.f32 %v1237_v44, %v4369_v55  ;;  %v1708_v10 = vmul.f32 0.5, %v1629_v5 }
 0x21c   : > { %v2096_v34 = vmul.f32 %v2017_v7, %v1779_v33  ;;  %3720 = verf.f32 %v1863_v47  ;;  %v1705_v38 = vadd.f32 %v4897_v30, %v1613_v35  ;;  %v3220_v19 = vpop.f32.mrf.mxu0 }
 0x21d   : > { %v3713_v36 = vpop.eup %3712  ;;  %v1617_v39 = vpop.f32.mrf.mxu1  ;;  %3722 = verf.f32 %v1788_v42  ;;  %v1630_v50 = vadd.f32 %v4897_v30, %v1238_v51 }
 0x21e   : > { %2175 = vst [vmem:[%s4476_s15 + $0x240] sm:$0xff] %v2096_v34  ;;  %v2018_v40 = vadd.f32 1.0, %v3713_v36  ;;  %v1864_v49 = vmul.f32 0.70710677, %v1705_v38  ;;  %v1618_v45 = vadd.f32 %v1617_v39, %v1157_v4  ;;  %v1784_v14 = vmul.f32 0.5, %v1705_v38 }
 0x21f   : > { %v3448_v46 = vpop.f32.mrf.mxu1  ;;  %v1789_v56 = vmul.f32 0.70710677, %v1630_v50  ;;  %v1709_v22 = vmul.f32 0.5, %v1630_v50 }
 0x220   : > { %v2097_v48 = vmul.f32 %v2018_v40, %v1780_v41  ;;  %3724 = verf.f32 %v1864_v49  ;;  %v1706_v52 = vadd.f32 %v4897_v30, %v1618_v45  ;;  %v1707_v30 = vmul.f32 0.5, %v1628_v23 }
 0x221   : > { %v3715_v57 = vpop.eup %3714  ;;  %3726 = verf.f32 %v1789_v56 }
 0x222   : > { %2176 = vst [vmem:[%s4476_s15 + $0x248] sm:$0xff] %v2097_v48  ;;  %v2019_v53 = vadd.f32 1.0, %v3715_v57  ;;  %v1865_v55 = vmul.f32 0.70710677, %v1706_v52  ;;  %v1785_v17 = vmul.f32 0.5, %v1706_v52 }
 0x224   : > { %v2098_v62 = vmul.f32 %v2019_v53, %v1781_v1  ;;  %3728 = verf.f32 %v1865_v55 }
 0x225   : > { %v3717_v58 = vpop.eup %3716 }
 0x226   : > { %2177 = vst [vmem:[%s4476_s15 + $0x250] sm:$0xff] %v2098_v62  ;;  %v2020_v60 = vadd.f32 1.0, %v3717_v58  ;;  %v3719_v63 = vpop.eup %3718 }
 0x227   : > { %v1945_v0 = vadd.f32 1.0, %v3719_v63 }
 0x228   : > { %v2099_v61 = vmul.f32 %v2020_v60, %v1782_v59 }
 0x229   : > { %v3721_v4 = vpop.eup %3720  ;;  %v2024_v3 = vmul.f32 %v1945_v0, %v1707_v30 }
 0x22a   : > { %2178 = vst [vmem:[%s4476_s15 + $0x258] sm:$0xff] %v2099_v61  ;;  %v2021_v32 = vadd.f32 1.0, %v3721_v4  ;;  %v3723_v11 = vpop.eup %3722 }
 0x22b   : > { %2103 = vst [vmem:[%s4476_s15] sm:$0xff] %v2024_v3  ;;  %v1946_v9 = vadd.f32 1.0, %v3723_v11 }
 0x22c   : > { %v2100_v8 = vmul.f32 %v2021_v32, %v1783_v2 }
 0x22d   : > { %v3725_v6 = vpop.eup %3724  ;;  %v2025_v16 = vmul.f32 %v1946_v9, %v1708_v10 }
 0x22e   : > { %2179 = vst [vmem:[%s4476_s15 + $0x260] sm:$0xff] %v2100_v8  ;;  %v2022_v43 = vadd.f32 1.0, %v3725_v6  ;;  %v3727_v12 = vpop.eup %3726 }
 0x22f   : > { %2104 = vst [vmem:[%s4476_s15 + $0x8] sm:$0xff] %v2025_v16  ;;  %v1947_v20 = vadd.f32 1.0, %v3727_v12 }
 0x230   : > { %v2101_v13 = vmul.f32 %v2022_v43, %v1784_v14 }
 0x231   : > { %v3729_v15 = vpop.eup %3728  ;;  %v2026_v21 = vmul.f32 %v1947_v20, %v1709_v22 }
 0x232   : > { %2180 = vst [vmem:[%s4476_s15 + $0x268] sm:$0xff] %v2101_v13  ;;  %v2023_v18 = vadd.f32 1.0, %v3729_v15  ;;  %2188 = sbr.rel (!%p3877_p4) target bundleno = 631 (0x277), region = 44 }
 0x233   : > { %2105 = vst [vmem:[%s4476_s15 + $0x10] sm:$0xff] %v2026_v21 }
 0x234   : > { %v2102_v26 = vmul.f32 %v2023_v18, %v1785_v17 }
 0x236   : > { %2181 = vst [vmem:[%s4476_s15 + $0x270] sm:$0xff] %v2102_v26 }
 0x237   : > { %s5155_s24 = smov (!%p2191_p8, %s2190_s24), 79 }
 0x238   : > { %s2748_s7 = sshll.u32 %s5155_s24, 7 }
 0x239   : > { %p2751_p9 = scmp.eq.s32.totalorder %s2748_s7, 0 }
 0x23a   : > { %s4946_s8 = sshrl.u32 (!%p2751_p9), %s5155_s24, 6 }
 0x23b   : > { %2199 = sbr.rel (%p2751_p9) target bundleno = 631 (0x277), region = 48  ;;  %p2752_p10 = scmp.le.s32.totalorder (!%p2751_p9), %s4946_s8, 0 }
 0x240   : > { %2612 = sbr.rel (%p2752_p10) target bundleno = 614 (0x266), region = 127  ;;  %s5146_s21 = smov (!%p2752_p10), %s4940_s6 }
 0x241   : > { %s5147_s26 = smov (!%p2752_p10), %s4476_s15  ;;  %s4955_s29 = smov (!%p2752_p10), 0  }
 0x242   : > { %s4957_s9 = smov (!%p2752_p10), 0  }
 0x245 LB: >> { %v2388_v23 = vld [vmem:[%s3794_s26] sm:$0xff]  ;;  %v2390_v27 = vld [vmem:[%s3794_s26 + $0x8] sm:$0xff]  ;;  %v2392_v24 = vld [vmem:[%s3794_s26 + $0x10] sm:$0xff]  ;;  %s2516_s10 = sadd.s32 1, %s3798_s29  ;;  %s2382_s9 = sadd.s32 1, %s3802_s9   ;;  %s3802_s9 = sphi %s4957_s9, %s2382_s9   ;;  %s3798_s29 = sphi %s4955_s29, %s5150_s29   ;;  %s3794_s26 = sphi %s5147_s26, %s5149_s26   ;;  %s3790_s21 = sphi %s5146_s21, %s5148_s21  }
 0x246   : >> { %2389 = vst [vmem:[%s3790_s21] sm:$0xff] %v2388_v23  ;;  %2391 = vst [vmem:[%s3790_s21 + $0x8] sm:$0xff] %v2390_v27  ;;  %v2394_v25 = vld [vmem:[%s3794_s26 + $0x18] sm:$0xff]  ;;  %v2396_v54 = vld [vmem:[%s3794_s26 + $0x20] sm:$0xff]  ;;  %p2517_p11 = scmp.ge.s32.totalorder %s2516_s10, %s4946_s8  ;;  %p2381_p12 = scmp.ge.s32.totalorder %s2382_s9, %s4946_s8 }
 0x247   : >> { %2393 = vst [vmem:[%s3790_s21 + $0x10] sm:$0xff] %v2392_v24  ;;  %v2398_v33 = vld [vmem:[%s3794_s26 + $0x28] sm:$0xff]  ;;  %2395 = vst [vmem:[%s3790_s21 + $0x18] sm:$0xff] %v2394_v25  ;;  %v2400_v7 = vld [vmem:[%s3794_s26 + $0x30] sm:$0xff] }
 0x248   : >> { %2397 = vst [vmem:[%s3790_s21 + $0x20] sm:$0xff] %v2396_v54  ;;  %2399 = vst [vmem:[%s3790_s21 + $0x28] sm:$0xff] %v2398_v33  ;;  %v2402_v28 = vld [vmem:[%s3794_s26 + $0x38] sm:$0xff]  ;;  %v2404_v29 = vld [vmem:[%s3794_s26 + $0x40] sm:$0xff]  ;;  %s5157_s10 = smov (%p2517_p11, %s2516_s10), 0 }
 0x249   : >> { %2401 = vst [vmem:[%s3790_s21 + $0x30] sm:$0xff] %v2400_v7  ;;  %2403 = vst [vmem:[%s3790_s21 + $0x38] sm:$0xff] %v2402_v28  ;;  %v2406_v47 = vld [vmem:[%s3794_s26 + $0x48] sm:$0xff]  ;;  %v2408_v35 = vld [vmem:[%s3794_s26 + $0x50] sm:$0xff]  ;;  %s2753_s12 = sshll.u32 %s5157_s10, 9  ;;  %s5150_s29 = smov %s5157_s10 }
 0x24a   : >> { %2405 = vst [vmem:[%s3790_s21 + $0x40] sm:$0xff] %v2404_v29  ;;  %v2410_v31 = vld [vmem:[%s3794_s26 + $0x58] sm:$0xff]  ;;  %2407 = vst [vmem:[%s3790_s21 + $0x48] sm:$0xff] %v2406_v47  ;;  %v2412_v37 = vld [vmem:[%s3794_s26 + $0x60] sm:$0xff]  ;;  %s5013_s11 = scalar_lea.vmem %s4476_s15, %s2753_s12 [#allocation2]   ;;  %s5016_s14 = scalar_lea.vmem %s4940_s6, %s2753_s12  }
 0x24b   : >> { %2409 = vst [vmem:[%s3790_s21 + $0x50] sm:$0xff] %v2408_v35  ;;  %2411 = vst [vmem:[%s3790_s21 + $0x58] sm:$0xff] %v2410_v31  ;;  %v2414_v34 = vld [vmem:[%s3794_s26 + $0x68] sm:$0xff]  ;;  %v2416_v5 = vld [vmem:[%s3794_s26 + $0x70] sm:$0xff] }
 0x24c   : >> { %2413 = vst [vmem:[%s3790_s21 + $0x60] sm:$0xff] %v2412_v37  ;;  %2415 = vst [vmem:[%s3790_s21 + $0x68] sm:$0xff] %v2414_v34  ;;  %v2418_v36 = vld [vmem:[%s3794_s26 + $0x78] sm:$0xff]  ;;  %v2420_v38 = vld [vmem:[%s3794_s26 + $0x80] sm:$0xff] }
 0x24d   : >> { %2417 = vst [vmem:[%s3790_s21 + $0x70] sm:$0xff] %v2416_v5  ;;  %v2422_v44 = vld [vmem:[%s3794_s26 + $0x88] sm:$0xff]  ;;  %2419 = vst [vmem:[%s3790_s21 + $0x78] sm:$0xff] %v2418_v36  ;;  %v2424_v39 = vld [vmem:[%s3794_s26 + $0x90] sm:$0xff] }
 0x24e   : >> { %2421 = vst [vmem:[%s3790_s21 + $0x80] sm:$0xff] %v2420_v38  ;;  %2423 = vst [vmem:[%s3790_s21 + $0x88] sm:$0xff] %v2422_v44  ;;  %v2426_v41 = vld [vmem:[%s3794_s26 + $0x98] sm:$0xff]  ;;  %v2428_v40 = vld [vmem:[%s3794_s26 + $0xa0] sm:$0xff] }
 0x24f   : >> { %2425 = vst [vmem:[%s3790_s21 + $0x90] sm:$0xff] %v2424_v39  ;;  %2427 = vst [vmem:[%s3790_s21 + $0x98] sm:$0xff] %v2426_v41  ;;  %v2430_v42 = vld [vmem:[%s3794_s26 + $0xa8] sm:$0xff]  ;;  %v2432_v51 = vld [vmem:[%s3794_s26 + $0xb0] sm:$0xff] }
 0x250   : >> { %2429 = vst [vmem:[%s3790_s21 + $0xa0] sm:$0xff] %v2428_v40  ;;  %v2434_v49 = vld [vmem:[%s3794_s26 + $0xb8] sm:$0xff]  ;;  %2431 = vst [vmem:[%s3790_s21 + $0xa8] sm:$0xff] %v2430_v42  ;;  %v2436_v45 = vld [vmem:[%s3794_s26 + $0xc0] sm:$0xff] }
 0x251   : >> { %2433 = vst [vmem:[%s3790_s21 + $0xb0] sm:$0xff] %v2432_v51  ;;  %2435 = vst [vmem:[%s3790_s21 + $0xb8] sm:$0xff] %v2434_v49  ;;  %v2438_v19 = vld [vmem:[%s3794_s26 + $0xc8] sm:$0xff]  ;;  %v2440_v46 = vld [vmem:[%s3794_s26 + $0xd0] sm:$0xff] }
 0x252   : >> { %2437 = vst [vmem:[%s3790_s21 + $0xc0] sm:$0xff] %v2436_v45  ;;  %2439 = vst [vmem:[%s3790_s21 + $0xc8] sm:$0xff] %v2438_v19  ;;  %v2442_v48 = vld [vmem:[%s3794_s26 + $0xd8] sm:$0xff]  ;;  %v2444_v50 = vld [vmem:[%s3794_s26 + $0xe0] sm:$0xff] }
 0x253   : >> { %2441 = vst [vmem:[%s3790_s21 + $0xd0] sm:$0xff] %v2440_v46  ;;  %v2446_v57 = vld [vmem:[%s3794_s26 + $0xe8] sm:$0xff]  ;;  %2443 = vst [vmem:[%s3790_s21 + $0xd8] sm:$0xff] %v2442_v48  ;;  %v2448_v52 = vld [vmem:[%s3794_s26 + $0xf0] sm:$0xff] }
 0x254   : >> { %2445 = vst [vmem:[%s3790_s21 + $0xe0] sm:$0xff] %v2444_v50  ;;  %2447 = vst [vmem:[%s3790_s21 + $0xe8] sm:$0xff] %v2446_v57  ;;  %v2450_v1 = vld [vmem:[%s3794_s26 + $0xf8] sm:$0xff]  ;;  %v2452_v53 = vld [vmem:[%s3794_s26 + $0x100] sm:$0xff] }
 0x255   : >> { %2449 = vst [vmem:[%s3790_s21 + $0xf0] sm:$0xff] %v2448_v52  ;;  %2451 = vst [vmem:[%s3790_s21 + $0xf8] sm:$0xff] %v2450_v1  ;;  %v2454_v56 = vld [vmem:[%s3794_s26 + $0x108] sm:$0xff]  ;;  %v2456_v55 = vld [vmem:[%s3794_s26 + $0x110] sm:$0xff] }
 0x256   : >> { %2453 = vst [vmem:[%s3790_s21 + $0x100] sm:$0xff] %v2452_v53  ;;  %v2458_v62 = vld [vmem:[%s3794_s26 + $0x118] sm:$0xff]  ;;  %2455 = vst [vmem:[%s3790_s21 + $0x108] sm:$0xff] %v2454_v56  ;;  %v2460_v58 = vld [vmem:[%s3794_s26 + $0x120] sm:$0xff] }
 0x257   : >> { %2457 = vst [vmem:[%s3790_s21 + $0x110] sm:$0xff] %v2456_v55  ;;  %2459 = vst [vmem:[%s3790_s21 + $0x118] sm:$0xff] %v2458_v62  ;;  %v2462_v59 = vld [vmem:[%s3794_s26 + $0x128] sm:$0xff]  ;;  %v2464_v60 = vld [vmem:[%s3794_s26 + $0x130] sm:$0xff] }
 0x258   : >> { %2461 = vst [vmem:[%s3790_s21 + $0x120] sm:$0xff] %v2460_v58  ;;  %2463 = vst [vmem:[%s3790_s21 + $0x128] sm:$0xff] %v2462_v59  ;;  %v2466_v61 = vld [vmem:[%s3794_s26 + $0x138] sm:$0xff]  ;;  %v2468_v63 = vld [vmem:[%s3794_s26 + $0x140] sm:$0xff] }
 0x259   : >> { %2465 = vst [vmem:[%s3790_s21 + $0x130] sm:$0xff] %v2464_v60  ;;  %v2470_v4 = vld [vmem:[%s3794_s26 + $0x148] sm:$0xff]  ;;  %2467 = vst [vmem:[%s3790_s21 + $0x138] sm:$0xff] %v2466_v61  ;;  %v2472_v30 = vld [vmem:[%s3794_s26 + $0x150] sm:$0xff] }
 0x25a   : >> { %2469 = vst [vmem:[%s3790_s21 + $0x140] sm:$0xff] %v2468_v63  ;;  %2471 = vst [vmem:[%s3790_s21 + $0x148] sm:$0xff] %v2470_v4  ;;  %v2474_v0 = vld [vmem:[%s3794_s26 + $0x158] sm:$0xff]  ;;  %v2476_v2 = vld [vmem:[%s3794_s26 + $0x160] sm:$0xff] }
 0x25b   : >> { %2473 = vst [vmem:[%s3790_s21 + $0x150] sm:$0xff] %v2472_v30  ;;  %2475 = vst [vmem:[%s3790_s21 + $0x158] sm:$0xff] %v2474_v0  ;;  %v2478_v32 = vld [vmem:[%s3794_s26 + $0x168] sm:$0xff]  ;;  %v2480_v3 = vld [vmem:[%s3794_s26 + $0x170] sm:$0xff] }
 0x25c   : >> { %2477 = vst [vmem:[%s3790_s21 + $0x160] sm:$0xff] %v2476_v2  ;;  %v2482_v11 = vld [vmem:[%s3794_s26 + $0x178] sm:$0xff]  ;;  %2479 = vst [vmem:[%s3790_s21 + $0x168] sm:$0xff] %v2478_v32  ;;  %v2484_v8 = vld [vmem:[%s3794_s26 + $0x180] sm:$0xff] }
 0x25d   : >> { %2481 = vst [vmem:[%s3790_s21 + $0x170] sm:$0xff] %v2480_v3  ;;  %2483 = vst [vmem:[%s3790_s21 + $0x178] sm:$0xff] %v2482_v11  ;;  %v2486_v6 = vld [vmem:[%s3794_s26 + $0x188] sm:$0xff]  ;;  %v2488_v10 = vld [vmem:[%s3794_s26 + $0x190] sm:$0xff] }
 0x25e   : >> { %2485 = vst [vmem:[%s3790_s21 + $0x180] sm:$0xff] %v2484_v8  ;;  %2487 = vst [vmem:[%s3790_s21 + $0x188] sm:$0xff] %v2486_v6  ;;  %v2490_v9 = vld [vmem:[%s3794_s26 + $0x198] sm:$0xff]  ;;  %v2492_v14 = vld [vmem:[%s3794_s26 + $0x1a0] sm:$0xff] }
 0x25f   : >> { %2489 = vst [vmem:[%s3790_s21 + $0x190] sm:$0xff] %v2488_v10  ;;  %v2494_v43 = vld [vmem:[%s3794_s26 + $0x1a8] sm:$0xff]  ;;  %2491 = vst [vmem:[%s3790_s21 + $0x198] sm:$0xff] %v2490_v9  ;;  %v2496_v16 = vld [vmem:[%s3794_s26 + $0x1b0] sm:$0xff] }
 0x260   : >> { %2493 = vst [vmem:[%s3790_s21 + $0x1a0] sm:$0xff] %v2492_v14  ;;  %2495 = vst [vmem:[%s3790_s21 + $0x1a8] sm:$0xff] %v2494_v43  ;;  %v2498_v12 = vld [vmem:[%s3794_s26 + $0x1b8] sm:$0xff]  ;;  %v2500_v13 = vld [vmem:[%s3794_s26 + $0x1c0] sm:$0xff] }
 0x261   : >> { %2497 = vst [vmem:[%s3790_s21 + $0x1b0] sm:$0xff] %v2496_v16  ;;  %2499 = vst [vmem:[%s3790_s21 + $0x1b8] sm:$0xff] %v2498_v12  ;;  %v2502_v15 = vld [vmem:[%s3794_s26 + $0x1c8] sm:$0xff]  ;;  %v2504_v22 = vld [vmem:[%s3794_s26 + $0x1d0] sm:$0xff]  ;;  %2384 = sbr.rel (!%p2381_p12) target bundleno = 581 (0x245), region = 133 }
 0x262   : >> { %2501 = vst [vmem:[%s3790_s21 + $0x1c0] sm:$0xff] %v2500_v13  ;;  %v2506_v20 = vld [vmem:[%s3794_s26 + $0x1d8] sm:$0xff]  ;;  %2503 = vst [vmem:[%s3790_s21 + $0x1c8] sm:$0xff] %v2502_v15  ;;  %v2508_v17 = vld [vmem:[%s3794_s26 + $0x1e0] sm:$0xff] }
 0x263   : >> { %2505 = vst [vmem:[%s3790_s21 + $0x1d0] sm:$0xff] %v2504_v22  ;;  %2507 = vst [vmem:[%s3790_s21 + $0x1d8] sm:$0xff] %v2506_v20  ;;  %v2510_v18 = vld [vmem:[%s3794_s26 + $0x1e8] sm:$0xff]  ;;  %v2512_v21 = vld [vmem:[%s3794_s26 + $0x1f0] sm:$0xff] }
 0x264   : >> { %2509 = vst [vmem:[%s3790_s21 + $0x1e0] sm:$0xff] %v2508_v17  ;;  %2511 = vst [vmem:[%s3790_s21 + $0x1e8] sm:$0xff] %v2510_v18  ;;  %v2514_v26 = vld [vmem:[%s3794_s26 + $0x1f8] sm:$0xff]  ;;  %s5149_s26 = smov %s5013_s11 }
 0x265   : >> { %2513 = vst [vmem:[%s3790_s21 + $0x1f0] sm:$0xff] %v2512_v21  ;;  %2515 = vst [vmem:[%s3790_s21 + $0x1f8] sm:$0xff] %v2514_v26  ;;  %s5148_s21 = smov %s5016_s14 }
 0x266 PF: > { %s5121_s13 = sand.u32 63, %s5155_s24   ;;  %s2764_s18 = sshll.u32 %s4946_s8, 9 }
 0x267   : > { %s2527_s17 = scalar_lea.vmem %s4476_s15, %s2764_s18 [#allocation2]   ;;  %s2529_s16 = scalar_lea.vmem %s4940_s6, %s2764_s18  }
 0x268   : > { %p2758_p13 = scmp.le.s32.totalorder %s5121_s13, 0 }
 0x269   : > { %s3804_s20 = smov (!%p2758_p13), %s2529_s16   ;;  %s3808_s23 = smov (!%p2758_p13), %s2527_s17  }
 0x26a   : > { %2626 = sbr.rel (%p2758_p13) target bundleno = 631 (0x277), region = 138  ;;  %s3812_s27 = smov (!%p2758_p13), 0  }
 0x26b   : > { %s3816_s28 = smov (!%p2758_p13), 0  }
 0x26f LB: >> { %v2539_v23 = vld [vmem:[%s3810_s23] sm:$0xff]  ;;  %s2541_s24 = sadd.s32 1, %s3814_s27  ;;  %s2533_s28 = sadd.s32 1, %s3818_s28   ;;  %s3818_s28 = sphi %s3816_s28, %s2533_s28   ;;  %s3814_s27 = sphi %s3812_s27, %s3813_s27   ;;  %s3810_s23 = sphi %s3808_s23, %s2546_s23   ;;  %s3806_s20 = sphi %s3804_s20, %s2547_s20  }
 0x270   : >> { %2540 = vst [vmem:[%s3806_s20] sm:$0xff] %v2539_v23  ;;  %p2542_p0 = scmp.ge.s32.totalorder %s2541_s24, %s5121_s13  ;;  %p2532_p1 = scmp.ge.s32.totalorder %s2533_s28, %s5121_s13 }
 0x272   : >> { %s5159_s24 = smov (%p2542_p0, %s2541_s24), 0  ;;  %2535 = sbr.rel (!%p2532_p1) target bundleno = 623 (0x26f), region = 144 }
 0x273   : >> { %s2759_s15 = sshll.u32 %s5159_s24, 3  ;;  %s3813_s27 = smov %s5159_s24  }
 0x274   : >> { %s2546_s23 = scalar_lea.vmem %s2527_s17, %s2759_s15 [#allocation2]   ;;  %s2547_s20 = scalar_lea.vmem %s2529_s16, %s2759_s15  }
 0x277 PF: > { %p12_p2 = scmp.ge.s32.totalorder %s3867_s22, 4   ;;  %s5151_s18 = smov %s3782_s19 }
 0x278   : > { %s5152_s19 = smov %s3875_s25  ;;  %s5153_s20 = smov %s3867_s22 }
 0x279   :  { %14 = sbr.rel (!%p12_p2) target bundleno = 2 (0x2), region = 155 }

// kernel: deeponet_forward.8
= control target key start
LH: loop header
LB: loop body
LE: loop exit
PB: predicated region body
PF: predicated region fallthrough
CT: control target
= control target key end

     0   :  { %v315_v0 = vmov 0.0   ;;  %vm316_vm0 = vmmov 0   ;;  %s506_s1 = inlined_call_operand.vmem [shape: f32[128,128], index: 1, kind: input, shape index: {}]   ;;  %s507_s0 = inlined_call_operand.vmem [shape: f32[8,128], index: 0, kind: input, shape index: {}]   ;;  %s508_s3 = inlined_call_operand.vmem [shape: f32[128,256], index: 3, kind: input, shape index: {}]   ;;  %s509_s2 = inlined_call_operand.vmem [shape: f32[1,128], index: 2, kind: input, shape index: {}]   ;;  %s510_s4 = inlined_call_operand.vmem [shape: f32[1,256], index: 4, kind: input, shape index: {}]   ;;  %s511_s5 = inlined_call_operand.vmem [shape: f32[8,256], index: 5, kind: output, shape index: {}]  }
   0x1   :  { %274 = vmatprep.subr.mxu0 %v315_v0  ;;  %v36_v1 = vld [vmem:[%s506_s1 + $0x78] sm:$0xff]  ;;  %v35_v2 = vld [vmem:[%s506_s1 + $0x70] sm:$0xff]  ;;  %306 = vmatprep.mubr.msk.f32.mxu0 %vm316_vm0, %v315_v0  ;;  %v34_v3 = vld [vmem:[%s506_s1 + $0x68] sm:$0xff] }
   0x2   :  { %275 = vmatpush3.msra.mxu0 %v36_v1  ;;  %243 = vmatprep.mubr.f32.mxu1 %v315_v0  ;;  %v33_v4 = vld [vmem:[%s506_s1 + $0x60] sm:$0xff]  ;;  %v32_v5 = vld [vmem:[%s506_s1 + $0x58] sm:$0xff]  ;;  %v31_v6 = vld [vmem:[%s506_s1 + $0x50] sm:$0xff] }
   0x3   :  { %276 = vmatprep.subr.mxu0 %v315_v0  ;;  %v30_v7 = vld [vmem:[%s506_s1 + $0x48] sm:$0xff]  ;;  %v29_v8 = vld [vmem:[%s506_s1 + $0x40] sm:$0xff]  ;;  %v28_v9 = vld [vmem:[%s506_s1 + $0x38] sm:$0xff] }
   0x4   :  { %277 = vmatpush3.msra.mxu0 %v35_v2  ;;  %v27_v10 = vld [vmem:[%s506_s1 + $0x30] sm:$0xff]  ;;  %v26_v11 = vld [vmem:[%s506_s1 + $0x28] sm:$0xff]  ;;  %v25_v12 = vld [vmem:[%s506_s1 + $0x20] sm:$0xff] }
   0x5   :  { %278 = vmatprep.subr.mxu0 %v315_v0  ;;  %v24_v13 = vld [vmem:[%s506_s1 + $0x18] sm:$0xff]  ;;  %v23_v14 = vld [vmem:[%s506_s1 + $0x10] sm:$0xff]  ;;  %v22_v15 = vld [vmem:[%s506_s1 + $0x8] sm:$0xff] }
   0x6   :  { %279 = vmatpush3.msra.mxu0 %v34_v3  ;;  %v21_v16 = vld [vmem:[%s506_s1] sm:$0xff]  ;;  %v166_v18 = vld [vmem:[%s508_s3 + $0xf8] sm:$0xff]  ;;  %v165_v19 = vld [vmem:[%s508_s3 + $0xf0] sm:$0xff] }
   0x7   :  { %280 = vmatprep.subr.mxu0 %v315_v0  ;;  %v20_v17 = vld [vmem:[%s507_s0] sm:$0xff]  ;;  %v164_v20 = vld [vmem:[%s508_s3 + $0xe8] sm:$0xff]  ;;  %179 = vmatprep.subr.mxu1 %v166_v18  ;;  %v162_v22 = vld [vmem:[%s508_s3 + $0xd8] sm:$0xff] }
   0x8   :  { %281 = vmatpush3.msra.mxu0 %v33_v4  ;;  %v163_v21 = vld [vmem:[%s508_s3 + $0xe0] sm:$0xff]  ;;  %180 = vmatpush1.msra.mxu1 %v165_v19  ;;  %v161_v23 = vld [vmem:[%s508_s3 + $0xd0] sm:$0xff]  ;;  %v160_v24 = vld [vmem:[%s508_s3 + $0xc8] sm:$0xff] }
   0x9   :  { %282 = vmatprep.subr.mxu0 %v315_v0  ;;  %181 = vmatprep.subr.mxu1 %v164_v20  ;;  %v159_v25 = vld [vmem:[%s508_s3 + $0xc0] sm:$0xff]  ;;  %v158_v26 = vld [vmem:[%s508_s3 + $0xb8] sm:$0xff]  ;;  %v157_v27 = vld [vmem:[%s508_s3 + $0xb0] sm:$0xff] }
   0xa   :  { %283 = vmatpush3.msra.mxu0 %v32_v5  ;;  %182 = vmatpush1.msra.mxu1 %v163_v21  ;;  %v156_v28 = vld [vmem:[%s508_s3 + $0xa8] sm:$0xff]  ;;  %v155_v29 = vld [vmem:[%s508_s3 + $0xa0] sm:$0xff]  ;;  %v154_v30 = vld [vmem:[%s508_s3 + $0x98] sm:$0xff] }
   0xb   :  { %284 = vmatprep.subr.mxu0 %v315_v0  ;;  %183 = vmatprep.subr.mxu1 %v162_v22  ;;  %v153_v31 = vld [vmem:[%s508_s3 + $0x90] sm:$0xff]  ;;  %v152_v32 = vld [vmem:[%s508_s3 + $0x88] sm:$0xff]  ;;  %v151_v33 = vld [vmem:[%s508_s3 + $0x80] sm:$0xff] }
   0xc   :  { %285 = vmatpush3.msra.mxu0 %v31_v6  ;;  %184 = vmatpush1.msra.mxu1 %v161_v23  ;;  %v150_v34 = vld [vmem:[%s508_s3 + $0x78] sm:$0xff]  ;;  %v149_v35 = vld [vmem:[%s508_s3 + $0x70] sm:$0xff]  ;;  %v148_v36 = vld [vmem:[%s508_s3 + $0x68] sm:$0xff] }
   0xd   :  { %286 = vmatprep.subr.mxu0 %v315_v0  ;;  %185 = vmatprep.subr.mxu1 %v160_v24  ;;  %v147_v37 = vld [vmem:[%s508_s3 + $0x60] sm:$0xff]  ;;  %v146_v38 = vld [vmem:[%s508_s3 + $0x58] sm:$0xff]  ;;  %v145_v39 = vld [vmem:[%s508_s3 + $0x50] sm:$0xff] }
   0xe   :  { %287 = vmatpush3.msra.mxu0 %v30_v7  ;;  %186 = vmatpush1.msra.mxu1 %v159_v25  ;;  %v144_v40 = vld [vmem:[%s508_s3 + $0x48] sm:$0xff]  ;;  %v143_v41 = vld [vmem:[%s508_s3 + $0x40] sm:$0xff]  ;;  %v142_v42 = vld [vmem:[%s508_s3 + $0x38] sm:$0xff] }
   0xf   :  { %288 = vmatprep.subr.mxu0 %v315_v0  ;;  %187 = vmatprep.subr.mxu1 %v158_v26  ;;  %v141_v43 = vld [vmem:[%s508_s3 + $0x30] sm:$0xff]  ;;  %v140_v44 = vld [vmem:[%s508_s3 + $0x28] sm:$0xff]  ;;  %v139_v45 = vld [vmem:[%s508_s3 + $0x20] sm:$0xff] }
  0x10   :  { %289 = vmatpush3.msra.mxu0 %v29_v8  ;;  %188 = vmatpush1.msra.mxu1 %v157_v27  ;;  %v138_v46 = vld [vmem:[%s508_s3 + $0x18] sm:$0xff]  ;;  %v137_v47 = vld [vmem:[%s508_s3 + $0x10] sm:$0xff]  ;;  %v136_v48 = vld [vmem:[%s508_s3 + $0x8] sm:$0xff] }
  0x11   :  { %290 = vmatprep.subr.mxu0 %v315_v0  ;;  %189 = vmatprep.subr.mxu1 %v156_v28  ;;  %v135_v49 = vld [vmem:[%s508_s3] sm:$0xff] }
  0x12   :  { %291 = vmatpush3.msra.mxu0 %v28_v9  ;;  %190 = vmatpush1.msra.mxu1 %v155_v29  ;;  %v256_v50 = vld [vmem:[%s509_s2] ss:$0 sm:$0xff] }
  0x13   :  { %292 = vmatprep.subr.mxu0 %v315_v0  ;;  %191 = vmatprep.subr.mxu1 %v154_v30 }
  0x14   :  { %293 = vmatpush3.msra.mxu0 %v27_v10  ;;  %192 = vmatpush1.msra.mxu1 %v153_v31  ;;  %v169_v10 = vlaneseq }
  0x15   :  { %294 = vmatprep.subr.mxu0 %v315_v0  ;;  %193 = vmatprep.subr.mxu1 %v152_v32 }
  0x16   :  { %295 = vmatpush3.msra.mxu0 %v26_v11  ;;  %194 = vmatpush1.msra.mxu1 %v151_v33  ;;  %v170_v11 = vshrl.u32 %v169_v10, 7 }
  0x17   :  { %296 = vmatprep.subr.mxu0 %v315_v0  ;;  %195 = vmatprep.subr.mxu1 %v150_v34 }
  0x18   :  { %297 = vmatpush3.msra.mxu0 %v25_v12  ;;  %196 = vmatpush1.msra.mxu1 %v149_v35  ;;  %v171_v12 = vsub.s32 0, %v170_v11 }
  0x19   :  { %298 = vmatprep.subr.mxu0 %v315_v0  ;;  %197 = vmatprep.subr.mxu1 %v148_v36 }
  0x1a   :  { %299 = vmatpush3.msra.mxu0 %v24_v13  ;;  %198 = vmatpush1.msra.mxu1 %v147_v37  ;;  %v167_v13 = vld [vmem:[%s510_s4] sm:$0x3] }
  0x1b   :  { %300 = vmatprep.subr.mxu0 %v315_v0  ;;  %199 = vmatprep.subr.mxu1 %v146_v38 }
  0x1c   :  { %301 = vmatpush3.msra.mxu0 %v23_v14  ;;  %200 = vmatpush1.msra.mxu1 %v145_v39  ;;  %v175_v14 = vsub.s32 1, %v170_v11 }
  0x1d   :  { %302 = vmatprep.subr.mxu0 %v315_v0  ;;  %201 = vmatprep.subr.mxu1 %v144_v40 }
  0x1e   :  { %303 = vmatpush3.msra.mxu0 %v22_v15  ;;  %202 = vmatpush1.msra.mxu1 %v143_v41  ;;  %v172_v15 = vrot.slane %v167_v13, %v171_v12 }
  0x1f   :  { %304 = vmatprep.subr.mxu0 %v315_v0  ;;  %203 = vmatprep.subr.mxu1 %v142_v42 }
  0x20   :  { %305 = vmatpush3.msra.mxu0 %v21_v16  ;;  %204 = vmatpush1.msra.mxu1 %v141_v43  ;;  %v176_v16 = vrot.slane %v167_v13, %v175_v14 }
  0x21   :  { %307 = vmatmul.mubr.f32.vlgmr.msra.gmra.mxu0 %v20_v17  ;;  %205 = vmatprep.subr.mxu1 %v140_v44 }
  0x22   :  { %206 = vmatpush1.msra.mxu1 %v139_v45 }
  0x23   :  { %207 = vmatprep.subr.mxu1 %v138_v46 }
  0x24   :  { %208 = vmatpush1.msra.mxu1 %v137_v47 }
  0x25   :  { %209 = vmatprep.subr.mxu1 %v136_v48 }
  0x26   :  { %210 = vmatpush1.msra.mxu1 %v135_v49 }
  0xe1   :  { %v110_v51 = vpop.f32.mrf.mxu0 }
  0xe2   :  { %v111_v52 = vadd.f32 %v256_v50, %v110_v51 }
  0xe3   :  { %v308_v53 = vpop.f32.mrf.mxu0 }
  0xe4   :  { %311 = vtanh.f32 %v111_v52 }
  0xf1   :  { %v312_v54 = vpop.eup %311 }
  0xf2   :  { %v115_v55 = vrot.slane %v312_v54, 4 }
  0xf4   :  { %v116_v56 = vadd.f32 %v312_v54, %v115_v55 }
  0xf6   :  { %v117_v57 = vrot.slane %v116_v56, 2 }
  0xf8   :  { %v118_v58 = vadd.f32 %v117_v57, %v116_v56 }
  0xfa   :  { %v119_v59 = vrot.slane %v118_v58, 1 }
  0xfc   :  { %v120_v60 = vadd.f32 %v119_v59, %v118_v58 }
  0xfe   :  { %v122_v61 = vmul.f32 0.125, %v120_v60 }
 0x100   :  { %v123_v62 = vsub.f32 %v312_v54, %v122_v61 }
 0x102   :  { %v124_v63 = vmul.f32 %v123_v62, %v123_v62 }
 0x104   :  { %v125_v0 = vrot.slane %v124_v63, 4 }
 0x106   :  { %v126_v1 = vadd.f32 %v125_v0, %v124_v63 }
 0x108   :  { %v127_v2 = vrot.slane %v126_v1, 2 }
 0x10a   :  { %v128_v3 = vadd.f32 %v127_v2, %v126_v1 }
 0x10c   :  { %v129_v4 = vrot.slane %v128_v3, 1 }
 0x10e   :  { %v130_v5 = vadd.f32 %v129_v4, %v128_v3 }
 0x110   :  { %v131_v6 = vmul.f32 0.125, %v130_v5 }
 0x112   :  { %v132_v7 = vadd.f32 1e-05, %v131_v6 }
 0x114   :  { %313 = vrsqrt.f32 %v132_v7 }
 0x121   :  { %v314_v8 = vpop.eup %313 }
 0x122   :  { %v134_v9 = vmul.f32 %v314_v8, %v123_v62 }
 0x124   :  { %244 = vmatmul.mubr.f32.vlgmr.msra.gmra.mxu1 %v134_v9 }
 0x1e4   :  { %v245_v17 = vpop.f32.mrf.mxu1 }
 0x1e5   :  { %v246_v18 = vadd.f32 %v245_v17, %v172_v15 }
 0x1e6   :  { %v247_v19 = vpop.f32.mrf.mxu1 }
 0x1e7   :  { %250 = vst [vmem:[%s511_s5] sm:$0xff] %v246_v18  ;;  %v248_v20 = vadd.f32 %v247_v19, %v176_v16 }
 0x1e9   :  { %251 = vst [vmem:[%s511_s5 + $0x8] sm:$0xff] %v248_v20 }

// kernel: deeponet_forward.9
= control target key start
LH: loop header
LB: loop body
LE: loop exit
PB: predicated region body
PF: predicated region fallthrough
CT: control target
= control target key end

     0   :  { %s1484_s21 = smov 0   ;;  %s1830_s0 = inlined_call_operand.vmem [shape: f32[2,256,128], index: 0, kind: input, shape index: {}]   ;;  %s1831_s1 = inlined_call_operand.vmem [shape: f32[128,128], index: 1, kind: input, shape index: {}]   ;;  %s1832_s2 = inlined_call_operand.vmem [shape: f32[1,128], index: 2, kind: input, shape index: {}]   ;;  %s1833_s3 = inlined_call_operand.vmem [shape: f32[128,128], index: 3, kind: input, shape index: {}]   ;;  %s1834_s4 = inlined_call_operand.vmem [shape: f32[1,128], index: 4, kind: input, shape index: {}]   ;;  %s1835_s5 = inlined_call_operand.vmem [shape: f32[8,256], index: 5, kind: input, shape index: {}]   ;;  %s1836_s6 = inlined_call_operand.vmem [shape: f32[2,8,128], index: 6, kind: output, shape index: {}]  }
   0x1 LB: > { %s1065_s22 = sadd.s32 4294967295, %s1447_s21   ;;  %p1069_p0 = scmp.ge.s32.totalorder %s1447_s21, 1  ;;  %s1447_s21 = sphi %s1484_s21, %s16_s21  }
   0x2   : > { %p212_p1 = scmp.lt.s32.totalorder %s1447_s21, 3 }
   0x4   : > { %p213_p2 = pnand %p1069_p0, %p212_p1 }
   0x5   : > { %p241_p3 = scmp.lt.s32.totalorder (!%p213_p2), %s1065_s22, 1 }
   0x6   : > { %216 = sbr.rel (%p213_p2) target bundleno = 747 (0x2eb), region = 44 }
   0xb   : > { %v297_v0 = vld [vmem:[%s1831_s1 + $0x78] sm:$0xff]  ;;  %v296_v1 = vld [vmem:[%s1831_s1 + $0x70] sm:$0xff]  ;;  %v295_v2 = vld [vmem:[%s1831_s1 + $0x68] sm:$0xff]  ;;  %s1838_s22 = smov (!%p241_p3, %s1065_s22), 1 }
   0xc   : > { %1209 = vmatprep.subr.mxu0 %v297_v0  ;;  %v294_v3 = vld [vmem:[%s1831_s1 + $0x60] sm:$0xff]  ;;  %s1077_s7 = sshll.u32 %s1838_s22, 8  ;;  %v706_v4 = vld [vmem:[%s1833_s3 + $0x78] sm:$0xff]  ;;  %v705_v7 = vld [vmem:[%s1833_s3 + $0x70] sm:$0xff]  ;;  %s1072_s9 = sshll.u32 %s1838_s22, 3 }
   0xd   : > { %1210 = vmatpush3.msra.mxu0 %v297_v0  ;;  %s1510_s10 = scalar_lea.vmem %s1830_s0, %s1077_s7  ;;  %v293_v5 = vld [vmem:[%s1831_s1 + $0x58] sm:$0xff]  ;;  %1289 = vmatprep.subr.mxu1 %v706_v4  ;;  %v292_v8 = vld [vmem:[%s1831_s1 + $0x50] sm:$0xff]  ;;  %v291_v9 = vld [vmem:[%s1831_s1 + $0x48] sm:$0xff]  ;;  %s249_s13 = scalar_lea.vmem %s1836_s6, %s1072_s9 }
   0xe   : > { %1211 = vmatprep.subr.mxu0 %v296_v1  ;;  %v250_v6 = vld [vmem:[%s1510_s10] sm:$0xff]  ;;  %1290 = vmatpush3.msra.mxu1 %v706_v4  ;;  %v289_v11 = vld [vmem:[%s1831_s1 + $0x38] sm:$0xff]  ;;  %v288_v12 = vld [vmem:[%s1831_s1 + $0x30] sm:$0xff] }
   0xf   : > { %1212 = vmatpush3.msra.mxu0 %v296_v1  ;;  %1241 = vmatprep.mubr.f32.mxu0 %v250_v6  ;;  %v290_v10 = vld [vmem:[%s1831_s1 + $0x40] sm:$0xff]  ;;  %v704_v13 = vld [vmem:[%s1833_s3 + $0x68] sm:$0xff]  ;;  %v285_v16 = vld [vmem:[%s1831_s1 + $0x18] sm:$0xff] }
  0x10   : > { %1213 = vmatprep.subr.mxu0 %v295_v2  ;;  %1291 = vmatprep.subr.mxu1 %v705_v7  ;;  %v287_v14 = vld [vmem:[%s1831_s1 + $0x28] sm:$0xff]  ;;  %v286_v15 = vld [vmem:[%s1831_s1 + $0x20] sm:$0xff]  ;;  %v284_v17 = vld [vmem:[%s1831_s1 + $0x10] sm:$0xff] }
  0x11   : > { %1214 = vmatpush3.msra.mxu0 %v295_v2  ;;  %1292 = vmatpush3.msra.mxu1 %v705_v7  ;;  %v283_v18 = vld [vmem:[%s1831_s1 + $0x8] sm:$0xff]  ;;  %v282_v19 = vld [vmem:[%s1831_s1] sm:$0xff]  ;;  %v252_v21 = vld [vmem:[%s1510_s10 + $0x10] sm:$0xff] }
  0x12   : > { %1215 = vmatprep.subr.mxu0 %v294_v3  ;;  %1293 = vmatprep.subr.mxu1 %v704_v13  ;;  %v251_v20 = vld [vmem:[%s1510_s10 + $0x8] sm:$0xff]  ;;  %v253_v22 = vld [vmem:[%s1510_s10 + $0x18] sm:$0xff]  ;;  %v254_v23 = vld [vmem:[%s1510_s10 + $0x20] sm:$0xff] }
  0x13   : > { %1216 = vmatpush3.msra.mxu0 %v294_v3  ;;  %1294 = vmatpush3.msra.mxu1 %v704_v13  ;;  %v255_v24 = vld [vmem:[%s1510_s10 + $0x28] sm:$0xff]  ;;  %v256_v25 = vld [vmem:[%s1510_s10 + $0x30] sm:$0xff]  ;;  %v257_v26 = vld [vmem:[%s1510_s10 + $0x38] sm:$0xff] }
  0x14   : > { %1217 = vmatprep.subr.mxu0 %v293_v5  ;;  %v258_v27 = vld [vmem:[%s1510_s10 + $0x40] sm:$0xff]  ;;  %v259_v28 = vld [vmem:[%s1510_s10 + $0x48] sm:$0xff]  ;;  %v260_v29 = vld [vmem:[%s1510_s10 + $0x50] sm:$0xff] }
  0x15   : > { %1218 = vmatpush3.msra.mxu0 %v293_v5  ;;  %v261_v30 = vld [vmem:[%s1510_s10 + $0x58] sm:$0xff]  ;;  %v262_v31 = vld [vmem:[%s1510_s10 + $0x60] sm:$0xff]  ;;  %v263_v32 = vld [vmem:[%s1510_s10 + $0x68] sm:$0xff] }
  0x16   : > { %1219 = vmatprep.subr.mxu0 %v292_v8  ;;  %v264_v33 = vld [vmem:[%s1510_s10 + $0x70] sm:$0xff]  ;;  %v265_v34 = vld [vmem:[%s1510_s10 + $0x78] sm:$0xff]  ;;  %v266_v35 = vld [vmem:[%s1510_s10 + $0x80] sm:$0xff] }
  0x17   : > { %1220 = vmatpush3.msra.mxu0 %v292_v8  ;;  %v267_v36 = vld [vmem:[%s1510_s10 + $0x88] sm:$0xff]  ;;  %v268_v37 = vld [vmem:[%s1510_s10 + $0x90] sm:$0xff]  ;;  %v269_v38 = vld [vmem:[%s1510_s10 + $0x98] sm:$0xff] }
  0x18   : > { %1221 = vmatprep.subr.mxu0 %v291_v9  ;;  %v270_v39 = vld [vmem:[%s1510_s10 + $0xa0] sm:$0xff]  ;;  %v271_v40 = vld [vmem:[%s1510_s10 + $0xa8] sm:$0xff]  ;;  %v272_v41 = vld [vmem:[%s1510_s10 + $0xb0] sm:$0xff] }
  0x19   : > { %1222 = vmatpush3.msra.mxu0 %v291_v9  ;;  %v273_v42 = vld [vmem:[%s1510_s10 + $0xb8] sm:$0xff]  ;;  %v274_v43 = vld [vmem:[%s1510_s10 + $0xc0] sm:$0xff]  ;;  %v275_v44 = vld [vmem:[%s1510_s10 + $0xc8] sm:$0xff] }
  0x1a   : > { %1223 = vmatprep.subr.mxu0 %v290_v10  ;;  %v276_v45 = vld [vmem:[%s1510_s10 + $0xd0] sm:$0xff]  ;;  %v277_v46 = vld [vmem:[%s1510_s10 + $0xd8] sm:$0xff]  ;;  %v278_v47 = vld [vmem:[%s1510_s10 + $0xe0] sm:$0xff] }
  0x1b   : > { %1224 = vmatpush3.msra.mxu0 %v290_v10  ;;  %v279_v48 = vld [vmem:[%s1510_s10 + $0xe8] sm:$0xff]  ;;  %v280_v49 = vld [vmem:[%s1510_s10 + $0xf0] sm:$0xff]  ;;  %v281_v50 = vld [vmem:[%s1510_s10 + $0xf8] sm:$0xff] }
  0x1c   : > { %1225 = vmatprep.subr.mxu0 %v289_v11  ;;  %v703_v51 = vld [vmem:[%s1833_s3 + $0x60] sm:$0xff]  ;;  %v702_v52 = vld [vmem:[%s1833_s3 + $0x58] sm:$0xff]  ;;  %v701_v53 = vld [vmem:[%s1833_s3 + $0x50] sm:$0xff] }
  0x1d   : > { %1226 = vmatpush3.msra.mxu0 %v289_v11  ;;  %1295 = vmatprep.subr.mxu1 %v703_v51  ;;  %v700_v54 = vld [vmem:[%s1833_s3 + $0x48] sm:$0xff]  ;;  %v699_v55 = vld [vmem:[%s1833_s3 + $0x40] sm:$0xff]  ;;  %v698_v56 = vld [vmem:[%s1833_s3 + $0x38] sm:$0xff] }
  0x1e   : > { %1227 = vmatprep.subr.mxu0 %v288_v12  ;;  %1296 = vmatpush3.msra.mxu1 %v703_v51  ;;  %v697_v57 = vld [vmem:[%s1833_s3 + $0x30] sm:$0xff]  ;;  %v696_v58 = vld [vmem:[%s1833_s3 + $0x28] sm:$0xff]  ;;  %v695_v59 = vld [vmem:[%s1833_s3 + $0x20] sm:$0xff] }
  0x1f   : > { %1228 = vmatpush3.msra.mxu0 %v288_v12  ;;  %1297 = vmatprep.subr.mxu1 %v702_v52  ;;  %v694_v60 = vld [vmem:[%s1833_s3 + $0x18] sm:$0xff]  ;;  %v693_v61 = vld [vmem:[%s1833_s3 + $0x10] sm:$0xff]  ;;  %v692_v62 = vld [vmem:[%s1833_s3 + $0x8] sm:$0xff] }
  0x20   : > { %1229 = vmatprep.subr.mxu0 %v287_v14  ;;  %1298 = vmatpush3.msra.mxu1 %v702_v52  ;;  %v691_v63 = vld [vmem:[%s1833_s3] sm:$0xff] }
  0x21   : > { %1230 = vmatpush3.msra.mxu0 %v287_v14  ;;  %1299 = vmatprep.subr.mxu1 %v701_v53  ;;  %v1631_v0 = vld [vmem:[%s1832_s2] ss:$0 sm:$0xff] }
  0x22   : > { %1231 = vmatprep.subr.mxu0 %v286_v15  ;;  %1300 = vmatpush3.msra.mxu1 %v701_v53 }
  0x23   : > { %1232 = vmatpush3.msra.mxu0 %v286_v15  ;;  %1301 = vmatprep.subr.mxu1 %v700_v54 }
  0x24   : > { %1233 = vmatprep.subr.mxu0 %v285_v16  ;;  %1302 = vmatpush3.msra.mxu1 %v700_v54 }
  0x25   : > { %1234 = vmatpush3.msra.mxu0 %v285_v16  ;;  %1303 = vmatprep.subr.mxu1 %v699_v55 }
  0x26   : > { %1235 = vmatprep.subr.mxu0 %v284_v17  ;;  %1304 = vmatpush3.msra.mxu1 %v699_v55 }
  0x27   : > { %1236 = vmatpush3.msra.mxu0 %v284_v17  ;;  %1305 = vmatprep.subr.mxu1 %v698_v56 }
  0x28   : > { %1237 = vmatprep.subr.mxu0 %v283_v18  ;;  %1306 = vmatpush3.msra.mxu1 %v698_v56 }
  0x29   : > { %1238 = vmatpush3.msra.mxu0 %v283_v18  ;;  %1307 = vmatprep.subr.mxu1 %v697_v57 }
  0x2a   : > { %1239 = vmatprep.subr.mxu0 %v282_v19  ;;  %1308 = vmatpush3.msra.mxu1 %v697_v57 }
  0x2b   : > { %1240 = vmatpush3.msra.mxu0 %v282_v19  ;;  %1309 = vmatprep.subr.mxu1 %v696_v58 }
  0x2c   : > { %1242 = vmatmul.mubr.f32.vlgmr.msra.gmra.mxu0 %v251_v20  ;;  %1310 = vmatpush3.msra.mxu1 %v696_v58 }
  0x2d   : > { %1244 = vmatprep.mubr.f32.mxu0 %v252_v21  ;;  %1311 = vmatprep.subr.mxu1 %v695_v59 }
  0x2e   : > { %1312 = vmatpush3.msra.mxu1 %v695_v59 }
  0x2f   : > { %1313 = vmatprep.subr.mxu1 %v694_v60 }
  0x30   : > { %1245 = vmatmul.mubr.f32.gmra.mxu0 %v253_v22  ;;  %1314 = vmatpush3.msra.mxu1 %v694_v60 }
  0x31   : > { %1247 = vmatprep.mubr.f32.mxu0 %v254_v23  ;;  %1315 = vmatprep.subr.mxu1 %v693_v61 }
  0x32   : > { %1316 = vmatpush3.msra.mxu1 %v693_v61 }
  0x33   : > { %1317 = vmatprep.subr.mxu1 %v692_v62 }
  0x34   : > { %1248 = vmatmul.mubr.f32.gmra.mxu0 %v255_v24  ;;  %1318 = vmatpush3.msra.mxu1 %v692_v62 }
  0x35   : > { %1250 = vmatprep.mubr.f32.mxu0 %v256_v25  ;;  %1319 = vmatprep.subr.mxu1 %v691_v63 }
  0x36   : > { %1320 = vmatpush3.msra.mxu1 %v691_v63 }
  0x38   : > { %1251 = vmatmul.mubr.f32.gmra.mxu0 %v257_v26 }
  0x39   : > { %1253 = vmatprep.mubr.f32.mxu0 %v258_v27 }
  0x3c   : > { %1254 = vmatmul.mubr.f32.gmra.mxu0 %v259_v28 }
  0x3d   : > { %1256 = vmatprep.mubr.f32.mxu0 %v260_v29 }
  0x40   : > { %1257 = vmatmul.mubr.f32.gmra.mxu0 %v261_v30 }
  0x41   : > { %1259 = vmatprep.mubr.f32.mxu0 %v262_v31 }
  0x44   : > { %1260 = vmatmul.mubr.f32.gmra.mxu0 %v263_v32 }
  0x45   : > { %1262 = vmatprep.mubr.f32.mxu0 %v264_v33 }
  0x48   : > { %1263 = vmatmul.mubr.f32.gmra.mxu0 %v265_v34 }
  0x49   : > { %1265 = vmatprep.mubr.f32.mxu0 %v266_v35 }
  0x4c   : > { %1266 = vmatmul.mubr.f32.gmra.mxu0 %v267_v36 }
  0x4d   : > { %1268 = vmatprep.mubr.f32.mxu0 %v268_v37 }
  0x50   : > { %1269 = vmatmul.mubr.f32.gmra.mxu0 %v269_v38 }
  0x51   : > { %1271 = vmatprep.mubr.f32.mxu0 %v270_v39 }
  0x54   : > { %1272 = vmatmul.mubr.f32.gmra.mxu0 %v271_v40 }
  0x55   : > { %1274 = vmatprep.mubr.f32.mxu0 %v272_v41 }
  0x58   : > { %1275 = vmatmul.mubr.f32.gmra.mxu0 %v273_v42 }
  0x59   : > { %1277 = vmatprep.mubr.f32.mxu0 %v274_v43 }
  0x5c   : > { %1278 = vmatmul.mubr.f32.gmra.mxu0 %v275_v44 }
  0x5d   : > { %1280 = vmatprep.mubr.f32.mxu0 %v276_v45 }
  0x60   : > { %1281 = vmatmul.mubr.f32.gmra.mxu0 %v277_v46 }
  0x61   : > { %1283 = vmatprep.mubr.f32.mxu0 %v278_v47 }
  0x64   : > { %1284 = vmatmul.mubr.f32.gmra.mxu0 %v279_v48 }
  0x65   : > { %1286 = vmatprep.mubr.f32.mxu0 %v280_v49 }
  0x68   : > { %1287 = vmatmul.mubr.f32.gmra.mxu0 %v281_v50 }
  0xec   : > { %v1243_v1 = vpop.f32.mrf.mxu0 }
  0xed   : > { %v377_v2 = vadd.f32 %v1243_v1, %v1631_v0 }
  0xee   : > { %v371_v3 = vpop.f32.mrf.mxu0 }
  0xef   : > { %v564_v4 = vmul.f32 0.70710677, %v377_v2  ;;  %v372_v5 = vadd.f32 %v1631_v0, %v371_v3  ;;  %v531_v37 = vmul.f32 0.5, %v377_v2 }
  0xf0   : > { %v1246_v6 = vpop.f32.mrf.mxu0 }
  0xf1   : > { %1377 = verf.f32 %v564_v4  ;;  %v563_v7 = vmul.f32 0.70710677, %v372_v5  ;;  %v387_v8 = vadd.f32 %v1246_v6, %v1631_v0  ;;  %v530_v39 = vmul.f32 0.5, %v372_v5 }
  0xf2   : > { %v381_v9 = vpop.f32.mrf.mxu0 }
  0xf3   : > { %1379 = verf.f32 %v563_v7  ;;  %v566_v10 = vmul.f32 0.70710677, %v387_v8  ;;  %v382_v11 = vadd.f32 %v1631_v0, %v381_v9  ;;  %v533_v54 = vmul.f32 0.5, %v387_v8 }
  0xf4   : > { %v1249_v12 = vpop.f32.mrf.mxu0 }
  0xf5   : > { %1381 = verf.f32 %v566_v10  ;;  %v565_v13 = vmul.f32 0.70710677, %v382_v11  ;;  %v397_v14 = vadd.f32 %v1249_v12, %v1631_v0  ;;  %v532_v51 = vmul.f32 0.5, %v382_v11 }
  0xf6   : > { %v391_v15 = vpop.f32.mrf.mxu0 }
  0xf7   : > { %1383 = verf.f32 %v565_v13  ;;  %v568_v16 = vmul.f32 0.70710677, %v397_v14  ;;  %v392_v17 = vadd.f32 %v1631_v0, %v391_v15  ;;  %v535_v2 = vmul.f32 0.5, %v397_v14 }
  0xf8   : > { %v1252_v18 = vpop.f32.mrf.mxu0 }
  0xf9   : > { %1385 = verf.f32 %v568_v16  ;;  %v567_v19 = vmul.f32 0.70710677, %v392_v17  ;;  %v1640_v20 = vadd.f32 %v1252_v18, %v1631_v0  ;;  %v534_v3 = vmul.f32 0.5, %v392_v17 }
  0xfa   : > { %v401_v21 = vpop.f32.mrf.mxu0 }
  0xfb   : > { %1387 = verf.f32 %v567_v19  ;;  %v570_v22 = vmul.f32 0.70710677, %v1640_v20  ;;  %v1644_v23 = vadd.f32 %v1631_v0, %v401_v21  ;;  %v537_v19 = vmul.f32 0.5, %v1640_v20 }
  0xfc   : > { %v1255_v24 = vpop.f32.mrf.mxu0 }
  0xfd   : > { %1389 = verf.f32 %v570_v22  ;;  %v569_v25 = vmul.f32 0.70710677, %v1644_v23  ;;  %v1648_v26 = vadd.f32 %v1255_v24, %v1631_v0  ;;  %v536_v16 = vmul.f32 0.5, %v1644_v23 }
  0xfe   : > { %v1378_v27 = vpop.eup %1377  ;;  %v411_v28 = vpop.f32.mrf.mxu0 }
  0xff   : > { %1391 = verf.f32 %v569_v25  ;;  %v572_v29 = vmul.f32 0.70710677, %v1648_v26  ;;  %v1652_v30 = vadd.f32 %v1631_v0, %v411_v28  ;;  %v628_v33 = vadd.f32 1.0, %v1378_v27 }
 0x100   : > { %v1380_v31 = vpop.eup %1379  ;;  %v1258_v32 = vpop.f32.mrf.mxu0  ;;  %v539_v20 = vmul.f32 0.5, %v1648_v26 }
 0x101   : > { %1393 = verf.f32 %v572_v29  ;;  %v571_v34 = vmul.f32 0.70710677, %v1652_v30  ;;  %v1656_v35 = vadd.f32 %v1258_v32, %v1631_v0  ;;  %v627_v40 = vadd.f32 1.0, %v1380_v31 }
 0x102   : > { %v1382_v36 = vpop.eup %1381  ;;  %v421_v38 = vpop.f32.mrf.mxu0  ;;  %v660_v46 = vmul.f32 %v628_v33, %v531_v37  ;;  %v538_v33 = vmul.f32 0.5, %v1652_v30 }
 0x103   : > { %1395 = verf.f32 %v571_v34  ;;  %v574_v41 = vmul.f32 0.70710677, %v1656_v35  ;;  %v1660_v42 = vadd.f32 %v1631_v0, %v421_v38  ;;  %v659_v45 = vmul.f32 %v627_v40, %v530_v39 }
 0x104   : > { %v1384_v43 = vpop.eup %1383  ;;  %v1261_v44 = vpop.f32.mrf.mxu0  ;;  %v630_v49 = vadd.f32 1.0, %v1382_v36 }
 0x105   : > { %1397 = verf.f32 %v574_v41  ;;  %v573_v47 = vmul.f32 0.70710677, %v1660_v42  ;;  %v1664_v48 = vadd.f32 %v1261_v44, %v1631_v0  ;;  %1321 = vmatprep.mubr.f32.mxu1 %v659_v45  ;;  %v629_v53 = vadd.f32 1.0, %v1384_v43 }
 0x106   : > { %v1386_v50 = vpop.eup %1385  ;;  %v431_v52 = vpop.f32.mrf.mxu0  ;;  %1322 = vmatmul.mubr.f32.vlgmr.msra.gmra.mxu1 %v660_v46  ;;  %v662_v63 = vmul.f32 %v630_v49, %v533_v54  ;;  %v540_v46 = vmul.f32 0.5, %v1660_v42 }
 0x107   : > { %1399 = verf.f32 %v573_v47  ;;  %v576_v55 = vmul.f32 0.70710677, %v1664_v48  ;;  %v1668_v56 = vadd.f32 %v1631_v0, %v431_v52  ;;  %v661_v59 = vmul.f32 %v629_v53, %v532_v51 }
 0x108   : > { %v1388_v57 = vpop.eup %1387  ;;  %v1264_v58 = vpop.f32.mrf.mxu0  ;;  %v632_v60 = vadd.f32 1.0, %v1386_v50  ;;  %v541_v50 = vmul.f32 0.5, %v1656_v35  ;;  %v543_v35 = vmul.f32 0.5, %v1664_v48 }
 0x109   : > { %1401 = verf.f32 %v576_v55  ;;  %v575_v61 = vmul.f32 0.70710677, %v1668_v56  ;;  %v1672_v62 = vadd.f32 %v1264_v58, %v1631_v0  ;;  %1324 = vmatprep.mubr.f32.mxu1 %v661_v59  ;;  %v631_v5 = vadd.f32 1.0, %v1388_v57 }
 0x10a   : > { %v1390_v1 = vpop.eup %1389  ;;  %v441_v4 = vpop.f32.mrf.mxu0  ;;  %1325 = vmatmul.mubr.f32.gmra.mxu1 %v662_v63  ;;  %v664_v11 = vmul.f32 %v632_v60, %v535_v2 }
 0x10b   : > { %1403 = verf.f32 %v575_v61  ;;  %v578_v6 = vmul.f32 0.70710677, %v1672_v62  ;;  %v1676_v7 = vadd.f32 %v1631_v0, %v441_v4  ;;  %v663_v10 = vmul.f32 %v631_v5, %v534_v3 }
 0x10c   : > { %v1392_v8 = vpop.eup %1391  ;;  %v1267_v9 = vpop.f32.mrf.mxu0  ;;  %v634_v14 = vadd.f32 1.0, %v1390_v1  ;;  %v542_v61 = vmul.f32 0.5, %v1668_v56 }
 0x10d   : > { %1405 = verf.f32 %v578_v6  ;;  %v577_v12 = vmul.f32 0.70710677, %v1676_v7  ;;  %v1680_v13 = vadd.f32 %v1267_v9, %v1631_v0  ;;  %1327 = vmatprep.mubr.f32.mxu1 %v663_v10  ;;  %v633_v18 = vadd.f32 1.0, %v1392_v8 }
 0x10e   : > { %v1394_v15 = vpop.eup %1393  ;;  %v451_v17 = vpop.f32.mrf.mxu0  ;;  %1328 = vmatmul.mubr.f32.gmra.mxu1 %v664_v11  ;;  %v666_v31 = vmul.f32 %v634_v14, %v537_v19  ;;  %v544_v11 = vmul.f32 0.5, %v1676_v7 }
 0x10f   : > { %1407 = verf.f32 %v577_v12  ;;  %v580_v21 = vmul.f32 0.70710677, %v1680_v13  ;;  %v1686_v22 = vadd.f32 %v1631_v0, %v451_v17  ;;  %v665_v27 = vmul.f32 %v633_v18, %v536_v16 }
 0x110   : > { %v1396_v24 = vpop.eup %1395  ;;  %v1270_v25 = vpop.f32.mrf.mxu0  ;;  %v636_v28 = vadd.f32 1.0, %v1394_v15  ;;  %v545_v15 = vmul.f32 0.5, %v1672_v62  ;;  %v547_v62 = vmul.f32 0.5, %v1680_v13 }
 0x111   : > { %1409 = verf.f32 %v580_v21  ;;  %v579_v29 = vmul.f32 0.70710677, %v1686_v22  ;;  %v1690_v23 = vadd.f32 %v1270_v25, %v1631_v0  ;;  %1330 = vmatprep.mubr.f32.mxu1 %v665_v27  ;;  %v635_v36 = vadd.f32 1.0, %v1396_v24 }
 0x112   : > { %v1398_v32 = vpop.eup %1397  ;;  %v461_v34 = vpop.f32.mrf.mxu0  ;;  %1331 = vmatmul.mubr.f32.gmra.mxu1 %v666_v31  ;;  %v668_v43 = vmul.f32 %v636_v28, %v539_v20 }
 0x113   : > { %1411 = verf.f32 %v579_v29  ;;  %v582_v37 = vmul.f32 0.70710677, %v1690_v23  ;;  %v1696_v38 = vadd.f32 %v1631_v0, %v461_v34  ;;  %v667_v41 = vmul.f32 %v635_v36, %v538_v33 }
 0x114   : > { %v1400_v39 = vpop.eup %1399  ;;  %v1273_v40 = vpop.f32.mrf.mxu0  ;;  %v638_v30 = vadd.f32 1.0, %v1398_v32  ;;  %v546_v29 = vmul.f32 0.5, %v1686_v22 }
 0x115   : > { %1413 = verf.f32 %v582_v37  ;;  %v581_v44 = vmul.f32 0.70710677, %v1696_v38  ;;  %v1700_v26 = vadd.f32 %v1273_v40, %v1631_v0  ;;  %1333 = vmatprep.mubr.f32.mxu1 %v667_v41  ;;  %v637_v49 = vadd.f32 1.0, %v1400_v39 }
 0x116   : > { %v1402_v45 = vpop.eup %1401  ;;  %v471_v47 = vpop.f32.mrf.mxu0  ;;  %1334 = vmatmul.mubr.f32.gmra.mxu1 %v668_v43  ;;  %v670_v59 = vmul.f32 %v638_v30, %v541_v50  ;;  %v548_v43 = vmul.f32 0.5, %v1696_v38 }
 0x117   : > { %1415 = verf.f32 %v581_v44  ;;  %v584_v51 = vmul.f32 0.70710677, %v1700_v26  ;;  %v1706_v52 = vadd.f32 %v1631_v0, %v471_v47  ;;  %v669_v55 = vmul.f32 %v637_v49, %v540_v46 }
 0x118   : > { %v1404_v53 = vpop.eup %1403  ;;  %v1276_v54 = vpop.f32.mrf.mxu0  ;;  %v640_v57 = vadd.f32 1.0, %v1402_v45  ;;  %v549_v45 = vmul.f32 0.5, %v1690_v23 }
 0x119   : > { %1417 = verf.f32 %v584_v51  ;;  %v583_v58 = vmul.f32 0.70710677, %v1706_v52  ;;  %v1710_v42 = vadd.f32 %v1276_v54, %v1631_v0  ;;  %1336 = vmatprep.mubr.f32.mxu1 %v669_v55  ;;  %v639_v1 = vadd.f32 1.0, %v1404_v53 }
 0x11a   : > { %v1406_v60 = vpop.eup %1405  ;;  %v481_v63 = vpop.f32.mrf.mxu0  ;;  %1337 = vmatmul.mubr.f32.gmra.mxu1 %v670_v59  ;;  %v672_v8 = vmul.f32 %v640_v57, %v543_v35  ;;  %v550_v23 = vmul.f32 0.5, %v1706_v52 }
 0x11b   : > { %1419 = verf.f32 %v583_v58  ;;  %v586_v2 = vmul.f32 0.70710677, %v1710_v42  ;;  %v1716_v3 = vadd.f32 %v1631_v0, %v481_v63  ;;  %v671_v6 = vmul.f32 %v639_v1, %v542_v61 }
 0x11c   : > { %v1408_v4 = vpop.eup %1407  ;;  %v1279_v5 = vpop.f32.mrf.mxu0  ;;  %v642_v56 = vadd.f32 1.0, %v1406_v60  ;;  %v551_v58 = vmul.f32 0.5, %v1700_v26  ;;  %v553_v52 = vmul.f32 0.5, %v1710_v42 }
 0x11d   : > { %1421 = verf.f32 %v586_v2  ;;  %v585_v9 = vmul.f32 0.70710677, %v1716_v3  ;;  %v1720_v48 = vadd.f32 %v1279_v5, %v1631_v0  ;;  %1339 = vmatprep.mubr.f32.mxu1 %v671_v6  ;;  %v641_v14 = vadd.f32 1.0, %v1408_v4 }
 0x11e   : > { %v1410_v10 = vpop.eup %1409  ;;  %v491_v12 = vpop.f32.mrf.mxu0  ;;  %1340 = vmatmul.mubr.f32.gmra.mxu1 %v672_v8  ;;  %v674_v27 = vmul.f32 %v642_v56, %v545_v15  ;;  %v552_v1 = vmul.f32 0.5, %v1716_v3 }
 0x11f   : > { %1423 = verf.f32 %v585_v9  ;;  %v588_v16 = vmul.f32 0.70710677, %v1720_v48  ;;  %v1726_v17 = vadd.f32 %v1631_v0, %v491_v12  ;;  %v673_v21 = vmul.f32 %v641_v14, %v544_v11 }
 0x120   : > { %v1412_v18 = vpop.eup %1411  ;;  %v1282_v19 = vpop.f32.mrf.mxu0  ;;  %v644_v24 = vadd.f32 1.0, %v1410_v10  ;;  %v555_v14 = vmul.f32 0.5, %v1720_v48 }
 0x121   : > { %1425 = verf.f32 %v588_v16  ;;  %v587_v25 = vmul.f32 0.70710677, %v1726_v17  ;;  %v1730_v7 = vadd.f32 %v1282_v19, %v1631_v0  ;;  %1342 = vmatprep.mubr.f32.mxu1 %v673_v21  ;;  %v643_v32 = vadd.f32 1.0, %v1412_v18 }
 0x122   : > { %v1414_v28 = vpop.eup %1413  ;;  %v501_v31 = vpop.f32.mrf.mxu0  ;;  %1343 = vmatmul.mubr.f32.gmra.mxu1 %v674_v27  ;;  %v676_v39 = vmul.f32 %v644_v24, %v547_v62 }
 0x123   : > { %1427 = verf.f32 %v587_v25  ;;  %v590_v20 = vmul.f32 0.70710677, %v1730_v7  ;;  %v502_v33 = vadd.f32 %v1631_v0, %v501_v31  ;;  %v675_v37 = vmul.f32 %v643_v32, %v546_v29 }
 0x124   : > { %v1416_v34 = vpop.eup %1415  ;;  %v1285_v36 = vpop.f32.mrf.mxu0  ;;  %v646_v13 = vadd.f32 1.0, %v1414_v28  ;;  %v557_v25 = vmul.f32 0.5, %v1730_v7 }
 0x125   : > { %1429 = verf.f32 %v590_v20  ;;  %v589_v40 = vmul.f32 0.70710677, %v502_v33  ;;  %v1737_v41 = vadd.f32 %v1285_v36, %v1631_v0  ;;  %1345 = vmatprep.mubr.f32.mxu1 %v675_v37  ;;  %v645_v30 = vadd.f32 1.0, %v1416_v34 }
 0x126   : > { %v1418_v22 = vpop.eup %1417  ;;  %v511_v44 = vpop.f32.mrf.mxu0  ;;  %1346 = vmatmul.mubr.f32.gmra.mxu1 %v676_v39  ;;  %v678_v38 = vmul.f32 %v646_v13, %v549_v45  ;;  %v556_v18 = vmul.f32 0.5, %v502_v33 }
 0x127   : > { %1431 = verf.f32 %v589_v40  ;;  %v592_v46 = vmul.f32 0.70710677, %v1737_v41  ;;  %v512_v47 = vadd.f32 %v1631_v0, %v511_v44  ;;  %v677_v51 = vmul.f32 %v645_v30, %v548_v43 }
 0x128   : > { %v1420_v49 = vpop.eup %1419  ;;  %v1288_v50 = vpop.f32.mrf.mxu0  ;;  %v648_v53 = vadd.f32 1.0, %v1418_v22  ;;  %v559_v32 = vmul.f32 0.5, %v1737_v41  ;;  %v940_v22 = vld [vmem:[%s1835_s5 + $0x8] sm:$0xff] }
 0x129   : > { %1433 = verf.f32 %v592_v46  ;;  %v591_v54 = vmul.f32 0.70710677, %v512_v47  ;;  %v527_v55 = vadd.f32 %v1288_v50, %v1631_v0  ;;  %1348 = vmatprep.mubr.f32.mxu1 %v677_v51  ;;  %v647_v60 = vadd.f32 1.0, %v1420_v49  ;;  %1005 = vmatprep.mubr.f32.mxu0 %v940_v22 }
 0x12a   : > { %v1422_v57 = vpop.eup %1421  ;;  %v521_v59 = vpop.f32.mrf.mxu0  ;;  %1349 = vmatmul.mubr.f32.gmra.mxu1 %v678_v38  ;;  %v680_v4 = vmul.f32 %v648_v53, %v551_v58  ;;  %v558_v28 = vmul.f32 0.5, %v512_v47 }
 0x12b   : > { %1435 = verf.f32 %v591_v54  ;;  %v594_v35 = vmul.f32 0.70710677, %v527_v55  ;;  %v522_v61 = vadd.f32 %v1631_v0, %v521_v59  ;;  %v679_v2 = vmul.f32 %v647_v60, %v550_v23 }
 0x12c   : > { %v1424_v63 = vpop.eup %1423  ;;  %v650_v8 = vadd.f32 1.0, %v1422_v57  ;;  %v554_v0 = vmul.f32 0.5, %v1726_v17  ;;  %v561_v7 = vmul.f32 0.5, %v527_v55 }
 0x12d   : > { %1437 = verf.f32 %v594_v35  ;;  %v593_v5 = vmul.f32 0.70710677, %v522_v61  ;;  %v649_v6 = vadd.f32 1.0, %v1424_v63  ;;  %1351 = vmatprep.mubr.f32.mxu1 %v679_v2  ;;  %v560_v34 = vmul.f32 0.5, %v522_v61 }
 0x12e   : > { %v1426_v26 = vpop.eup %1425  ;;  %1352 = vmatmul.mubr.f32.gmra.mxu1 %v680_v4  ;;  %v682_v10 = vmul.f32 %v650_v8, %v553_v52 }
 0x12f   : > { %1439 = verf.f32 %v593_v5  ;;  %v681_v9 = vmul.f32 %v649_v6, %v552_v1  ;;  %v652_v3 = vadd.f32 1.0, %v1426_v26 }
 0x130   : > { %v1428_v56 = vpop.eup %1427 }
 0x131   : > { %1354 = vmatprep.mubr.f32.mxu1 %v681_v9  ;;  %v651_v11 = vadd.f32 1.0, %v1428_v56  ;;  %v684_v19 = vmul.f32 %v652_v3, %v555_v14  ;;  %v1777_v9 = vld [vmem:[%s1834_s4] ss:$0 sm:$0xff] }
 0x132   : > { %v1430_v12 = vpop.eup %1429  ;;  %1355 = vmatmul.mubr.f32.gmra.mxu1 %v682_v10 }
 0x133   : > { %v683_v15 = vmul.f32 %v651_v11, %v554_v0  ;;  %v654_v21 = vadd.f32 1.0, %v1430_v12 }
 0x134   : > { %v1432_v16 = vpop.eup %1431 }
 0x135   : > { %1357 = vmatprep.mubr.f32.mxu1 %v683_v15  ;;  %v653_v42 = vadd.f32 1.0, %v1432_v16  ;;  %v686_v62 = vmul.f32 %v654_v21, %v557_v25 }
 0x136   : > { %v1434_v24 = vpop.eup %1433  ;;  %1358 = vmatmul.mubr.f32.gmra.mxu1 %v684_v19 }
 0x137   : > { %v685_v17 = vmul.f32 %v653_v42, %v556_v18  ;;  %v656_v31 = vadd.f32 1.0, %v1434_v24 }
 0x138   : > { %v1436_v27 = vpop.eup %1435 }
 0x139   : > { %1360 = vmatprep.mubr.f32.mxu1 %v685_v17  ;;  %v655_v29 = vadd.f32 1.0, %v1436_v27  ;;  %v688_v36 = vmul.f32 %v656_v31, %v559_v32 }
 0x13a   : > { %v1438_v48 = vpop.eup %1437  ;;  %1361 = vmatmul.mubr.f32.gmra.mxu1 %v686_v62 }
 0x13b   : > { %v687_v20 = vmul.f32 %v655_v29, %v558_v28  ;;  %v658_v39 = vadd.f32 1.0, %v1438_v48 }
 0x13c   : > { %v1440_v33 = vpop.eup %1439 }
 0x13d   : > { %1363 = vmatprep.mubr.f32.mxu1 %v687_v20  ;;  %v657_v37 = vadd.f32 1.0, %v1440_v33  ;;  %v690_v13 = vmul.f32 %v658_v39, %v561_v7 }
 0x13e   : > { %1364 = vmatmul.mubr.f32.gmra.mxu1 %v688_v36 }
 0x13f   : > { %v689_v40 = vmul.f32 %v657_v37, %v560_v34 }
 0x141   : > { %1366 = vmatprep.mubr.f32.mxu1 %v689_v40 }
 0x142   : > { %1367 = vmatmul.mubr.f32.gmra.mxu1 %v690_v13 }
 0x1c6   : > { %v1756_v41 = vpop.f32.mrf.mxu1 }
 0x1c7   : > { %v786_v13 = vadd.f32 %v1756_v41, %v1777_v9 }
 0x1c8   : > { %v1758_v43 = vpop.f32.mrf.mxu1 }
 0x1ca   : > { %v1760_v44 = vpop.f32.mrf.mxu1 }
 0x1cb   : > { %v796_v37 = vadd.f32 %v1760_v44, %v1777_v9  ;;  %v781_v44 = vadd.f32 %v1777_v9, %v1758_v43 }
 0x1cc   : > { %v1762_v30 = vpop.f32.mrf.mxu1 }
 0x1cd   : > { %v791_v7 = vadd.f32 %v1777_v9, %v1762_v30  ;;  %v939_v30 = vld [vmem:[%s1835_s5] sm:$0xff] }
 0x1ce   : > { %v1764_v45 = vpop.f32.mrf.mxu1 }
 0x1cf   : > { %v806_v20 = vadd.f32 %v1764_v45, %v1777_v9 }
 0x1d0   : > { %v1766_v46 = vpop.f32.mrf.mxu1 }
 0x1d1   : > { %v801_v34 = vadd.f32 %v1777_v9, %v1766_v46 }
 0x1d2   : > { %v1332_v47 = vpop.f32.mrf.mxu1 }
 0x1d3   : > { %v816_v29 = vadd.f32 %v1332_v47, %v1777_v9 }
 0x1d4   : > { %v810_v49 = vpop.f32.mrf.mxu1 }
 0x1d5   : > { %v811_v48 = vadd.f32 %v1777_v9, %v810_v49 }
 0x1d6   : > { %v1335_v50 = vpop.f32.mrf.mxu1 }
 0x1d7   : > { %v826_v17 = vadd.f32 %v1335_v50, %v1777_v9 }
 0x1d8   : > { %v820_v51 = vpop.f32.mrf.mxu1 }
 0x1d9   : > { %v821_v28 = vadd.f32 %v1777_v9, %v820_v51 }
 0x1da   : > { %v1338_v53 = vpop.f32.mrf.mxu1 }
 0x1db   : > { %v836_v42 = vadd.f32 %v1338_v53, %v1777_v9 }
 0x1dc   : > { %v830_v54 = vpop.f32.mrf.mxu1 }
 0x1dd   : > { %v831_v24 = vadd.f32 %v1777_v9, %v830_v54 }
 0x1de   : > { %v1341_v55 = vpop.f32.mrf.mxu1 }
 0x1df   : > { %v846_v15 = vadd.f32 %v1341_v55, %v1777_v9 }
 0x1e0   : > { %v840_v38 = vpop.f32.mrf.mxu1 }
 0x1e1   : > { %v841_v18 = vadd.f32 %v1777_v9, %v840_v38 }
 0x1e2   : > { %v1344_v57 = vpop.f32.mrf.mxu1 }
 0x1e3   : > { %v856_v10 = vadd.f32 %v1344_v57, %v1777_v9 }
 0x1e4   : > { %v850_v58 = vpop.f32.mrf.mxu1 }
 0x1e5   : > { %v851_v12 = vadd.f32 %v1777_v9, %v850_v58 }
 0x1e6   : > { %v1768_v23 = vpop.f32.mrf.mxu1 }
 0x1e7   : > { %v866_v40 = vadd.f32 %v1768_v23, %v1777_v9 }
 0x1e8   : > { %v1770_v59 = vpop.f32.mrf.mxu1 }
 0x1e9   : > { %v861_v22 = vadd.f32 %v1777_v9, %v1770_v59 }
 0x1ea   : > { %v1350_v60 = vpop.f32.mrf.mxu1 }
 0x1eb   : > { %v876_v36 = vadd.f32 %v1350_v60, %v1777_v9 }
 0x1ec   : > { %v1772_v35 = vpop.f32.mrf.mxu1 }
 0x1ed   : > { %v871_v39 = vadd.f32 %v1777_v9, %v1772_v35 }
 0x1ee   : > { %v1353_v61 = vpop.f32.mrf.mxu1 }
 0x1ef   : > { %v886_v32 = vadd.f32 %v1353_v61, %v1777_v9 }
 0x1f0   : > { %v880_v63 = vpop.f32.mrf.mxu1 }
 0x1f1   : > { %v881_v33 = vadd.f32 %v1777_v9, %v880_v63 }
 0x1f2   : > { %v1356_v1 = vpop.f32.mrf.mxu1 }
 0x1f3   : > { %v896_v62 = vadd.f32 %v1356_v1, %v1777_v9 }
 0x1f4   : > { %v890_v2 = vpop.f32.mrf.mxu1 }
 0x1f5   : > { %v891_v31 = vadd.f32 %v1777_v9, %v890_v2 }
 0x1f6   : > { %v1359_v4 = vpop.f32.mrf.mxu1 }
 0x1f7   : > { %v906_v25 = vadd.f32 %v1359_v4, %v1777_v9 }
 0x1f8   : > { %v900_v5 = vpop.f32.mrf.mxu1 }
 0x1f9   : > { %v901_v27 = vadd.f32 %v1777_v9, %v900_v5 }
 0x1fa   : > { %v1362_v6 = vpop.f32.mrf.mxu1 }
 0x1fb   : > { %v916_v19 = vadd.f32 %v1362_v6, %v1777_v9 }
 0x1fc   : > { %v910_v8 = vpop.f32.mrf.mxu1 }
 0x1fd   : > { %v911_v21 = vadd.f32 %v1777_v9, %v910_v8 }
 0x1fe   : > { %v1365_v26 = vpop.f32.mrf.mxu1 }
 0x1ff   : > { %v926_v14 = vadd.f32 %v1365_v26, %v1777_v9 }
 0x200   : > { %v920_v52 = vpop.f32.mrf.mxu1 }
 0x201   : > { %v921_v16 = vadd.f32 %v1777_v9, %v920_v52 }
 0x202   : > { %v1368_v56 = vpop.f32.mrf.mxu1 }
 0x203   : > { %v936_v0 = vadd.f32 %v1368_v56, %v1777_v9 }
 0x204   : > { %v930_v11 = vpop.f32.mrf.mxu1 }
 0x205   : > { %v931_v3 = vadd.f32 %v1777_v9, %v930_v11  ;;  %1174 = vmatprep.subr.mxu0 %v936_v0 }
 0x206   : > { %1175 = vmatpush3.msra.mxu0 %v856_v10 }
 0x207   : > { %1176 = vmatprep.subr.mxu0 %v931_v3 }
 0x208   : > { %1177 = vmatpush3.msra.mxu0 %v851_v12 }
 0x209   : > { %1178 = vmatprep.subr.mxu0 %v926_v14 }
 0x20a   : > { %1179 = vmatpush3.msra.mxu0 %v846_v15 }
 0x20b   : > { %1180 = vmatprep.subr.mxu0 %v921_v16 }
 0x20c   : > { %1181 = vmatpush3.msra.mxu0 %v841_v18 }
 0x20d   : > { %1182 = vmatprep.subr.mxu0 %v916_v19 }
 0x20e   : > { %1183 = vmatpush3.msra.mxu0 %v836_v42 }
 0x20f   : > { %1184 = vmatprep.subr.mxu0 %v911_v21 }
 0x210   : > { %1185 = vmatpush3.msra.mxu0 %v831_v24 }
 0x211   : > { %1186 = vmatprep.subr.mxu0 %v906_v25 }
 0x212   : > { %1187 = vmatpush3.msra.mxu0 %v826_v17 }
 0x213   : > { %1188 = vmatprep.subr.mxu0 %v901_v27 }
 0x214   : > { %1189 = vmatpush3.msra.mxu0 %v821_v28 }
 0x215   : > { %1190 = vmatprep.subr.mxu0 %v896_v62 }
 0x216   : > { %1191 = vmatpush3.msra.mxu0 %v816_v29 }
 0x217   : > { %1192 = vmatprep.subr.mxu0 %v891_v31 }
 0x218   : > { %1193 = vmatpush3.msra.mxu0 %v811_v48 }
 0x219   : > { %1194 = vmatprep.subr.mxu0 %v886_v32 }
 0x21a   : > { %1195 = vmatpush3.msra.mxu0 %v806_v20 }
 0x21b   : > { %1196 = vmatprep.subr.mxu0 %v881_v33 }
 0x21c   : > { %1197 = vmatpush3.msra.mxu0 %v801_v34 }
 0x21d   : > { %1198 = vmatprep.subr.mxu0 %v876_v36 }
 0x21e   : > { %1199 = vmatpush3.msra.mxu0 %v796_v37 }
 0x21f   : > { %1200 = vmatprep.subr.mxu0 %v871_v39 }
 0x220   : > { %1201 = vmatpush3.msra.mxu0 %v791_v7 }
 0x221   : > { %1202 = vmatprep.subr.mxu0 %v866_v40 }
 0x222   : > { %1203 = vmatpush3.msra.mxu0 %v786_v13 }
 0x223   : > { %1204 = vmatprep.subr.mxu0 %v861_v22 }
 0x224   : > { %1205 = vmatpush3.msra.mxu0 %v781_v44 }
 0x225   : > { %1006 = vmatmul.mubr.f32.vlgmr.msra.gmra.mxu0 %v939_v30 }
 0x2e5   : > { %v1206_v45 = vpop.f32.mrf.mxu0 }
 0x2e7   : > { %v1207_v41 = vpop.f32.mrf.mxu0 }
 0x2e8   : > { %v1208_v46 = vadd.f32 %v1207_v41, %v1206_v45 }
 0x2ea   : > { %1011 = vst [vmem:[%s249_s13] sm:$0xff] %v1208_v46 }
 0x2eb PF: > { %s16_s21 = sadd.s32 1, %s1447_s21  }
 0x2ec   : > { %p13_p4 = scmp.ge.s32.totalorder %s16_s21, 4  }
 0x2ee   :  { %15 = sbr.rel (!%p13_p4) target bundleno = 1 (0x1), region = 74 }

</bundles_post_ra>
